<compile_context>
chip_gen: v7x
topology: tpu7x:2x2x1
jax: 0.10.0
libtpu: 0.0.40
codegen_flags: <defaults>
</compile_context>

<pallas_src>
from functools import partial

import jax
import jax.numpy as jnp
from jax import lax
from jax.experimental import pallas as pl
from jax.experimental.pallas import tpu as pltpu

_LANE = 128          # pad the class dim of the final matmul to a full lane slab
_NEG_INF = -1e30     # effective -inf for padded logits (exp underflows to 0)


# ----------------------- constant-matrix precomputation ---------------------
# (runs once, outside the kernel, in plain JAX; analogous to pre-transposing
#  weights at parameter-preparation time)

def _lowered_w_mats(w, w_in):
    """Conv weight (O, C, KH, KW) -> M (KH, w_in*C, OW*O) with
       M[di][w*C + c, j*O + o] = w[o, c, di, w - j] (0 outside the 5-tap)."""
    O, C, KH, KW = w.shape
    ow = w_in - KW + 1
    wi = jnp.arange(w_in)[:, None]
    ji = jnp.arange(ow)[None, :]
    d = wi - ji                                  # (w_in, ow)  == w - j
    valid = (d >= 0) & (d < KW)
    dcl = jnp.clip(d, 0, KW - 1)
    mats = []
    for di in range(KH):
        wd = w[:, :, di, :]                      # (O, C, KW)
        vals = wd[:, :, dcl]                     # (O, C, w_in, ow)
        vals = jnp.where(valid[None, None], vals, 0.0)
        m = vals.transpose(2, 1, 3, 0).reshape(w_in * C, ow * O)
        mats.append(m)
    return jnp.stack(mats).astype(jnp.float32)   # (KH, w_in*C, ow*O)


def _pool_row_mats(oh):
    """(2, oh//2, oh): even/odd row selection for 2x2 max pooling."""
    ph = oh // 2
    i = jnp.arange(ph)[:, None]
    r = jnp.arange(oh)[None, :]
    return jnp.stack([(r == 2 * i).astype(jnp.float32),
                      (r == 2 * i + 1).astype(jnp.float32)])


def _pool_lane_mats(ow, c):
    """(2, ow*c, (ow//2)*c): even/odd column selection in the w*c+c lane layout."""
    pw = ow // 2
    li = jnp.arange(ow * c)
    lo = jnp.arange(pw * c)
    wi, ci = li // c, li % c
    jo, co = lo // c, lo % c
    same_c = ci[:, None] == co[None, :]
    even = (same_c & (wi[:, None] == 2 * jo[None, :])).astype(jnp.float32)
    odd = (same_c & (wi[:, None] == 2 * jo[None, :] + 1)).astype(jnp.float32)
    return jnp.stack([even, odd])


def _fc1_lowered(fc1_w, c2, hh, ww):
    """fc1 weight (120, c2*hh*ww) -> (hh, ww*c2, 120) so that the kernel's
       (row h, lane w*c2+c) activation layout contracts in torch .view order
       (k = c*hh*ww + h*ww + w)."""
    h = jnp.arange(hh)[:, None, None]
    w = jnp.arange(ww)[None, :, None]
    c = jnp.arange(c2)[None, None, :]
    kt = (c * (hh * ww) + h * ww + w).reshape(hh, ww * c2)
    return fc1_w.T[kt].astype(jnp.float32)       # (hh, ww*c2, 120)


def prepare_params(params):
    """One-time transformation of PyTorch-layout params into kernel constants."""
    f32 = jnp.float32
    n_class = params["fc3_w"].shape[0]
    assert n_class <= _LANE
    M1 = _lowered_w_mats(params["conv1_w"].astype(f32), 28)    # (5, 28*Cin, 144)
    B1 = jnp.tile(params["conv1_b"].astype(f32), 24).reshape(1, 144)
    P1R = _pool_row_mats(24)                                   # (2, 12, 24)
    P1C = _pool_lane_mats(24, 6)                               # (2, 144, 72)
    M2 = _lowered_w_mats(params["conv2_w"].astype(f32), 12)    # (5, 72, 128)
    B2 = jnp.tile(params["conv2_b"].astype(f32), 8).reshape(1, 128)
    P2R = _pool_row_mats(8)                                    # (2, 4, 8)
    P2C = _pool_lane_mats(8, 16)                               # (2, 128, 64)
    W1P = _fc1_lowered(params["fc1_w"].astype(f32), 16, 4, 4)  # (4, 64, 120)
    FB1 = params["fc1_b"].astype(f32).reshape(1, -1)
    W2T = params["fc2_w"].astype(f32).T                        # (120, 84)
    FB2 = params["fc2_b"].astype(f32).reshape(1, -1)
    # fc3 padded to a full 128-lane slab; padded logits get -1e30 bias -> softmax 0
    W3P = jnp.zeros((params["fc3_w"].shape[1], _LANE), f32).at[:, :n_class].set(
        params["fc3_w"].astype(f32).T)                         # (84, 128)
    FB3P = jnp.full((1, _LANE), _NEG_INF, f32).at[0, :n_class].set(
        params["fc3_b"].astype(f32))                           # (1, 128)
    return (M1, B1, P1R, P1C, M2, B2, P2R, P2C,
            W1P, FB1, W2T, FB2, W3P, FB3P)


# ------------------------------ fused kernel --------------------------------

def _lenet_kernel(x_ref, m1_ref, b1_ref, p1r_ref, p1c_ref,
                  m2_ref, b2_ref, p2r_ref, p2c_ref,
                  w1p_ref, fb1_ref, w2t_ref, fb2_ref, w3p_ref, fb3p_ref,
                  o_ref, flat_ref):
    f32 = jnp.float32
    bt = x_ref.shape[0]                       # images per grid step (static)

    def conv_block(act, oh, m_ref, b_ref):
        # row shift = static sublane slice (no MXU); one matmul per kernel row
        acc = jnp.dot(act[0:oh, :], m_ref[0], preferred_element_type=f32)
        for di in range(1, m_ref.shape[0]):
            acc = acc + jnp.dot(act[di:di + oh, :], m_ref[di],
                                preferred_element_type=f32)
        return jnp.maximum(acc + b_ref[...], 0.0)     # bias + ReLU

    def pool_block(y, pr_ref, pc_ref):
        t = jnp.maximum(jnp.dot(pr_ref[0], y, preferred_element_type=f32),
                        jnp.dot(pr_ref[1], y, preferred_element_type=f32))
        return jnp.maximum(jnp.dot(t, pc_ref[0], preferred_element_type=f32),
                           jnp.dot(t, pc_ref[1], preferred_element_type=f32))

    # conv/pool per image (statically unrolled); pool2 rows parked in VMEM
    # scratch laid out (4*bt, 64) with row index r*bt + b.
    for b in range(bt):
        img = x_ref[b]                                            # (28, 28*Cin)
        p1 = pool_block(conv_block(img, 24, m1_ref, b1_ref), p1r_ref, p1c_ref)
        p2 = pool_block(conv_block(p1, 8, m2_ref, b2_ref), p2r_ref, p2c_ref)
        for r in range(4):                                        # p2: (4, 64)
            i = r * bt + b
            flat_ref[i:i + 1, :] = p2[r:r + 1, :]

    # fc layers batched over the whole image block (M = bt matmuls)
    h = jnp.dot(flat_ref[0:bt, :], w1p_ref[0], preferred_element_type=f32)
    for r in range(1, 4):
        h = h + jnp.dot(flat_ref[r * bt:(r + 1) * bt, :], w1p_ref[r],
                        preferred_element_type=f32)
    h = h + fb1_ref[...]                                           # (bt, 120)
    h = jnp.dot(h, w2t_ref[...], preferred_element_type=f32) + fb2_ref[...]
    logits = jnp.dot(h, w3p_ref[...], preferred_element_type=f32) + fb3p_ref[...]

    # numerically stable softmax over the 128-lane slab; padded lanes hold
    # -1e30 so exp == 0 exactly.  Exact divide for parity with PyTorch.
    m = jnp.max(logits, axis=-1, keepdims=True)
    e = jnp.exp(logits - m)
    o_ref[...] = e / jnp.sum(e, axis=-1, keepdims=True)


def _const_spec(shape):
    nd = len(shape)

    def imap(b, _nd=nd):
        return (0,) * _nd

    return pl.BlockSpec(shape, imap)


@partial(jax.jit, static_argnames=("n_class",))
def lenet_forward(prep, x, n_class):
    """x: (B, C, 28, 28) NCHW float32 -> (B, n_class) softmax probabilities."""
    B, C, H, W = x.shape
    # NCHW -> per-image (H, w*C + c) lane layout (tiny, one-time glue)
    x_l = jnp.transpose(x, (0, 2, 3, 1)).reshape(B, H, W * C)

    b_tile = 8 if B % 8 == 0 else B           # dense sublane output blocks
    grid = (B // b_tile,)

    in_specs = [pl.BlockSpec((b_tile, H, W * C), lambda b: (b, 0, 0))]
    in_specs += [_const_spec(a.shape) for a in prep]

    out = pl.pallas_call(
        _lenet_kernel,
        out_shape=jax.ShapeDtypeStruct((B, _LANE), jnp.float32),
        grid=grid,
        in_specs=in_specs,
        out_specs=pl.BlockSpec((b_tile, _LANE), lambda b: (b, 0)),
        scratch_shapes=[pltpu.VMEM((4 * b_tile, 64), jnp.float32)],
        compiler_params=pltpu.CompilerParams(
            dimension_semantics=("parallel",)),
    )(x_l, *prep)
    return out[:, :n_class]


# ----------------------------- params / reference ---------------------------

def init_params(key, in_dim, n_class):
    ks = jax.random.split(key, 10)

    def u(k, shape, fan_in):
        bound = float(1.0 / (fan_in ** 0.5))
        return jax.random.uniform(k, shape, jnp.float32, -bound, bound)

    return {
        "conv1_w": u(ks[0], (6, in_dim, 5, 5), in_dim * 25),
        "conv1_b": u(ks[1], (6,), in_dim * 25),
        "conv2_w": u(ks[2], (16, 6, 5, 5), 6 * 25),
        "conv2_b": u(ks[3], (16,), 6 * 25),
        "fc1_w": u(ks[4], (120, 16 * 4 * 4), 16 * 4 * 4),
        "fc1_b": u(ks[5], (120,), 16 * 4 * 4),
        "fc2_w": u(ks[6], (84, 120), 120),
        "fc2_b": u(ks[7], (84,), 120),
        "fc3_w": u(ks[8], (n_class, 84), 84),
        "fc3_b": u(ks[9], (n_class,), 84),
    }


def lenet_reference(params, x):
    """Pure-JAX (XLA) reference of the PyTorch module, for validation."""
    hp = lax.Precision.HIGHEST
    y = lax.conv_general_dilated(x, params["conv1_w"], (1, 1), "VALID",
                                 dimension_numbers=("NCHW", "OIHW", "NCHW"),
                                 precision=hp)
    y = jnp.maximum(y + params["conv1_b"].reshape(1, -1, 1, 1), 0.0)
    y = lax.reduce_window(y, -jnp.inf, lax.max, (1, 1, 2, 2), (1, 1, 2, 2), "VALID")
    y = lax.conv_general_dilated(y, params["conv2_w"], (1, 1), "VALID",
                                 dimension_numbers=("NCHW", "OIHW", "NCHW"),
                                 precision=hp)
    y = jnp.maximum(y + params["conv2_b"].reshape(1, -1, 1, 1), 0.0)
    y = lax.reduce_window(y, -jnp.inf, lax.max, (1, 1, 2, 2), (1, 1, 2, 2), "VALID")
    flat = y.reshape(y.shape[0], -1)
    h = jnp.dot(flat, params["fc1_w"].T, precision=hp) + params["fc1_b"]
    h = jnp.dot(h, params["fc2_w"].T, precision=hp) + params["fc2_b"]
    h = jnp.dot(h, params["fc3_w"].T, precision=hp) + params["fc3_b"]
    return jax.nn.softmax(h, axis=-1)


if __name__ == "__main__":
    in_dim, n_class, batch = 1, 10, 16   # FC expects 16*4*4 => 28x28 input
    key = jax.random.PRNGKey(0)
    kx, kp = jax.random.split(key)
    x = jax.random.normal(kx, (batch, in_dim, 28, 28), jnp.float32)
    params = init_params(kp, in_dim, n_class)
    prep = prepare_params(params)

    out = lenet_forward(prep, x, n_class)
    out = jax.block_until_ready(out)

    assert out.shape == (batch, n_class), out.shape
    assert out.dtype == jnp.float32
    # softmax rows sum to 1 (exact divide now)
    assert bool(jnp.allclose(jnp.sum(out, axis=-1), 1.0, atol=1e-4))
    # numerically matches the PyTorch-semantics reference
    ref = lenet_reference(params, x)
    assert bool(jnp.allclose(out, ref, atol=1e-2))
    print("KERNEL_OK")
</pallas_src>

<mosaic_0001>
module attributes {stable_mosaic.version = 11 : i64} {
  func.func @_lenet_kernel(%arg0: i32, %arg1: memref<8x28x28xf32, #tpu.memory_space<vmem>>, %arg2: memref<5x28x144xf32, #tpu.memory_space<vmem>>, %arg3: memref<1x144xf32, #tpu.memory_space<vmem>>, %arg4: memref<2x12x24xf32, #tpu.memory_space<vmem>>, %arg5: memref<2x144x72xf32, #tpu.memory_space<vmem>>, %arg6: memref<5x72x128xf32, #tpu.memory_space<vmem>>, %arg7: memref<1x128xf32, #tpu.memory_space<vmem>>, %arg8: memref<2x4x8xf32, #tpu.memory_space<vmem>>, %arg9: memref<2x128x64xf32, #tpu.memory_space<vmem>>, %arg10: memref<4x64x120xf32, #tpu.memory_space<vmem>>, %arg11: memref<1x120xf32, #tpu.memory_space<vmem>>, %arg12: memref<120x84xf32, #tpu.memory_space<vmem>>, %arg13: memref<1x84xf32, #tpu.memory_space<vmem>>, %arg14: memref<84x128xf32, #tpu.memory_space<vmem>>, %arg15: memref<1x128xf32, #tpu.memory_space<vmem>>, %arg16: memref<8x128xf32, #tpu.memory_space<vmem>>, %arg17: memref<32x64xf32, #tpu.memory_space<vmem>>) attributes {dimension_semantics = [#tpu.dimension_semantics<parallel>], iteration_bounds = array<i64: 2>, scalar_prefetch = 0 : i64, scratch_operands = 1 : i64, tpu.core_type = #tpu.core_type<tc>, window_params = [{transform_indices = @transform_0, window_bounds = array<i64: 8, 28, 28>}, {pipeline_mode = #tpu.pipeline_mode<synchronous>, transform_indices = @transform_1, window_bounds = array<i64: 5, 28, 144>}, {pipeline_mode = #tpu.pipeline_mode<synchronous>, transform_indices = @transform_2, window_bounds = array<i64: 1, 144>}, {pipeline_mode = #tpu.pipeline_mode<synchronous>, transform_indices = @transform_3, window_bounds = array<i64: 2, 12, 24>}, {pipeline_mode = #tpu.pipeline_mode<synchronous>, transform_indices = @transform_4, window_bounds = array<i64: 2, 144, 72>}, {pipeline_mode = #tpu.pipeline_mode<synchronous>, transform_indices = @transform_5, window_bounds = array<i64: 5, 72, 128>}, {pipeline_mode = #tpu.pipeline_mode<synchronous>, transform_indices = @transform_6, window_bounds = array<i64: 1, 128>}, {pipeline_mode = #tpu.pipeline_mode<synchronous>, transform_indices = @transform_7, window_bounds = array<i64: 2, 4, 8>}, {pipeline_mode = #tpu.pipeline_mode<synchronous>, transform_indices = @transform_8, window_bounds = array<i64: 2, 128, 64>}, {pipeline_mode = #tpu.pipeline_mode<synchronous>, transform_indices = @transform_9, window_bounds = array<i64: 4, 64, 120>}, {pipeline_mode = #tpu.pipeline_mode<synchronous>, transform_indices = @transform_10, window_bounds = array<i64: 1, 120>}, {pipeline_mode = #tpu.pipeline_mode<synchronous>, transform_indices = @transform_11, window_bounds = array<i64: 120, 84>}, {pipeline_mode = #tpu.pipeline_mode<synchronous>, transform_indices = @transform_12, window_bounds = array<i64: 1, 84>}, {pipeline_mode = #tpu.pipeline_mode<synchronous>, transform_indices = @transform_13, window_bounds = array<i64: 84, 128>}, {pipeline_mode = #tpu.pipeline_mode<synchronous>, transform_indices = @transform_14, window_bounds = array<i64: 1, 128>}, {transform_indices = @transform_15, window_bounds = array<i64: 8, 128>}]} {
    %c0 = arith.constant 0 : index
    %c0_0 = arith.constant 0 : index
    %c0_1 = arith.constant 0 : index
    %0 = vector.load %arg1[%c0, %c0_0, %c0_1] : memref<8x28x28xf32, #tpu.memory_space<vmem>>, vector<1x28x28xf32>
    %1 = vector.shape_cast %0 : vector<1x28x28xf32> to vector<28x28xf32>
    %2 = vector.extract_strided_slice %1 {offsets = [0, 0], sizes = [24, 28], strides = [1, 1]} : vector<28x28xf32> to vector<24x28xf32>
    %c0_2 = arith.constant 0 : index
    %c0_3 = arith.constant 0 : index
    %c0_4 = arith.constant 0 : index
    %3 = vector.load %arg2[%c0_2, %c0_3, %c0_4] : memref<5x28x144xf32, #tpu.memory_space<vmem>>, vector<1x28x144xf32>
    %4 = vector.shape_cast %3 : vector<1x28x144xf32> to vector<28x144xf32>
    %cst = arith.constant dense<0.000000e+00> : vector<24x144xf32>
    %5 = tpu.matmul %2, %4, %cst {dimension_numbers = #tpu.dot_dimension_numbers<[1], [0], [0], [1], [0, 0, 1, 1], [], []>} : vector<24x28xf32>, vector<28x144xf32>, vector<24x144xf32> -> vector<24x144xf32>
    %6 = vector.extract_strided_slice %1 {offsets = [1, 0], sizes = [24, 28], strides = [1, 1]} : vector<28x28xf32> to vector<24x28xf32>
    %c1 = arith.constant 1 : index
    %c0_5 = arith.constant 0 : index
    %c0_6 = arith.constant 0 : index
    %7 = vector.load %arg2[%c1, %c0_5, %c0_6] : memref<5x28x144xf32, #tpu.memory_space<vmem>>, vector<1x28x144xf32>
    %8 = vector.shape_cast %7 : vector<1x28x144xf32> to vector<28x144xf32>
    %cst_7 = arith.constant dense<0.000000e+00> : vector<24x144xf32>
    %9 = tpu.matmul %6, %8, %cst_7 {dimension_numbers = #tpu.dot_dimension_numbers<[1], [0], [0], [1], [0, 0, 1, 1], [], []>} : vector<24x28xf32>, vector<28x144xf32>, vector<24x144xf32> -> vector<24x144xf32>
    %10 = arith.addf %5, %9 : vector<24x144xf32>
    %11 = vector.extract_strided_slice %1 {offsets = [2, 0], sizes = [24, 28], strides = [1, 1]} : vector<28x28xf32> to vector<24x28xf32>
    %c2 = arith.constant 2 : index
    %c0_8 = arith.constant 0 : index
    %c0_9 = arith.constant 0 : index
    %12 = vector.load %arg2[%c2, %c0_8, %c0_9] : memref<5x28x144xf32, #tpu.memory_space<vmem>>, vector<1x28x144xf32>
    %13 = vector.shape_cast %12 : vector<1x28x144xf32> to vector<28x144xf32>
    %cst_10 = arith.constant dense<0.000000e+00> : vector<24x144xf32>
    %14 = tpu.matmul %11, %13, %cst_10 {dimension_numbers = #tpu.dot_dimension_numbers<[1], [0], [0], [1], [0, 0, 1, 1], [], []>} : vector<24x28xf32>, vector<28x144xf32>, vector<24x144xf32> -> vector<24x144xf32>
    %15 = arith.addf %10, %14 : vector<24x144xf32>
    %16 = vector.extract_strided_slice %1 {offsets = [3, 0], sizes = [24, 28], strides = [1, 1]} : vector<28x28xf32> to vector<24x28xf32>
    %c3 = arith.constant 3 : index
    %c0_11 = arith.constant 0 : index
    %c0_12 = arith.constant 0 : index
    %17 = vector.load %arg2[%c3, %c0_11, %c0_12] : memref<5x28x144xf32, #tpu.memory_space<vmem>>, vector<1x28x144xf32>
    %18 = vector.shape_cast %17 : vector<1x28x144xf32> to vector<28x144xf32>
    %cst_13 = arith.constant dense<0.000000e+00> : vector<24x144xf32>
    %19 = tpu.matmul %16, %18, %cst_13 {dimension_numbers = #tpu.dot_dimension_numbers<[1], [0], [0], [1], [0, 0, 1, 1], [], []>} : vector<24x28xf32>, vector<28x144xf32>, vector<24x144xf32> -> vector<24x144xf32>
    %20 = arith.addf %15, %19 : vector<24x144xf32>
    %21 = vector.extract_strided_slice %1 {offsets = [4, 0], sizes = [24, 28], strides = [1, 1]} : vector<28x28xf32> to vector<24x28xf32>
    %c4 = arith.constant 4 : index
    %c0_14 = arith.constant 0 : index
    %c0_15 = arith.constant 0 : index
    %22 = vector.load %arg2[%c4, %c0_14, %c0_15] : memref<5x28x144xf32, #tpu.memory_space<vmem>>, vector<1x28x144xf32>
    %23 = vector.shape_cast %22 : vector<1x28x144xf32> to vector<28x144xf32>
    %cst_16 = arith.constant dense<0.000000e+00> : vector<24x144xf32>
    %24 = tpu.matmul %21, %23, %cst_16 {dimension_numbers = #tpu.dot_dimension_numbers<[1], [0], [0], [1], [0, 0, 1, 1], [], []>} : vector<24x28xf32>, vector<28x144xf32>, vector<24x144xf32> -> vector<24x144xf32>
    %25 = arith.addf %20, %24 : vector<24x144xf32>
    %c0_17 = arith.constant 0 : index
    %c0_18 = arith.constant 0 : index
    %26 = vector.load %arg3[%c0_17, %c0_18] : memref<1x144xf32, #tpu.memory_space<vmem>>, vector<1x144xf32>
    %27 = vector.broadcast %26 : vector<1x144xf32> to vector<24x144xf32>
    %28 = arith.addf %25, %27 : vector<24x144xf32>
    %cst_19 = arith.constant 0.000000e+00 : f32
    %29 = vector.broadcast %cst_19 : f32 to vector<24x144xf32>
    %30 = arith.maximumf %28, %29 : vector<24x144xf32>
    %c0_20 = arith.constant 0 : index
    %c0_21 = arith.constant 0 : index
    %c0_22 = arith.constant 0 : index
    %31 = vector.load %arg4[%c0_20, %c0_21, %c0_22] : memref<2x12x24xf32, #tpu.memory_space<vmem>>, vector<1x12x24xf32>
    %32 = vector.shape_cast %31 : vector<1x12x24xf32> to vector<12x24xf32>
    %cst_23 = arith.constant dense<0.000000e+00> : vector<12x144xf32>
    %33 = tpu.matmul %32, %30, %cst_23 {dimension_numbers = #tpu.dot_dimension_numbers<[1], [0], [0], [1], [0, 0, 1, 1], [], []>} : vector<12x24xf32>, vector<24x144xf32>, vector<12x144xf32> -> vector<12x144xf32>
    %c1_24 = arith.constant 1 : index
    %c0_25 = arith.constant 0 : index
    %c0_26 = arith.constant 0 : index
    %34 = vector.load %arg4[%c1_24, %c0_25, %c0_26] : memref<2x12x24xf32, #tpu.memory_space<vmem>>, vector<1x12x24xf32>
    %35 = vector.shape_cast %34 : vector<1x12x24xf32> to vector<12x24xf32>
    %cst_27 = arith.constant dense<0.000000e+00> : vector<12x144xf32>
    %36 = tpu.matmul %35, %30, %cst_27 {dimension_numbers = #tpu.dot_dimension_numbers<[1], [0], [0], [1], [0, 0, 1, 1], [], []>} : vector<12x24xf32>, vector<24x144xf32>, vector<12x144xf32> -> vector<12x144xf32>
    %37 = arith.maximumf %33, %36 : vector<12x144xf32>
    %c0_28 = arith.constant 0 : index
    %c0_29 = arith.constant 0 : index
    %c0_30 = arith.constant 0 : index
    %38 = vector.load %arg5[%c0_28, %c0_29, %c0_30] : memref<2x144x72xf32, #tpu.memory_space<vmem>>, vector<1x144x72xf32>
    %39 = vector.shape_cast %38 : vector<1x144x72xf32> to vector<144x72xf32>
    %cst_31 = arith.constant dense<0.000000e+00> : vector<12x72xf32>
    %40 = tpu.matmul %37, %39, %cst_31 {dimension_numbers = #tpu.dot_dimension_numbers<[1], [0], [0], [1], [0, 0, 1, 1], [], []>} : vector<12x144xf32>, vector<144x72xf32>, vector<12x72xf32> -> vector<12x72xf32>
    %c1_32 = arith.constant 1 : index
    %c0_33 = arith.constant 0 : index
    %c0_34 = arith.constant 0 : index
    %41 = vector.load %arg5[%c1_32, %c0_33, %c0_34] : memref<2x144x72xf32, #tpu.memory_space<vmem>>, vector<1x144x72xf32>
    %42 = vector.shape_cast %41 : vector<1x144x72xf32> to vector<144x72xf32>
    %cst_35 = arith.constant dense<0.000000e+00> : vector<12x72xf32>
    %43 = tpu.matmul %37, %42, %cst_35 {dimension_numbers = #tpu.dot_dimension_numbers<[1], [0], [0], [1], [0, 0, 1, 1], [], []>} : vector<12x144xf32>, vector<144x72xf32>, vector<12x72xf32> -> vector<12x72xf32>
    %44 = arith.maximumf %40, %43 : vector<12x72xf32>
    %45 = vector.extract_strided_slice %44 {offsets = [0, 0], sizes = [8, 72], strides = [1, 1]} : vector<12x72xf32> to vector<8x72xf32>
    %c0_36 = arith.constant 0 : index
    %c0_37 = arith.constant 0 : index
    %c0_38 = arith.constant 0 : index
    %46 = vector.load %arg6[%c0_36, %c0_37, %c0_38] : memref<5x72x128xf32, #tpu.memory_space<vmem>>, vector<1x72x128xf32>
    %47 = vector.shape_cast %46 : vector<1x72x128xf32> to vector<72x128xf32>
    %cst_39 = arith.constant dense<0.000000e+00> : vector<8x128xf32>
    %48 = tpu.matmul %45, %47, %cst_39 {dimension_numbers = #tpu.dot_dimension_numbers<[1], [0], [0], [1], [0, 0, 1, 1], [], []>} : vector<8x72xf32>, vector<72x128xf32>, vector<8x128xf32> -> vector<8x128xf32>
    %49 = vector.extract_strided_slice %44 {offsets = [1, 0], sizes = [8, 72], strides = [1, 1]} : vector<12x72xf32> to vector<8x72xf32>
    %c1_40 = arith.constant 1 : index
    %c0_41 = arith.constant 0 : index
    %c0_42 = arith.constant 0 : index
    %50 = vector.load %arg6[%c1_40, %c0_41, %c0_42] : memref<5x72x128xf32, #tpu.memory_space<vmem>>, vector<1x72x128xf32>
    %51 = vector.shape_cast %50 : vector<1x72x128xf32> to vector<72x128xf32>
    %cst_43 = arith.constant dense<0.000000e+00> : vector<8x128xf32>
    %52 = tpu.matmul %49, %51, %cst_43 {dimension_numbers = #tpu.dot_dimension_numbers<[1], [0], [0], [1], [0, 0, 1, 1], [], []>} : vector<8x72xf32>, vector<72x128xf32>, vector<8x128xf32> -> vector<8x128xf32>
    %53 = arith.addf %48, %52 : vector<8x128xf32>
    %54 = vector.extract_strided_slice %44 {offsets = [2, 0], sizes = [8, 72], strides = [1, 1]} : vector<12x72xf32> to vector<8x72xf32>
    %c2_44 = arith.constant 2 : index
    %c0_45 = arith.constant 0 : index
    %c0_46 = arith.constant 0 : index
    %55 = vector.load %arg6[%c2_44, %c0_45, %c0_46] : memref<5x72x128xf32, #tpu.memory_space<vmem>>, vector<1x72x128xf32>
    %56 = vector.shape_cast %55 : vector<1x72x128xf32> to vector<72x128xf32>
    %cst_47 = arith.constant dense<0.000000e+00> : vector<8x128xf32>
    %57 = tpu.matmul %54, %56, %cst_47 {dimension_numbers = #tpu.dot_dimension_numbers<[1], [0], [0], [1], [0, 0, 1, 1], [], []>} : vector<8x72xf32>, vector<72x128xf32>, vector<8x128xf32> -> vector<8x128xf32>
    %58 = arith.addf %53, %57 : vector<8x128xf32>
    %59 = vector.extract_strided_slice %44 {offsets = [3, 0], sizes = [8, 72], strides = [1, 1]} : vector<12x72xf32> to vector<8x72xf32>
    %c3_48 = arith.constant 3 : index
    %c0_49 = arith.constant 0 : index
    %c0_50 = arith.constant 0 : index
    %60 = vector.load %arg6[%c3_48, %c0_49, %c0_50] : memref<5x72x128xf32, #tpu.memory_space<vmem>>, vector<1x72x128xf32>
    %61 = vector.shape_cast %60 : vector<1x72x128xf32> to vector<72x128xf32>
    %cst_51 = arith.constant dense<0.000000e+00> : vector<8x128xf32>
    %62 = tpu.matmul %59, %61, %cst_51 {dimension_numbers = #tpu.dot_dimension_numbers<[1], [0], [0], [1], [0, 0, 1, 1], [], []>} : vector<8x72xf32>, vector<72x128xf32>, vector<8x128xf32> -> vector<8x128xf32>
    %63 = arith.addf %58, %62 : vector<8x128xf32>
    %64 = vector.extract_strided_slice %44 {offsets = [4, 0], sizes = [8, 72], strides = [1, 1]} : vector<12x72xf32> to vector<8x72xf32>
    %c4_52 = arith.constant 4 : index
    %c0_53 = arith.constant 0 : index
    %c0_54 = arith.constant 0 : index
    %65 = vector.load %arg6[%c4_52, %c0_53, %c0_54] : memref<5x72x128xf32, #tpu.memory_space<vmem>>, vector<1x72x128xf32>
    %66 = vector.shape_cast %65 : vector<1x72x128xf32> to vector<72x128xf32>
    %cst_55 = arith.constant dense<0.000000e+00> : vector<8x128xf32>
    %67 = tpu.matmul %64, %66, %cst_55 {dimension_numbers = #tpu.dot_dimension_numbers<[1], [0], [0], [1], [0, 0, 1, 1], [], []>} : vector<8x72xf32>, vector<72x128xf32>, vector<8x128xf32> -> vector<8x128xf32>
    %68 = arith.addf %63, %67 : vector<8x128xf32>
    %c0_56 = arith.constant 0 : index
    %c0_57 = arith.constant 0 : index
    %69 = vector.load %arg7[%c0_56, %c0_57] : memref<1x128xf32, #tpu.memory_space<vmem>>, vector<1x128xf32>
    %70 = vector.broadcast %69 : vector<1x128xf32> to vector<8x128xf32>
    %71 = arith.addf %68, %70 : vector<8x128xf32>
    %cst_58 = arith.constant 0.000000e+00 : f32
    %72 = vector.broadcast %cst_58 : f32 to vector<8x128xf32>
    %73 = arith.maximumf %71, %72 : vector<8x128xf32>
    %c0_59 = arith.constant 0 : index
    %c0_60 = arith.constant 0 : index
    %c0_61 = arith.constant 0 : index
    %74 = vector.load %arg8[%c0_59, %c0_60, %c0_61] : memref<2x4x8xf32, #tpu.memory_space<vmem>>, vector<1x4x8xf32>
    %75 = vector.shape_cast %74 : vector<1x4x8xf32> to vector<4x8xf32>
    %cst_62 = arith.constant dense<0.000000e+00> : vector<4x128xf32>
    %76 = tpu.matmul %75, %73, %cst_62 {dimension_numbers = #tpu.dot_dimension_numbers<[1], [0], [0], [1], [0, 0, 1, 1], [], []>} : vector<4x8xf32>, vector<8x128xf32>, vector<4x128xf32> -> vector<4x128xf32>
    %c1_63 = arith.constant 1 : index
    %c0_64 = arith.constant 0 : index
    %c0_65 = arith.constant 0 : index
    %77 = vector.load %arg8[%c1_63, %c0_64, %c0_65] : memref<2x4x8xf32, #tpu.memory_space<vmem>>, vector<1x4x8xf32>
    %78 = vector.shape_cast %77 : vector<1x4x8xf32> to vector<4x8xf32>
    %cst_66 = arith.constant dense<0.000000e+00> : vector<4x128xf32>
    %79 = tpu.matmul %78, %73, %cst_66 {dimension_numbers = #tpu.dot_dimension_numbers<[1], [0], [0], [1], [0, 0, 1, 1], [], []>} : vector<4x8xf32>, vector<8x128xf32>, vector<4x128xf32> -> vector<4x128xf32>
    %80 = arith.maximumf %76, %79 : vector<4x128xf32>
    %c0_67 = arith.constant 0 : index
    %c0_68 = arith.constant 0 : index
    %c0_69 = arith.constant 0 : index
    %81 = vector.load %arg9[%c0_67, %c0_68, %c0_69] : memref<2x128x64xf32, #tpu.memory_space<vmem>>, vector<1x128x64xf32>
    %82 = vector.shape_cast %81 : vector<1x128x64xf32> to vector<128x64xf32>
    %cst_70 = arith.constant dense<0.000000e+00> : vector<4x64xf32>
    %83 = tpu.matmul %80, %82, %cst_70 {dimension_numbers = #tpu.dot_dimension_numbers<[1], [0], [0], [1], [0, 0, 1, 1], [], []>} : vector<4x128xf32>, vector<128x64xf32>, vector<4x64xf32> -> vector<4x64xf32>
    %c1_71 = arith.constant 1 : index
    %c0_72 = arith.constant 0 : index
    %c0_73 = arith.constant 0 : index
    %84 = vector.load %arg9[%c1_71, %c0_72, %c0_73] : memref<2x128x64xf32, #tpu.memory_space<vmem>>, vector<1x128x64xf32>
    %85 = vector.shape_cast %84 : vector<1x128x64xf32> to vector<128x64xf32>
    %cst_74 = arith.constant dense<0.000000e+00> : vector<4x64xf32>
    %86 = tpu.matmul %80, %85, %cst_74 {dimension_numbers = #tpu.dot_dimension_numbers<[1], [0], [0], [1], [0, 0, 1, 1], [], []>} : vector<4x128xf32>, vector<128x64xf32>, vector<4x64xf32> -> vector<4x64xf32>
    %87 = arith.maximumf %83, %86 : vector<4x64xf32>
    %88 = vector.extract_strided_slice %87 {offsets = [0, 0], sizes = [1, 64], strides = [1, 1]} : vector<4x64xf32> to vector<1x64xf32>
    %c0_75 = arith.constant 0 : index
    %c0_76 = arith.constant 0 : index
    %89 = vector.load %arg17[%c0_75, %c0_76] : memref<32x64xf32, #tpu.memory_space<vmem>>, vector<1x64xf32>
    tpu.vector_store %arg17[%c0_75, %c0_76], %88 {strides = array<i32>} : memref<32x64xf32, #tpu.memory_space<vmem>>, vector<1x64xf32>,
    %90 = vector.extract_strided_slice %87 {offsets = [1, 0], sizes = [1, 64], strides = [1, 1]} : vector<4x64xf32> to vector<1x64xf32>
    %c8 = arith.constant 8 : index
    %c0_77 = arith.constant 0 : index
    %91 = vector.load %arg17[%c8, %c0_77] : memref<32x64xf32, #tpu.memory_space<vmem>>, vector<1x64xf32>
    tpu.vector_store %arg17[%c8, %c0_77], %90 {strides = array<i32>} : memref<32x64xf32, #tpu.memory_space<vmem>>, vector<1x64xf32>,
    %92 = vector.extract_strided_slice %87 {offsets = [2, 0], sizes = [1, 64], strides = [1, 1]} : vector<4x64xf32> to vector<1x64xf32>
    %c16 = arith.constant 16 : index
    %c0_78 = arith.constant 0 : index
    %93 = vector.load %arg17[%c16, %c0_78] : memref<32x64xf32, #tpu.memory_space<vmem>>, vector<1x64xf32>
    tpu.vector_store %arg17[%c16, %c0_78], %92 {strides = array<i32>} : memref<32x64xf32, #tpu.memory_space<vmem>>, vector<1x64xf32>,
    %94 = vector.extract_strided_slice %87 {offsets = [3, 0], sizes = [1, 64], strides = [1, 1]} : vector<4x64xf32> to vector<1x64xf32>
    %c24 = arith.constant 24 : index
    %c0_79 = arith.constant 0 : index
    %95 = vector.load %arg17[%c24, %c0_79] : memref<32x64xf32, #tpu.memory_space<vmem>>, vector<1x64xf32>
    tpu.vector_store %arg17[%c24, %c0_79], %94 {strides = array<i32>} : memref<32x64xf32, #tpu.memory_space<vmem>>, vector<1x64xf32>,
    %c1_80 = arith.constant 1 : index
    %c0_81 = arith.constant 0 : index
    %c0_82 = arith.constant 0 : index
    %96 = vector.load %arg1[%c1_80, %c0_81, %c0_82] : memref<8x28x28xf32, #tpu.memory_space<vmem>>, vector<1x28x28xf32>
    %97 = vector.shape_cast %96 : vector<1x28x28xf32> to vector<28x28xf32>
    %98 = vector.extract_strided_slice %97 {offsets = [0, 0], sizes = [24, 28], strides = [1, 1]} : vector<28x28xf32> to vector<24x28xf32>
    %c0_83 = arith.constant 0 : index
    %c0_84 = arith.constant 0 : index
    %c0_85 = arith.constant 0 : index
    %99 = vector.load %arg2[%c0_83, %c0_84, %c0_85] : memref<5x28x144xf32, #tpu.memory_space<vmem>>, vector<1x28x144xf32>
    %100 = vector.shape_cast %99 : vector<1x28x144xf32> to vector<28x144xf32>
    %cst_86 = arith.constant dense<0.000000e+00> : vector<24x144xf32>
    %101 = tpu.matmul %98, %100, %cst_86 {dimension_numbers = #tpu.dot_dimension_numbers<[1], [0], [0], [1], [0, 0, 1, 1], [], []>} : vector<24x28xf32>, vector<28x144xf32>, vector<24x144xf32> -> vector<24x144xf32>
    %102 = vector.extract_strided_slice %97 {offsets = [1, 0], sizes = [24, 28], strides = [1, 1]} : vector<28x28xf32> to vector<24x28xf32>
    %c1_87 = arith.constant 1 : index
    %c0_88 = arith.constant 0 : index
    %c0_89 = arith.constant 0 : index
    %103 = vector.load %arg2[%c1_87, %c0_88, %c0_89] : memref<5x28x144xf32, #tpu.memory_space<vmem>>, vector<1x28x144xf32>
    %104 = vector.shape_cast %103 : vector<1x28x144xf32> to vector<28x144xf32>
    %cst_90 = arith.constant dense<0.000000e+00> : vector<24x144xf32>
    %105 = tpu.matmul %102, %104, %cst_90 {dimension_numbers = #tpu.dot_dimension_numbers<[1], [0], [0], [1], [0, 0, 1, 1], [], []>} : vector<24x28xf32>, vector<28x144xf32>, vector<24x144xf32> -> vector<24x144xf32>
    %106 = arith.addf %101, %105 : vector<24x144xf32>
    %107 = vector.extract_strided_slice %97 {offsets = [2, 0], sizes = [24, 28], strides = [1, 1]} : vector<28x28xf32> to vector<24x28xf32>
    %c2_91 = arith.constant 2 : index
    %c0_92 = arith.constant 0 : index
    %c0_93 = arith.constant 0 : index
    %108 = vector.load %arg2[%c2_91, %c0_92, %c0_93] : memref<5x28x144xf32, #tpu.memory_space<vmem>>, vector<1x28x144xf32>
    %109 = vector.shape_cast %108 : vector<1x28x144xf32> to vector<28x144xf32>
    %cst_94 = arith.constant dense<0.000000e+00> : vector<24x144xf32>
    %110 = tpu.matmul %107, %109, %cst_94 {dimension_numbers = #tpu.dot_dimension_numbers<[1], [0], [0], [1], [0, 0, 1, 1], [], []>} : vector<24x28xf32>, vector<28x144xf32>, vector<24x144xf32> -> vector<24x144xf32>
    %111 = arith.addf %106, %110 : vector<24x144xf32>
    %112 = vector.extract_strided_slice %97 {offsets = [3, 0], sizes = [24, 28], strides = [1, 1]} : vector<28x28xf32> to vector<24x28xf32>
    %c3_95 = arith.constant 3 : index
    %c0_96 = arith.constant 0 : index
    %c0_97 = arith.constant 0 : index
    %113 = vector.load %arg2[%c3_95, %c0_96, %c0_97] : memref<5x28x144xf32, #tpu.memory_space<vmem>>, vector<1x28x144xf32>
    %114 = vector.shape_cast %113 : vector<1x28x144xf32> to vector<28x144xf32>
    %cst_98 = arith.constant dense<0.000000e+00> : vector<24x144xf32>
    %115 = tpu.matmul %112, %114, %cst_98 {dimension_numbers = #tpu.dot_dimension_numbers<[1], [0], [0], [1], [0, 0, 1, 1], [], []>} : vector<24x28xf32>, vector<28x144xf32>, vector<24x144xf32> -> vector<24x144xf32>
    %116 = arith.addf %111, %115 : vector<24x144xf32>
    %117 = vector.extract_strided_slice %97 {offsets = [4, 0], sizes = [24, 28], strides = [1, 1]} : vector<28x28xf32> to vector<24x28xf32>
    %c4_99 = arith.constant 4 : index
    %c0_100 = arith.constant 0 : index
    %c0_101 = arith.constant 0 : index
    %118 = vector.load %arg2[%c4_99, %c0_100, %c0_101] : memref<5x28x144xf32, #tpu.memory_space<vmem>>, vector<1x28x144xf32>
    %119 = vector.shape_cast %118 : vector<1x28x144xf32> to vector<28x144xf32>
    %cst_102 = arith.constant dense<0.000000e+00> : vector<24x144xf32>
    %120 = tpu.matmul %117, %119, %cst_102 {dimension_numbers = #tpu.dot_dimension_numbers<[1], [0], [0], [1], [0, 0, 1, 1], [], []>} : vector<24x28xf32>, vector<28x144xf32>, vector<24x144xf32> -> vector<24x144xf32>
    %121 = arith.addf %116, %120 : vector<24x144xf32>
    %c0_103 = arith.constant 0 : index
    %c0_104 = arith.constant 0 : index
    %122 = vector.load %arg3[%c0_103, %c0_104] : memref<1x144xf32, #tpu.memory_space<vmem>>, vector<1x144xf32>
    %123 = vector.broadcast %122 : vector<1x144xf32> to vector<24x144xf32>
    %124 = arith.addf %121, %123 : vector<24x144xf32>
    %cst_105 = arith.constant 0.000000e+00 : f32
    %125 = vector.broadcast %cst_105 : f32 to vector<24x144xf32>
    %126 = arith.maximumf %124, %125 : vector<24x144xf32>
    %c0_106 = arith.constant 0 : index
    %c0_107 = arith.constant 0 : index
    %c0_108 = arith.constant 0 : index
    %127 = vector.load %arg4[%c0_106, %c0_107, %c0_108] : memref<2x12x24xf32, #tpu.memory_space<vmem>>, vector<1x12x24xf32>
    %128 = vector.shape_cast %127 : vector<1x12x24xf32> to vector<12x24xf32>
    %cst_109 = arith.constant dense<0.000000e+00> : vector<12x144xf32>
    %129 = tpu.matmul %128, %126, %cst_109 {dimension_numbers = #tpu.dot_dimension_numbers<[1], [0], [0], [1], [0, 0, 1, 1], [], []>} : vector<12x24xf32>, vector<24x144xf32>, vector<12x144xf32> -> vector<12x144xf32>
    %c1_110 = arith.constant 1 : index
    %c0_111 = arith.constant 0 : index
    %c0_112 = arith.constant 0 : index
    %130 = vector.load %arg4[%c1_110, %c0_111, %c0_112] : memref<2x12x24xf32, #tpu.memory_space<vmem>>, vector<1x12x24xf32>
    %131 = vector.shape_cast %130 : vector<1x12x24xf32> to vector<12x24xf32>
    %cst_113 = arith.constant dense<0.000000e+00> : vector<12x144xf32>
    %132 = tpu.matmul %131, %126, %cst_113 {dimension_numbers = #tpu.dot_dimension_numbers<[1], [0], [0], [1], [0, 0, 1, 1], [], []>} : vector<12x24xf32>, vector<24x144xf32>, vector<12x144xf32> -> vector<12x144xf32>
    %133 = arith.maximumf %129, %132 : vector<12x144xf32>
    %c0_114 = arith.constant 0 : index
    %c0_115 = arith.constant 0 : index
    %c0_116 = arith.constant 0 : index
    %134 = vector.load %arg5[%c0_114, %c0_115, %c0_116] : memref<2x144x72xf32, #tpu.memory_space<vmem>>, vector<1x144x72xf32>
    %135 = vector.shape_cast %134 : vector<1x144x72xf32> to vector<144x72xf32>
    %cst_117 = arith.constant dense<0.000000e+00> : vector<12x72xf32>
    %136 = tpu.matmul %133, %135, %cst_117 {dimension_numbers = #tpu.dot_dimension_numbers<[1], [0], [0], [1], [0, 0, 1, 1], [], []>} : vector<12x144xf32>, vector<144x72xf32>, vector<12x72xf32> -> vector<12x72xf32>
    %c1_118 = arith.constant 1 : index
    %c0_119 = arith.constant 0 : index
    %c0_120 = arith.constant 0 : index
    %137 = vector.load %arg5[%c1_118, %c0_119, %c0_120] : memref<2x144x72xf32, #tpu.memory_space<vmem>>, vector<1x144x72xf32>
    %138 = vector.shape_cast %137 : vector<1x144x72xf32> to vector<144x72xf32>
    %cst_121 = arith.constant dense<0.000000e+00> : vector<12x72xf32>
    %139 = tpu.matmul %133, %138, %cst_121 {dimension_numbers = #tpu.dot_dimension_numbers<[1], [0], [0], [1], [0, 0, 1, 1], [], []>} : vector<12x144xf32>, vector<144x72xf32>, vector<12x72xf32> -> vector<12x72xf32>
    %140 = arith.maximumf %136, %139 : vector<12x72xf32>
    %141 = vector.extract_strided_slice %140 {offsets = [0, 0], sizes = [8, 72], strides = [1, 1]} : vector<12x72xf32> to vector<8x72xf32>
    %c0_122 = arith.constant 0 : index
    %c0_123 = arith.constant 0 : index
    %c0_124 = arith.constant 0 : index
    %142 = vector.load %arg6[%c0_122, %c0_123, %c0_124] : memref<5x72x128xf32, #tpu.memory_space<vmem>>, vector<1x72x128xf32>
    %143 = vector.shape_cast %142 : vector<1x72x128xf32> to vector<72x128xf32>
    %cst_125 = arith.constant dense<0.000000e+00> : vector<8x128xf32>
    %144 = tpu.matmul %141, %143, %cst_125 {dimension_numbers = #tpu.dot_dimension_numbers<[1], [0], [0], [1], [0, 0, 1, 1], [], []>} : vector<8x72xf32>, vector<72x128xf32>, vector<8x128xf32> -> vector<8x128xf32>
    %145 = vector.extract_strided_slice %140 {offsets = [1, 0], sizes = [8, 72], strides = [1, 1]} : vector<12x72xf32> to vector<8x72xf32>
    %c1_126 = arith.constant 1 : index
    %c0_127 = arith.constant 0 : index
    %c0_128 = arith.constant 0 : index
    %146 = vector.load %arg6[%c1_126, %c0_127, %c0_128] : memref<5x72x128xf32, #tpu.memory_space<vmem>>, vector<1x72x128xf32>
    %147 = vector.shape_cast %146 : vector<1x72x128xf32> to vector<72x128xf32>
    %cst_129 = arith.constant dense<0.000000e+00> : vector<8x128xf32>
    %148 = tpu.matmul %145, %147, %cst_129 {dimension_numbers = #tpu.dot_dimension_numbers<[1], [0], [0], [1], [0, 0, 1, 1], [], []>} : vector<8x72xf32>, vector<72x128xf32>, vector<8x128xf32> -> vector<8x128xf32>
    %149 = arith.addf %144, %148 : vector<8x128xf32>
    %150 = vector.extract_strided_slice %140 {offsets = [2, 0], sizes = [8, 72], strides = [1, 1]} : vector<12x72xf32> to vector<8x72xf32>
    %c2_130 = arith.constant 2 : index
    %c0_131 = arith.constant 0 : index
    %c0_132 = arith.constant 0 : index
    %151 = vector.load %arg6[%c2_130, %c0_131, %c0_132] : memref<5x72x128xf32, #tpu.memory_space<vmem>>, vector<1x72x128xf32>
    %152 = vector.shape_cast %151 : vector<1x72x128xf32> to vector<72x128xf32>
    %cst_133 = arith.constant dense<0.000000e+00> : vector<8x128xf32>
    %153 = tpu.matmul %150, %152, %cst_133 {dimension_numbers = #tpu.dot_dimension_numbers<[1], [0], [0], [1], [0, 0, 1, 1], [], []>} : vector<8x72xf32>, vector<72x128xf32>, vector<8x128xf32> -> vector<8x128xf32>
    %154 = arith.addf %149, %153 : vector<8x128xf32>
    %155 = vector.extract_strided_slice %140 {offsets = [3, 0], sizes = [8, 72], strides = [1, 1]} : vector<12x72xf32> to vector<8x72xf32>
    %c3_134 = arith.constant 3 : index
    %c0_135 = arith.constant 0 : index
    %c0_136 = arith.constant 0 : index
    %156 = vector.load %arg6[%c3_134, %c0_135, %c0_136] : memref<5x72x128xf32, #tpu.memory_space<vmem>>, vector<1x72x128xf32>
    %157 = vector.shape_cast %156 : vector<1x72x128xf32> to vector<72x128xf32>
    %cst_137 = arith.constant dense<0.000000e+00> : vector<8x128xf32>
    %158 = tpu.matmul %155, %157, %cst_137 {dimension_numbers = #tpu.dot_dimension_numbers<[1], [0], [0], [1], [0, 0, 1, 1], [], []>} : vector<8x72xf32>, vector<72x128xf32>, vector<8x128xf32> -> vector<8x128xf32>
    %159 = arith.addf %154, %158 : vector<8x128xf32>
    %160 = vector.extract_strided_slice %140 {offsets = [4, 0], sizes = [8, 72], strides = [1, 1]} : vector<12x72xf32> to vector<8x72xf32>
    %c4_138 = arith.constant 4 : index
    %c0_139 = arith.constant 0 : index
    %c0_140 = arith.constant 0 : index
    %161 = vector.load %arg6[%c4_138, %c0_139, %c0_140] : memref<5x72x128xf32, #tpu.memory_space<vmem>>, vector<1x72x128xf32>
    %162 = vector.shape_cast %161 : vector<1x72x128xf32> to vector<72x128xf32>
    %cst_141 = arith.constant dense<0.000000e+00> : vector<8x128xf32>
    %163 = tpu.matmul %160, %162, %cst_141 {dimension_numbers = #tpu.dot_dimension_numbers<[1], [0], [0], [1], [0, 0, 1, 1], [], []>} : vector<8x72xf32>, vector<72x128xf32>, vector<8x128xf32> -> vector<8x128xf32>
    %164 = arith.addf %159, %163 : vector<8x128xf32>
    %c0_142 = arith.constant 0 : index
    %c0_143 = arith.constant 0 : index
    %165 = vector.load %arg7[%c0_142, %c0_143] : memref<1x128xf32, #tpu.memory_space<vmem>>, vector<1x128xf32>
    %166 = vector.broadcast %165 : vector<1x128xf32> to vector<8x128xf32>
    %167 = arith.addf %164, %166 : vector<8x128xf32>
    %cst_144 = arith.constant 0.000000e+00 : f32
    %168 = vector.broadcast %cst_144 : f32 to vector<8x128xf32>
    %169 = arith.maximumf %167, %168 : vector<8x128xf32>
    %c0_145 = arith.constant 0 : index
    %c0_146 = arith.constant 0 : index
    %c0_147 = arith.constant 0 : index
    %170 = vector.load %arg8[%c0_145, %c0_146, %c0_147] : memref<2x4x8xf32, #tpu.memory_space<vmem>>, vector<1x4x8xf32>
    %171 = vector.shape_cast %170 : vector<1x4x8xf32> to vector<4x8xf32>
    %cst_148 = arith.constant dense<0.000000e+00> : vector<4x128xf32>
    %172 = tpu.matmul %171, %169, %cst_148 {dimension_numbers = #tpu.dot_dimension_numbers<[1], [0], [0], [1], [0, 0, 1, 1], [], []>} : vector<4x8xf32>, vector<8x128xf32>, vector<4x128xf32> -> vector<4x128xf32>
    %c1_149 = arith.constant 1 : index
    %c0_150 = arith.constant 0 : index
    %c0_151 = arith.constant 0 : index
    %173 = vector.load %arg8[%c1_149, %c0_150, %c0_151] : memref<2x4x8xf32, #tpu.memory_space<vmem>>, vector<1x4x8xf32>
    %174 = vector.shape_cast %173 : vector<1x4x8xf32> to vector<4x8xf32>
    %cst_152 = arith.constant dense<0.000000e+00> : vector<4x128xf32>
    %175 = tpu.matmul %174, %169, %cst_152 {dimension_numbers = #tpu.dot_dimension_numbers<[1], [0], [0], [1], [0, 0, 1, 1], [], []>} : vector<4x8xf32>, vector<8x128xf32>, vector<4x128xf32> -> vector<4x128xf32>
    %176 = arith.maximumf %172, %175 : vector<4x128xf32>
    %c0_153 = arith.constant 0 : index
    %c0_154 = arith.constant 0 : index
    %c0_155 = arith.constant 0 : index
    %177 = vector.load %arg9[%c0_153, %c0_154, %c0_155] : memref<2x128x64xf32, #tpu.memory_space<vmem>>, vector<1x128x64xf32>
    %178 = vector.shape_cast %177 : vector<1x128x64xf32> to vector<128x64xf32>
    %cst_156 = arith.constant dense<0.000000e+00> : vector<4x64xf32>
    %179 = tpu.matmul %176, %178, %cst_156 {dimension_numbers = #tpu.dot_dimension_numbers<[1], [0], [0], [1], [0, 0, 1, 1], [], []>} : vector<4x128xf32>, vector<128x64xf32>, vector<4x64xf32> -> vector<4x64xf32>
    %c1_157 = arith.constant 1 : index
    %c0_158 = arith.constant 0 : index
    %c0_159 = arith.constant 0 : index
    %180 = vector.load %arg9[%c1_157, %c0_158, %c0_159] : memref<2x128x64xf32, #tpu.memory_space<vmem>>, vector<1x128x64xf32>
    %181 = vector.shape_cast %180 : vector<1x128x64xf32> to vector<128x64xf32>
    %cst_160 = arith.constant dense<0.000000e+00> : vector<4x64xf32>
    %182 = tpu.matmul %176, %181, %cst_160 {dimension_numbers = #tpu.dot_dimension_numbers<[1], [0], [0], [1], [0, 0, 1, 1], [], []>} : vector<4x128xf32>, vector<128x64xf32>, vector<4x64xf32> -> vector<4x64xf32>
    %183 = arith.maximumf %179, %182 : vector<4x64xf32>
    %184 = vector.extract_strided_slice %183 {offsets = [0, 0], sizes = [1, 64], strides = [1, 1]} : vector<4x64xf32> to vector<1x64xf32>
    %c1_161 = arith.constant 1 : index
    %c0_162 = arith.constant 0 : index
    %185 = vector.load %arg17[%c1_161, %c0_162] : memref<32x64xf32, #tpu.memory_space<vmem>>, vector<1x64xf32>
    tpu.vector_store %arg17[%c1_161, %c0_162], %184 {strides = array<i32>} : memref<32x64xf32, #tpu.memory_space<vmem>>, vector<1x64xf32>,
    %186 = vector.extract_strided_slice %183 {offsets = [1, 0], sizes = [1, 64], strides = [1, 1]} : vector<4x64xf32> to vector<1x64xf32>
    %c9 = arith.constant 9 : index
    %c0_163 = arith.constant 0 : index
    %187 = vector.load %arg17[%c9, %c0_163] : memref<32x64xf32, #tpu.memory_space<vmem>>, vector<1x64xf32>
    tpu.vector_store %arg17[%c9, %c0_163], %186 {strides = array<i32>} : memref<32x64xf32, #tpu.memory_space<vmem>>, vector<1x64xf32>,
    %188 = vector.extract_strided_slice %183 {offsets = [2, 0], sizes = [1, 64], strides = [1, 1]} : vector<4x64xf32> to vector<1x64xf32>
    %c17 = arith.constant 17 : index
    %c0_164 = arith.constant 0 : index
    %189 = vector.load %arg17[%c17, %c0_164] : memref<32x64xf32, #tpu.memory_space<vmem>>, vector<1x64xf32>
    tpu.vector_store %arg17[%c17, %c0_164], %188 {strides = array<i32>} : memref<32x64xf32, #tpu.memory_space<vmem>>, vector<1x64xf32>,
    %190 = vector.extract_strided_slice %183 {offsets = [3, 0], sizes = [1, 64], strides = [1, 1]} : vector<4x64xf32> to vector<1x64xf32>
    %c25 = arith.constant 25 : index
    %c0_165 = arith.constant 0 : index
    %191 = vector.load %arg17[%c25, %c0_165] : memref<32x64xf32, #tpu.memory_space<vmem>>, vector<1x64xf32>
    tpu.vector_store %arg17[%c25, %c0_165], %190 {strides = array<i32>} : memref<32x64xf32, #tpu.memory_space<vmem>>, vector<1x64xf32>,
    %c2_166 = arith.constant 2 : index
    %c0_167 = arith.constant 0 : index
    %c0_168 = arith.constant 0 : index
    %192 = vector.load %arg1[%c2_166, %c0_167, %c0_168] : memref<8x28x28xf32, #tpu.memory_space<vmem>>, vector<1x28x28xf32>
    %193 = vector.shape_cast %192 : vector<1x28x28xf32> to vector<28x28xf32>
    %194 = vector.extract_strided_slice %193 {offsets = [0, 0], sizes = [24, 28], strides = [1, 1]} : vector<28x28xf32> to vector<24x28xf32>
    %c0_169 = arith.constant 0 : index
    %c0_170 = arith.constant 0 : index
    %c0_171 = arith.constant 0 : index
    %195 = vector.load %arg2[%c0_169, %c0_170, %c0_171] : memref<5x28x144xf32, #tpu.memory_space<vmem>>, vector<1x28x144xf32>
    %196 = vector.shape_cast %195 : vector<1x28x144xf32> to vector<28x144xf32>
    %cst_172 = arith.constant dense<0.000000e+00> : vector<24x144xf32>
    %197 = tpu.matmul %194, %196, %cst_172 {dimension_numbers = #tpu.dot_dimension_numbers<[1], [0], [0], [1], [0, 0, 1, 1], [], []>} : vector<24x28xf32>, vector<28x144xf32>, vector<24x144xf32> -> vector<24x144xf32>
    %198 = vector.extract_strided_slice %193 {offsets = [1, 0], sizes = [24, 28], strides = [1, 1]} : vector<28x28xf32> to vector<24x28xf32>
    %c1_173 = arith.constant 1 : index
    %c0_174 = arith.constant 0 : index
    %c0_175 = arith.constant 0 : index
    %199 = vector.load %arg2[%c1_173, %c0_174, %c0_175] : memref<5x28x144xf32, #tpu.memory_space<vmem>>, vector<1x28x144xf32>
    %200 = vector.shape_cast %199 : vector<1x28x144xf32> to vector<28x144xf32>
    %cst_176 = arith.constant dense<0.000000e+00> : vector<24x144xf32>
    %201 = tpu.matmul %198, %200, %cst_176 {dimension_numbers = #tpu.dot_dimension_numbers<[1], [0], [0], [1], [0, 0, 1, 1], [], []>} : vector<24x28xf32>, vector<28x144xf32>, vector<24x144xf32> -> vector<24x144xf32>
    %202 = arith.addf %197, %201 : vector<24x144xf32>
    %203 = vector.extract_strided_slice %193 {offsets = [2, 0], sizes = [24, 28], strides = [1, 1]} : vector<28x28xf32> to vector<24x28xf32>
    %c2_177 = arith.constant 2 : index
    %c0_178 = arith.constant 0 : index
    %c0_179 = arith.constant 0 : index
    %204 = vector.load %arg2[%c2_177, %c0_178, %c0_179] : memref<5x28x144xf32, #tpu.memory_space<vmem>>, vector<1x28x144xf32>
    %205 = vector.shape_cast %204 : vector<1x28x144xf32> to vector<28x144xf32>
    %cst_180 = arith.constant dense<0.000000e+00> : vector<24x144xf32>
    %206 = tpu.matmul %203, %205, %cst_180 {dimension_numbers = #tpu.dot_dimension_numbers<[1], [0], [0], [1], [0, 0, 1, 1], [], []>} : vector<24x28xf32>, vector<28x144xf32>, vector<24x144xf32> -> vector<24x144xf32>
    %207 = arith.addf %202, %206 : vector<24x144xf32>
    %208 = vector.extract_strided_slice %193 {offsets = [3, 0], sizes = [24, 28], strides = [1, 1]} : vector<28x28xf32> to vector<24x28xf32>
    %c3_181 = arith.constant 3 : index
    %c0_182 = arith.constant 0 : index
    %c0_183 = arith.constant 0 : index
    %209 = vector.load %arg2[%c3_181, %c0_182, %c0_183] : memref<5x28x144xf32, #tpu.memory_space<vmem>>, vector<1x28x144xf32>
    %210 = vector.shape_cast %209 : vector<1x28x144xf32> to vector<28x144xf32>
    %cst_184 = arith.constant dense<0.000000e+00> : vector<24x144xf32>
    %211 = tpu.matmul %208, %210, %cst_184 {dimension_numbers = #tpu.dot_dimension_numbers<[1], [0], [0], [1], [0, 0, 1, 1], [], []>} : vector<24x28xf32>, vector<28x144xf32>, vector<24x144xf32> -> vector<24x144xf32>
    %212 = arith.addf %207, %211 : vector<24x144xf32>
    %213 = vector.extract_strided_slice %193 {offsets = [4, 0], sizes = [24, 28], strides = [1, 1]} : vector<28x28xf32> to vector<24x28xf32>
    %c4_185 = arith.constant 4 : index
    %c0_186 = arith.constant 0 : index
    %c0_187 = arith.constant 0 : index
    %214 = vector.load %arg2[%c4_185, %c0_186, %c0_187] : memref<5x28x144xf32, #tpu.memory_space<vmem>>, vector<1x28x144xf32>
    %215 = vector.shape_cast %214 : vector<1x28x144xf32> to vector<28x144xf32>
    %cst_188 = arith.constant dense<0.000000e+00> : vector<24x144xf32>
    %216 = tpu.matmul %213, %215, %cst_188 {dimension_numbers = #tpu.dot_dimension_numbers<[1], [0], [0], [1], [0, 0, 1, 1], [], []>} : vector<24x28xf32>, vector<28x144xf32>, vector<24x144xf32> -> vector<24x144xf32>
    %217 = arith.addf %212, %216 : vector<24x144xf32>
    %c0_189 = arith.constant 0 : index
    %c0_190 = arith.constant 0 : index
    %218 = vector.load %arg3[%c0_189, %c0_190] : memref<1x144xf32, #tpu.memory_space<vmem>>, vector<1x144xf32>
    %219 = vector.broadcast %218 : vector<1x144xf32> to vector<24x144xf32>
    %220 = arith.addf %217, %219 : vector<24x144xf32>
    %cst_191 = arith.constant 0.000000e+00 : f32
    %221 = vector.broadcast %cst_191 : f32 to vector<24x144xf32>
    %222 = arith.maximumf %220, %221 : vector<24x144xf32>
    %c0_192 = arith.constant 0 : index
    %c0_193 = arith.constant 0 : index
    %c0_194 = arith.constant 0 : index
    %223 = vector.load %arg4[%c0_192, %c0_193, %c0_194] : memref<2x12x24xf32, #tpu.memory_space<vmem>>, vector<1x12x24xf32>
    %224 = vector.shape_cast %223 : vector<1x12x24xf32> to vector<12x24xf32>
    %cst_195 = arith.constant dense<0.000000e+00> : vector<12x144xf32>
    %225 = tpu.matmul %224, %222, %cst_195 {dimension_numbers = #tpu.dot_dimension_numbers<[1], [0], [0], [1], [0, 0, 1, 1], [], []>} : vector<12x24xf32>, vector<24x144xf32>, vector<12x144xf32> -> vector<12x144xf32>
    %c1_196 = arith.constant 1 : index
    %c0_197 = arith.constant 0 : index
    %c0_198 = arith.constant 0 : index
    %226 = vector.load %arg4[%c1_196, %c0_197, %c0_198] : memref<2x12x24xf32, #tpu.memory_space<vmem>>, vector<1x12x24xf32>
    %227 = vector.shape_cast %226 : vector<1x12x24xf32> to vector<12x24xf32>
    %cst_199 = arith.constant dense<0.000000e+00> : vector<12x144xf32>
    %228 = tpu.matmul %227, %222, %cst_199 {dimension_numbers = #tpu.dot_dimension_numbers<[1], [0], [0], [1], [0, 0, 1, 1], [], []>} : vector<12x24xf32>, vector<24x144xf32>, vector<12x144xf32> -> vector<12x144xf32>
    %229 = arith.maximumf %225, %228 : vector<12x144xf32>
    %c0_200 = arith.constant 0 : index
    %c0_201 = arith.constant 0 : index
    %c0_202 = arith.constant 0 : index
    %230 = vector.load %arg5[%c0_200, %c0_201, %c0_202] : memref<2x144x72xf32, #tpu.memory_space<vmem>>, vector<1x144x72xf32>
    %231 = vector.shape_cast %230 : vector<1x144x72xf32> to vector<144x72xf32>
    %cst_203 = arith.constant dense<0.000000e+00> : vector<12x72xf32>
    %232 = tpu.matmul %229, %231, %cst_203 {dimension_numbers = #tpu.dot_dimension_numbers<[1], [0], [0], [1], [0, 0, 1, 1], [], []>} : vector<12x144xf32>, vector<144x72xf32>, vector<12x72xf32> -> vector<12x72xf32>
    %c1_204 = arith.constant 1 : index
    %c0_205 = arith.constant 0 : index
    %c0_206 = arith.constant 0 : index
    %233 = vector.load %arg5[%c1_204, %c0_205, %c0_206] : memref<2x144x72xf32, #tpu.memory_space<vmem>>, vector<1x144x72xf32>
    %234 = vector.shape_cast %233 : vector<1x144x72xf32> to vector<144x72xf32>
    %cst_207 = arith.constant dense<0.000000e+00> : vector<12x72xf32>
    %235 = tpu.matmul %229, %234, %cst_207 {dimension_numbers = #tpu.dot_dimension_numbers<[1], [0], [0], [1], [0, 0, 1, 1], [], []>} : vector<12x144xf32>, vector<144x72xf32>, vector<12x72xf32> -> vector<12x72xf32>
    %236 = arith.maximumf %232, %235 : vector<12x72xf32>
    %237 = vector.extract_strided_slice %236 {offsets = [0, 0], sizes = [8, 72], strides = [1, 1]} : vector<12x72xf32> to vector<8x72xf32>
    %c0_208 = arith.constant 0 : index
    %c0_209 = arith.constant 0 : index
    %c0_210 = arith.constant 0 : index
    %238 = vector.load %arg6[%c0_208, %c0_209, %c0_210] : memref<5x72x128xf32, #tpu.memory_space<vmem>>, vector<1x72x128xf32>
    %239 = vector.shape_cast %238 : vector<1x72x128xf32> to vector<72x128xf32>
    %cst_211 = arith.constant dense<0.000000e+00> : vector<8x128xf32>
    %240 = tpu.matmul %237, %239, %cst_211 {dimension_numbers = #tpu.dot_dimension_numbers<[1], [0], [0], [1], [0, 0, 1, 1], [], []>} : vector<8x72xf32>, vector<72x128xf32>, vector<8x128xf32> -> vector<8x128xf32>
    %241 = vector.extract_strided_slice %236 {offsets = [1, 0], sizes = [8, 72], strides = [1, 1]} : vector<12x72xf32> to vector<8x72xf32>
    %c1_212 = arith.constant 1 : index
    %c0_213 = arith.constant 0 : index
    %c0_214 = arith.constant 0 : index
    %242 = vector.load %arg6[%c1_212, %c0_213, %c0_214] : memref<5x72x128xf32, #tpu.memory_space<vmem>>, vector<1x72x128xf32>
    %243 = vector.shape_cast %242 : vector<1x72x128xf32> to vector<72x128xf32>
    %cst_215 = arith.constant dense<0.000000e+00> : vector<8x128xf32>
    %244 = tpu.matmul %241, %243, %cst_215 {dimension_numbers = #tpu.dot_dimension_numbers<[1], [0], [0], [1], [0, 0, 1, 1], [], []>} : vector<8x72xf32>, vector<72x128xf32>, vector<8x128xf32> -> vector<8x128xf32>
    %245 = arith.addf %240, %244 : vector<8x128xf32>
    %246 = vector.extract_strided_slice %236 {offsets = [2, 0], sizes = [8, 72], strides = [1, 1]} : vector<12x72xf32> to vector<8x72xf32>
    %c2_216 = arith.constant 2 : index
    %c0_217 = arith.constant 0 : index
    %c0_218 = arith.constant 0 : index
    %247 = vector.load %arg6[%c2_216, %c0_217, %c0_218] : memref<5x72x128xf32, #tpu.memory_space<vmem>>, vector<1x72x128xf32>
    %248 = vector.shape_cast %247 : vector<1x72x128xf32> to vector<72x128xf32>
    %cst_219 = arith.constant dense<0.000000e+00> : vector<8x128xf32>
    %249 = tpu.matmul %246, %248, %cst_219 {dimension_numbers = #tpu.dot_dimension_numbers<[1], [0], [0], [1], [0, 0, 1, 1], [], []>} : vector<8x72xf32>, vector<72x128xf32>, vector<8x128xf32> -> vector<8x128xf32>
    %250 = arith.addf %245, %249 : vector<8x128xf32>
    %251 = vector.extract_strided_slice %236 {offsets = [3, 0], sizes = [8, 72], strides = [1, 1]} : vector<12x72xf32> to vector<8x72xf32>
    %c3_220 = arith.constant 3 : index
    %c0_221 = arith.constant 0 : index
    %c0_222 = arith.constant 0 : index
    %252 = vector.load %arg6[%c3_220, %c0_221, %c0_222] : memref<5x72x128xf32, #tpu.memory_space<vmem>>, vector<1x72x128xf32>
    %253 = vector.shape_cast %252 : vector<1x72x128xf32> to vector<72x128xf32>
    %cst_223 = arith.constant dense<0.000000e+00> : vector<8x128xf32>
    %254 = tpu.matmul %251, %253, %cst_223 {dimension_numbers = #tpu.dot_dimension_numbers<[1], [0], [0], [1], [0, 0, 1, 1], [], []>} : vector<8x72xf32>, vector<72x128xf32>, vector<8x128xf32> -> vector<8x128xf32>
    %255 = arith.addf %250, %254 : vector<8x128xf32>
    %256 = vector.extract_strided_slice %236 {offsets = [4, 0], sizes = [8, 72], strides = [1, 1]} : vector<12x72xf32> to vector<8x72xf32>
    %c4_224 = arith.constant 4 : index
    %c0_225 = arith.constant 0 : index
    %c0_226 = arith.constant 0 : index
    %257 = vector.load %arg6[%c4_224, %c0_225, %c0_226] : memref<5x72x128xf32, #tpu.memory_space<vmem>>, vector<1x72x128xf32>
    %258 = vector.shape_cast %257 : vector<1x72x128xf32> to vector<72x128xf32>
    %cst_227 = arith.constant dense<0.000000e+00> : vector<8x128xf32>
    %259 = tpu.matmul %256, %258, %cst_227 {dimension_numbers = #tpu.dot_dimension_numbers<[1], [0], [0], [1], [0, 0, 1, 1], [], []>} : vector<8x72xf32>, vector<72x128xf32>, vector<8x128xf32> -> vector<8x128xf32>
    %260 = arith.addf %255, %259 : vector<8x128xf32>
    %c0_228 = arith.constant 0 : index
    %c0_229 = arith.constant 0 : index
    %261 = vector.load %arg7[%c0_228, %c0_229] : memref<1x128xf32, #tpu.memory_space<vmem>>, vector<1x128xf32>
    %262 = vector.broadcast %261 : vector<1x128xf32> to vector<8x128xf32>
    %263 = arith.addf %260, %262 : vector<8x128xf32>
    %cst_230 = arith.constant 0.000000e+00 : f32
    %264 = vector.broadcast %cst_230 : f32 to vector<8x128xf32>
    %265 = arith.maximumf %263, %264 : vector<8x128xf32>
    %c0_231 = arith.constant 0 : index
    %c0_232 = arith.constant 0 : index
    %c0_233 = arith.constant 0 : index
    %266 = vector.load %arg8[%c0_231, %c0_232, %c0_233] : memref<2x4x8xf32, #tpu.memory_space<vmem>>, vector<1x4x8xf32>
    %267 = vector.shape_cast %266 : vector<1x4x8xf32> to vector<4x8xf32>
    %cst_234 = arith.constant dense<0.000000e+00> : vector<4x128xf32>
    %268 = tpu.matmul %267, %265, %cst_234 {dimension_numbers = #tpu.dot_dimension_numbers<[1], [0], [0], [1], [0, 0, 1, 1], [], []>} : vector<4x8xf32>, vector<8x128xf32>, vector<4x128xf32> -> vector<4x128xf32>
    %c1_235 = arith.constant 1 : index
    %c0_236 = arith.constant 0 : index
    %c0_237 = arith.constant 0 : index
    %269 = vector.load %arg8[%c1_235, %c0_236, %c0_237] : memref<2x4x8xf32, #tpu.memory_space<vmem>>, vector<1x4x8xf32>
    %270 = vector.shape_cast %269 : vector<1x4x8xf32> to vector<4x8xf32>
    %cst_238 = arith.constant dense<0.000000e+00> : vector<4x128xf32>
    %271 = tpu.matmul %270, %265, %cst_238 {dimension_numbers = #tpu.dot_dimension_numbers<[1], [0], [0], [1], [0, 0, 1, 1], [], []>} : vector<4x8xf32>, vector<8x128xf32>, vector<4x128xf32> -> vector<4x128xf32>
    %272 = arith.maximumf %268, %271 : vector<4x128xf32>
    %c0_239 = arith.constant 0 : index
    %c0_240 = arith.constant 0 : index
    %c0_241 = arith.constant 0 : index
    %273 = vector.load %arg9[%c0_239, %c0_240, %c0_241] : memref<2x128x64xf32, #tpu.memory_space<vmem>>, vector<1x128x64xf32>
    %274 = vector.shape_cast %273 : vector<1x128x64xf32> to vector<128x64xf32>
    %cst_242 = arith.constant dense<0.000000e+00> : vector<4x64xf32>
    %275 = tpu.matmul %272, %274, %cst_242 {dimension_numbers = #tpu.dot_dimension_numbers<[1], [0], [0], [1], [0, 0, 1, 1], [], []>} : vector<4x128xf32>, vector<128x64xf32>, vector<4x64xf32> -> vector<4x64xf32>
    %c1_243 = arith.constant 1 : index
    %c0_244 = arith.constant 0 : index
    %c0_245 = arith.constant 0 : index
    %276 = vector.load %arg9[%c1_243, %c0_244, %c0_245] : memref<2x128x64xf32, #tpu.memory_space<vmem>>, vector<1x128x64xf32>
    %277 = vector.shape_cast %276 : vector<1x128x64xf32> to vector<128x64xf32>
    %cst_246 = arith.constant dense<0.000000e+00> : vector<4x64xf32>
    %278 = tpu.matmul %272, %277, %cst_246 {dimension_numbers = #tpu.dot_dimension_numbers<[1], [0], [0], [1], [0, 0, 1, 1], [], []>} : vector<4x128xf32>, vector<128x64xf32>, vector<4x64xf32> -> vector<4x64xf32>
    %279 = arith.maximumf %275, %278 : vector<4x64xf32>
    %280 = vector.extract_strided_slice %279 {offsets = [0, 0], sizes = [1, 64], strides = [1, 1]} : vector<4x64xf32> to vector<1x64xf32>
    %c2_247 = arith.constant 2 : index
    %c0_248 = arith.constant 0 : index
    %281 = vector.load %arg17[%c2_247, %c0_248] : memref<32x64xf32, #tpu.memory_space<vmem>>, vector<1x64xf32>
    tpu.vector_store %arg17[%c2_247, %c0_248], %280 {strides = array<i32>} : memref<32x64xf32, #tpu.memory_space<vmem>>, vector<1x64xf32>,
    %282 = vector.extract_strided_slice %279 {offsets = [1, 0], sizes = [1, 64], strides = [1, 1]} : vector<4x64xf32> to vector<1x64xf32>
    %c10 = arith.constant 10 : index
    %c0_249 = arith.constant 0 : index
    %283 = vector.load %arg17[%c10, %c0_249] : memref<32x64xf32, #tpu.memory_space<vmem>>, vector<1x64xf32>
    tpu.vector_store %arg17[%c10, %c0_249], %282 {strides = array<i32>} : memref<32x64xf32, #tpu.memory_space<vmem>>, vector<1x64xf32>,
    %284 = vector.extract_strided_slice %279 {offsets = [2, 0], sizes = [1, 64], strides = [1, 1]} : vector<4x64xf32> to vector<1x64xf32>
    %c18 = arith.constant 18 : index
    %c0_250 = arith.constant 0 : index
    %285 = vector.load %arg17[%c18, %c0_250] : memref<32x64xf32, #tpu.memory_space<vmem>>, vector<1x64xf32>
    tpu.vector_store %arg17[%c18, %c0_250], %284 {strides = array<i32>} : memref<32x64xf32, #tpu.memory_space<vmem>>, vector<1x64xf32>,
    %286 = vector.extract_strided_slice %279 {offsets = [3, 0], sizes = [1, 64], strides = [1, 1]} : vector<4x64xf32> to vector<1x64xf32>
    %c26 = arith.constant 26 : index
    %c0_251 = arith.constant 0 : index
    %287 = vector.load %arg17[%c26, %c0_251] : memref<32x64xf32, #tpu.memory_space<vmem>>, vector<1x64xf32>
    tpu.vector_store %arg17[%c26, %c0_251], %286 {strides = array<i32>} : memref<32x64xf32, #tpu.memory_space<vmem>>, vector<1x64xf32>,
    %c3_252 = arith.constant 3 : index
    %c0_253 = arith.constant 0 : index
    %c0_254 = arith.constant 0 : index
    %288 = vector.load %arg1[%c3_252, %c0_253, %c0_254] : memref<8x28x28xf32, #tpu.memory_space<vmem>>, vector<1x28x28xf32>
    %289 = vector.shape_cast %288 : vector<1x28x28xf32> to vector<28x28xf32>
    %290 = vector.extract_strided_slice %289 {offsets = [0, 0], sizes = [24, 28], strides = [1, 1]} : vector<28x28xf32> to vector<24x28xf32>
    %c0_255 = arith.constant 0 : index
    %c0_256 = arith.constant 0 : index
    %c0_257 = arith.constant 0 : index
    %291 = vector.load %arg2[%c0_255, %c0_256, %c0_257] : memref<5x28x144xf32, #tpu.memory_space<vmem>>, vector<1x28x144xf32>
    %292 = vector.shape_cast %291 : vector<1x28x144xf32> to vector<28x144xf32>
    %cst_258 = arith.constant dense<0.000000e+00> : vector<24x144xf32>
    %293 = tpu.matmul %290, %292, %cst_258 {dimension_numbers = #tpu.dot_dimension_numbers<[1], [0], [0], [1], [0, 0, 1, 1], [], []>} : vector<24x28xf32>, vector<28x144xf32>, vector<24x144xf32> -> vector<24x144xf32>
    %294 = vector.extract_strided_slice %289 {offsets = [1, 0], sizes = [24, 28], strides = [1, 1]} : vector<28x28xf32> to vector<24x28xf32>
    %c1_259 = arith.constant 1 : index
    %c0_260 = arith.constant 0 : index
    %c0_261 = arith.constant 0 : index
    %295 = vector.load %arg2[%c1_259, %c0_260, %c0_261] : memref<5x28x144xf32, #tpu.memory_space<vmem>>, vector<1x28x144xf32>
    %296 = vector.shape_cast %295 : vector<1x28x144xf32> to vector<28x144xf32>
    %cst_262 = arith.constant dense<0.000000e+00> : vector<24x144xf32>
    %297 = tpu.matmul %294, %296, %cst_262 {dimension_numbers = #tpu.dot_dimension_numbers<[1], [0], [0], [1], [0, 0, 1, 1], [], []>} : vector<24x28xf32>, vector<28x144xf32>, vector<24x144xf32> -> vector<24x144xf32>
    %298 = arith.addf %293, %297 : vector<24x144xf32>
    %299 = vector.extract_strided_slice %289 {offsets = [2, 0], sizes = [24, 28], strides = [1, 1]} : vector<28x28xf32> to vector<24x28xf32>
    %c2_263 = arith.constant 2 : index
    %c0_264 = arith.constant 0 : index
    %c0_265 = arith.constant 0 : index
    %300 = vector.load %arg2[%c2_263, %c0_264, %c0_265] : memref<5x28x144xf32, #tpu.memory_space<vmem>>, vector<1x28x144xf32>
    %301 = vector.shape_cast %300 : vector<1x28x144xf32> to vector<28x144xf32>
    %cst_266 = arith.constant dense<0.000000e+00> : vector<24x144xf32>
    %302 = tpu.matmul %299, %301, %cst_266 {dimension_numbers = #tpu.dot_dimension_numbers<[1], [0], [0], [1], [0, 0, 1, 1], [], []>} : vector<24x28xf32>, vector<28x144xf32>, vector<24x144xf32> -> vector<24x144xf32>
    %303 = arith.addf %298, %302 : vector<24x144xf32>
    %304 = vector.extract_strided_slice %289 {offsets = [3, 0], sizes = [24, 28], strides = [1, 1]} : vector<28x28xf32> to vector<24x28xf32>
    %c3_267 = arith.constant 3 : index
    %c0_268 = arith.constant 0 : index
    %c0_269 = arith.constant 0 : index
    %305 = vector.load %arg2[%c3_267, %c0_268, %c0_269] : memref<5x28x144xf32, #tpu.memory_space<vmem>>, vector<1x28x144xf32>
    %306 = vector.shape_cast %305 : vector<1x28x144xf32> to vector<28x144xf32>
    %cst_270 = arith.constant dense<0.000000e+00> : vector<24x144xf32>
    %307 = tpu.matmul %304, %306, %cst_270 {dimension_numbers = #tpu.dot_dimension_numbers<[1], [0], [0], [1], [0, 0, 1, 1], [], []>} : vector<24x28xf32>, vector<28x144xf32>, vector<24x144xf32> -> vector<24x144xf32>
    %308 = arith.addf %303, %307 : vector<24x144xf32>
    %309 = vector.extract_strided_slice %289 {offsets = [4, 0], sizes = [24, 28], strides = [1, 1]} : vector<28x28xf32> to vector<24x28xf32>
    %c4_271 = arith.constant 4 : index
    %c0_272 = arith.constant 0 : index
    %c0_273 = arith.constant 0 : index
    %310 = vector.load %arg2[%c4_271, %c0_272, %c0_273] : memref<5x28x144xf32, #tpu.memory_space<vmem>>, vector<1x28x144xf32>
    %311 = vector.shape_cast %310 : vector<1x28x144xf32> to vector<28x144xf32>
    %cst_274 = arith.constant dense<0.000000e+00> : vector<24x144xf32>
    %312 = tpu.matmul %309, %311, %cst_274 {dimension_numbers = #tpu.dot_dimension_numbers<[1], [0], [0], [1], [0, 0, 1, 1], [], []>} : vector<24x28xf32>, vector<28x144xf32>, vector<24x144xf32> -> vector<24x144xf32>
    %313 = arith.addf %308, %312 : vector<24x144xf32>
    %c0_275 = arith.constant 0 : index
    %c0_276 = arith.constant 0 : index
    %314 = vector.load %arg3[%c0_275, %c0_276] : memref<1x144xf32, #tpu.memory_space<vmem>>, vector<1x144xf32>
    %315 = vector.broadcast %314 : vector<1x144xf32> to vector<24x144xf32>
    %316 = arith.addf %313, %315 : vector<24x144xf32>
    %cst_277 = arith.constant 0.000000e+00 : f32
    %317 = vector.broadcast %cst_277 : f32 to vector<24x144xf32>
    %318 = arith.maximumf %316, %317 : vector<24x144xf32>
    %c0_278 = arith.constant 0 : index
    %c0_279 = arith.constant 0 : index
    %c0_280 = arith.constant 0 : index
    %319 = vector.load %arg4[%c0_278, %c0_279, %c0_280] : memref<2x12x24xf32, #tpu.memory_space<vmem>>, vector<1x12x24xf32>
    %320 = vector.shape_cast %319 : vector<1x12x24xf32> to vector<12x24xf32>
    %cst_281 = arith.constant dense<0.000000e+00> : vector<12x144xf32>
    %321 = tpu.matmul %320, %318, %cst_281 {dimension_numbers = #tpu.dot_dimension_numbers<[1], [0], [0], [1], [0, 0, 1, 1], [], []>} : vector<12x24xf32>, vector<24x144xf32>, vector<12x144xf32> -> vector<12x144xf32>
    %c1_282 = arith.constant 1 : index
    %c0_283 = arith.constant 0 : index
    %c0_284 = arith.constant 0 : index
    %322 = vector.load %arg4[%c1_282, %c0_283, %c0_284] : memref<2x12x24xf32, #tpu.memory_space<vmem>>, vector<1x12x24xf32>
    %323 = vector.shape_cast %322 : vector<1x12x24xf32> to vector<12x24xf32>
    %cst_285 = arith.constant dense<0.000000e+00> : vector<12x144xf32>
    %324 = tpu.matmul %323, %318, %cst_285 {dimension_numbers = #tpu.dot_dimension_numbers<[1], [0], [0], [1], [0, 0, 1, 1], [], []>} : vector<12x24xf32>, vector<24x144xf32>, vector<12x144xf32> -> vector<12x144xf32>
    %325 = arith.maximumf %321, %324 : vector<12x144xf32>
    %c0_286 = arith.constant 0 : index
    %c0_287 = arith.constant 0 : index
    %c0_288 = arith.constant 0 : index
    %326 = vector.load %arg5[%c0_286, %c0_287, %c0_288] : memref<2x144x72xf32, #tpu.memory_space<vmem>>, vector<1x144x72xf32>
    %327 = vector.shape_cast %326 : vector<1x144x72xf32> to vector<144x72xf32>
    %cst_289 = arith.constant dense<0.000000e+00> : vector<12x72xf32>
    %328 = tpu.matmul %325, %327, %cst_289 {dimension_numbers = #tpu.dot_dimension_numbers<[1], [0], [0], [1], [0, 0, 1, 1], [], []>} : vector<12x144xf32>, vector<144x72xf32>, vector<12x72xf32> -> vector<12x72xf32>
    %c1_290 = arith.constant 1 : index
    %c0_291 = arith.constant 0 : index
    %c0_292 = arith.constant 0 : index
    %329 = vector.load %arg5[%c1_290, %c0_291, %c0_292] : memref<2x144x72xf32, #tpu.memory_space<vmem>>, vector<1x144x72xf32>
    %330 = vector.shape_cast %329 : vector<1x144x72xf32> to vector<144x72xf32>
    %cst_293 = arith.constant dense<0.000000e+00> : vector<12x72xf32>
    %331 = tpu.matmul %325, %330, %cst_293 {dimension_numbers = #tpu.dot_dimension_numbers<[1], [0], [0], [1], [0, 0, 1, 1], [], []>} : vector<12x144xf32>, vector<144x72xf32>, vector<12x72xf32> -> vector<12x72xf32>
    %332 = arith.maximumf %328, %331 : vector<12x72xf32>
    %333 = vector.extract_strided_slice %332 {offsets = [0, 0], sizes = [8, 72], strides = [1, 1]} : vector<12x72xf32> to vector<8x72xf32>
    %c0_294 = arith.constant 0 : index
    %c0_295 = arith.constant 0 : index
    %c0_296 = arith.constant 0 : index
    %334 = vector.load %arg6[%c0_294, %c0_295, %c0_296] : memref<5x72x128xf32, #tpu.memory_space<vmem>>, vector<1x72x128xf32>
    %335 = vector.shape_cast %334 : vector<1x72x128xf32> to vector<72x128xf32>
    %cst_297 = arith.constant dense<0.000000e+00> : vector<8x128xf32>
    %336 = tpu.matmul %333, %335, %cst_297 {dimension_numbers = #tpu.dot_dimension_numbers<[1], [0], [0], [1], [0, 0, 1, 1], [], []>} : vector<8x72xf32>, vector<72x128xf32>, vector<8x128xf32> -> vector<8x128xf32>
    %337 = vector.extract_strided_slice %332 {offsets = [1, 0], sizes = [8, 72], strides = [1, 1]} : vector<12x72xf32> to vector<8x72xf32>
    %c1_298 = arith.constant 1 : index
    %c0_299 = arith.constant 0 : index
    %c0_300 = arith.constant 0 : index
    %338 = vector.load %arg6[%c1_298, %c0_299, %c0_300] : memref<5x72x128xf32, #tpu.memory_space<vmem>>, vector<1x72x128xf32>
    %339 = vector.shape_cast %338 : vector<1x72x128xf32> to vector<72x128xf32>
    %cst_301 = arith.constant dense<0.000000e+00> : vector<8x128xf32>
    %340 = tpu.matmul %337, %339, %cst_301 {dimension_numbers = #tpu.dot_dimension_numbers<[1], [0], [0], [1], [0, 0, 1, 1], [], []>} : vector<8x72xf32>, vector<72x128xf32>, vector<8x128xf32> -> vector<8x128xf32>
    %341 = arith.addf %336, %340 : vector<8x128xf32>
    %342 = vector.extract_strided_slice %332 {offsets = [2, 0], sizes = [8, 72], strides = [1, 1]} : vector<12x72xf32> to vector<8x72xf32>
    %c2_302 = arith.constant 2 : index
    %c0_303 = arith.constant 0 : index
    %c0_304 = arith.constant 0 : index
    %343 = vector.load %arg6[%c2_302, %c0_303, %c0_304] : memref<5x72x128xf32, #tpu.memory_space<vmem>>, vector<1x72x128xf32>
    %344 = vector.shape_cast %343 : vector<1x72x128xf32> to vector<72x128xf32>
    %cst_305 = arith.constant dense<0.000000e+00> : vector<8x128xf32>
    %345 = tpu.matmul %342, %344, %cst_305 {dimension_numbers = #tpu.dot_dimension_numbers<[1], [0], [0], [1], [0, 0, 1, 1], [], []>} : vector<8x72xf32>, vector<72x128xf32>, vector<8x128xf32> -> vector<8x128xf32>
    %346 = arith.addf %341, %345 : vector<8x128xf32>
    %347 = vector.extract_strided_slice %332 {offsets = [3, 0], sizes = [8, 72], strides = [1, 1]} : vector<12x72xf32> to vector<8x72xf32>
    %c3_306 = arith.constant 3 : index
    %c0_307 = arith.constant 0 : index
    %c0_308 = arith.constant 0 : index
    %348 = vector.load %arg6[%c3_306, %c0_307, %c0_308] : memref<5x72x128xf32, #tpu.memory_space<vmem>>, vector<1x72x128xf32>
    %349 = vector.shape_cast %348 : vector<1x72x128xf32> to vector<72x128xf32>
    %cst_309 = arith.constant dense<0.000000e+00> : vector<8x128xf32>
    %350 = tpu.matmul %347, %349, %cst_309 {dimension_numbers = #tpu.dot_dimension_numbers<[1], [0], [0], [1], [0, 0, 1, 1], [], []>} : vector<8x72xf32>, vector<72x128xf32>, vector<8x128xf32> -> vector<8x128xf32>
    %351 = arith.addf %346, %350 : vector<8x128xf32>
    %352 = vector.extract_strided_slice %332 {offsets = [4, 0], sizes = [8, 72], strides = [1, 1]} : vector<12x72xf32> to vector<8x72xf32>
    %c4_310 = arith.constant 4 : index
    %c0_311 = arith.constant 0 : index
    %c0_312 = arith.constant 0 : index
    %353 = vector.load %arg6[%c4_310, %c0_311, %c0_312] : memref<5x72x128xf32, #tpu.memory_space<vmem>>, vector<1x72x128xf32>
    %354 = vector.shape_cast %353 : vector<1x72x128xf32> to vector<72x128xf32>
    %cst_313 = arith.constant dense<0.000000e+00> : vector<8x128xf32>
    %355 = tpu.matmul %352, %354, %cst_313 {dimension_numbers = #tpu.dot_dimension_numbers<[1], [0], [0], [1], [0, 0, 1, 1], [], []>} : vector<8x72xf32>, vector<72x128xf32>, vector<8x128xf32> -> vector<8x128xf32>
    %356 = arith.addf %351, %355 : vector<8x128xf32>
    %c0_314 = arith.constant 0 : index
    %c0_315 = arith.constant 0 : index
    %357 = vector.load %arg7[%c0_314, %c0_315] : memref<1x128xf32, #tpu.memory_space<vmem>>, vector<1x128xf32>
    %358 = vector.broadcast %357 : vector<1x128xf32> to vector<8x128xf32>
    %359 = arith.addf %356, %358 : vector<8x128xf32>
    %cst_316 = arith.constant 0.000000e+00 : f32
    %360 = vector.broadcast %cst_316 : f32 to vector<8x128xf32>
    %361 = arith.maximumf %359, %360 : vector<8x128xf32>
    %c0_317 = arith.constant 0 : index
    %c0_318 = arith.constant 0 : index
    %c0_319 = arith.constant 0 : index
    %362 = vector.load %arg8[%c0_317, %c0_318, %c0_319] : memref<2x4x8xf32, #tpu.memory_space<vmem>>, vector<1x4x8xf32>
    %363 = vector.shape_cast %362 : vector<1x4x8xf32> to vector<4x8xf32>
    %cst_320 = arith.constant dense<0.000000e+00> : vector<4x128xf32>
    %364 = tpu.matmul %363, %361, %cst_320 {dimension_numbers = #tpu.dot_dimension_numbers<[1], [0], [0], [1], [0, 0, 1, 1], [], []>} : vector<4x8xf32>, vector<8x128xf32>, vector<4x128xf32> -> vector<4x128xf32>
    %c1_321 = arith.constant 1 : index
    %c0_322 = arith.constant 0 : index
    %c0_323 = arith.constant 0 : index
    %365 = vector.load %arg8[%c1_321, %c0_322, %c0_323] : memref<2x4x8xf32, #tpu.memory_space<vmem>>, vector<1x4x8xf32>
    %366 = vector.shape_cast %365 : vector<1x4x8xf32> to vector<4x8xf32>
    %cst_324 = arith.constant dense<0.000000e+00> : vector<4x128xf32>
    %367 = tpu.matmul %366, %361, %cst_324 {dimension_numbers = #tpu.dot_dimension_numbers<[1], [0], [0], [1], [0, 0, 1, 1], [], []>} : vector<4x8xf32>, vector<8x128xf32>, vector<4x128xf32> -> vector<4x128xf32>
    %368 = arith.maximumf %364, %367 : vector<4x128xf32>
    %c0_325 = arith.constant 0 : index
    %c0_326 = arith.constant 0 : index
    %c0_327 = arith.constant 0 : index
    %369 = vector.load %arg9[%c0_325, %c0_326, %c0_327] : memref<2x128x64xf32, #tpu.memory_space<vmem>>, vector<1x128x64xf32>
    %370 = vector.shape_cast %369 : vector<1x128x64xf32> to vector<128x64xf32>
    %cst_328 = arith.constant dense<0.000000e+00> : vector<4x64xf32>
    %371 = tpu.matmul %368, %370, %cst_328 {dimension_numbers = #tpu.dot_dimension_numbers<[1], [0], [0], [1], [0, 0, 1, 1], [], []>} : vector<4x128xf32>, vector<128x64xf32>, vector<4x64xf32> -> vector<4x64xf32>
    %c1_329 = arith.constant 1 : index
    %c0_330 = arith.constant 0 : index
    %c0_331 = arith.constant 0 : index
    %372 = vector.load %arg9[%c1_329, %c0_330, %c0_331] : memref<2x128x64xf32, #tpu.memory_space<vmem>>, vector<1x128x64xf32>
    %373 = vector.shape_cast %372 : vector<1x128x64xf32> to vector<128x64xf32>
    %cst_332 = arith.constant dense<0.000000e+00> : vector<4x64xf32>
    %374 = tpu.matmul %368, %373, %cst_332 {dimension_numbers = #tpu.dot_dimension_numbers<[1], [0], [0], [1], [0, 0, 1, 1], [], []>} : vector<4x128xf32>, vector<128x64xf32>, vector<4x64xf32> -> vector<4x64xf32>
    %375 = arith.maximumf %371, %374 : vector<4x64xf32>
    %376 = vector.extract_strided_slice %375 {offsets = [0, 0], sizes = [1, 64], strides = [1, 1]} : vector<4x64xf32> to vector<1x64xf32>
    %c3_333 = arith.constant 3 : index
    %c0_334 = arith.constant 0 : index
    %377 = vector.load %arg17[%c3_333, %c0_334] : memref<32x64xf32, #tpu.memory_space<vmem>>, vector<1x64xf32>
    tpu.vector_store %arg17[%c3_333, %c0_334], %376 {strides = array<i32>} : memref<32x64xf32, #tpu.memory_space<vmem>>, vector<1x64xf32>,
    %378 = vector.extract_strided_slice %375 {offsets = [1, 0], sizes = [1, 64], strides = [1, 1]} : vector<4x64xf32> to vector<1x64xf32>
    %c11 = arith.constant 11 : index
    %c0_335 = arith.constant 0 : index
    %379 = vector.load %arg17[%c11, %c0_335] : memref<32x64xf32, #tpu.memory_space<vmem>>, vector<1x64xf32>
    tpu.vector_store %arg17[%c11, %c0_335], %378 {strides = array<i32>} : memref<32x64xf32, #tpu.memory_space<vmem>>, vector<1x64xf32>,
    %380 = vector.extract_strided_slice %375 {offsets = [2, 0], sizes = [1, 64], strides = [1, 1]} : vector<4x64xf32> to vector<1x64xf32>
    %c19 = arith.constant 19 : index
    %c0_336 = arith.constant 0 : index
    %381 = vector.load %arg17[%c19, %c0_336] : memref<32x64xf32, #tpu.memory_space<vmem>>, vector<1x64xf32>
    tpu.vector_store %arg17[%c19, %c0_336], %380 {strides = array<i32>} : memref<32x64xf32, #tpu.memory_space<vmem>>, vector<1x64xf32>,
    %382 = vector.extract_strided_slice %375 {offsets = [3, 0], sizes = [1, 64], strides = [1, 1]} : vector<4x64xf32> to vector<1x64xf32>
    %c27 = arith.constant 27 : index
    %c0_337 = arith.constant 0 : index
    %383 = vector.load %arg17[%c27, %c0_337] : memref<32x64xf32, #tpu.memory_space<vmem>>, vector<1x64xf32>
    tpu.vector_store %arg17[%c27, %c0_337], %382 {strides = array<i32>} : memref<32x64xf32, #tpu.memory_space<vmem>>, vector<1x64xf32>,
    %c4_338 = arith.constant 4 : index
    %c0_339 = arith.constant 0 : index
    %c0_340 = arith.constant 0 : index
    %384 = vector.load %arg1[%c4_338, %c0_339, %c0_340] : memref<8x28x28xf32, #tpu.memory_space<vmem>>, vector<1x28x28xf32>
    %385 = vector.shape_cast %384 : vector<1x28x28xf32> to vector<28x28xf32>
    %386 = vector.extract_strided_slice %385 {offsets = [0, 0], sizes = [24, 28], strides = [1, 1]} : vector<28x28xf32> to vector<24x28xf32>
    %c0_341 = arith.constant 0 : index
    %c0_342 = arith.constant 0 : index
    %c0_343 = arith.constant 0 : index
    %387 = vector.load %arg2[%c0_341, %c0_342, %c0_343] : memref<5x28x144xf32, #tpu.memory_space<vmem>>, vector<1x28x144xf32>
    %388 = vector.shape_cast %387 : vector<1x28x144xf32> to vector<28x144xf32>
    %cst_344 = arith.constant dense<0.000000e+00> : vector<24x144xf32>
    %389 = tpu.matmul %386, %388, %cst_344 {dimension_numbers = #tpu.dot_dimension_numbers<[1], [0], [0], [1], [0, 0, 1, 1], [], []>} : vector<24x28xf32>, vector<28x144xf32>, vector<24x144xf32> -> vector<24x144xf32>
    %390 = vector.extract_strided_slice %385 {offsets = [1, 0], sizes = [24, 28], strides = [1, 1]} : vector<28x28xf32> to vector<24x28xf32>
    %c1_345 = arith.constant 1 : index
    %c0_346 = arith.constant 0 : index
    %c0_347 = arith.constant 0 : index
    %391 = vector.load %arg2[%c1_345, %c0_346, %c0_347] : memref<5x28x144xf32, #tpu.memory_space<vmem>>, vector<1x28x144xf32>
    %392 = vector.shape_cast %391 : vector<1x28x144xf32> to vector<28x144xf32>
    %cst_348 = arith.constant dense<0.000000e+00> : vector<24x144xf32>
    %393 = tpu.matmul %390, %392, %cst_348 {dimension_numbers = #tpu.dot_dimension_numbers<[1], [0], [0], [1], [0, 0, 1, 1], [], []>} : vector<24x28xf32>, vector<28x144xf32>, vector<24x144xf32> -> vector<24x144xf32>
    %394 = arith.addf %389, %393 : vector<24x144xf32>
    %395 = vector.extract_strided_slice %385 {offsets = [2, 0], sizes = [24, 28], strides = [1, 1]} : vector<28x28xf32> to vector<24x28xf32>
    %c2_349 = arith.constant 2 : index
    %c0_350 = arith.constant 0 : index
    %c0_351 = arith.constant 0 : index
    %396 = vector.load %arg2[%c2_349, %c0_350, %c0_351] : memref<5x28x144xf32, #tpu.memory_space<vmem>>, vector<1x28x144xf32>
    %397 = vector.shape_cast %396 : vector<1x28x144xf32> to vector<28x144xf32>
    %cst_352 = arith.constant dense<0.000000e+00> : vector<24x144xf32>
    %398 = tpu.matmul %395, %397, %cst_352 {dimension_numbers = #tpu.dot_dimension_numbers<[1], [0], [0], [1], [0, 0, 1, 1], [], []>} : vector<24x28xf32>, vector<28x144xf32>, vector<24x144xf32> -> vector<24x144xf32>
    %399 = arith.addf %394, %398 : vector<24x144xf32>
    %400 = vector.extract_strided_slice %385 {offsets = [3, 0], sizes = [24, 28], strides = [1, 1]} : vector<28x28xf32> to vector<24x28xf32>
    %c3_353 = arith.constant 3 : index
    %c0_354 = arith.constant 0 : index
    %c0_355 = arith.constant 0 : index
    %401 = vector.load %arg2[%c3_353, %c0_354, %c0_355] : memref<5x28x144xf32, #tpu.memory_space<vmem>>, vector<1x28x144xf32>
    %402 = vector.shape_cast %401 : vector<1x28x144xf32> to vector<28x144xf32>
    %cst_356 = arith.constant dense<0.000000e+00> : vector<24x144xf32>
    %403 = tpu.matmul %400, %402, %cst_356 {dimension_numbers = #tpu.dot_dimension_numbers<[1], [0], [0], [1], [0, 0, 1, 1], [], []>} : vector<24x28xf32>, vector<28x144xf32>, vector<24x144xf32> -> vector<24x144xf32>
    %404 = arith.addf %399, %403 : vector<24x144xf32>
    %405 = vector.extract_strided_slice %385 {offsets = [4, 0], sizes = [24, 28], strides = [1, 1]} : vector<28x28xf32> to vector<24x28xf32>
    %c4_357 = arith.constant 4 : index
    %c0_358 = arith.constant 0 : index
    %c0_359 = arith.constant 0 : index
    %406 = vector.load %arg2[%c4_357, %c0_358, %c0_359] : memref<5x28x144xf32, #tpu.memory_space<vmem>>, vector<1x28x144xf32>
    %407 = vector.shape_cast %406 : vector<1x28x144xf32> to vector<28x144xf32>
    %cst_360 = arith.constant dense<0.000000e+00> : vector<24x144xf32>
    %408 = tpu.matmul %405, %407, %cst_360 {dimension_numbers = #tpu.dot_dimension_numbers<[1], [0], [0], [1], [0, 0, 1, 1], [], []>} : vector<24x28xf32>, vector<28x144xf32>, vector<24x144xf32> -> vector<24x144xf32>
    %409 = arith.addf %404, %408 : vector<24x144xf32>
    %c0_361 = arith.constant 0 : index
    %c0_362 = arith.constant 0 : index
    %410 = vector.load %arg3[%c0_361, %c0_362] : memref<1x144xf32, #tpu.memory_space<vmem>>, vector<1x144xf32>
    %411 = vector.broadcast %410 : vector<1x144xf32> to vector<24x144xf32>
    %412 = arith.addf %409, %411 : vector<24x144xf32>
    %cst_363 = arith.constant 0.000000e+00 : f32
    %413 = vector.broadcast %cst_363 : f32 to vector<24x144xf32>
    %414 = arith.maximumf %412, %413 : vector<24x144xf32>
    %c0_364 = arith.constant 0 : index
    %c0_365 = arith.constant 0 : index
    %c0_366 = arith.constant 0 : index
    %415 = vector.load %arg4[%c0_364, %c0_365, %c0_366] : memref<2x12x24xf32, #tpu.memory_space<vmem>>, vector<1x12x24xf32>
    %416 = vector.shape_cast %415 : vector<1x12x24xf32> to vector<12x24xf32>
    %cst_367 = arith.constant dense<0.000000e+00> : vector<12x144xf32>
    %417 = tpu.matmul %416, %414, %cst_367 {dimension_numbers = #tpu.dot_dimension_numbers<[1], [0], [0], [1], [0, 0, 1, 1], [], []>} : vector<12x24xf32>, vector<24x144xf32>, vector<12x144xf32> -> vector<12x144xf32>
    %c1_368 = arith.constant 1 : index
    %c0_369 = arith.constant 0 : index
    %c0_370 = arith.constant 0 : index
    %418 = vector.load %arg4[%c1_368, %c0_369, %c0_370] : memref<2x12x24xf32, #tpu.memory_space<vmem>>, vector<1x12x24xf32>
    %419 = vector.shape_cast %418 : vector<1x12x24xf32> to vector<12x24xf32>
    %cst_371 = arith.constant dense<0.000000e+00> : vector<12x144xf32>
    %420 = tpu.matmul %419, %414, %cst_371 {dimension_numbers = #tpu.dot_dimension_numbers<[1], [0], [0], [1], [0, 0, 1, 1], [], []>} : vector<12x24xf32>, vector<24x144xf32>, vector<12x144xf32> -> vector<12x144xf32>
    %421 = arith.maximumf %417, %420 : vector<12x144xf32>
    %c0_372 = arith.constant 0 : index
    %c0_373 = arith.constant 0 : index
    %c0_374 = arith.constant 0 : index
    %422 = vector.load %arg5[%c0_372, %c0_373, %c0_374] : memref<2x144x72xf32, #tpu.memory_space<vmem>>, vector<1x144x72xf32>
    %423 = vector.shape_cast %422 : vector<1x144x72xf32> to vector<144x72xf32>
    %cst_375 = arith.constant dense<0.000000e+00> : vector<12x72xf32>
    %424 = tpu.matmul %421, %423, %cst_375 {dimension_numbers = #tpu.dot_dimension_numbers<[1], [0], [0], [1], [0, 0, 1, 1], [], []>} : vector<12x144xf32>, vector<144x72xf32>, vector<12x72xf32> -> vector<12x72xf32>
    %c1_376 = arith.constant 1 : index
    %c0_377 = arith.constant 0 : index
    %c0_378 = arith.constant 0 : index
    %425 = vector.load %arg5[%c1_376, %c0_377, %c0_378] : memref<2x144x72xf32, #tpu.memory_space<vmem>>, vector<1x144x72xf32>
    %426 = vector.shape_cast %425 : vector<1x144x72xf32> to vector<144x72xf32>
    %cst_379 = arith.constant dense<0.000000e+00> : vector<12x72xf32>
    %427 = tpu.matmul %421, %426, %cst_379 {dimension_numbers = #tpu.dot_dimension_numbers<[1], [0], [0], [1], [0, 0, 1, 1], [], []>} : vector<12x144xf32>, vector<144x72xf32>, vector<12x72xf32> -> vector<12x72xf32>
    %428 = arith.maximumf %424, %427 : vector<12x72xf32>
    %429 = vector.extract_strided_slice %428 {offsets = [0, 0], sizes = [8, 72], strides = [1, 1]} : vector<12x72xf32> to vector<8x72xf32>
    %c0_380 = arith.constant 0 : index
    %c0_381 = arith.constant 0 : index
    %c0_382 = arith.constant 0 : index
    %430 = vector.load %arg6[%c0_380, %c0_381, %c0_382] : memref<5x72x128xf32, #tpu.memory_space<vmem>>, vector<1x72x128xf32>
    %431 = vector.shape_cast %430 : vector<1x72x128xf32> to vector<72x128xf32>
    %cst_383 = arith.constant dense<0.000000e+00> : vector<8x128xf32>
    %432 = tpu.matmul %429, %431, %cst_383 {dimension_numbers = #tpu.dot_dimension_numbers<[1], [0], [0], [1], [0, 0, 1, 1], [], []>} : vector<8x72xf32>, vector<72x128xf32>, vector<8x128xf32> -> vector<8x128xf32>
    %433 = vector.extract_strided_slice %428 {offsets = [1, 0], sizes = [8, 72], strides = [1, 1]} : vector<12x72xf32> to vector<8x72xf32>
    %c1_384 = arith.constant 1 : index
    %c0_385 = arith.constant 0 : index
    %c0_386 = arith.constant 0 : index
    %434 = vector.load %arg6[%c1_384, %c0_385, %c0_386] : memref<5x72x128xf32, #tpu.memory_space<vmem>>, vector<1x72x128xf32>
    %435 = vector.shape_cast %434 : vector<1x72x128xf32> to vector<72x128xf32>
    %cst_387 = arith.constant dense<0.000000e+00> : vector<8x128xf32>
    %436 = tpu.matmul %433, %435, %cst_387 {dimension_numbers = #tpu.dot_dimension_numbers<[1], [0], [0], [1], [0, 0, 1, 1], [], []>} : vector<8x72xf32>, vector<72x128xf32>, vector<8x128xf32> -> vector<8x128xf32>
    %437 = arith.addf %432, %436 : vector<8x128xf32>
    %438 = vector.extract_strided_slice %428 {offsets = [2, 0], sizes = [8, 72], strides = [1, 1]} : vector<12x72xf32> to vector<8x72xf32>
    %c2_388 = arith.constant 2 : index
    %c0_389 = arith.constant 0 : index
    %c0_390 = arith.constant 0 : index
    %439 = vector.load %arg6[%c2_388, %c0_389, %c0_390] : memref<5x72x128xf32, #tpu.memory_space<vmem>>, vector<1x72x128xf32>
    %440 = vector.shape_cast %439 : vector<1x72x128xf32> to vector<72x128xf32>
    %cst_391 = arith.constant dense<0.000000e+00> : vector<8x128xf32>
    %441 = tpu.matmul %438, %440, %cst_391 {dimension_numbers = #tpu.dot_dimension_numbers<[1], [0], [0], [1], [0, 0, 1, 1], [], []>} : vector<8x72xf32>, vector<72x128xf32>, vector<8x128xf32> -> vector<8x128xf32>
    %442 = arith.addf %437, %441 : vector<8x128xf32>
    %443 = vector.extract_strided_slice %428 {offsets = [3, 0], sizes = [8, 72], strides = [1, 1]} : vector<12x72xf32> to vector<8x72xf32>
    %c3_392 = arith.constant 3 : index
    %c0_393 = arith.constant 0 : index
    %c0_394 = arith.constant 0 : index
    %444 = vector.load %arg6[%c3_392, %c0_393, %c0_394] : memref<5x72x128xf32, #tpu.memory_space<vmem>>, vector<1x72x128xf32>
    %445 = vector.shape_cast %444 : vector<1x72x128xf32> to vector<72x128xf32>
    %cst_395 = arith.constant dense<0.000000e+00> : vector<8x128xf32>
    %446 = tpu.matmul %443, %445, %cst_395 {dimension_numbers = #tpu.dot_dimension_numbers<[1], [0], [0], [1], [0, 0, 1, 1], [], []>} : vector<8x72xf32>, vector<72x128xf32>, vector<8x128xf32> -> vector<8x128xf32>
    %447 = arith.addf %442, %446 : vector<8x128xf32>
    %448 = vector.extract_strided_slice %428 {offsets = [4, 0], sizes = [8, 72], strides = [1, 1]} : vector<12x72xf32> to vector<8x72xf32>
    %c4_396 = arith.constant 4 : index
    %c0_397 = arith.constant 0 : index
    %c0_398 = arith.constant 0 : index
    %449 = vector.load %arg6[%c4_396, %c0_397, %c0_398] : memref<5x72x128xf32, #tpu.memory_space<vmem>>, vector<1x72x128xf32>
    %450 = vector.shape_cast %449 : vector<1x72x128xf32> to vector<72x128xf32>
    %cst_399 = arith.constant dense<0.000000e+00> : vector<8x128xf32>
    %451 = tpu.matmul %448, %450, %cst_399 {dimension_numbers = #tpu.dot_dimension_numbers<[1], [0], [0], [1], [0, 0, 1, 1], [], []>} : vector<8x72xf32>, vector<72x128xf32>, vector<8x128xf32> -> vector<8x128xf32>
    %452 = arith.addf %447, %451 : vector<8x128xf32>
    %c0_400 = arith.constant 0 : index
    %c0_401 = arith.constant 0 : index
    %453 = vector.load %arg7[%c0_400, %c0_401] : memref<1x128xf32, #tpu.memory_space<vmem>>, vector<1x128xf32>
    %454 = vector.broadcast %453 : vector<1x128xf32> to vector<8x128xf32>
    %455 = arith.addf %452, %454 : vector<8x128xf32>
    %cst_402 = arith.constant 0.000000e+00 : f32
    %456 = vector.broadcast %cst_402 : f32 to vector<8x128xf32>
    %457 = arith.maximumf %455, %456 : vector<8x128xf32>
    %c0_403 = arith.constant 0 : index
    %c0_404 = arith.constant 0 : index
    %c0_405 = arith.constant 0 : index
    %458 = vector.load %arg8[%c0_403, %c0_404, %c0_405] : memref<2x4x8xf32, #tpu.memory_space<vmem>>, vector<1x4x8xf32>
    %459 = vector.shape_cast %458 : vector<1x4x8xf32> to vector<4x8xf32>
    %cst_406 = arith.constant dense<0.000000e+00> : vector<4x128xf32>
    %460 = tpu.matmul %459, %457, %cst_406 {dimension_numbers = #tpu.dot_dimension_numbers<[1], [0], [0], [1], [0, 0, 1, 1], [], []>} : vector<4x8xf32>, vector<8x128xf32>, vector<4x128xf32> -> vector<4x128xf32>
    %c1_407 = arith.constant 1 : index
    %c0_408 = arith.constant 0 : index
    %c0_409 = arith.constant 0 : index
    %461 = vector.load %arg8[%c1_407, %c0_408, %c0_409] : memref<2x4x8xf32, #tpu.memory_space<vmem>>, vector<1x4x8xf32>
    %462 = vector.shape_cast %461 : vector<1x4x8xf32> to vector<4x8xf32>
    %cst_410 = arith.constant dense<0.000000e+00> : vector<4x128xf32>
    %463 = tpu.matmul %462, %457, %cst_410 {dimension_numbers = #tpu.dot_dimension_numbers<[1], [0], [0], [1], [0, 0, 1, 1], [], []>} : vector<4x8xf32>, vector<8x128xf32>, vector<4x128xf32> -> vector<4x128xf32>
    %464 = arith.maximumf %460, %463 : vector<4x128xf32>
    %c0_411 = arith.constant 0 : index
    %c0_412 = arith.constant 0 : index
    %c0_413 = arith.constant 0 : index
    %465 = vector.load %arg9[%c0_411, %c0_412, %c0_413] : memref<2x128x64xf32, #tpu.memory_space<vmem>>, vector<1x128x64xf32>
    %466 = vector.shape_cast %465 : vector<1x128x64xf32> to vector<128x64xf32>
    %cst_414 = arith.constant dense<0.000000e+00> : vector<4x64xf32>
    %467 = tpu.matmul %464, %466, %cst_414 {dimension_numbers = #tpu.dot_dimension_numbers<[1], [0], [0], [1], [0, 0, 1, 1], [], []>} : vector<4x128xf32>, vector<128x64xf32>, vector<4x64xf32> -> vector<4x64xf32>
    %c1_415 = arith.constant 1 : index
    %c0_416 = arith.constant 0 : index
    %c0_417 = arith.constant 0 : index
    %468 = vector.load %arg9[%c1_415, %c0_416, %c0_417] : memref<2x128x64xf32, #tpu.memory_space<vmem>>, vector<1x128x64xf32>
    %469 = vector.shape_cast %468 : vector<1x128x64xf32> to vector<128x64xf32>
    %cst_418 = arith.constant dense<0.000000e+00> : vector<4x64xf32>
    %470 = tpu.matmul %464, %469, %cst_418 {dimension_numbers = #tpu.dot_dimension_numbers<[1], [0], [0], [1], [0, 0, 1, 1], [], []>} : vector<4x128xf32>, vector<128x64xf32>, vector<4x64xf32> -> vector<4x64xf32>
    %471 = arith.maximumf %467, %470 : vector<4x64xf32>
    %472 = vector.extract_strided_slice %471 {offsets = [0, 0], sizes = [1, 64], strides = [1, 1]} : vector<4x64xf32> to vector<1x64xf32>
    %c4_419 = arith.constant 4 : index
    %c0_420 = arith.constant 0 : index
    %473 = vector.load %arg17[%c4_419, %c0_420] : memref<32x64xf32, #tpu.memory_space<vmem>>, vector<1x64xf32>
    tpu.vector_store %arg17[%c4_419, %c0_420], %472 {strides = array<i32>} : memref<32x64xf32, #tpu.memory_space<vmem>>, vector<1x64xf32>,
    %474 = vector.extract_strided_slice %471 {offsets = [1, 0], sizes = [1, 64], strides = [1, 1]} : vector<4x64xf32> to vector<1x64xf32>
    %c12 = arith.constant 12 : index
    %c0_421 = arith.constant 0 : index
    %475 = vector.load %arg17[%c12, %c0_421] : memref<32x64xf32, #tpu.memory_space<vmem>>, vector<1x64xf32>
    tpu.vector_store %arg17[%c12, %c0_421], %474 {strides = array<i32>} : memref<32x64xf32, #tpu.memory_space<vmem>>, vector<1x64xf32>,
    %476 = vector.extract_strided_slice %471 {offsets = [2, 0], sizes = [1, 64], strides = [1, 1]} : vector<4x64xf32> to vector<1x64xf32>
    %c20 = arith.constant 20 : index
    %c0_422 = arith.constant 0 : index
    %477 = vector.load %arg17[%c20, %c0_422] : memref<32x64xf32, #tpu.memory_space<vmem>>, vector<1x64xf32>
    tpu.vector_store %arg17[%c20, %c0_422], %476 {strides = array<i32>} : memref<32x64xf32, #tpu.memory_space<vmem>>, vector<1x64xf32>,
    %478 = vector.extract_strided_slice %471 {offsets = [3, 0], sizes = [1, 64], strides = [1, 1]} : vector<4x64xf32> to vector<1x64xf32>
    %c28 = arith.constant 28 : index
    %c0_423 = arith.constant 0 : index
    %479 = vector.load %arg17[%c28, %c0_423] : memref<32x64xf32, #tpu.memory_space<vmem>>, vector<1x64xf32>
    tpu.vector_store %arg17[%c28, %c0_423], %478 {strides = array<i32>} : memref<32x64xf32, #tpu.memory_space<vmem>>, vector<1x64xf32>,
    %c5 = arith.constant 5 : index
    %c0_424 = arith.constant 0 : index
    %c0_425 = arith.constant 0 : index
    %480 = vector.load %arg1[%c5, %c0_424, %c0_425] : memref<8x28x28xf32, #tpu.memory_space<vmem>>, vector<1x28x28xf32>
    %481 = vector.shape_cast %480 : vector<1x28x28xf32> to vector<28x28xf32>
    %482 = vector.extract_strided_slice %481 {offsets = [0, 0], sizes = [24, 28], strides = [1, 1]} : vector<28x28xf32> to vector<24x28xf32>
    %c0_426 = arith.constant 0 : index
    %c0_427 = arith.constant 0 : index
    %c0_428 = arith.constant 0 : index
    %483 = vector.load %arg2[%c0_426, %c0_427, %c0_428] : memref<5x28x144xf32, #tpu.memory_space<vmem>>, vector<1x28x144xf32>
    %484 = vector.shape_cast %483 : vector<1x28x144xf32> to vector<28x144xf32>
    %cst_429 = arith.constant dense<0.000000e+00> : vector<24x144xf32>
    %485 = tpu.matmul %482, %484, %cst_429 {dimension_numbers = #tpu.dot_dimension_numbers<[1], [0], [0], [1], [0, 0, 1, 1], [], []>} : vector<24x28xf32>, vector<28x144xf32>, vector<24x144xf32> -> vector<24x144xf32>
    %486 = vector.extract_strided_slice %481 {offsets = [1, 0], sizes = [24, 28], strides = [1, 1]} : vector<28x28xf32> to vector<24x28xf32>
    %c1_430 = arith.constant 1 : index
    %c0_431 = arith.constant 0 : index
    %c0_432 = arith.constant 0 : index
    %487 = vector.load %arg2[%c1_430, %c0_431, %c0_432] : memref<5x28x144xf32, #tpu.memory_space<vmem>>, vector<1x28x144xf32>
    %488 = vector.shape_cast %487 : vector<1x28x144xf32> to vector<28x144xf32>
    %cst_433 = arith.constant dense<0.000000e+00> : vector<24x144xf32>
    %489 = tpu.matmul %486, %488, %cst_433 {dimension_numbers = #tpu.dot_dimension_numbers<[1], [0], [0], [1], [0, 0, 1, 1], [], []>} : vector<24x28xf32>, vector<28x144xf32>, vector<24x144xf32> -> vector<24x144xf32>
    %490 = arith.addf %485, %489 : vector<24x144xf32>
    %491 = vector.extract_strided_slice %481 {offsets = [2, 0], sizes = [24, 28], strides = [1, 1]} : vector<28x28xf32> to vector<24x28xf32>
    %c2_434 = arith.constant 2 : index
    %c0_435 = arith.constant 0 : index
    %c0_436 = arith.constant 0 : index
    %492 = vector.load %arg2[%c2_434, %c0_435, %c0_436] : memref<5x28x144xf32, #tpu.memory_space<vmem>>, vector<1x28x144xf32>
    %493 = vector.shape_cast %492 : vector<1x28x144xf32> to vector<28x144xf32>
    %cst_437 = arith.constant dense<0.000000e+00> : vector<24x144xf32>
    %494 = tpu.matmul %491, %493, %cst_437 {dimension_numbers = #tpu.dot_dimension_numbers<[1], [0], [0], [1], [0, 0, 1, 1], [], []>} : vector<24x28xf32>, vector<28x144xf32>, vector<24x144xf32> -> vector<24x144xf32>
    %495 = arith.addf %490, %494 : vector<24x144xf32>
    %496 = vector.extract_strided_slice %481 {offsets = [3, 0], sizes = [24, 28], strides = [1, 1]} : vector<28x28xf32> to vector<24x28xf32>
    %c3_438 = arith.constant 3 : index
    %c0_439 = arith.constant 0 : index
    %c0_440 = arith.constant 0 : index
    %497 = vector.load %arg2[%c3_438, %c0_439, %c0_440] : memref<5x28x144xf32, #tpu.memory_space<vmem>>, vector<1x28x144xf32>
    %498 = vector.shape_cast %497 : vector<1x28x144xf32> to vector<28x144xf32>
    %cst_441 = arith.constant dense<0.000000e+00> : vector<24x144xf32>
    %499 = tpu.matmul %496, %498, %cst_441 {dimension_numbers = #tpu.dot_dimension_numbers<[1], [0], [0], [1], [0, 0, 1, 1], [], []>} : vector<24x28xf32>, vector<28x144xf32>, vector<24x144xf32> -> vector<24x144xf32>
    %500 = arith.addf %495, %499 : vector<24x144xf32>
    %501 = vector.extract_strided_slice %481 {offsets = [4, 0], sizes = [24, 28], strides = [1, 1]} : vector<28x28xf32> to vector<24x28xf32>
    %c4_442 = arith.constant 4 : index
    %c0_443 = arith.constant 0 : index
    %c0_444 = arith.constant 0 : index
    %502 = vector.load %arg2[%c4_442, %c0_443, %c0_444] : memref<5x28x144xf32, #tpu.memory_space<vmem>>, vector<1x28x144xf32>
    %503 = vector.shape_cast %502 : vector<1x28x144xf32> to vector<28x144xf32>
    %cst_445 = arith.constant dense<0.000000e+00> : vector<24x144xf32>
    %504 = tpu.matmul %501, %503, %cst_445 {dimension_numbers = #tpu.dot_dimension_numbers<[1], [0], [0], [1], [0, 0, 1, 1], [], []>} : vector<24x28xf32>, vector<28x144xf32>, vector<24x144xf32> -> vector<24x144xf32>
    %505 = arith.addf %500, %504 : vector<24x144xf32>
    %c0_446 = arith.constant 0 : index
    %c0_447 = arith.constant 0 : index
    %506 = vector.load %arg3[%c0_446, %c0_447] : memref<1x144xf32, #tpu.memory_space<vmem>>, vector<1x144xf32>
    %507 = vector.broadcast %506 : vector<1x144xf32> to vector<24x144xf32>
    %508 = arith.addf %505, %507 : vector<24x144xf32>
    %cst_448 = arith.constant 0.000000e+00 : f32
    %509 = vector.broadcast %cst_448 : f32 to vector<24x144xf32>
    %510 = arith.maximumf %508, %509 : vector<24x144xf32>
    %c0_449 = arith.constant 0 : index
    %c0_450 = arith.constant 0 : index
    %c0_451 = arith.constant 0 : index
    %511 = vector.load %arg4[%c0_449, %c0_450, %c0_451] : memref<2x12x24xf32, #tpu.memory_space<vmem>>, vector<1x12x24xf32>
    %512 = vector.shape_cast %511 : vector<1x12x24xf32> to vector<12x24xf32>
    %cst_452 = arith.constant dense<0.000000e+00> : vector<12x144xf32>
    %513 = tpu.matmul %512, %510, %cst_452 {dimension_numbers = #tpu.dot_dimension_numbers<[1], [0], [0], [1], [0, 0, 1, 1], [], []>} : vector<12x24xf32>, vector<24x144xf32>, vector<12x144xf32> -> vector<12x144xf32>
    %c1_453 = arith.constant 1 : index
    %c0_454 = arith.constant 0 : index
    %c0_455 = arith.constant 0 : index
    %514 = vector.load %arg4[%c1_453, %c0_454, %c0_455] : memref<2x12x24xf32, #tpu.memory_space<vmem>>, vector<1x12x24xf32>
    %515 = vector.shape_cast %514 : vector<1x12x24xf32> to vector<12x24xf32>
    %cst_456 = arith.constant dense<0.000000e+00> : vector<12x144xf32>
    %516 = tpu.matmul %515, %510, %cst_456 {dimension_numbers = #tpu.dot_dimension_numbers<[1], [0], [0], [1], [0, 0, 1, 1], [], []>} : vector<12x24xf32>, vector<24x144xf32>, vector<12x144xf32> -> vector<12x144xf32>
    %517 = arith.maximumf %513, %516 : vector<12x144xf32>
    %c0_457 = arith.constant 0 : index
    %c0_458 = arith.constant 0 : index
    %c0_459 = arith.constant 0 : index
    %518 = vector.load %arg5[%c0_457, %c0_458, %c0_459] : memref<2x144x72xf32, #tpu.memory_space<vmem>>, vector<1x144x72xf32>
    %519 = vector.shape_cast %518 : vector<1x144x72xf32> to vector<144x72xf32>
    %cst_460 = arith.constant dense<0.000000e+00> : vector<12x72xf32>
    %520 = tpu.matmul %517, %519, %cst_460 {dimension_numbers = #tpu.dot_dimension_numbers<[1], [0], [0], [1], [0, 0, 1, 1], [], []>} : vector<12x144xf32>, vector<144x72xf32>, vector<12x72xf32> -> vector<12x72xf32>
    %c1_461 = arith.constant 1 : index
    %c0_462 = arith.constant 0 : index
    %c0_463 = arith.constant 0 : index
    %521 = vector.load %arg5[%c1_461, %c0_462, %c0_463] : memref<2x144x72xf32, #tpu.memory_space<vmem>>, vector<1x144x72xf32>
    %522 = vector.shape_cast %521 : vector<1x144x72xf32> to vector<144x72xf32>
    %cst_464 = arith.constant dense<0.000000e+00> : vector<12x72xf32>
    %523 = tpu.matmul %517, %522, %cst_464 {dimension_numbers = #tpu.dot_dimension_numbers<[1], [0], [0], [1], [0, 0, 1, 1], [], []>} : vector<12x144xf32>, vector<144x72xf32>, vector<12x72xf32> -> vector<12x72xf32>
    %524 = arith.maximumf %520, %523 : vector<12x72xf32>
    %525 = vector.extract_strided_slice %524 {offsets = [0, 0], sizes = [8, 72], strides = [1, 1]} : vector<12x72xf32> to vector<8x72xf32>
    %c0_465 = arith.constant 0 : index
    %c0_466 = arith.constant 0 : index
    %c0_467 = arith.constant 0 : index
    %526 = vector.load %arg6[%c0_465, %c0_466, %c0_467] : memref<5x72x128xf32, #tpu.memory_space<vmem>>, vector<1x72x128xf32>
    %527 = vector.shape_cast %526 : vector<1x72x128xf32> to vector<72x128xf32>
    %cst_468 = arith.constant dense<0.000000e+00> : vector<8x128xf32>
    %528 = tpu.matmul %525, %527, %cst_468 {dimension_numbers = #tpu.dot_dimension_numbers<[1], [0], [0], [1], [0, 0, 1, 1], [], []>} : vector<8x72xf32>, vector<72x128xf32>, vector<8x128xf32> -> vector<8x128xf32>
    %529 = vector.extract_strided_slice %524 {offsets = [1, 0], sizes = [8, 72], strides = [1, 1]} : vector<12x72xf32> to vector<8x72xf32>
    %c1_469 = arith.constant 1 : index
    %c0_470 = arith.constant 0 : index
    %c0_471 = arith.constant 0 : index
    %530 = vector.load %arg6[%c1_469, %c0_470, %c0_471] : memref<5x72x128xf32, #tpu.memory_space<vmem>>, vector<1x72x128xf32>
    %531 = vector.shape_cast %530 : vector<1x72x128xf32> to vector<72x128xf32>
    %cst_472 = arith.constant dense<0.000000e+00> : vector<8x128xf32>
    %532 = tpu.matmul %529, %531, %cst_472 {dimension_numbers = #tpu.dot_dimension_numbers<[1], [0], [0], [1], [0, 0, 1, 1], [], []>} : vector<8x72xf32>, vector<72x128xf32>, vector<8x128xf32> -> vector<8x128xf32>
    %533 = arith.addf %528, %532 : vector<8x128xf32>
    %534 = vector.extract_strided_slice %524 {offsets = [2, 0], sizes = [8, 72], strides = [1, 1]} : vector<12x72xf32> to vector<8x72xf32>
    %c2_473 = arith.constant 2 : index
    %c0_474 = arith.constant 0 : index
    %c0_475 = arith.constant 0 : index
    %535 = vector.load %arg6[%c2_473, %c0_474, %c0_475] : memref<5x72x128xf32, #tpu.memory_space<vmem>>, vector<1x72x128xf32>
    %536 = vector.shape_cast %535 : vector<1x72x128xf32> to vector<72x128xf32>
    %cst_476 = arith.constant dense<0.000000e+00> : vector<8x128xf32>
    %537 = tpu.matmul %534, %536, %cst_476 {dimension_numbers = #tpu.dot_dimension_numbers<[1], [0], [0], [1], [0, 0, 1, 1], [], []>} : vector<8x72xf32>, vector<72x128xf32>, vector<8x128xf32> -> vector<8x128xf32>
    %538 = arith.addf %533, %537 : vector<8x128xf32>
    %539 = vector.extract_strided_slice %524 {offsets = [3, 0], sizes = [8, 72], strides = [1, 1]} : vector<12x72xf32> to vector<8x72xf32>
    %c3_477 = arith.constant 3 : index
    %c0_478 = arith.constant 0 : index
    %c0_479 = arith.constant 0 : index
    %540 = vector.load %arg6[%c3_477, %c0_478, %c0_479] : memref<5x72x128xf32, #tpu.memory_space<vmem>>, vector<1x72x128xf32>
    %541 = vector.shape_cast %540 : vector<1x72x128xf32> to vector<72x128xf32>
    %cst_480 = arith.constant dense<0.000000e+00> : vector<8x128xf32>
    %542 = tpu.matmul %539, %541, %cst_480 {dimension_numbers = #tpu.dot_dimension_numbers<[1], [0], [0], [1], [0, 0, 1, 1], [], []>} : vector<8x72xf32>, vector<72x128xf32>, vector<8x128xf32> -> vector<8x128xf32>
    %543 = arith.addf %538, %542 : vector<8x128xf32>
    %544 = vector.extract_strided_slice %524 {offsets = [4, 0], sizes = [8, 72], strides = [1, 1]} : vector<12x72xf32> to vector<8x72xf32>
    %c4_481 = arith.constant 4 : index
    %c0_482 = arith.constant 0 : index
    %c0_483 = arith.constant 0 : index
    %545 = vector.load %arg6[%c4_481, %c0_482, %c0_483] : memref<5x72x128xf32, #tpu.memory_space<vmem>>, vector<1x72x128xf32>
    %546 = vector.shape_cast %545 : vector<1x72x128xf32> to vector<72x128xf32>
    %cst_484 = arith.constant dense<0.000000e+00> : vector<8x128xf32>
    %547 = tpu.matmul %544, %546, %cst_484 {dimension_numbers = #tpu.dot_dimension_numbers<[1], [0], [0], [1], [0, 0, 1, 1], [], []>} : vector<8x72xf32>, vector<72x128xf32>, vector<8x128xf32> -> vector<8x128xf32>
    %548 = arith.addf %543, %547 : vector<8x128xf32>
    %c0_485 = arith.constant 0 : index
    %c0_486 = arith.constant 0 : index
    %549 = vector.load %arg7[%c0_485, %c0_486] : memref<1x128xf32, #tpu.memory_space<vmem>>, vector<1x128xf32>
    %550 = vector.broadcast %549 : vector<1x128xf32> to vector<8x128xf32>
    %551 = arith.addf %548, %550 : vector<8x128xf32>
    %cst_487 = arith.constant 0.000000e+00 : f32
    %552 = vector.broadcast %cst_487 : f32 to vector<8x128xf32>
    %553 = arith.maximumf %551, %552 : vector<8x128xf32>
    %c0_488 = arith.constant 0 : index
    %c0_489 = arith.constant 0 : index
    %c0_490 = arith.constant 0 : index
    %554 = vector.load %arg8[%c0_488, %c0_489, %c0_490] : memref<2x4x8xf32, #tpu.memory_space<vmem>>, vector<1x4x8xf32>
    %555 = vector.shape_cast %554 : vector<1x4x8xf32> to vector<4x8xf32>
    %cst_491 = arith.constant dense<0.000000e+00> : vector<4x128xf32>
    %556 = tpu.matmul %555, %553, %cst_491 {dimension_numbers = #tpu.dot_dimension_numbers<[1], [0], [0], [1], [0, 0, 1, 1], [], []>} : vector<4x8xf32>, vector<8x128xf32>, vector<4x128xf32> -> vector<4x128xf32>
    %c1_492 = arith.constant 1 : index
    %c0_493 = arith.constant 0 : index
    %c0_494 = arith.constant 0 : index
    %557 = vector.load %arg8[%c1_492, %c0_493, %c0_494] : memref<2x4x8xf32, #tpu.memory_space<vmem>>, vector<1x4x8xf32>
    %558 = vector.shape_cast %557 : vector<1x4x8xf32> to vector<4x8xf32>
    %cst_495 = arith.constant dense<0.000000e+00> : vector<4x128xf32>
    %559 = tpu.matmul %558, %553, %cst_495 {dimension_numbers = #tpu.dot_dimension_numbers<[1], [0], [0], [1], [0, 0, 1, 1], [], []>} : vector<4x8xf32>, vector<8x128xf32>, vector<4x128xf32> -> vector<4x128xf32>
    %560 = arith.maximumf %556, %559 : vector<4x128xf32>
    %c0_496 = arith.constant 0 : index
    %c0_497 = arith.constant 0 : index
    %c0_498 = arith.constant 0 : index
    %561 = vector.load %arg9[%c0_496, %c0_497, %c0_498] : memref<2x128x64xf32, #tpu.memory_space<vmem>>, vector<1x128x64xf32>
    %562 = vector.shape_cast %561 : vector<1x128x64xf32> to vector<128x64xf32>
    %cst_499 = arith.constant dense<0.000000e+00> : vector<4x64xf32>
    %563 = tpu.matmul %560, %562, %cst_499 {dimension_numbers = #tpu.dot_dimension_numbers<[1], [0], [0], [1], [0, 0, 1, 1], [], []>} : vector<4x128xf32>, vector<128x64xf32>, vector<4x64xf32> -> vector<4x64xf32>
    %c1_500 = arith.constant 1 : index
    %c0_501 = arith.constant 0 : index
    %c0_502 = arith.constant 0 : index
    %564 = vector.load %arg9[%c1_500, %c0_501, %c0_502] : memref<2x128x64xf32, #tpu.memory_space<vmem>>, vector<1x128x64xf32>
    %565 = vector.shape_cast %564 : vector<1x128x64xf32> to vector<128x64xf32>
    %cst_503 = arith.constant dense<0.000000e+00> : vector<4x64xf32>
    %566 = tpu.matmul %560, %565, %cst_503 {dimension_numbers = #tpu.dot_dimension_numbers<[1], [0], [0], [1], [0, 0, 1, 1], [], []>} : vector<4x128xf32>, vector<128x64xf32>, vector<4x64xf32> -> vector<4x64xf32>
    %567 = arith.maximumf %563, %566 : vector<4x64xf32>
    %568 = vector.extract_strided_slice %567 {offsets = [0, 0], sizes = [1, 64], strides = [1, 1]} : vector<4x64xf32> to vector<1x64xf32>
    %c5_504 = arith.constant 5 : index
    %c0_505 = arith.constant 0 : index
    %569 = vector.load %arg17[%c5_504, %c0_505] : memref<32x64xf32, #tpu.memory_space<vmem>>, vector<1x64xf32>
    tpu.vector_store %arg17[%c5_504, %c0_505], %568 {strides = array<i32>} : memref<32x64xf32, #tpu.memory_space<vmem>>, vector<1x64xf32>,
    %570 = vector.extract_strided_slice %567 {offsets = [1, 0], sizes = [1, 64], strides = [1, 1]} : vector<4x64xf32> to vector<1x64xf32>
    %c13 = arith.constant 13 : index
    %c0_506 = arith.constant 0 : index
    %571 = vector.load %arg17[%c13, %c0_506] : memref<32x64xf32, #tpu.memory_space<vmem>>, vector<1x64xf32>
    tpu.vector_store %arg17[%c13, %c0_506], %570 {strides = array<i32>} : memref<32x64xf32, #tpu.memory_space<vmem>>, vector<1x64xf32>,
    %572 = vector.extract_strided_slice %567 {offsets = [2, 0], sizes = [1, 64], strides = [1, 1]} : vector<4x64xf32> to vector<1x64xf32>
    %c21 = arith.constant 21 : index
    %c0_507 = arith.constant 0 : index
    %573 = vector.load %arg17[%c21, %c0_507] : memref<32x64xf32, #tpu.memory_space<vmem>>, vector<1x64xf32>
    tpu.vector_store %arg17[%c21, %c0_507], %572 {strides = array<i32>} : memref<32x64xf32, #tpu.memory_space<vmem>>, vector<1x64xf32>,
    %574 = vector.extract_strided_slice %567 {offsets = [3, 0], sizes = [1, 64], strides = [1, 1]} : vector<4x64xf32> to vector<1x64xf32>
    %c29 = arith.constant 29 : index
    %c0_508 = arith.constant 0 : index
    %575 = vector.load %arg17[%c29, %c0_508] : memref<32x64xf32, #tpu.memory_space<vmem>>, vector<1x64xf32>
    tpu.vector_store %arg17[%c29, %c0_508], %574 {strides = array<i32>} : memref<32x64xf32, #tpu.memory_space<vmem>>, vector<1x64xf32>,
    %c6 = arith.constant 6 : index
    %c0_509 = arith.constant 0 : index
    %c0_510 = arith.constant 0 : index
    %576 = vector.load %arg1[%c6, %c0_509, %c0_510] : memref<8x28x28xf32, #tpu.memory_space<vmem>>, vector<1x28x28xf32>
    %577 = vector.shape_cast %576 : vector<1x28x28xf32> to vector<28x28xf32>
    %578 = vector.extract_strided_slice %577 {offsets = [0, 0], sizes = [24, 28], strides = [1, 1]} : vector<28x28xf32> to vector<24x28xf32>
    %c0_511 = arith.constant 0 : index
    %c0_512 = arith.constant 0 : index
    %c0_513 = arith.constant 0 : index
    %579 = vector.load %arg2[%c0_511, %c0_512, %c0_513] : memref<5x28x144xf32, #tpu.memory_space<vmem>>, vector<1x28x144xf32>
    %580 = vector.shape_cast %579 : vector<1x28x144xf32> to vector<28x144xf32>
    %cst_514 = arith.constant dense<0.000000e+00> : vector<24x144xf32>
    %581 = tpu.matmul %578, %580, %cst_514 {dimension_numbers = #tpu.dot_dimension_numbers<[1], [0], [0], [1], [0, 0, 1, 1], [], []>} : vector<24x28xf32>, vector<28x144xf32>, vector<24x144xf32> -> vector<24x144xf32>
    %582 = vector.extract_strided_slice %577 {offsets = [1, 0], sizes = [24, 28], strides = [1, 1]} : vector<28x28xf32> to vector<24x28xf32>
    %c1_515 = arith.constant 1 : index
    %c0_516 = arith.constant 0 : index
    %c0_517 = arith.constant 0 : index
    %583 = vector.load %arg2[%c1_515, %c0_516, %c0_517] : memref<5x28x144xf32, #tpu.memory_space<vmem>>, vector<1x28x144xf32>
    %584 = vector.shape_cast %583 : vector<1x28x144xf32> to vector<28x144xf32>
    %cst_518 = arith.constant dense<0.000000e+00> : vector<24x144xf32>
    %585 = tpu.matmul %582, %584, %cst_518 {dimension_numbers = #tpu.dot_dimension_numbers<[1], [0], [0], [1], [0, 0, 1, 1], [], []>} : vector<24x28xf32>, vector<28x144xf32>, vector<24x144xf32> -> vector<24x144xf32>
    %586 = arith.addf %581, %585 : vector<24x144xf32>
    %587 = vector.extract_strided_slice %577 {offsets = [2, 0], sizes = [24, 28], strides = [1, 1]} : vector<28x28xf32> to vector<24x28xf32>
    %c2_519 = arith.constant 2 : index
    %c0_520 = arith.constant 0 : index
    %c0_521 = arith.constant 0 : index
    %588 = vector.load %arg2[%c2_519, %c0_520, %c0_521] : memref<5x28x144xf32, #tpu.memory_space<vmem>>, vector<1x28x144xf32>
    %589 = vector.shape_cast %588 : vector<1x28x144xf32> to vector<28x144xf32>
    %cst_522 = arith.constant dense<0.000000e+00> : vector<24x144xf32>
    %590 = tpu.matmul %587, %589, %cst_522 {dimension_numbers = #tpu.dot_dimension_numbers<[1], [0], [0], [1], [0, 0, 1, 1], [], []>} : vector<24x28xf32>, vector<28x144xf32>, vector<24x144xf32> -> vector<24x144xf32>
    %591 = arith.addf %586, %590 : vector<24x144xf32>
    %592 = vector.extract_strided_slice %577 {offsets = [3, 0], sizes = [24, 28], strides = [1, 1]} : vector<28x28xf32> to vector<24x28xf32>
    %c3_523 = arith.constant 3 : index
    %c0_524 = arith.constant 0 : index
    %c0_525 = arith.constant 0 : index
    %593 = vector.load %arg2[%c3_523, %c0_524, %c0_525] : memref<5x28x144xf32, #tpu.memory_space<vmem>>, vector<1x28x144xf32>
    %594 = vector.shape_cast %593 : vector<1x28x144xf32> to vector<28x144xf32>
    %cst_526 = arith.constant dense<0.000000e+00> : vector<24x144xf32>
    %595 = tpu.matmul %592, %594, %cst_526 {dimension_numbers = #tpu.dot_dimension_numbers<[1], [0], [0], [1], [0, 0, 1, 1], [], []>} : vector<24x28xf32>, vector<28x144xf32>, vector<24x144xf32> -> vector<24x144xf32>
    %596 = arith.addf %591, %595 : vector<24x144xf32>
    %597 = vector.extract_strided_slice %577 {offsets = [4, 0], sizes = [24, 28], strides = [1, 1]} : vector<28x28xf32> to vector<24x28xf32>
    %c4_527 = arith.constant 4 : index
    %c0_528 = arith.constant 0 : index
    %c0_529 = arith.constant 0 : index
    %598 = vector.load %arg2[%c4_527, %c0_528, %c0_529] : memref<5x28x144xf32, #tpu.memory_space<vmem>>, vector<1x28x144xf32>
    %599 = vector.shape_cast %598 : vector<1x28x144xf32> to vector<28x144xf32>
    %cst_530 = arith.constant dense<0.000000e+00> : vector<24x144xf32>
    %600 = tpu.matmul %597, %599, %cst_530 {dimension_numbers = #tpu.dot_dimension_numbers<[1], [0], [0], [1], [0, 0, 1, 1], [], []>} : vector<24x28xf32>, vector<28x144xf32>, vector<24x144xf32> -> vector<24x144xf32>
    %601 = arith.addf %596, %600 : vector<24x144xf32>
    %c0_531 = arith.constant 0 : index
    %c0_532 = arith.constant 0 : index
    %602 = vector.load %arg3[%c0_531, %c0_532] : memref<1x144xf32, #tpu.memory_space<vmem>>, vector<1x144xf32>
    %603 = vector.broadcast %602 : vector<1x144xf32> to vector<24x144xf32>
    %604 = arith.addf %601, %603 : vector<24x144xf32>
    %cst_533 = arith.constant 0.000000e+00 : f32
    %605 = vector.broadcast %cst_533 : f32 to vector<24x144xf32>
    %606 = arith.maximumf %604, %605 : vector<24x144xf32>
    %c0_534 = arith.constant 0 : index
    %c0_535 = arith.constant 0 : index
    %c0_536 = arith.constant 0 : index
    %607 = vector.load %arg4[%c0_534, %c0_535, %c0_536] : memref<2x12x24xf32, #tpu.memory_space<vmem>>, vector<1x12x24xf32>
    %608 = vector.shape_cast %607 : vector<1x12x24xf32> to vector<12x24xf32>
    %cst_537 = arith.constant dense<0.000000e+00> : vector<12x144xf32>
    %609 = tpu.matmul %608, %606, %cst_537 {dimension_numbers = #tpu.dot_dimension_numbers<[1], [0], [0], [1], [0, 0, 1, 1], [], []>} : vector<12x24xf32>, vector<24x144xf32>, vector<12x144xf32> -> vector<12x144xf32>
    %c1_538 = arith.constant 1 : index
    %c0_539 = arith.constant 0 : index
    %c0_540 = arith.constant 0 : index
    %610 = vector.load %arg4[%c1_538, %c0_539, %c0_540] : memref<2x12x24xf32, #tpu.memory_space<vmem>>, vector<1x12x24xf32>
    %611 = vector.shape_cast %610 : vector<1x12x24xf32> to vector<12x24xf32>
    %cst_541 = arith.constant dense<0.000000e+00> : vector<12x144xf32>
    %612 = tpu.matmul %611, %606, %cst_541 {dimension_numbers = #tpu.dot_dimension_numbers<[1], [0], [0], [1], [0, 0, 1, 1], [], []>} : vector<12x24xf32>, vector<24x144xf32>, vector<12x144xf32> -> vector<12x144xf32>
    %613 = arith.maximumf %609, %612 : vector<12x144xf32>
    %c0_542 = arith.constant 0 : index
    %c0_543 = arith.constant 0 : index
    %c0_544 = arith.constant 0 : index
    %614 = vector.load %arg5[%c0_542, %c0_543, %c0_544] : memref<2x144x72xf32, #tpu.memory_space<vmem>>, vector<1x144x72xf32>
    %615 = vector.shape_cast %614 : vector<1x144x72xf32> to vector<144x72xf32>
    %cst_545 = arith.constant dense<0.000000e+00> : vector<12x72xf32>
    %616 = tpu.matmul %613, %615, %cst_545 {dimension_numbers = #tpu.dot_dimension_numbers<[1], [0], [0], [1], [0, 0, 1, 1], [], []>} : vector<12x144xf32>, vector<144x72xf32>, vector<12x72xf32> -> vector<12x72xf32>
    %c1_546 = arith.constant 1 : index
    %c0_547 = arith.constant 0 : index
    %c0_548 = arith.constant 0 : index
    %617 = vector.load %arg5[%c1_546, %c0_547, %c0_548] : memref<2x144x72xf32, #tpu.memory_space<vmem>>, vector<1x144x72xf32>
    %618 = vector.shape_cast %617 : vector<1x144x72xf32> to vector<144x72xf32>
    %cst_549 = arith.constant dense<0.000000e+00> : vector<12x72xf32>
    %619 = tpu.matmul %613, %618, %cst_549 {dimension_numbers = #tpu.dot_dimension_numbers<[1], [0], [0], [1], [0, 0, 1, 1], [], []>} : vector<12x144xf32>, vector<144x72xf32>, vector<12x72xf32> -> vector<12x72xf32>
    %620 = arith.maximumf %616, %619 : vector<12x72xf32>
    %621 = vector.extract_strided_slice %620 {offsets = [0, 0], sizes = [8, 72], strides = [1, 1]} : vector<12x72xf32> to vector<8x72xf32>
    %c0_550 = arith.constant 0 : index
    %c0_551 = arith.constant 0 : index
    %c0_552 = arith.constant 0 : index
    %622 = vector.load %arg6[%c0_550, %c0_551, %c0_552] : memref<5x72x128xf32, #tpu.memory_space<vmem>>, vector<1x72x128xf32>
    %623 = vector.shape_cast %622 : vector<1x72x128xf32> to vector<72x128xf32>
    %cst_553 = arith.constant dense<0.000000e+00> : vector<8x128xf32>
    %624 = tpu.matmul %621, %623, %cst_553 {dimension_numbers = #tpu.dot_dimension_numbers<[1], [0], [0], [1], [0, 0, 1, 1], [], []>} : vector<8x72xf32>, vector<72x128xf32>, vector<8x128xf32> -> vector<8x128xf32>
    %625 = vector.extract_strided_slice %620 {offsets = [1, 0], sizes = [8, 72], strides = [1, 1]} : vector<12x72xf32> to vector<8x72xf32>
    %c1_554 = arith.constant 1 : index
    %c0_555 = arith.constant 0 : index
    %c0_556 = arith.constant 0 : index
    %626 = vector.load %arg6[%c1_554, %c0_555, %c0_556] : memref<5x72x128xf32, #tpu.memory_space<vmem>>, vector<1x72x128xf32>
    %627 = vector.shape_cast %626 : vector<1x72x128xf32> to vector<72x128xf32>
    %cst_557 = arith.constant dense<0.000000e+00> : vector<8x128xf32>
    %628 = tpu.matmul %625, %627, %cst_557 {dimension_numbers = #tpu.dot_dimension_numbers<[1], [0], [0], [1], [0, 0, 1, 1], [], []>} : vector<8x72xf32>, vector<72x128xf32>, vector<8x128xf32> -> vector<8x128xf32>
    %629 = arith.addf %624, %628 : vector<8x128xf32>
    %630 = vector.extract_strided_slice %620 {offsets = [2, 0], sizes = [8, 72], strides = [1, 1]} : vector<12x72xf32> to vector<8x72xf32>
    %c2_558 = arith.constant 2 : index
    %c0_559 = arith.constant 0 : index
    %c0_560 = arith.constant 0 : index
    %631 = vector.load %arg6[%c2_558, %c0_559, %c0_560] : memref<5x72x128xf32, #tpu.memory_space<vmem>>, vector<1x72x128xf32>
    %632 = vector.shape_cast %631 : vector<1x72x128xf32> to vector<72x128xf32>
    %cst_561 = arith.constant dense<0.000000e+00> : vector<8x128xf32>
    %633 = tpu.matmul %630, %632, %cst_561 {dimension_numbers = #tpu.dot_dimension_numbers<[1], [0], [0], [1], [0, 0, 1, 1], [], []>} : vector<8x72xf32>, vector<72x128xf32>, vector<8x128xf32> -> vector<8x128xf32>
    %634 = arith.addf %629, %633 : vector<8x128xf32>
    %635 = vector.extract_strided_slice %620 {offsets = [3, 0], sizes = [8, 72], strides = [1, 1]} : vector<12x72xf32> to vector<8x72xf32>
    %c3_562 = arith.constant 3 : index
    %c0_563 = arith.constant 0 : index
    %c0_564 = arith.constant 0 : index
    %636 = vector.load %arg6[%c3_562, %c0_563, %c0_564] : memref<5x72x128xf32, #tpu.memory_space<vmem>>, vector<1x72x128xf32>
    %637 = vector.shape_cast %636 : vector<1x72x128xf32> to vector<72x128xf32>
    %cst_565 = arith.constant dense<0.000000e+00> : vector<8x128xf32>
    %638 = tpu.matmul %635, %637, %cst_565 {dimension_numbers = #tpu.dot_dimension_numbers<[1], [0], [0], [1], [0, 0, 1, 1], [], []>} : vector<8x72xf32>, vector<72x128xf32>, vector<8x128xf32> -> vector<8x128xf32>
    %639 = arith.addf %634, %638 : vector<8x128xf32>
    %640 = vector.extract_strided_slice %620 {offsets = [4, 0], sizes = [8, 72], strides = [1, 1]} : vector<12x72xf32> to vector<8x72xf32>
    %c4_566 = arith.constant 4 : index
    %c0_567 = arith.constant 0 : index
    %c0_568 = arith.constant 0 : index
    %641 = vector.load %arg6[%c4_566, %c0_567, %c0_568] : memref<5x72x128xf32, #tpu.memory_space<vmem>>, vector<1x72x128xf32>
    %642 = vector.shape_cast %641 : vector<1x72x128xf32> to vector<72x128xf32>
    %cst_569 = arith.constant dense<0.000000e+00> : vector<8x128xf32>
    %643 = tpu.matmul %640, %642, %cst_569 {dimension_numbers = #tpu.dot_dimension_numbers<[1], [0], [0], [1], [0, 0, 1, 1], [], []>} : vector<8x72xf32>, vector<72x128xf32>, vector<8x128xf32> -> vector<8x128xf32>
    %644 = arith.addf %639, %643 : vector<8x128xf32>
    %c0_570 = arith.constant 0 : index
    %c0_571 = arith.constant 0 : index
    %645 = vector.load %arg7[%c0_570, %c0_571] : memref<1x128xf32, #tpu.memory_space<vmem>>, vector<1x128xf32>
    %646 = vector.broadcast %645 : vector<1x128xf32> to vector<8x128xf32>
    %647 = arith.addf %644, %646 : vector<8x128xf32>
    %cst_572 = arith.constant 0.000000e+00 : f32
    %648 = vector.broadcast %cst_572 : f32 to vector<8x128xf32>
    %649 = arith.maximumf %647, %648 : vector<8x128xf32>
    %c0_573 = arith.constant 0 : index
    %c0_574 = arith.constant 0 : index
    %c0_575 = arith.constant 0 : index
    %650 = vector.load %arg8[%c0_573, %c0_574, %c0_575] : memref<2x4x8xf32, #tpu.memory_space<vmem>>, vector<1x4x8xf32>
    %651 = vector.shape_cast %650 : vector<1x4x8xf32> to vector<4x8xf32>
    %cst_576 = arith.constant dense<0.000000e+00> : vector<4x128xf32>
    %652 = tpu.matmul %651, %649, %cst_576 {dimension_numbers = #tpu.dot_dimension_numbers<[1], [0], [0], [1], [0, 0, 1, 1], [], []>} : vector<4x8xf32>, vector<8x128xf32>, vector<4x128xf32> -> vector<4x128xf32>
    %c1_577 = arith.constant 1 : index
    %c0_578 = arith.constant 0 : index
    %c0_579 = arith.constant 0 : index
    %653 = vector.load %arg8[%c1_577, %c0_578, %c0_579] : memref<2x4x8xf32, #tpu.memory_space<vmem>>, vector<1x4x8xf32>
    %654 = vector.shape_cast %653 : vector<1x4x8xf32> to vector<4x8xf32>
    %cst_580 = arith.constant dense<0.000000e+00> : vector<4x128xf32>
    %655 = tpu.matmul %654, %649, %cst_580 {dimension_numbers = #tpu.dot_dimension_numbers<[1], [0], [0], [1], [0, 0, 1, 1], [], []>} : vector<4x8xf32>, vector<8x128xf32>, vector<4x128xf32> -> vector<4x128xf32>
    %656 = arith.maximumf %652, %655 : vector<4x128xf32>
    %c0_581 = arith.constant 0 : index
    %c0_582 = arith.constant 0 : index
    %c0_583 = arith.constant 0 : index
    %657 = vector.load %arg9[%c0_581, %c0_582, %c0_583] : memref<2x128x64xf32, #tpu.memory_space<vmem>>, vector<1x128x64xf32>
    %658 = vector.shape_cast %657 : vector<1x128x64xf32> to vector<128x64xf32>
    %cst_584 = arith.constant dense<0.000000e+00> : vector<4x64xf32>
    %659 = tpu.matmul %656, %658, %cst_584 {dimension_numbers = #tpu.dot_dimension_numbers<[1], [0], [0], [1], [0, 0, 1, 1], [], []>} : vector<4x128xf32>, vector<128x64xf32>, vector<4x64xf32> -> vector<4x64xf32>
    %c1_585 = arith.constant 1 : index
    %c0_586 = arith.constant 0 : index
    %c0_587 = arith.constant 0 : index
    %660 = vector.load %arg9[%c1_585, %c0_586, %c0_587] : memref<2x128x64xf32, #tpu.memory_space<vmem>>, vector<1x128x64xf32>
    %661 = vector.shape_cast %660 : vector<1x128x64xf32> to vector<128x64xf32>
    %cst_588 = arith.constant dense<0.000000e+00> : vector<4x64xf32>
    %662 = tpu.matmul %656, %661, %cst_588 {dimension_numbers = #tpu.dot_dimension_numbers<[1], [0], [0], [1], [0, 0, 1, 1], [], []>} : vector<4x128xf32>, vector<128x64xf32>, vector<4x64xf32> -> vector<4x64xf32>
    %663 = arith.maximumf %659, %662 : vector<4x64xf32>
    %664 = vector.extract_strided_slice %663 {offsets = [0, 0], sizes = [1, 64], strides = [1, 1]} : vector<4x64xf32> to vector<1x64xf32>
    %c6_589 = arith.constant 6 : index
    %c0_590 = arith.constant 0 : index
    %665 = vector.load %arg17[%c6_589, %c0_590] : memref<32x64xf32, #tpu.memory_space<vmem>>, vector<1x64xf32>
    tpu.vector_store %arg17[%c6_589, %c0_590], %664 {strides = array<i32>} : memref<32x64xf32, #tpu.memory_space<vmem>>, vector<1x64xf32>,
    %666 = vector.extract_strided_slice %663 {offsets = [1, 0], sizes = [1, 64], strides = [1, 1]} : vector<4x64xf32> to vector<1x64xf32>
    %c14 = arith.constant 14 : index
    %c0_591 = arith.constant 0 : index
    %667 = vector.load %arg17[%c14, %c0_591] : memref<32x64xf32, #tpu.memory_space<vmem>>, vector<1x64xf32>
    tpu.vector_store %arg17[%c14, %c0_591], %666 {strides = array<i32>} : memref<32x64xf32, #tpu.memory_space<vmem>>, vector<1x64xf32>,
    %668 = vector.extract_strided_slice %663 {offsets = [2, 0], sizes = [1, 64], strides = [1, 1]} : vector<4x64xf32> to vector<1x64xf32>
    %c22 = arith.constant 22 : index
    %c0_592 = arith.constant 0 : index
    %669 = vector.load %arg17[%c22, %c0_592] : memref<32x64xf32, #tpu.memory_space<vmem>>, vector<1x64xf32>
    tpu.vector_store %arg17[%c22, %c0_592], %668 {strides = array<i32>} : memref<32x64xf32, #tpu.memory_space<vmem>>, vector<1x64xf32>,
    %670 = vector.extract_strided_slice %663 {offsets = [3, 0], sizes = [1, 64], strides = [1, 1]} : vector<4x64xf32> to vector<1x64xf32>
    %c30 = arith.constant 30 : index
    %c0_593 = arith.constant 0 : index
    %671 = vector.load %arg17[%c30, %c0_593] : memref<32x64xf32, #tpu.memory_space<vmem>>, vector<1x64xf32>
    tpu.vector_store %arg17[%c30, %c0_593], %670 {strides = array<i32>} : memref<32x64xf32, #tpu.memory_space<vmem>>, vector<1x64xf32>,
    %c7 = arith.constant 7 : index
    %c0_594 = arith.constant 0 : index
    %c0_595 = arith.constant 0 : index
    %672 = vector.load %arg1[%c7, %c0_594, %c0_595] : memref<8x28x28xf32, #tpu.memory_space<vmem>>, vector<1x28x28xf32>
    %673 = vector.shape_cast %672 : vector<1x28x28xf32> to vector<28x28xf32>
    %674 = vector.extract_strided_slice %673 {offsets = [0, 0], sizes = [24, 28], strides = [1, 1]} : vector<28x28xf32> to vector<24x28xf32>
    %c0_596 = arith.constant 0 : index
    %c0_597 = arith.constant 0 : index
    %c0_598 = arith.constant 0 : index
    %675 = vector.load %arg2[%c0_596, %c0_597, %c0_598] : memref<5x28x144xf32, #tpu.memory_space<vmem>>, vector<1x28x144xf32>
    %676 = vector.shape_cast %675 : vector<1x28x144xf32> to vector<28x144xf32>
    %cst_599 = arith.constant dense<0.000000e+00> : vector<24x144xf32>
    %677 = tpu.matmul %674, %676, %cst_599 {dimension_numbers = #tpu.dot_dimension_numbers<[1], [0], [0], [1], [0, 0, 1, 1], [], []>} : vector<24x28xf32>, vector<28x144xf32>, vector<24x144xf32> -> vector<24x144xf32>
    %678 = vector.extract_strided_slice %673 {offsets = [1, 0], sizes = [24, 28], strides = [1, 1]} : vector<28x28xf32> to vector<24x28xf32>
    %c1_600 = arith.constant 1 : index
    %c0_601 = arith.constant 0 : index
    %c0_602 = arith.constant 0 : index
    %679 = vector.load %arg2[%c1_600, %c0_601, %c0_602] : memref<5x28x144xf32, #tpu.memory_space<vmem>>, vector<1x28x144xf32>
    %680 = vector.shape_cast %679 : vector<1x28x144xf32> to vector<28x144xf32>
    %cst_603 = arith.constant dense<0.000000e+00> : vector<24x144xf32>
    %681 = tpu.matmul %678, %680, %cst_603 {dimension_numbers = #tpu.dot_dimension_numbers<[1], [0], [0], [1], [0, 0, 1, 1], [], []>} : vector<24x28xf32>, vector<28x144xf32>, vector<24x144xf32> -> vector<24x144xf32>
    %682 = arith.addf %677, %681 : vector<24x144xf32>
    %683 = vector.extract_strided_slice %673 {offsets = [2, 0], sizes = [24, 28], strides = [1, 1]} : vector<28x28xf32> to vector<24x28xf32>
    %c2_604 = arith.constant 2 : index
    %c0_605 = arith.constant 0 : index
    %c0_606 = arith.constant 0 : index
    %684 = vector.load %arg2[%c2_604, %c0_605, %c0_606] : memref<5x28x144xf32, #tpu.memory_space<vmem>>, vector<1x28x144xf32>
    %685 = vector.shape_cast %684 : vector<1x28x144xf32> to vector<28x144xf32>
    %cst_607 = arith.constant dense<0.000000e+00> : vector<24x144xf32>
    %686 = tpu.matmul %683, %685, %cst_607 {dimension_numbers = #tpu.dot_dimension_numbers<[1], [0], [0], [1], [0, 0, 1, 1], [], []>} : vector<24x28xf32>, vector<28x144xf32>, vector<24x144xf32> -> vector<24x144xf32>
    %687 = arith.addf %682, %686 : vector<24x144xf32>
    %688 = vector.extract_strided_slice %673 {offsets = [3, 0], sizes = [24, 28], strides = [1, 1]} : vector<28x28xf32> to vector<24x28xf32>
    %c3_608 = arith.constant 3 : index
    %c0_609 = arith.constant 0 : index
    %c0_610 = arith.constant 0 : index
    %689 = vector.load %arg2[%c3_608, %c0_609, %c0_610] : memref<5x28x144xf32, #tpu.memory_space<vmem>>, vector<1x28x144xf32>
    %690 = vector.shape_cast %689 : vector<1x28x144xf32> to vector<28x144xf32>
    %cst_611 = arith.constant dense<0.000000e+00> : vector<24x144xf32>
    %691 = tpu.matmul %688, %690, %cst_611 {dimension_numbers = #tpu.dot_dimension_numbers<[1], [0], [0], [1], [0, 0, 1, 1], [], []>} : vector<24x28xf32>, vector<28x144xf32>, vector<24x144xf32> -> vector<24x144xf32>
    %692 = arith.addf %687, %691 : vector<24x144xf32>
    %693 = vector.extract_strided_slice %673 {offsets = [4, 0], sizes = [24, 28], strides = [1, 1]} : vector<28x28xf32> to vector<24x28xf32>
    %c4_612 = arith.constant 4 : index
    %c0_613 = arith.constant 0 : index
    %c0_614 = arith.constant 0 : index
    %694 = vector.load %arg2[%c4_612, %c0_613, %c0_614] : memref<5x28x144xf32, #tpu.memory_space<vmem>>, vector<1x28x144xf32>
    %695 = vector.shape_cast %694 : vector<1x28x144xf32> to vector<28x144xf32>
    %cst_615 = arith.constant dense<0.000000e+00> : vector<24x144xf32>
    %696 = tpu.matmul %693, %695, %cst_615 {dimension_numbers = #tpu.dot_dimension_numbers<[1], [0], [0], [1], [0, 0, 1, 1], [], []>} : vector<24x28xf32>, vector<28x144xf32>, vector<24x144xf32> -> vector<24x144xf32>
    %697 = arith.addf %692, %696 : vector<24x144xf32>
    %c0_616 = arith.constant 0 : index
    %c0_617 = arith.constant 0 : index
    %698 = vector.load %arg3[%c0_616, %c0_617] : memref<1x144xf32, #tpu.memory_space<vmem>>, vector<1x144xf32>
    %699 = vector.broadcast %698 : vector<1x144xf32> to vector<24x144xf32>
    %700 = arith.addf %697, %699 : vector<24x144xf32>
    %cst_618 = arith.constant 0.000000e+00 : f32
    %701 = vector.broadcast %cst_618 : f32 to vector<24x144xf32>
    %702 = arith.maximumf %700, %701 : vector<24x144xf32>
    %c0_619 = arith.constant 0 : index
    %c0_620 = arith.constant 0 : index
    %c0_621 = arith.constant 0 : index
    %703 = vector.load %arg4[%c0_619, %c0_620, %c0_621] : memref<2x12x24xf32, #tpu.memory_space<vmem>>, vector<1x12x24xf32>
    %704 = vector.shape_cast %703 : vector<1x12x24xf32> to vector<12x24xf32>
    %cst_622 = arith.constant dense<0.000000e+00> : vector<12x144xf32>
    %705 = tpu.matmul %704, %702, %cst_622 {dimension_numbers = #tpu.dot_dimension_numbers<[1], [0], [0], [1], [0, 0, 1, 1], [], []>} : vector<12x24xf32>, vector<24x144xf32>, vector<12x144xf32> -> vector<12x144xf32>
    %c1_623 = arith.constant 1 : index
    %c0_624 = arith.constant 0 : index
    %c0_625 = arith.constant 0 : index
    %706 = vector.load %arg4[%c1_623, %c0_624, %c0_625] : memref<2x12x24xf32, #tpu.memory_space<vmem>>, vector<1x12x24xf32>
    %707 = vector.shape_cast %706 : vector<1x12x24xf32> to vector<12x24xf32>
    %cst_626 = arith.constant dense<0.000000e+00> : vector<12x144xf32>
    %708 = tpu.matmul %707, %702, %cst_626 {dimension_numbers = #tpu.dot_dimension_numbers<[1], [0], [0], [1], [0, 0, 1, 1], [], []>} : vector<12x24xf32>, vector<24x144xf32>, vector<12x144xf32> -> vector<12x144xf32>
    %709 = arith.maximumf %705, %708 : vector<12x144xf32>
    %c0_627 = arith.constant 0 : index
    %c0_628 = arith.constant 0 : index
    %c0_629 = arith.constant 0 : index
    %710 = vector.load %arg5[%c0_627, %c0_628, %c0_629] : memref<2x144x72xf32, #tpu.memory_space<vmem>>, vector<1x144x72xf32>
    %711 = vector.shape_cast %710 : vector<1x144x72xf32> to vector<144x72xf32>
    %cst_630 = arith.constant dense<0.000000e+00> : vector<12x72xf32>
    %712 = tpu.matmul %709, %711, %cst_630 {dimension_numbers = #tpu.dot_dimension_numbers<[1], [0], [0], [1], [0, 0, 1, 1], [], []>} : vector<12x144xf32>, vector<144x72xf32>, vector<12x72xf32> -> vector<12x72xf32>
    %c1_631 = arith.constant 1 : index
    %c0_632 = arith.constant 0 : index
    %c0_633 = arith.constant 0 : index
    %713 = vector.load %arg5[%c1_631, %c0_632, %c0_633] : memref<2x144x72xf32, #tpu.memory_space<vmem>>, vector<1x144x72xf32>
    %714 = vector.shape_cast %713 : vector<1x144x72xf32> to vector<144x72xf32>
    %cst_634 = arith.constant dense<0.000000e+00> : vector<12x72xf32>
    %715 = tpu.matmul %709, %714, %cst_634 {dimension_numbers = #tpu.dot_dimension_numbers<[1], [0], [0], [1], [0, 0, 1, 1], [], []>} : vector<12x144xf32>, vector<144x72xf32>, vector<12x72xf32> -> vector<12x72xf32>
    %716 = arith.maximumf %712, %715 : vector<12x72xf32>
    %717 = vector.extract_strided_slice %716 {offsets = [0, 0], sizes = [8, 72], strides = [1, 1]} : vector<12x72xf32> to vector<8x72xf32>
    %c0_635 = arith.constant 0 : index
    %c0_636 = arith.constant 0 : index
    %c0_637 = arith.constant 0 : index
    %718 = vector.load %arg6[%c0_635, %c0_636, %c0_637] : memref<5x72x128xf32, #tpu.memory_space<vmem>>, vector<1x72x128xf32>
    %719 = vector.shape_cast %718 : vector<1x72x128xf32> to vector<72x128xf32>
    %cst_638 = arith.constant dense<0.000000e+00> : vector<8x128xf32>
    %720 = tpu.matmul %717, %719, %cst_638 {dimension_numbers = #tpu.dot_dimension_numbers<[1], [0], [0], [1], [0, 0, 1, 1], [], []>} : vector<8x72xf32>, vector<72x128xf32>, vector<8x128xf32> -> vector<8x128xf32>
    %721 = vector.extract_strided_slice %716 {offsets = [1, 0], sizes = [8, 72], strides = [1, 1]} : vector<12x72xf32> to vector<8x72xf32>
    %c1_639 = arith.constant 1 : index
    %c0_640 = arith.constant 0 : index
    %c0_641 = arith.constant 0 : index
    %722 = vector.load %arg6[%c1_639, %c0_640, %c0_641] : memref<5x72x128xf32, #tpu.memory_space<vmem>>, vector<1x72x128xf32>
    %723 = vector.shape_cast %722 : vector<1x72x128xf32> to vector<72x128xf32>
    %cst_642 = arith.constant dense<0.000000e+00> : vector<8x128xf32>
    %724 = tpu.matmul %721, %723, %cst_642 {dimension_numbers = #tpu.dot_dimension_numbers<[1], [0], [0], [1], [0, 0, 1, 1], [], []>} : vector<8x72xf32>, vector<72x128xf32>, vector<8x128xf32> -> vector<8x128xf32>
    %725 = arith.addf %720, %724 : vector<8x128xf32>
    %726 = vector.extract_strided_slice %716 {offsets = [2, 0], sizes = [8, 72], strides = [1, 1]} : vector<12x72xf32> to vector<8x72xf32>
    %c2_643 = arith.constant 2 : index
    %c0_644 = arith.constant 0 : index
    %c0_645 = arith.constant 0 : index
    %727 = vector.load %arg6[%c2_643, %c0_644, %c0_645] : memref<5x72x128xf32, #tpu.memory_space<vmem>>, vector<1x72x128xf32>
    %728 = vector.shape_cast %727 : vector<1x72x128xf32> to vector<72x128xf32>
    %cst_646 = arith.constant dense<0.000000e+00> : vector<8x128xf32>
    %729 = tpu.matmul %726, %728, %cst_646 {dimension_numbers = #tpu.dot_dimension_numbers<[1], [0], [0], [1], [0, 0, 1, 1], [], []>} : vector<8x72xf32>, vector<72x128xf32>, vector<8x128xf32> -> vector<8x128xf32>
    %730 = arith.addf %725, %729 : vector<8x128xf32>
    %731 = vector.extract_strided_slice %716 {offsets = [3, 0], sizes = [8, 72], strides = [1, 1]} : vector<12x72xf32> to vector<8x72xf32>
    %c3_647 = arith.constant 3 : index
    %c0_648 = arith.constant 0 : index
    %c0_649 = arith.constant 0 : index
    %732 = vector.load %arg6[%c3_647, %c0_648, %c0_649] : memref<5x72x128xf32, #tpu.memory_space<vmem>>, vector<1x72x128xf32>
    %733 = vector.shape_cast %732 : vector<1x72x128xf32> to vector<72x128xf32>
    %cst_650 = arith.constant dense<0.000000e+00> : vector<8x128xf32>
    %734 = tpu.matmul %731, %733, %cst_650 {dimension_numbers = #tpu.dot_dimension_numbers<[1], [0], [0], [1], [0, 0, 1, 1], [], []>} : vector<8x72xf32>, vector<72x128xf32>, vector<8x128xf32> -> vector<8x128xf32>
    %735 = arith.addf %730, %734 : vector<8x128xf32>
    %736 = vector.extract_strided_slice %716 {offsets = [4, 0], sizes = [8, 72], strides = [1, 1]} : vector<12x72xf32> to vector<8x72xf32>
    %c4_651 = arith.constant 4 : index
    %c0_652 = arith.constant 0 : index
    %c0_653 = arith.constant 0 : index
    %737 = vector.load %arg6[%c4_651, %c0_652, %c0_653] : memref<5x72x128xf32, #tpu.memory_space<vmem>>, vector<1x72x128xf32>
    %738 = vector.shape_cast %737 : vector<1x72x128xf32> to vector<72x128xf32>
    %cst_654 = arith.constant dense<0.000000e+00> : vector<8x128xf32>
    %739 = tpu.matmul %736, %738, %cst_654 {dimension_numbers = #tpu.dot_dimension_numbers<[1], [0], [0], [1], [0, 0, 1, 1], [], []>} : vector<8x72xf32>, vector<72x128xf32>, vector<8x128xf32> -> vector<8x128xf32>
    %740 = arith.addf %735, %739 : vector<8x128xf32>
    %c0_655 = arith.constant 0 : index
    %c0_656 = arith.constant 0 : index
    %741 = vector.load %arg7[%c0_655, %c0_656] : memref<1x128xf32, #tpu.memory_space<vmem>>, vector<1x128xf32>
    %742 = vector.broadcast %741 : vector<1x128xf32> to vector<8x128xf32>
    %743 = arith.addf %740, %742 : vector<8x128xf32>
    %cst_657 = arith.constant 0.000000e+00 : f32
    %744 = vector.broadcast %cst_657 : f32 to vector<8x128xf32>
    %745 = arith.maximumf %743, %744 : vector<8x128xf32>
    %c0_658 = arith.constant 0 : index
    %c0_659 = arith.constant 0 : index
    %c0_660 = arith.constant 0 : index
    %746 = vector.load %arg8[%c0_658, %c0_659, %c0_660] : memref<2x4x8xf32, #tpu.memory_space<vmem>>, vector<1x4x8xf32>
    %747 = vector.shape_cast %746 : vector<1x4x8xf32> to vector<4x8xf32>
    %cst_661 = arith.constant dense<0.000000e+00> : vector<4x128xf32>
    %748 = tpu.matmul %747, %745, %cst_661 {dimension_numbers = #tpu.dot_dimension_numbers<[1], [0], [0], [1], [0, 0, 1, 1], [], []>} : vector<4x8xf32>, vector<8x128xf32>, vector<4x128xf32> -> vector<4x128xf32>
    %c1_662 = arith.constant 1 : index
    %c0_663 = arith.constant 0 : index
    %c0_664 = arith.constant 0 : index
    %749 = vector.load %arg8[%c1_662, %c0_663, %c0_664] : memref<2x4x8xf32, #tpu.memory_space<vmem>>, vector<1x4x8xf32>
    %750 = vector.shape_cast %749 : vector<1x4x8xf32> to vector<4x8xf32>
    %cst_665 = arith.constant dense<0.000000e+00> : vector<4x128xf32>
    %751 = tpu.matmul %750, %745, %cst_665 {dimension_numbers = #tpu.dot_dimension_numbers<[1], [0], [0], [1], [0, 0, 1, 1], [], []>} : vector<4x8xf32>, vector<8x128xf32>, vector<4x128xf32> -> vector<4x128xf32>
    %752 = arith.maximumf %748, %751 : vector<4x128xf32>
    %c0_666 = arith.constant 0 : index
    %c0_667 = arith.constant 0 : index
    %c0_668 = arith.constant 0 : index
    %753 = vector.load %arg9[%c0_666, %c0_667, %c0_668] : memref<2x128x64xf32, #tpu.memory_space<vmem>>, vector<1x128x64xf32>
    %754 = vector.shape_cast %753 : vector<1x128x64xf32> to vector<128x64xf32>
    %cst_669 = arith.constant dense<0.000000e+00> : vector<4x64xf32>
    %755 = tpu.matmul %752, %754, %cst_669 {dimension_numbers = #tpu.dot_dimension_numbers<[1], [0], [0], [1], [0, 0, 1, 1], [], []>} : vector<4x128xf32>, vector<128x64xf32>, vector<4x64xf32> -> vector<4x64xf32>
    %c1_670 = arith.constant 1 : index
    %c0_671 = arith.constant 0 : index
    %c0_672 = arith.constant 0 : index
    %756 = vector.load %arg9[%c1_670, %c0_671, %c0_672] : memref<2x128x64xf32, #tpu.memory_space<vmem>>, vector<1x128x64xf32>
    %757 = vector.shape_cast %756 : vector<1x128x64xf32> to vector<128x64xf32>
    %cst_673 = arith.constant dense<0.000000e+00> : vector<4x64xf32>
    %758 = tpu.matmul %752, %757, %cst_673 {dimension_numbers = #tpu.dot_dimension_numbers<[1], [0], [0], [1], [0, 0, 1, 1], [], []>} : vector<4x128xf32>, vector<128x64xf32>, vector<4x64xf32> -> vector<4x64xf32>
    %759 = arith.maximumf %755, %758 : vector<4x64xf32>
    %760 = vector.extract_strided_slice %759 {offsets = [0, 0], sizes = [1, 64], strides = [1, 1]} : vector<4x64xf32> to vector<1x64xf32>
    %c7_674 = arith.constant 7 : index
    %c0_675 = arith.constant 0 : index
    %761 = vector.load %arg17[%c7_674, %c0_675] : memref<32x64xf32, #tpu.memory_space<vmem>>, vector<1x64xf32>
    tpu.vector_store %arg17[%c7_674, %c0_675], %760 {strides = array<i32>} : memref<32x64xf32, #tpu.memory_space<vmem>>, vector<1x64xf32>,
    %762 = vector.extract_strided_slice %759 {offsets = [1, 0], sizes = [1, 64], strides = [1, 1]} : vector<4x64xf32> to vector<1x64xf32>
    %c15 = arith.constant 15 : index
    %c0_676 = arith.constant 0 : index
    %763 = vector.load %arg17[%c15, %c0_676] : memref<32x64xf32, #tpu.memory_space<vmem>>, vector<1x64xf32>
    tpu.vector_store %arg17[%c15, %c0_676], %762 {strides = array<i32>} : memref<32x64xf32, #tpu.memory_space<vmem>>, vector<1x64xf32>,
    %764 = vector.extract_strided_slice %759 {offsets = [2, 0], sizes = [1, 64], strides = [1, 1]} : vector<4x64xf32> to vector<1x64xf32>
    %c23 = arith.constant 23 : index
    %c0_677 = arith.constant 0 : index
    %765 = vector.load %arg17[%c23, %c0_677] : memref<32x64xf32, #tpu.memory_space<vmem>>, vector<1x64xf32>
    tpu.vector_store %arg17[%c23, %c0_677], %764 {strides = array<i32>} : memref<32x64xf32, #tpu.memory_space<vmem>>, vector<1x64xf32>,
    %766 = vector.extract_strided_slice %759 {offsets = [3, 0], sizes = [1, 64], strides = [1, 1]} : vector<4x64xf32> to vector<1x64xf32>
    %c31 = arith.constant 31 : index
    %c0_678 = arith.constant 0 : index
    %767 = vector.load %arg17[%c31, %c0_678] : memref<32x64xf32, #tpu.memory_space<vmem>>, vector<1x64xf32>
    tpu.vector_store %arg17[%c31, %c0_678], %766 {strides = array<i32>} : memref<32x64xf32, #tpu.memory_space<vmem>>, vector<1x64xf32>,
    %c0_679 = arith.constant 0 : index
    %c0_680 = arith.constant 0 : index
    %768 = vector.load %arg17[%c0_679, %c0_680] : memref<32x64xf32, #tpu.memory_space<vmem>>, vector<8x64xf32>
    %c0_681 = arith.constant 0 : index
    %c0_682 = arith.constant 0 : index
    %c0_683 = arith.constant 0 : index
    %769 = vector.load %arg10[%c0_681, %c0_682, %c0_683] : memref<4x64x120xf32, #tpu.memory_space<vmem>>, vector<1x64x120xf32>
    %770 = vector.shape_cast %769 : vector<1x64x120xf32> to vector<64x120xf32>
    %cst_684 = arith.constant dense<0.000000e+00> : vector<8x120xf32>
    %771 = tpu.matmul %768, %770, %cst_684 {dimension_numbers = #tpu.dot_dimension_numbers<[1], [0], [0], [1], [0, 0, 1, 1], [], []>} : vector<8x64xf32>, vector<64x120xf32>, vector<8x120xf32> -> vector<8x120xf32>
    %c8_685 = arith.constant 8 : index
    %c0_686 = arith.constant 0 : index
    %772 = vector.load %arg17[%c8_685, %c0_686] : memref<32x64xf32, #tpu.memory_space<vmem>>, vector<8x64xf32>
    %c1_687 = arith.constant 1 : index
    %c0_688 = arith.constant 0 : index
    %c0_689 = arith.constant 0 : index
    %773 = vector.load %arg10[%c1_687, %c0_688, %c0_689] : memref<4x64x120xf32, #tpu.memory_space<vmem>>, vector<1x64x120xf32>
    %774 = vector.shape_cast %773 : vector<1x64x120xf32> to vector<64x120xf32>
    %cst_690 = arith.constant dense<0.000000e+00> : vector<8x120xf32>
    %775 = tpu.matmul %772, %774, %cst_690 {dimension_numbers = #tpu.dot_dimension_numbers<[1], [0], [0], [1], [0, 0, 1, 1], [], []>} : vector<8x64xf32>, vector<64x120xf32>, vector<8x120xf32> -> vector<8x120xf32>
    %776 = arith.addf %771, %775 : vector<8x120xf32>
    %c16_691 = arith.constant 16 : index
    %c0_692 = arith.constant 0 : index
    %777 = vector.load %arg17[%c16_691, %c0_692] : memref<32x64xf32, #tpu.memory_space<vmem>>, vector<8x64xf32>
    %c2_693 = arith.constant 2 : index
    %c0_694 = arith.constant 0 : index
    %c0_695 = arith.constant 0 : index
    %778 = vector.load %arg10[%c2_693, %c0_694, %c0_695] : memref<4x64x120xf32, #tpu.memory_space<vmem>>, vector<1x64x120xf32>
    %779 = vector.shape_cast %778 : vector<1x64x120xf32> to vector<64x120xf32>
    %cst_696 = arith.constant dense<0.000000e+00> : vector<8x120xf32>
    %780 = tpu.matmul %777, %779, %cst_696 {dimension_numbers = #tpu.dot_dimension_numbers<[1], [0], [0], [1], [0, 0, 1, 1], [], []>} : vector<8x64xf32>, vector<64x120xf32>, vector<8x120xf32> -> vector<8x120xf32>
    %781 = arith.addf %776, %780 : vector<8x120xf32>
    %c24_697 = arith.constant 24 : index
    %c0_698 = arith.constant 0 : index
    %782 = vector.load %arg17[%c24_697, %c0_698] : memref<32x64xf32, #tpu.memory_space<vmem>>, vector<8x64xf32>
    %c3_699 = arith.constant 3 : index
    %c0_700 = arith.constant 0 : index
    %c0_701 = arith.constant 0 : index
    %783 = vector.load %arg10[%c3_699, %c0_700, %c0_701] : memref<4x64x120xf32, #tpu.memory_space<vmem>>, vector<1x64x120xf32>
    %784 = vector.shape_cast %783 : vector<1x64x120xf32> to vector<64x120xf32>
    %cst_702 = arith.constant dense<0.000000e+00> : vector<8x120xf32>
    %785 = tpu.matmul %782, %784, %cst_702 {dimension_numbers = #tpu.dot_dimension_numbers<[1], [0], [0], [1], [0, 0, 1, 1], [], []>} : vector<8x64xf32>, vector<64x120xf32>, vector<8x120xf32> -> vector<8x120xf32>
    %786 = arith.addf %781, %785 : vector<8x120xf32>
    %c0_703 = arith.constant 0 : index
    %c0_704 = arith.constant 0 : index
    %787 = vector.load %arg11[%c0_703, %c0_704] : memref<1x120xf32, #tpu.memory_space<vmem>>, vector<1x120xf32>
    %788 = vector.broadcast %787 : vector<1x120xf32> to vector<8x120xf32>
    %789 = arith.addf %786, %788 : vector<8x120xf32>
    %c0_705 = arith.constant 0 : index
    %c0_706 = arith.constant 0 : index
    %790 = vector.load %arg12[%c0_705, %c0_706] : memref<120x84xf32, #tpu.memory_space<vmem>>, vector<120x84xf32>
    %cst_707 = arith.constant dense<0.000000e+00> : vector<8x84xf32>
    %791 = tpu.matmul %789, %790, %cst_707 {dimension_numbers = #tpu.dot_dimension_numbers<[1], [0], [0], [1], [0, 0, 1, 1], [], []>} : vector<8x120xf32>, vector<120x84xf32>, vector<8x84xf32> -> vector<8x84xf32>
    %c0_708 = arith.constant 0 : index
    %c0_709 = arith.constant 0 : index
    %792 = vector.load %arg13[%c0_708, %c0_709] : memref<1x84xf32, #tpu.memory_space<vmem>>, vector<1x84xf32>
    %793 = vector.broadcast %792 : vector<1x84xf32> to vector<8x84xf32>
    %794 = arith.addf %791, %793 : vector<8x84xf32>
    %c0_710 = arith.constant 0 : index
    %c0_711 = arith.constant 0 : index
    %795 = vector.load %arg14[%c0_710, %c0_711] : memref<84x128xf32, #tpu.memory_space<vmem>>, vector<84x128xf32>
    %cst_712 = arith.constant dense<0.000000e+00> : vector<8x128xf32>
    %796 = tpu.matmul %794, %795, %cst_712 {dimension_numbers = #tpu.dot_dimension_numbers<[1], [0], [0], [1], [0, 0, 1, 1], [], []>} : vector<8x84xf32>, vector<84x128xf32>, vector<8x128xf32> -> vector<8x128xf32>
    %c0_713 = arith.constant 0 : index
    %c0_714 = arith.constant 0 : index
    %797 = vector.load %arg15[%c0_713, %c0_714] : memref<1x128xf32, #tpu.memory_space<vmem>>, vector<1x128xf32>
    %798 = vector.broadcast %797 : vector<1x128xf32> to vector<8x128xf32>
    %799 = arith.addf %796, %798 : vector<8x128xf32>
    %cst_715 = arith.constant dense<0xFF800000> : vector<8xf32>
    %800 = vector.multi_reduction <maximumf>, %799, %cst_715 [1] : vector<8x128xf32> to vector<8xf32>
    %801 = vector.shape_cast %800 : vector<8xf32> to vector<8x1xf32>
    %802 = vector.broadcast %801 : vector<8x1xf32> to vector<8x128xf32>
    %803 = arith.subf %799, %802 : vector<8x128xf32>
    %804 = math.exp %803 : vector<8x128xf32>
    %cst_716 = arith.constant dense<0.000000e+00> : vector<8xf32>
    %805 = vector.multi_reduction <add>, %804, %cst_716 [1] : vector<8x128xf32> to vector<8xf32>
    %806 = vector.shape_cast %805 : vector<8xf32> to vector<8x1xf32>
    %807 = vector.broadcast %806 : vector<8x1xf32> to vector<8x128xf32>
    %808 = arith.divf %804, %807 : vector<8x128xf32>
    %c0_717 = arith.constant 0 : index
    %c0_718 = arith.constant 0 : index
    %809 = vector.load %arg16[%c0_717, %c0_718] : memref<8x128xf32, #tpu.memory_space<vmem>>, vector<8x128xf32>
    tpu.vector_store %arg16[%c0_717, %c0_718], %808 {strides = array<i32>} : memref<8x128xf32, #tpu.memory_space<vmem>>, vector<8x128xf32>,
    return
  }
  func.func @transform_0(%arg0: i32) -> (i32, i32, i32) {
    %c0_i32 = arith.constant 0 : i32
    %c0_i32_0 = arith.constant 0 : i32
    %c0_i32_1 = arith.constant 0 : i32
    return %arg0, %c0_i32, %c0_i32_0 : i32, i32, i32
  }
  func.func @transform_1(%arg0: i32) -> (i32, i32, i32) {
    %c0_i32 = arith.constant 0 : i32
    %c0_i32_0 = arith.constant 0 : i32
    %c0_i32_1 = arith.constant 0 : i32
    %c0_i32_2 = arith.constant 0 : i32
    return %c0_i32, %c0_i32_0, %c0_i32_1 : i32, i32, i32
  }
  func.func @transform_2(%arg0: i32) -> (i32, i32) {
    %c0_i32 = arith.constant 0 : i32
    %c0_i32_0 = arith.constant 0 : i32
    %c0_i32_1 = arith.constant 0 : i32
    return %c0_i32, %c0_i32_0 : i32, i32
  }
  func.func @transform_3(%arg0: i32) -> (i32, i32, i32) {
    %c0_i32 = arith.constant 0 : i32
    %c0_i32_0 = arith.constant 0 : i32
    %c0_i32_1 = arith.constant 0 : i32
    %c0_i32_2 = arith.constant 0 : i32
    return %c0_i32, %c0_i32_0, %c0_i32_1 : i32, i32, i32
  }
  func.func @transform_4(%arg0: i32) -> (i32, i32, i32) {
    %c0_i32 = arith.constant 0 : i32
    %c0_i32_0 = arith.constant 0 : i32
    %c0_i32_1 = arith.constant 0 : i32
    %c0_i32_2 = arith.constant 0 : i32
    return %c0_i32, %c0_i32_0, %c0_i32_1 : i32, i32, i32
  }
  func.func @transform_5(%arg0: i32) -> (i32, i32, i32) {
    %c0_i32 = arith.constant 0 : i32
    %c0_i32_0 = arith.constant 0 : i32
    %c0_i32_1 = arith.constant 0 : i32
    %c0_i32_2 = arith.constant 0 : i32
    return %c0_i32, %c0_i32_0, %c0_i32_1 : i32, i32, i32
  }
  func.func @transform_6(%arg0: i32) -> (i32, i32) {
    %c0_i32 = arith.constant 0 : i32
    %c0_i32_0 = arith.constant 0 : i32
    %c0_i32_1 = arith.constant 0 : i32
    return %c0_i32, %c0_i32_0 : i32, i32
  }
  func.func @transform_7(%arg0: i32) -> (i32, i32, i32) {
    %c0_i32 = arith.constant 0 : i32
    %c0_i32_0 = arith.constant 0 : i32
    %c0_i32_1 = arith.constant 0 : i32
    %c0_i32_2 = arith.constant 0 : i32
    return %c0_i32, %c0_i32_0, %c0_i32_1 : i32, i32, i32
  }
  func.func @transform_8(%arg0: i32) -> (i32, i32, i32) {
    %c0_i32 = arith.constant 0 : i32
    %c0_i32_0 = arith.constant 0 : i32
    %c0_i32_1 = arith.constant 0 : i32
    %c0_i32_2 = arith.constant 0 : i32
    return %c0_i32, %c0_i32_0, %c0_i32_1 : i32, i32, i32
  }
  func.func @transform_9(%arg0: i32) -> (i32, i32, i32) {
    %c0_i32 = arith.constant 0 : i32
    %c0_i32_0 = arith.constant 0 : i32
    %c0_i32_1 = arith.constant 0 : i32
    %c0_i32_2 = arith.constant 0 : i32
    return %c0_i32, %c0_i32_0, %c0_i32_1 : i32, i32, i32
  }
  func.func @transform_10(%arg0: i32) -> (i32, i32) {
    %c0_i32 = arith.constant 0 : i32
    %c0_i32_0 = arith.constant 0 : i32
    %c0_i32_1 = arith.constant 0 : i32
    return %c0_i32, %c0_i32_0 : i32, i32
  }
  func.func @transform_11(%arg0: i32) -> (i32, i32) {
    %c0_i32 = arith.constant 0 : i32
    %c0_i32_0 = arith.constant 0 : i32
    %c0_i32_1 = arith.constant 0 : i32
    return %c0_i32, %c0_i32_0 : i32, i32
  }
  func.func @transform_12(%arg0: i32) -> (i32, i32) {
    %c0_i32 = arith.constant 0 : i32
    %c0_i32_0 = arith.constant 0 : i32
    %c0_i32_1 = arith.constant 0 : i32
    return %c0_i32, %c0_i32_0 : i32, i32
  }
  func.func @transform_13(%arg0: i32) -> (i32, i32) {
    %c0_i32 = arith.constant 0 : i32
    %c0_i32_0 = arith.constant 0 : i32
    %c0_i32_1 = arith.constant 0 : i32
    return %c0_i32, %c0_i32_0 : i32, i32
  }
  func.func @transform_14(%arg0: i32) -> (i32, i32) {
    %c0_i32 = arith.constant 0 : i32
    %c0_i32_0 = arith.constant 0 : i32
    %c0_i32_1 = arith.constant 0 : i32
    return %c0_i32, %c0_i32_0 : i32, i32
  }
  func.func @transform_15(%arg0: i32) -> (i32, i32) {
    %c0_i32 = arith.constant 0 : i32
    %c0_i32_0 = arith.constant 0 : i32
    return %arg0, %c0_i32 : i32, i32
  }
}

</mosaic_0001>

<bundles_post_ra>
// kernel: lenet_forward.1
= control target key start
LH: loop header
LB: loop body
LE: loop exit
PB: predicated region body
PF: predicated region fallthrough
CT: control target
= control target key end

     0   :  { %s26631_s0 = inlined_call_operand.vmem [shape: f32[16,28,28], index: 0, kind: input, shape index: {}]   ;;  %s26632_s1 = inlined_call_operand.vmem [shape: f32[5,28,144], index: 1, kind: input, shape index: {}]   ;;  %s26633_s2 = inlined_call_operand.vmem [shape: f32[1,144], index: 2, kind: input, shape index: {}]   ;;  %s26634_s3 = inlined_call_operand.vmem [shape: f32[2,12,24], index: 3, kind: input, shape index: {}]   ;;  %s26635_s4 = inlined_call_operand.vmem [shape: f32[2,144,72], index: 4, kind: input, shape index: {}]   ;;  %s26636_s5 = inlined_call_operand.vmem [shape: f32[5,72,128], index: 5, kind: input, shape index: {}]   ;;  %s26637_s6 = inlined_call_operand.vmem [shape: f32[1,128], index: 6, kind: input, shape index: {}]   ;;  %s26638_s7 = inlined_call_operand.vmem [shape: f32[2,4,8], index: 7, kind: input, shape index: {}]   ;;  %s26639_s8 = inlined_call_operand.vmem [shape: f32[2,128,64], index: 8, kind: input, shape index: {}]   ;;  %s26640_s9 = inlined_call_operand.hbm [shape: f32[4,64,120], index: 9, kind: input, shape index: {}]   ;;  %s26641_s10 = inlined_call_operand.vmem [shape: f32[1,120], index: 10, kind: input, shape index: {}]   ;;  %s26642_s11 = inlined_call_operand.vmem [shape: f32[120,84], index: 11, kind: input, shape index: {}]   ;;  %s26643_s12 = inlined_call_operand.vmem [shape: f32[1,84], index: 12, kind: input, shape index: {}]   ;;  %s26644_s13 = inlined_call_operand.vmem [shape: f32[84,128], index: 13, kind: input, shape index: {}]   ;;  %s26645_s14 = inlined_call_operand.vmem [shape: f32[1,128], index: 14, kind: input, shape index: {}]   ;;  %s26646_s15 = inlined_call_operand.hbm [shape: f32[16,128], index: 15, kind: output, shape index: {}]  }
   0x1   :  { %26655 = sst [smem:[#allocation14_spill]] %s26640_s9 }
   0x2   :  { %20 = vsyncpa [#allocation4], 0 }
   0x3   :  { %21 = vsyncpa [#allocation5], 0 }
   0x4   :  { %23 = vsyncpa [#allocation5 + $0x1], 0  ;;  %s20800_s18 = smov 0   ;;  %s20802_s19 = smov 0  }
   0x5   :  { %s20804_s20 = smov 0   ;;  %s20806_s21 = smov 0  }
   0x6 LB: > { %26656 = sst [smem:[#allocation9_spill]] %s20698_s18  ;;  %s20821_s22 = sadd.s32 4294967295, %s20710_s21   ;;  %s20710_s21 = sphi %s20806_s21, %s26675_s21   ;;  %s20706_s20 = sphi %s20804_s20, %s26677_s20   ;;  %s20702_s19 = sphi %s20802_s19, %s26679_s19   ;;  %s20698_s18 = sphi %s20800_s18, %s26678_s18  }
   0x7   : > { %26657 = sst [smem:[#allocation10_spill]] %s20706_s20  ;;  %s14917_s23 = sadd.s32 4294967294, %s20710_s21  }
   0x8   : > { %s20825_s24 = sadd.s32 1, %s20710_s21   ;;  %s356_s25 = sadd.s32 1, %s20706_s20 }
   0x9   : > { %26658 = sst [smem:[#allocation11_spill]] %s20825_s24  ;;  %s353_s26 = ssub.s32 %s20710_s21, %s20825_s24 }
   0xa   : > { %p366_p0 = scmp.ne.s32.totalorder %s20706_s20, %s20702_s19  ;;  %p354_p1 = scmp.eq.s32.totalorder %s353_s26, 0 }
   0xb   : > { %p367_p2 = scmp.eq.s32.totalorder %s20821_s22, 1  ;;  %p372_p3 = scmp.ne.s32.totalorder %s20702_s19, %s20698_s18 }
   0xc   : > { %p373_p4 = scmp.eq.s32.totalorder %s14917_s23, 1  ;;  %p14918_p7 = scmp.ge.s32.totalorder %s20710_s21, 1 }
   0xd   : > { %s20836_s27 = scalar_select %p354_p1, %s20706_s20, %s356_s25  }
   0xe   : > { %p20838_p5 = por %p367_p2, %p366_p0  ;;  %p20842_p6 = por %p373_p4, %p372_p3 }
   0xf   : > { %26659 = sst [smem:[#allocation12_spill]] %s20836_s27  ;;  %p380_p8 = scmp.lt.s32.totalorder %s20710_s21, 3 }
  0x10   : > { %s26660_s28 = scalar_select %p20838_p5, 1, 0 }
  0x11   : > { %s26661_s29 = scalar_select %p20842_p6, 1, 0 }
  0x12   : > { %p26652_p9 = scmp.eq.s32.totalorder %s20821_s22, 0  ;;  %p20849_p10 = pnand %p14918_p7, %p380_p8 }
  0x13   : > { %26662 = sst [smem:[#allocation13_spill]] %s26661_s29  ;;  %s20712_s16 = smov [#allocation3]  }
  0x14   : > { %s26663_s30 = scalar_select %p20849_p10, 1, 0 }
  0x15   : > { %s416_s17 = sshll.u32 %s20712_s16, 4  ;;  %p20562_p11 = pneg %p20849_p10  ;;  %s417_s17 = int_to_ptr.vmem [resolvable:$true] %s416_s17 }
  0x16   : > { %s26665_s9 = sld [smem:[#allocation14_spill]] }
  0x17   : > { %p20857_p12 = pnand %p26652_p9, %p20562_p11 }
  0x19   : > { %p20618_p0 = pneg %p20857_p12 }
  0x1c   : > { %s20616_s27 = scalar_lea.hbm %s26665_s9, 4096 }
  0x1d   : > { %p20617_p13 = scmp.ne.s32.totalorder %s26665_s9, %s20616_s27  ;;  %p20623_p3 = scmp.lt.u32.totalorder %s20616_s27, %s26665_s9 }
  0x1f   : > { %p20619_p1 = pnand %p20618_p0, %p20617_p13 }
  0x21   : > { %p20620_p2 = pneg %p20619_p1 }
  0x23   : > { %p20625_p4 = pnand %p20623_p3, %p20620_p2 }
  0x25   : > { %20628 = shalt.err (!%p20625_p4)
}
  0x26   : > { %s20629_s18 = scalar_lea.vmem %s417_s17, 4096  ;;  %p20637_p9 = scmp.lt.s32.totalorder %s417_s17, %s417_s17 }
  0x27   : > { %p20630_p7 = scmp.ne.s32.totalorder %s417_s17, %s20629_s18  ;;  %p20638_p6 = scmp.lt.s32.totalorder %s20629_s18, %s20629_s18 }
  0x29   : > { %p20632_p8 = pnand %p20630_p7, %p20618_p0  ;;  %p20639_p5 = por %p20638_p6, %p20637_p9 }
  0x2b   : > { %p20633_p11 = pneg %p20632_p8 }
  0x2d   : > { %p20640_p10 = pnand %p20639_p5, %p20633_p11 }
  0x2f   : > { %20643 = shalt.err (!%p20640_p10)
}
  0x30   : > { %s20713_s20 = smov 128   ;;  %s20714_s24 = smov 8  }
  0x31   : > { %20565 = dma.hbm_to_vmem [thread:$0]  (!%p20857_p12), %s26665_s9, 4096, %s417_s17, [#allocation4], %s20713_s20, %s20713_s20, %s20714_s24  }
  0x32   : > { %p26666_p13 = scmp.ne.s32.totalorder %s26663_s30, 0 }
  0x33   : > { %p26667_p1 = scmp.eq.s32.totalorder (!%p26666_p13), %s20821_s22, 0 }
  0x34   : > { %457 = sbr.rel (%p26666_p13) target bundleno = 10986 (0x2aea), region = 80 }
  0x3b   : > { %20689 = dma.done.wait (%p26667_p1), [#allocation4], 4096   ;;  %p26668_p0 = pmov %p26667_p1 }
  0x3c   : > { %s14924_s18 = sshll.u32 %s20821_s22, 3  ;;  %v20715_v0 = vmov 0.0   ;;  %vm553_vm0 = vcmask 1043456   ;;  %vm20716_vm1 = vmmov 1   ;;  %v14928_v2 = vld [vmem:[%s26632_s1 + $0x48] sm:$0xff]  ;;  %v14930_v3 = vld [vmem:[%s26632_s1 + $0x58] sm:$0xff] }
  0x3d   : > { %20691 = vsyncadd (%p26668_p0), [#allocation4], 4294963200  ;;  %624 = vmatprep.mubr.f32.mxu0 %v20715_v0  ;;  %p507_p5 = scmp.lt.s32.totalorder %s14924_s18, 15  ;;  %1188 = vmatprep.mubr.f32.mxu1 %v20715_v0  ;;  %v14927_v4 = vld [vmem:[%s26632_s1 + $0x40] sm:$0xff]  ;;  %v18520_v5 = vpack.c.bf16 %v14930_v3, %v14928_v2  ;;  %v14929_v6 = vld [vmem:[%s26632_s1 + $0x50] sm:$0xff]  ;;  %vm538_vm3 = vcmask 1046528  }
  0x3e   : > { %vm20887_vm2 = vmpackc.low %vm553_vm0, %vm20716_vm1  ;;  %v14932_v7 = vld [vmem:[%s26632_s1 + $0x68] sm:$0xff]  ;;  %v14934_v8 = vld [vmem:[%s26632_s1 + $0x78] sm:$0xf]  ;;  %v18522_v9 = vpack.c.bf16 %v14929_v6, %v14927_v4  ;;  %vm546_vm4 = vcmask 228352   ;;  %vm747_vm5 = vcmask 1045504   ;;  %vm865_vm6 = vcmask 1044480  }
  0x3f   : > { %s26681_s18 = smov (!%p507_p5, %s14924_s18), 15  ;;  %v18524_v10 = vpack.c.bf16 %v14934_v8, %v14932_v7  ;;  %v14931_v11 = vld [vmem:[%s26632_s1 + $0x60] sm:$0xff]  ;;  %v14933_v12 = vld [vmem:[%s26632_s1 + $0x70] sm:$0xf]  ;;  %18521 = vmatprep.subr.bf16.mxu0 %v18520_v5  ;;  %v518_v15 = vld [vmem:[%s26632_s1 + $0x8] sm:$0xff]  ;;  %vm1117_vm7 = vcmask 195584  }
  0x40   : > { %s16137_s27 = sshll.u32 %s26681_s18, 5  ;;  %v520_v16 = vld [vmem:[%s26632_s1 + $0x18] sm:$0xff]  ;;  %18523 = vmatpush1.bf16.msra.mxu0 %v18522_v9  ;;  %v18527_v17 = vpack.c.bf16 %v14933_v12, %v14931_v11  ;;  %v517_v21 = vld [vmem:[%s26632_s1] sm:$0xff]  ;;  %v519_v22 = vld [vmem:[%s26632_s1 + $0x10] sm:$0xff]  ;;  %vm1309_vm8 = vcmask 130048   ;;  %vm20718_vm9 = vmmov 0  }
  0x41   : > { %s20894_s17 = scalar_lea.vmem %s26631_s0, %s16137_s27  ;;  %18526 = vmatprep.subr.msk.bf16.mxu0 %vm20887_vm2, %v18524_v10  ;;  %v18530_v20 = vpack.c.bf16 %v520_v16, %v518_v15  ;;  %v522_v24 = vld [vmem:[%s26632_s1 + $0x28] sm:$0xff]  ;;  %v524_v25 = vld [vmem:[%s26632_s1 + $0x38] sm:$0xf]  ;;  %v18532_v27 = vpack.c.bf16 %v519_v22, %v517_v21  ;;  %v521_v31 = vld [vmem:[%s26632_s1 + $0x20] sm:$0xff]  ;;  %vm1511_vm10 = vcmask 588800   ;;  %vm1924_vm11 = vcmask 64512  }
  0x42   : > { %v20921_v13 = vld [vmem:[%s20894_s17] sm:$0xff]  ;;  %v20924_v14 = vld [vmem:[%s20894_s17 + $0x8] sm:$0xff]  ;;  %v20943_v23 = vld [vmem:[%s20894_s17 + $0x10] sm:$0xff]  ;;  %v18534_v30 = vpack.c.bf16 %v524_v25, %v522_v24  ;;  %vm2248_vm12 = vcmask 516096   ;;  %vm2250_vm13 = vcmask 517121   ;;  %vm2252_vm14 = vcmask 518146  }
  0x43   : > { %v539_v18 = vrot.slane %v20921_v13, 1  ;;  %v540_v19 = vrot.slane %v20924_v14, 1  ;;  %v542_v28 = vrot.slane %v20943_v23, 1  ;;  %v20956_v29 = vld [vmem:[%s20894_s17 + $0x18] sm:$0xf]  ;;  %v14946_v33 = vld [vmem:[%s26632_s1 + $0x88] sm:$0xff] }
  0x44   : > { %18529 = vmatpush1.bf16.msk.msra.mxu0 %vm20887_vm2, %v18527_v17  ;;  %v523_v32 = vld [vmem:[%s26632_s1 + $0x30] sm:$0xf]  ;;  %v14948_v34 = vld [vmem:[%s26632_s1 + $0x98] sm:$0xff]  ;;  %v544_v36 = vrot.slane %v20956_v29, 1  ;;  %v14945_v40 = vld [vmem:[%s26632_s1 + $0x80] sm:$0xff]  ;;  %v748_v52 = vrot.slane %v20921_v13, 2 }
  0x45   : > { %v541_v26 = vsel %vm538_vm3, %v539_v18, %v540_v19  ;;  %18531 = vmatprep.subr.bf16.mxu0 %v18530_v20  ;;  %v543_v35 = vsel %vm538_vm3, %v540_v19, %v542_v28  ;;  %v18537_v37 = vpack.c.bf16 %v523_v32, %v521_v31  ;;  %v18540_v38 = vpack.c.bf16 %v14948_v34, %v14946_v33  ;;  %v14947_v41 = vld [vmem:[%s26632_s1 + $0x90] sm:$0xff]  ;;  %v14950_v42 = vld [vmem:[%s26632_s1 + $0xa8] sm:$0xff]  ;;  %v14952_v43 = vld [vmem:[%s26632_s1 + $0xb8] sm:$0xf]  ;;  %s503_s29 = sand.u32 1, %s20702_s19   ;;  %s16134_s23 = sshll.u32 %s20821_s22, 7 }
  0x46   : > { %v545_v39 = vsel %vm538_vm3, %v542_v28, %v544_v36  ;;  %v18542_v44 = vpack.c.bf16 %v14947_v41, %v14945_v40  ;;  %v18544_v45 = vpack.c.bf16 %v14952_v43, %v14950_v42  ;;  %v14949_v46 = vld [vmem:[%s26632_s1 + $0xa0] sm:$0xff]  ;;  %v14951_v47 = vld [vmem:[%s26632_s1 + $0xb0] sm:$0xf]  ;;  %v14959_v48 = vld [vmem:[%s26632_s1 + $0xc8] sm:$0xff]  ;;  %v749_v53 = vrot.slane %v20924_v14, 2  ;;  %s14923_s30 = sshll.u32 %s503_s29, 3  ;;  %s26589_s25 = scalar_lea.hbm %s26646_s15, %s16134_s23 }
  0x47   : > { %14937 = vmatmul.mubr.msk.f32.vlgmr.msra.gmra.mrb[0].mxu0 %vm546_vm4, %v541_v26  ;;  %v14961_v49 = vld [vmem:[%s26632_s1 + $0xd8] sm:$0xff]  ;;  %v18547_v50 = vpack.c.bf16 %v14951_v47, %v14949_v46  ;;  %v14958_v54 = vld [vmem:[%s26632_s1 + $0xc0] sm:$0xff]  ;;  %v14960_v55 = vld [vmem:[%s26632_s1 + $0xd0] sm:$0xff]  ;;  %v751_v60 = vrot.slane %v20943_v23, 2  ;;  %v753_v5 = vrot.slane %v20956_v29, 2  ;;  %v866_v9 = vrot.slane %v20921_v13, 3 }
  0x48   : > { %630 = vmatprep.mubr.f32.mxu0 %v20715_v0  ;;  %18533 = vmatpush1.bf16.msra.mxu0 %v18532_v27  ;;  %v18550_v51 = vpack.c.bf16 %v14961_v49, %v14959_v48  ;;  %v14963_v56 = vld [vmem:[%s26632_s1 + $0xe8] sm:$0xff]  ;;  %v14965_v57 = vld [vmem:[%s26632_s1 + $0xf8] sm:$0xf]  ;;  %v750_v58 = vsel %vm747_vm5, %v748_v52, %v749_v53  ;;  %v18552_v59 = vpack.c.bf16 %v14960_v55, %v14958_v54  ;;  %v14962_v62 = vld [vmem:[%s26632_s1 + $0xe0] sm:$0xff]  ;;  %v867_v10 = vrot.slane %v20924_v14, 3  ;;  %s505_s16 = scalar_lea.vmem [#allocation6], %s14923_s30 }
  0x49   : > { %18536 = vmatprep.subr.msk.bf16.mxu0 %vm20887_vm2, %v18534_v30  ;;  %v18554_v61 = vpack.c.bf16 %v14965_v57, %v14963_v56  ;;  %v14964_v63 = vld [vmem:[%s26632_s1 + $0xf0] sm:$0xf]  ;;  %v14972_v2 = vld [vmem:[%s26632_s1 + $0x108] sm:$0xff]  ;;  %v14974_v3 = vld [vmem:[%s26632_s1 + $0x118] sm:$0xff]  ;;  %v752_v4 = vsel %vm747_vm5, %v749_v53, %v751_v60  ;;  %v754_v8 = vsel %vm747_vm5, %v751_v60, %v753_v5  ;;  %v869_v19 = vrot.slane %v20943_v23, 3  ;;  %s14833_s9 = scalar_lea.sflag [#allocation5], %s503_s29 }
  0x4a   : > { %v18557_v6 = vpack.c.bf16 %v14964_v63, %v14962_v62  ;;  %v18560_v7 = vpack.c.bf16 %v14974_v3, %v14972_v2  ;;  %v14971_v11 = vld [vmem:[%s26632_s1 + $0x100] sm:$0xff]  ;;  %v14973_v12 = vld [vmem:[%s26632_s1 + $0x110] sm:$0xff]  ;;  %v14976_v15 = vld [vmem:[%s26632_s1 + $0x128] sm:$0xff]  ;;  %v868_v17 = vsel %vm865_vm6, %v866_v9, %v867_v10  ;;  %v871_v25 = vrot.slane %v20956_v29, 3  ;;  %p26671_p9 = scmp.ne.s32.totalorder %s26660_s28, 0  ;;  %s20719_s22 = smov [#allocation6]  }
  0x4b   : > { %14938 = vmatmul.mubr.msk.f32.gmra.mrb[2].mxu0 %vm546_vm4, %v543_v35  ;;  %v14978_v16 = vld [vmem:[%s26632_s1 + $0x138] sm:$0xf]  ;;  %v18562_v18 = vpack.c.bf16 %v14973_v12, %v14971_v11  ;;  %v14975_v21 = vld [vmem:[%s26632_s1 + $0x120] sm:$0xff]  ;;  %v14977_v22 = vld [vmem:[%s26632_s1 + $0x130] sm:$0xf]  ;;  %v870_v24 = vsel %vm865_vm6, %v867_v10, %v869_v19  ;;  %v983_v28 = vrot.slane %v20921_v13, 4 }
  0x4c   : > { %636 = vmatprep.mubr.f32.mxu0 %v20715_v0  ;;  %18539 = vmatpush1.bf16.msk.msra.mxu0 %vm20887_vm2, %v18537_v37  ;;  %v18564_v20 = vpack.c.bf16 %v14978_v16, %v14976_v15  ;;  %v18567_v26 = vpack.c.bf16 %v14977_v22, %v14975_v21  ;;  %v872_v27 = vsel %vm865_vm6, %v869_v19, %v871_v25  ;;  %v984_v30 = vrot.slane %v20924_v14, 4  ;;  %v1091_v37 = vld [vmem:[%s26633_s2] sm:$0x3]  ;;  %v1292_v63 = vld [vmem:[%s26635_s4 + $0x8] sm:$0xff]  ;;  %v14986_v2 = vld [vmem:[%s26634_s3 + $0x10] sm:$0xff]  ;;  %s20648_s18 = sshll.u32 %s20719_s22, 4  ;;  %s20649_s18 = int_to_ptr.vmem [resolvable:$false] %s20648_s18 }
  0x4d   : > { %18541 = vmatprep.subr.bf16.mxu0 %v18540_v38  ;;  %v986_v32 = vrot.slane %v20943_v23, 4  ;;  %v988_v34 = vrot.slane %v20956_v29, 4  ;;  %v1115_v60 = vld [vmem:[%s26634_s3] sm:$0xff]  ;;  %v1294_v5 = vld [vmem:[%s26635_s4 + $0x18] sm:$0xff]  ;;  %v1296_v9 = vld [vmem:[%s26635_s4 + $0x28] sm:$0xff]  ;;  %vm2254_vm15 = vcmask 519171  }
  0x4e   : > { %v985_v31 = vsel %vm553_vm0, %v983_v28, %v984_v30  ;;  %v1291_v62 = vld [vmem:[%s26635_s4] sm:$0xff]  ;;  %v1297_v11 = vld [vmem:[%s26635_s4 + $0x30] sm:$0xff]  ;;  %v1298_v12 = vld [vmem:[%s26635_s4 + $0x38] sm:$0xff]  ;;  %vm14308_vm1 = vcmask 523264   ;;  %s20650_s27 = scalar_lea.vmem %s20649_s18, 256 }
  0x4f   : > { %14939 = vmatmul.mubr.msk.f32.gmra.mrb[4].mxu0 %vm546_vm4, %v545_v39  ;;  %v987_v33 = vsel %vm553_vm0, %v984_v30, %v986_v32  ;;  %v18579_v3 = vpack.c.bf16 %v1292_v63, %v1291_v62  ;;  %v18588_v15 = vpack.c.bf16 %v1298_v12, %v1297_v11  ;;  %v1299_v16 = vld [vmem:[%s26635_s4 + $0x40] sm:$0xff]  ;;  %v1301_v19 = vld [vmem:[%s26635_s4 + $0x50] sm:$0xff]  ;;  %v15005_v63 = vld [vmem:[%s26635_s4 + $0xf8] sm:$0xff] }
  0x50   : > { %719 = vmatprep.mubr.f32.mxu0 %v20715_v0  ;;  %v1303_v22 = vld [vmem:[%s26635_s4 + $0x60] sm:$0xff]  ;;  %v15004_v62 = vld [vmem:[%s26635_s4 + $0xf0] sm:$0xff] }
  0x51   : > { %v1307_v30 = vld [vmem:[%s26635_s4 + $0x80] sm:$0xff]  ;;  %v15023_v11 = vld [vmem:[%s26636_s5 + $0x90] sm:$0xff] }
  0x53   : > { %14942 = vmatmul.mubr.msk.f32.vlgmr.msra.gmra.mrb[0].mxu0 %vm546_vm4, %v20921_v13  ;;  %v989_v13 = vsel %vm553_vm0, %v986_v32, %v988_v34 }
  0x54   : > { %725 = vmatprep.mubr.f32.mxu0 %v20715_v0  ;;  %18543 = vmatpush1.bf16.msra.mxu0 %v18542_v44 }
  0x55   : > { %18546 = vmatprep.subr.msk.bf16.mxu0 %vm20887_vm2, %v18544_v45 }
  0x57   : > { %14943 = vmatmul.mubr.msk.f32.gmra.mrb[2].mxu0 %vm546_vm4, %v20924_v14  ;;  %v20717_v14 = vmov 0.0|0.0  }
  0x58   : > { %731 = vmatprep.mubr.f32.mxu0 %v20715_v0  ;;  %18549 = vmatpush1.bf16.msk.msra.mxu0 %vm20887_vm2, %v18547_v50 }
  0x59   : > { %18551 = vmatprep.subr.bf16.mxu0 %v18550_v51 }
  0x5b   : > { %14944 = vmatmul.mubr.msk.f32.gmra.mrb[4].mxu0 %vm546_vm4, %v20943_v23  ;;  %v1093_v23 = vlaneseq }
  0x5c   : > { %831 = vmatprep.mubr.f32.mxu0 %v20715_v0 }
  0x5d   : > { %v1094_v35 = vshrl.u32 %v1093_v23, 7 }
  0x5f   : > { %14955 = vmatmul.mubr.msk.f32.vlgmr.msra.gmra.mrb[0].mxu0 %vm546_vm4, %v750_v58  ;;  %v21109_v36 = vsub.s32 0, %v1094_v35  ;;  %v21114_v29 = vsub.s32 1, %v1094_v35  ;;  %v14992_v35 = vld [vmem:[%s26635_s4 + $0x90] sm:$0xff] }
  0x60   : > { %837 = vmatprep.mubr.f32.mxu0 %v20715_v0  ;;  %18553 = vmatpush1.bf16.msra.mxu0 %v18552_v59 }
  0x61   : > { %18556 = vmatprep.subr.msk.bf16.mxu0 %vm20887_vm2, %v18554_v61  ;;  %v1096_v38 = vrot.slane %v1091_v37, %v21109_v36  ;;  %v1100_v40 = vrot.slane %v1091_v37, %v21114_v29  ;;  %v1116_v61 = vld [vmem:[%s26634_s3 + $0x8] sm:$0xf]  ;;  %v14993_v37 = vld [vmem:[%s26635_s4 + $0x98] sm:$0xff] }
  0x63   : > { %14956 = vmatmul.mubr.msk.f32.gmra.mrb[2].mxu0 %vm546_vm4, %v752_v4  ;;  %v1293_v4 = vld [vmem:[%s26635_s4 + $0x10] sm:$0xff] }
  0x64   : > { %843 = vmatprep.mubr.f32.mxu0 %v20715_v0  ;;  %18559 = vmatpush1.bf16.msk.msra.mxu0 %vm20887_vm2, %v18557_v6  ;;  %v14987_v6 = vld [vmem:[%s26634_s3 + $0x18] sm:$0xf] }
  0x65   : > { %18561 = vmatprep.subr.bf16.mxu0 %v18560_v7  ;;  %v18582_v7 = vpack.c.bf16 %v1294_v5, %v1293_v4  ;;  %v15007_v4 = vld [vmem:[%s26635_s4 + $0x108] sm:$0xff] }
  0x67   : > { %14957 = vmatmul.mubr.msk.f32.gmra.mrb[4].mxu0 %vm546_vm4, %v754_v8  ;;  %v1295_v8 = vld [vmem:[%s26635_s4 + $0x20] sm:$0xff] }
  0x68   : > { %949 = vmatprep.mubr.f32.mxu0 %v20715_v0  ;;  %v18585_v10 = vpack.c.bf16 %v1296_v9, %v1295_v8  ;;  %v15012_v9 = vld [vmem:[%s26636_s5 + $0x48] sm:$0xff] }
  0x6b   : > { %14968 = vmatmul.mubr.msk.f32.vlgmr.msra.gmra.mrb[0].mxu0 %vm546_vm4, %v868_v17  ;;  %v1300_v17 = vld [vmem:[%s26635_s4 + $0x48] sm:$0xff] }
  0x6c   : > { %955 = vmatprep.mubr.f32.mxu0 %v20715_v0  ;;  %18563 = vmatpush1.bf16.msra.mxu0 %v18562_v18  ;;  %v18591_v18 = vpack.c.bf16 %v1300_v17, %v1299_v16  ;;  %v15014_v16 = vld [vmem:[%s26636_s5 + $0x58] sm:$0xff]  ;;  %v15015_v17 = vld [vmem:[%s26636_s5 + $0x60] sm:$0xff] }
  0x6d   : > { %18566 = vmatprep.subr.msk.bf16.mxu0 %vm20887_vm2, %v18564_v20  ;;  %v1302_v20 = vld [vmem:[%s26635_s4 + $0x58] sm:$0xff] }
  0x6e   : > { %v18594_v21 = vpack.c.bf16 %v1302_v20, %v1301_v19  ;;  %v15025_v19 = vld [vmem:[%s26636_s5 + $0xa0] sm:$0xff]  ;;  %v15026_v20 = vld [vmem:[%s26636_s5 + $0xa8] sm:$0xff] }
  0x6f   : > { %14969 = vmatmul.mubr.msk.f32.gmra.mrb[2].mxu0 %vm546_vm4, %v870_v24  ;;  %v1304_v24 = vld [vmem:[%s26635_s4 + $0x68] sm:$0xff] }
  0x70   : > { %961 = vmatprep.mubr.f32.mxu0 %v20715_v0  ;;  %18569 = vmatpush1.bf16.msk.msra.mxu0 %vm20887_vm2, %v18567_v26  ;;  %v18597_v25 = vpack.c.bf16 %v1304_v24, %v1303_v22  ;;  %v1305_v26 = vld [vmem:[%s26635_s4 + $0x70] sm:$0xff]  ;;  %v18660_v22 = vpack.c.bf16 %v15026_v20, %v15025_v19  ;;  %v15016_v24 = vld [vmem:[%s26636_s5 + $0x68] sm:$0xff]  ;;  %v1494_v19 = vld [vmem:[%s26636_s5 + $0x38] sm:$0xff] }
  0x71   : > { %18632 = vmatprep.subr.bf16.mxu0 %v20717_v14  ;;  %v15049_v20 = vld [vmem:[%s26636_s5 + $0x150] sm:$0xff] }
  0x73   : > { %14970 = vmatmul.mubr.msk.f32.gmra.mrb[4].mxu0 %vm546_vm4, %v872_v27  ;;  %v1306_v27 = vld [vmem:[%s26635_s4 + $0x78] sm:$0xff] }
  0x74   : > { %1066 = vmatprep.mubr.f32.mxu0 %v20715_v0  ;;  %v18600_v28 = vpack.c.bf16 %v1306_v27, %v1305_v26  ;;  %v15027_v26 = vld [vmem:[%s26636_s5 + $0xb0] sm:$0xff] }
  0x77   : > { %14981 = vmatmul.mubr.msk.f32.vlgmr.msra.gmra.mrb[0].mxu0 %vm546_vm4, %v985_v31  ;;  %v1308_v31 = vld [vmem:[%s26635_s4 + $0x88] sm:$0xff] }
  0x78   : > { %1072 = vmatprep.mubr.f32.mxu0 %v20715_v0  ;;  %v18603_v32 = vpack.c.bf16 %v1308_v31, %v1307_v30  ;;  %v15018_v31 = vld [vmem:[%s26636_s5 + $0x78] sm:$0xff] }
  0x7b   : > { %14982 = vmatmul.mubr.msk.f32.gmra.mrb[2].mxu0 %vm546_vm4, %v987_v33 }
  0x7c   : > { %1078 = vmatprep.mubr.f32.mxu0 %v20715_v0 }
  0x7f   : > { %14983 = vmatmul.mubr.msk.f32.gmra.mrb[4].mxu0 %vm546_vm4, %v989_v13 }
  0x80   : > { %16924 = vmatprep.mubr.msk.f32.mxu0 %vm20718_vm9, %v20715_v0 }
 0x14a   : > { %v1068_v39 = vpop.f32.mrb[0].mxu0 }
 0x14b   : > { %v1070_v41 = vpop.f32.mrb[1].mxu0  ;;  %v1103_v42 = vadd.f32 %v1096_v38, %v1068_v39 }
 0x14c   : > { %v1104_v43 = vadd.f32 %v1100_v40, %v1070_v41 }
 0x14d   : > { %v1109_v48 = vmax.f32 %v1103_v42, 0.0  ;;  %v18606_v42 = vpack.c.bf16 %v14993_v37, %v14992_v35  ;;  %v15020_v35 = vld [vmem:[%s26636_s5 + $0x88] sm:$0xff]  ;;  %v15031_v37 = vld [vmem:[%s26636_s5 + $0xd0] sm:$0xff] }
 0x14e   : > { %v1074_v44 = vpop.f32.mrb[2].mxu0  ;;  %v1110_v50 = vmax.f32 %v1104_v43, 0.0  ;;  %v14994_v43 = vld [vmem:[%s26635_s4 + $0xa0] sm:$0xff] }
 0x14f   : > { %v1105_v45 = vadd.f32 %v1096_v38, %v1074_v44  ;;  %v1076_v46 = vpop.f32.mrb[3].mxu0  ;;  %v14995_v44 = vld [vmem:[%s26635_s4 + $0xa8] sm:$0xff] }
 0x150   : > { %v1106_v47 = vadd.f32 %v1100_v40, %v1076_v46 }
 0x151   : > { %v1111_v49 = vmax.f32 %v1105_v45, 0.0 }
 0x152   : > { %v1112_v51 = vmax.f32 %v1106_v47, 0.0  ;;  %v1080_v52 = vpop.f32.mrb[4].mxu0 }
 0x153   : > { %v1082_v53 = vpop.f32.mrb[5].mxu0  ;;  %v18572_v54 = vpack.c.bf16 %v1111_v49, %v1109_v48  ;;  %v1107_v57 = vadd.f32 %v1096_v38, %v1080_v52  ;;  %v18609_v49 = vpack.c.bf16 %v14995_v44, %v14994_v43 }
 0x154   : > { %v1108_v55 = vadd.f32 %v1100_v40, %v1082_v53  ;;  %v18570_v56 = vpack.c.bf16 %v1112_v51, %v1110_v50  ;;  %v14996_v50 = vld [vmem:[%s26635_s4 + $0xb0] sm:$0xff]  ;;  %v14997_v51 = vld [vmem:[%s26635_s4 + $0xb8] sm:$0xff]  ;;  %v14998_v53 = vld [vmem:[%s26635_s4 + $0xc0] sm:$0xff] }
 0x155   : > { %v1113_v59 = vmax.f32 %v1107_v57, 0.0  ;;  %v18612_v52 = vpack.c.bf16 %v14997_v51, %v14996_v50  ;;  %v15001_v57 = vld [vmem:[%s26635_s4 + $0xd8] sm:$0xff] }
 0x156   : > { %v1114_v58 = vmax.f32 %v1108_v55, 0.0  ;;  %18571 = vmatprep.subr.bf16.mxu1 %v18570_v56 }
 0x157   : > { %18573 = vmatpush1.bf16.msra.mxu1 %v18572_v54 }
 0x158   : > { %1128 = vmatprep.subr.mxu1 %v1114_v58 }
 0x15b   : > { %1129 = vmatpush1.msra.mxu1 %v1113_v59 }
 0x15c   : > { %14984 = vmatmul.mubr.msk.f32.vlgmr.msra.gmra.mrb[0].mxu1 %vm1117_vm7, %v1115_v60  ;;  %18575 = vmatprep.subr.bf16.mxu1 %v18570_v56  ;;  %v15000_v56 = vld [vmem:[%s26635_s4 + $0xd0] sm:$0xff]  ;;  %v15003_v60 = vld [vmem:[%s26635_s4 + $0xe8] sm:$0xff] }
 0x15d   : > { %18577 = vmatpush1.bf16.msra.mxu1 %v18572_v54  ;;  %1194 = vmatprep.mubr.f32.mxu1 %v20715_v0  ;;  %v14999_v54 = vld [vmem:[%s26635_s4 + $0xc8] sm:$0xff] }
 0x15e   : > { %1214 = vmatprep.subr.mxu1 %v1114_v58  ;;  %v18615_v55 = vpack.c.bf16 %v14999_v54, %v14998_v53  ;;  %v18618_v58 = vpack.c.bf16 %v15001_v57, %v15000_v56 }
 0x160   : > { %14985 = vmatmul.mubr.msk.f32.gmra.mrb[2].mxu1 %vm1117_vm7, %v1116_v61 }
 0x161   : > { %1215 = vmatpush1.msra.mxu1 %v1113_v59  ;;  %1274 = vmatprep.mubr.f32.mxu1 %v20715_v0  ;;  %v15002_v59 = vld [vmem:[%s26635_s4 + $0xe0] sm:$0xff] }
 0x162   : > { %18578 = vmatprep.subr.bf16.mxu1 %v20717_v14  ;;  %v18621_v61 = vpack.c.bf16 %v15003_v60, %v15002_v59 }
 0x164   : > { %14988 = vmatmul.mubr.msk.f32.vlgmr.msra.gmra.mrb[4].mxu1 %vm1117_vm7, %v14986_v2  ;;  %v18624_v2 = vpack.c.bf16 %v15005_v63, %v15004_v62  ;;  %v1489_v62 = vld [vmem:[%s26636_s5 + $0x10] sm:$0xff]  ;;  %v1490_v63 = vld [vmem:[%s26636_s5 + $0x18] sm:$0xff] }
 0x165   : > { %1280 = vmatprep.mubr.f32.mxu1 %v20715_v0  ;;  %18580 = vmatpush1.bf16.msra.mxu1 %v18579_v3  ;;  %v15006_v3 = vld [vmem:[%s26635_s4 + $0x100] sm:$0xff] }
 0x166   : > { %18581 = vmatprep.subr.bf16.mxu1 %v20717_v14  ;;  %v18627_v5 = vpack.c.bf16 %v15007_v4, %v15006_v3  ;;  %v15046_v3 = vld [vmem:[%s26636_s5 + $0x138] sm:$0xff] }
 0x168   : > { %14989 = vmatmul.mubr.msk.f32.gmra.mrb[6].mxu1 %vm1117_vm7, %v14987_v6  ;;  %v15008_v6 = vld [vmem:[%s26635_s4 + $0x110] sm:$0xff] }
 0x169   : > { %18583 = vmatpush1.bf16.msra.mxu1 %v18582_v7  ;;  %v15009_v7 = vld [vmem:[%s26635_s4 + $0x118] sm:$0xff] }
 0x16a   : > { %18584 = vmatprep.subr.bf16.mxu1 %v20717_v14  ;;  %v18630_v8 = vpack.c.bf16 %v15009_v7, %v15008_v6 }
 0x16d   : > { %18586 = vmatpush1.bf16.msra.mxu1 %v18585_v10  ;;  %v15013_v10 = vld [vmem:[%s26636_s5 + $0x50] sm:$0xff] }
 0x16e   : > { %18587 = vmatprep.subr.bf16.mxu1 %v20717_v14  ;;  %v18633_v12 = vpack.c.bf16 %v15013_v10, %v15012_v9  ;;  %v1491_v10 = vld [vmem:[%s26636_s5 + $0x20] sm:$0xff] }
 0x170   : > { %18634 = vmatpush3.bf16.msra.mxu0 %v18633_v12  ;;  %v15047_v12 = vld [vmem:[%s26636_s5 + $0x140] sm:$0xff] }
 0x171   : > { %18589 = vmatpush1.bf16.msra.mxu1 %v18588_v15  ;;  %v15024_v15 = vld [vmem:[%s26636_s5 + $0x98] sm:$0xff]  ;;  %18635 = vmatprep.subr.bf16.mxu0 %v20717_v14 }
 0x172   : > { %18590 = vmatprep.subr.bf16.mxu1 %v20717_v14 }
 0x175   : > { %18592 = vmatpush1.bf16.msra.mxu1 %v18591_v18  ;;  %v18657_v18 = vpack.c.bf16 %v15024_v15, %v15023_v11  ;;  %v1492_v11 = vld [vmem:[%s26636_s5 + $0x28] sm:$0xff] }
 0x176   : > { %18593 = vmatprep.subr.bf16.mxu1 %v20717_v14  ;;  %v15048_v15 = vld [vmem:[%s26636_s5 + $0x148] sm:$0xff] }
 0x179   : > { %18595 = vmatpush1.bf16.msra.mxu1 %v18594_v21  ;;  %v18636_v21 = vpack.c.bf16 %v15015_v17, %v15014_v16  ;;  %v18651_v16 = vpack.c.bf16 %v1492_v11, %v1491_v10  ;;  %v18687_v17 = vpack.c.bf16 %v15048_v15, %v15047_v12  ;;  %v1923_v15 = vld [vmem:[%s26638_s7] sm:$0xf] }
 0x17a   : > { %18596 = vmatprep.subr.bf16.mxu1 %v20717_v14 }
 0x17b   : > { %18637 = vmatpush3.bf16.msra.mxu0 %v18636_v21  ;;  %v15050_v21 = vld [vmem:[%s26636_s5 + $0x158] sm:$0xff] }
 0x17c   : > { %18638 = vmatprep.subr.bf16.mxu0 %v20717_v14 }
 0x17d   : > { %18598 = vmatpush1.bf16.msra.mxu1 %v18597_v25  ;;  %v15017_v25 = vld [vmem:[%s26636_s5 + $0x70] sm:$0xff] }
 0x17e   : > { %18599 = vmatprep.subr.bf16.mxu1 %v20717_v14  ;;  %v18639_v27 = vpack.c.bf16 %v15017_v25, %v15016_v24  ;;  %v18690_v24 = vpack.c.bf16 %v15050_v21, %v15049_v20  ;;  %v15033_v25 = vld [vmem:[%s26636_s5 + $0xd8] sm:$0xff]  ;;  %v2076_v20 = vld [vmem:[%s26639_s8 + $0x10] sm:$0xff] }
 0x17f   : > { %v2077_v21 = vld [vmem:[%s26639_s8 + $0x18] sm:$0xff] }
 0x180   : > { %18640 = vmatpush3.bf16.msra.mxu0 %v18639_v27  ;;  %v1495_v27 = vld [vmem:[%s26636_s5 + $0x40] sm:$0xff] }
 0x181   : > { %18601 = vmatpush1.bf16.msra.mxu1 %v18600_v28  ;;  %v15028_v28 = vld [vmem:[%s26636_s5 + $0xb8] sm:$0xff]  ;;  %18641 = vmatprep.subr.bf16.mxu0 %v20717_v14 }
 0x182   : > { %18602 = vmatprep.subr.bf16.mxu1 %v20717_v14  ;;  %v18663_v30 = vpack.c.bf16 %v15028_v28, %v15027_v26  ;;  %v15034_v26 = vld [vmem:[%s26636_s5 + $0xe0] sm:$0xff] }
 0x183   : > { %v15051_v28 = vld [vmem:[%s26636_s5 + $0x160] sm:$0xff] }
 0x185   : > { %18604 = vmatpush1.bf16.msra.mxu1 %v18603_v32  ;;  %v15019_v32 = vld [vmem:[%s26636_s5 + $0x80] sm:$0xff] }
 0x186   : > { %18605 = vmatprep.subr.bf16.mxu1 %v20717_v14 }
 0x22f   : > { %v1190_v33 = vpop.f32.mrb[0].mxu1 }
 0x230   : > { %v1192_v34 = vpop.f32.mrb[1].mxu1 }
 0x233   : > { %v1196_v13 = vpop.f32.mrb[2].mxu1 }
 0x234   : > { %v1198_v23 = vpop.f32.mrb[3].mxu1 }
 0x237   : > { %v1276_v38 = vpop.f32.mrb[4].mxu1 }
 0x238   : > { %v1287_v39 = vmax.f32 %v1190_v33, %v1276_v38  ;;  %v1278_v40 = vpop.f32.mrb[5].mxu1  ;;  %v15029_v33 = vld [vmem:[%s26636_s5 + $0xc0] sm:$0xff] }
 0x239   : > { %v1288_v41 = vmax.f32 %v1192_v34, %v1278_v40  ;;  %v18642_v34 = vpack.c.bf16 %v15019_v32, %v15018_v31  ;;  %v15035_v31 = vld [vmem:[%s26636_s5 + $0xe8] sm:$0xff]  ;;  %v15036_v32 = vld [vmem:[%s26636_s5 + $0xf0] sm:$0xff] }
 0x23b   : > { %v1282_v45 = vpop.f32.mrb[6].mxu1  ;;  %14990 = vmatprep.mubr.msk.f32.mxu1 %vm1309_vm8, %v1288_v41  ;;  %18643 = vmatpush3.bf16.msra.mxu0 %v18642_v34  ;;  %v15037_v34 = vld [vmem:[%s26636_s5 + $0xf8] sm:$0xff] }
 0x23c   : > { %v1289_v46 = vmax.f32 %v1196_v13, %v1282_v45  ;;  %v1284_v47 = vpop.f32.mrb[7].mxu1  ;;  %1381 = vmatmul.mubr.f32.vlgmr.msra.gmra.mrb[8].mxu1 %v1287_v39  ;;  %v15030_v13 = vld [vmem:[%s26636_s5 + $0xc8] sm:$0xff]  ;;  %16922 = vmatprep.subr.mxu0 %v20715_v0  ;;  %v1487_v45 = vld [vmem:[%s26636_s5] sm:$0xff] }
 0x23d   : > { %v1290_v48 = vmax.f32 %v1198_v23, %v1284_v47  ;;  %18607 = vmatpush1.bf16.msra.mxu1 %v18606_v42  ;;  %v18666_v23 = vpack.c.bf16 %v15030_v13, %v15029_v33  ;;  %v15043_v47 = vld [vmem:[%s26636_s5 + $0x120] sm:$0xff]  ;;  %v18672_v33 = vpack.c.bf16 %v15036_v32, %v15035_v31  ;;  %v2083_v32 = vld [vmem:[%s26639_s8 + $0x48] sm:$0xff] }
 0x23e   : > { %18608 = vmatprep.subr.bf16.mxu1 %v20717_v14  ;;  %v15038_v13 = vld [vmem:[%s26636_s5 + $0x100] sm:$0xff] }
 0x23f   : > { %14991 = vmatprep.mubr.msk.f32.mxu1 %vm1309_vm8, %v1290_v48  ;;  %16923 = vmatpush3.msra.mxu0 %v15020_v35  ;;  %v15039_v35 = vld [vmem:[%s26636_s5 + $0x108] sm:$0xff]  ;;  %v2082_v31 = vld [vmem:[%s26639_s8 + $0x40] sm:$0xff] }
 0x240   : > { %1386 = vmatmul.mubr.f32.gmra.mrb[10].mxu1 %v1289_v46  ;;  %18644 = vmatprep.subr.bf16.mxu0 %v20717_v14 }
 0x241   : > { %18610 = vmatpush1.bf16.msra.mxu1 %v18609_v49  ;;  %15010 = vmatprep.mubr.msk.f32.mxu1 %vm1309_vm8, %v1288_v41 }
 0x242   : > { %18611 = vmatprep.subr.bf16.mxu1 %v20717_v14 }
 0x245   : > { %18613 = vmatpush1.bf16.msra.mxu1 %v18612_v52 }
 0x246   : > { %18614 = vmatprep.subr.bf16.mxu1 %v20717_v14 }
 0x249   : > { %18616 = vmatpush1.bf16.msra.mxu1 %v18615_v55 }
 0x24a   : > { %18617 = vmatprep.subr.bf16.mxu1 %v20717_v14 }
 0x24d   : > { %18619 = vmatpush1.bf16.msra.mxu1 %v18618_v58 }
 0x24e   : > { %18620 = vmatprep.subr.bf16.mxu1 %v20717_v14 }
 0x251   : > { %18622 = vmatpush1.bf16.msra.mxu1 %v18621_v61 }
 0x252   : > { %18623 = vmatprep.subr.bf16.mxu1 %v20717_v14 }
 0x255   : > { %18625 = vmatpush1.bf16.msra.mxu1 %v18624_v2  ;;  %v15045_v2 = vld [vmem:[%s26636_s5 + $0x130] sm:$0xff] }
 0x256   : > { %18626 = vmatprep.subr.bf16.mxu1 %v20717_v14  ;;  %v18684_v9 = vpack.c.bf16 %v15046_v3, %v15045_v2 }
 0x259   : > { %18628 = vmatpush1.bf16.msra.mxu1 %v18627_v5 }
 0x25a   : > { %18629 = vmatprep.subr.bf16.mxu1 %v20717_v14 }
 0x25d   : > { %18631 = vmatpush1.bf16.msra.mxu1 %v18630_v8  ;;  %v18648_v8 = vpack.c.bf16 %v1490_v63, %v1489_v62 }
 0x25e   : > { %18656 = vmatprep.subr.bf16.mxu1 %v20717_v14 }
 0x260   : > { %1475 = vmatmul.mubr.f32.vlgmr.msra.gmra.mrb[12].mxu1 %v1287_v39 }
 0x261   : > { %15011 = vmatprep.mubr.msk.f32.mxu1 %vm1309_vm8, %v1290_v48  ;;  %18658 = vmatpush3.bf16.msra.mxu1 %v18657_v18  ;;  %v15044_v48 = vld [vmem:[%s26636_s5 + $0x128] sm:$0xff]  ;;  %v1493_v18 = vld [vmem:[%s26636_s5 + $0x30] sm:$0xff] }
 0x262   : > { %18659 = vmatprep.subr.bf16.mxu1 %v20717_v14  ;;  %v18681_v53 = vpack.c.bf16 %v15044_v48, %v15043_v47  ;;  %v15062_v47 = vld [vmem:[%s26639_s8 + $0xa8] sm:$0xff] }
 0x264   : > { %1480 = vmatmul.mubr.f32.gmra.mrb[14].mxu1 %v1289_v46  ;;  %v1488_v46 = vld [vmem:[%s26636_s5 + $0x8] sm:$0xff] }
 0x265   : > { %18661 = vmatpush3.bf16.msra.mxu1 %v18660_v22  ;;  %16966 = vmatprep.mubr.msk.f32.mxu1 %vm20718_vm9, %v20715_v0  ;;  %v18645_v52 = vpack.c.bf16 %v1488_v46, %v1487_v45  ;;  %v18654_v22 = vpack.c.bf16 %v1494_v19, %v1493_v18  ;;  %v15061_v46 = vld [vmem:[%s26639_s8 + $0xa0] sm:$0xff] }
 0x266   : > { %18662 = vmatprep.subr.bf16.mxu1 %v20717_v14  ;;  %v18723_v48 = vpack.c.bf16 %v15062_v47, %v15061_v46  ;;  %v15055_v18 = vld [vmem:[%s26638_s7 + $0x4] sm:$0xf]  ;;  %v15072_v46 = vld [vmem:[%s26639_s8 + $0xf8] sm:$0xff] }
 0x269   : > { %18664 = vmatpush3.bf16.msra.mxu1 %v18663_v30  ;;  %v18669_v30 = vpack.c.bf16 %v15034_v26, %v15033_v25  ;;  %v2079_v25 = vld [vmem:[%s26639_s8 + $0x28] sm:$0xff] }
 0x26a   : > { %18665 = vmatprep.subr.bf16.mxu1 %v20717_v14 }
 0x26d   : > { %18667 = vmatpush3.bf16.msra.mxu1 %v18666_v23  ;;  %v18675_v23 = vpack.c.bf16 %v15038_v13, %v15037_v34  ;;  %v2084_v34 = vld [vmem:[%s26639_s8 + $0x50] sm:$0xff]  ;;  %v2085_v13 = vld [vmem:[%s26639_s8 + $0x58] sm:$0xff] }
 0x26e   : > { %16964 = vmatprep.subr.mxu1 %v20715_v0 }
 0x271   : > { %16965 = vmatpush3.msra.mxu1 %v15031_v37  ;;  %v15040_v37 = vld [vmem:[%s26636_s5 + $0x110] sm:$0xff] }
 0x272   : > { %18680 = vmatprep.subr.bf16.mxu1 %v20717_v14 }
 0x30f   : > { %v1382_v38 = vpop.f32.mrb[8].mxu1 }
 0x310   : > { %v1384_v39 = vpop.f32.mrb[9].mxu1 }
 0x311   : > { %v15041_v39 = vld [vmem:[%s26636_s5 + $0x118] sm:$0xff] }
 0x313   : > { %v1387_v40 = vpop.f32.mrb[10].mxu1 }
 0x314   : > { %v1389_v41 = vpop.f32.mrb[11].mxu1 }
 0x315   : > { %v15058_v41 = vld [vmem:[%s26639_s8 + $0x88] sm:$0xff] }
 0x333   : > { %v1476_v42 = vpop.f32.mrb[12].mxu1 }
 0x334   : > { %v21336_v43 = vmax.f32 %v1382_v38, %v1476_v42  ;;  %v1478_v44 = vpop.f32.mrb[13].mxu1  ;;  %v18678_v38 = vpack.c.bf16 %v15040_v37, %v15039_v35  ;;  %v2086_v35 = vld [vmem:[%s26639_s8 + $0x60] sm:$0xff]  ;;  %v2087_v37 = vld [vmem:[%s26639_s8 + $0x68] sm:$0xff] }
 0x335   : > { %v15060_v44 = vld [vmem:[%s26639_s8 + $0x98] sm:$0xff] }
 0x336   : > { %v1508_v54 = vrot.slane %v21336_v43, 1  ;;  %v1666_v55 = vrot.slane %v21336_v43, 2  ;;  %v1838_v56 = vrot.slane %v21336_v43, 4  ;;  %v1752_v57 = vrot.slane %v21336_v43, 3 }
 0x337   : > { %v1481_v49 = vpop.f32.mrb[14].mxu1 }
 0x338   : > { %v1486_v50 = vmax.f32 %v1387_v40, %v1481_v49  ;;  %v1483_v51 = vpop.f32.mrb[15].mxu1  ;;  %v15057_v40 = vld [vmem:[%s26639_s8 + $0x80] sm:$0xff]  ;;  %v15063_v49 = vld [vmem:[%s26639_s8 + $0xb0] sm:$0xff] }
 0x339   : > { %v18717_v42 = vpack.c.bf16 %v15058_v41, %v15057_v40  ;;  %v15070_v40 = vld [vmem:[%s26639_s8 + $0xe8] sm:$0xff] }
 0x33a   : > { %v1509_v58 = vrot.slane %v1486_v50, 1  ;;  %v1667_v59 = vrot.slane %v1486_v50, 2  ;;  %v1753_v60 = vrot.slane %v1486_v50, 3  ;;  %v1839_v61 = vrot.slane %v1486_v50, 4  ;;  %v15064_v50 = vld [vmem:[%s26639_s8 + $0xb8] sm:$0xff] }
 0x33b   : > { %v18726_v51 = vpack.c.bf16 %v15064_v50, %v15063_v49  ;;  %v15080_v49 = vld [vmem:[%s26632_s1 + $0x58] sm:$0xff] }
 0x33c   : > { %v1510_v4 = vsel %vm538_vm3, %v1508_v54, %v1509_v58  ;;  %v1668_v5 = vsel %vm747_vm5, %v1666_v55, %v1667_v59  ;;  %v1840_v6 = vsel %vm553_vm0, %v1838_v56, %v1839_v61  ;;  %v21370_v7 = vsel %vm865_vm6, %v1752_v57, %v1753_v60  ;;  %v15067_v55 = vld [vmem:[%s26639_s8 + $0xd0] sm:$0xff]  ;;  %v15068_v56 = vld [vmem:[%s26639_s8 + $0xd8] sm:$0xff] }
 0x33d   : > { %16925 = vmatmul.mubr.msk.f32.vlgmr.msra.gmra.mrb[6].mxu0 %vm1511_vm10, %v1510_v4  ;;  %16967 = vmatmul.mubr.msk.f32.vlgmr.msra.gmra.mrb[16].mxu1 %vm1511_vm10, %v1668_v5  ;;  %v18732_v57 = vpack.c.bf16 %v15068_v56, %v15067_v55  ;;  %v15082_v55 = vld [vmem:[%s26632_s1 + $0x68] sm:$0xff]  ;;  %v15084_v56 = vld [vmem:[%s26632_s1 + $0x78] sm:$0xf] }
 0x33e   : > { %18646 = vmatpush3.bf16.msra.mxu0 %v18645_v52  ;;  %18682 = vmatpush3.bf16.msra.mxu1 %v18681_v53  ;;  %v15065_v52 = vld [vmem:[%s26639_s8 + $0xc0] sm:$0xff]  ;;  %v15066_v53 = vld [vmem:[%s26639_s8 + $0xc8] sm:$0xff] }
 0x33f   : > { %18647 = vmatprep.subr.bf16.mxu0 %v20717_v14  ;;  %18683 = vmatprep.subr.bf16.mxu1 %v20717_v14  ;;  %v18729_v54 = vpack.c.bf16 %v15066_v53, %v15065_v52  ;;  %v15077_v53 = vld [vmem:[%s26632_s1 + $0x40] sm:$0xff] }
 0x340   : > { %16945 = vmatprep.mubr.msk.f32.mxu0 %vm20718_vm9, %v20715_v0  ;;  %17008 = vmatprep.mubr.msk.f32.mxu1 %vm20718_vm9, %v20715_v0 }
 0x342   : > { %18649 = vmatpush3.bf16.msra.mxu0 %v18648_v8  ;;  %18685 = vmatpush3.bf16.msra.mxu1 %v18684_v9  ;;  %v15053_v9 = vld [vmem:[%s26637_s6] ss:$0 sm:$0xff] }
 0x343   : > { %18650 = vmatprep.subr.bf16.mxu0 %v20717_v14  ;;  %18686 = vmatprep.subr.bf16.mxu1 %v20717_v14 }
 0x346   : > { %18652 = vmatpush3.bf16.msra.mxu0 %v18651_v16  ;;  %18688 = vmatpush3.bf16.msra.mxu1 %v18687_v17  ;;  %v2074_v16 = vld [vmem:[%s26639_s8] sm:$0xff]  ;;  %v2075_v17 = vld [vmem:[%s26639_s8 + $0x8] sm:$0xff] }
 0x347   : > { %18653 = vmatprep.subr.bf16.mxu0 %v20717_v14  ;;  %18689 = vmatprep.subr.bf16.mxu1 %v20717_v14  ;;  %v18693_v19 = vpack.c.bf16 %v2075_v17, %v2074_v16  ;;  %v2268_v16 = vld [vmem:[%s26632_s1 + $0x38] sm:$0xf] }
 0x34a   : > { %18655 = vmatpush3.bf16.msra.mxu0 %v18654_v22  ;;  %18691 = vmatpush3.bf16.msra.mxu1 %v18690_v24  ;;  %v18696_v22 = vpack.c.bf16 %v2077_v21, %v2076_v20  ;;  %v2078_v24 = vld [vmem:[%s26639_s8 + $0x20] sm:$0xff]  ;;  %v21650_v20 = vld [vmem:[%s20894_s17 + $0x38] sm:$0xf] }
 0x34b   : > { %16943 = vmatprep.subr.mxu0 %v20715_v0  ;;  %17006 = vmatprep.subr.mxu1 %v20715_v0  ;;  %v18699_v26 = vpack.c.bf16 %v2079_v25, %v2078_v24  ;;  %v2267_v24 = vld [vmem:[%s26632_s1 + $0x30] sm:$0xf]  ;;  %v15096_v25 = vld [vmem:[%s26632_s1 + $0x88] sm:$0xff] }
 0x34e   : > { %16944 = vmatpush3.msra.mxu0 %v1495_v27  ;;  %17007 = vmatpush3.msra.mxu1 %v15051_v28  ;;  %v2080_v27 = vld [vmem:[%s26639_s8 + $0x30] sm:$0xff]  ;;  %v2081_v28 = vld [vmem:[%s26639_s8 + $0x38] sm:$0xff] }
 0x34f   : > { %16946 = vmatmul.mubr.msk.f32.vlgmr.msra.gmra.mrb[8].mxu0 %vm1511_vm10, %v21336_v43  ;;  %18668 = vmatprep.subr.bf16.mxu0 %v20717_v14  ;;  %v15059_v43 = vld [vmem:[%s26639_s8 + $0x90] sm:$0xff] }
 0x350   : > { %17009 = vmatmul.mubr.msk.f32.vlgmr.msra.gmra.mrb[18].mxu1 %vm1511_vm10, %v1840_v6  ;;  %18670 = vmatpush3.bf16.msra.mxu0 %v18669_v30  ;;  %v18720_v45 = vpack.c.bf16 %v15060_v44, %v15059_v43  ;;  %v18702_v30 = vpack.c.bf16 %v2081_v28, %v2080_v27  ;;  %v2089_v43 = vld [vmem:[%s26639_s8 + $0x78] sm:$0xff]  ;;  %v2286_v28 = vrot.slane %v21650_v20, 1 }
 0x351   : > { %18671 = vmatprep.subr.bf16.mxu0 %v20717_v14  ;;  %16987 = vmatprep.mubr.msk.f32.mxu0 %vm20718_vm9, %v20715_v0 }
 0x352   : > { %18716 = vmatprep.subr.bf16.mxu1 %v20717_v14  ;;  %17088 = vmatprep.mubr.msk.f32.mxu1 %vm20718_vm9, %v20715_v0 }
 0x353   : > { %18718 = vmatpush3.bf16.msra.mxu1 %v18717_v42  ;;  %v2088_v42 = vld [vmem:[%s26639_s8 + $0x70] sm:$0xff] }
 0x354   : > { %18673 = vmatpush3.bf16.msra.mxu0 %v18672_v33  ;;  %18719 = vmatprep.subr.bf16.mxu1 %v20717_v14  ;;  %v18705_v33 = vpack.c.bf16 %v2083_v32, %v2082_v31  ;;  %v18714_v44 = vpack.c.bf16 %v2089_v43, %v2088_v42 }
 0x355   : > { %18674 = vmatprep.subr.bf16.mxu0 %v20717_v14 }
 0x357   : > { %18721 = vmatpush3.bf16.msra.mxu1 %v18720_v45  ;;  %v15071_v45 = vld [vmem:[%s26639_s8 + $0xf0] sm:$0xff] }
 0x358   : > { %18676 = vmatpush3.bf16.msra.mxu0 %v18675_v23  ;;  %18722 = vmatprep.subr.bf16.mxu1 %v20717_v14  ;;  %v18708_v23 = vpack.c.bf16 %v2085_v13, %v2084_v34  ;;  %v18738_v47 = vpack.c.bf16 %v15072_v46, %v15071_v45  ;;  %v15097_v34 = vld [vmem:[%s26632_s1 + $0x90] sm:$0xff]  ;;  %v15100_v13 = vld [vmem:[%s26632_s1 + $0xa8] sm:$0xff]  ;;  %v15108_v46 = vld [vmem:[%s26632_s1 + $0xc0] sm:$0xff] }
 0x359   : > { %18677 = vmatprep.subr.bf16.mxu0 %v20717_v14 }
 0x35b   : > { %18724 = vmatpush3.bf16.msra.mxu1 %v18723_v48  ;;  %v15078_v48 = vld [vmem:[%s26632_s1 + $0x48] sm:$0xff] }
 0x35c   : > { %18679 = vmatpush3.bf16.msra.mxu0 %v18678_v38  ;;  %18725 = vmatprep.subr.bf16.mxu1 %v20717_v14  ;;  %v18711_v38 = vpack.c.bf16 %v2087_v37, %v2086_v35  ;;  %v18740_v50 = vpack.c.bf16 %v15080_v49, %v15078_v48  ;;  %v15113_v48 = vld [vmem:[%s26632_s1 + $0xe8] sm:$0xff]  ;;  %v15115_v49 = vld [vmem:[%s26632_s1 + $0xf8] sm:$0xf] }
 0x35d   : > { %16985 = vmatprep.subr.mxu0 %v20715_v0 }
 0x35f   : > { %18727 = vmatpush3.bf16.msra.mxu1 %v18726_v51 }
 0x360   : > { %16986 = vmatpush3.msra.mxu0 %v15041_v39  ;;  %18728 = vmatprep.subr.bf16.mxu1 %v20717_v14  ;;  %v15069_v39 = vld [vmem:[%s26639_s8 + $0xe0] sm:$0xff] }
 0x361   : > { %16988 = vmatmul.mubr.msk.f32.vlgmr.msra.gmra.mrb[10].mxu0 %vm1511_vm10, %v21370_v7  ;;  %17011 = vmatprep.subr.mxu0 %v20715_v0  ;;  %v18735_v41 = vpack.c.bf16 %v15070_v40, %v15069_v39  ;;  %v15101_v39 = vld [vmem:[%s26632_s1 + $0xb0] sm:$0xf]  ;;  %v15109_v40 = vld [vmem:[%s26632_s1 + $0xc8] sm:$0xff] }
 0x362   : > { %17013 = vmatprep.mubr.msk.f32.mxu0 %vm20718_vm9, %v20715_v0 }
 0x363   : > { %18730 = vmatpush3.bf16.msra.mxu1 %v18729_v54  ;;  %v15079_v54 = vld [vmem:[%s26632_s1 + $0x50] sm:$0xff] }
 0x364   : > { %18731 = vmatprep.subr.bf16.mxu1 %v20717_v14 }
 0x367   : > { %18733 = vmatpush3.bf16.msra.mxu1 %v18732_v57 }
 0x368   : > { %18734 = vmatprep.subr.bf16.mxu1 %v20717_v14 }
 0x36b   : > { %18736 = vmatpush3.bf16.msra.mxu1 %v18735_v41  ;;  %v15111_v41 = vld [vmem:[%s26632_s1 + $0xd8] sm:$0xff] }
 0x36c   : > { %18737 = vmatprep.subr.bf16.mxu1 %v20717_v14  ;;  %v18770_v43 = vpack.c.bf16 %v15111_v41, %v15109_v40 }
 0x36f   : > { %18739 = vmatpush3.bf16.msra.mxu1 %v18738_v47  ;;  %v15110_v47 = vld [vmem:[%s26632_s1 + $0xd0] sm:$0xff] }
 0x410   : > { %v1580_v58 = vpop.f32.mrb[6].mxu0  ;;  %v1737_v59 = vpop.f32.mrb[16].mxu1 }
 0x411   : > { %v16926_v60 = vpop.f32.mrb[7].mxu0  ;;  %v16968_v61 = vpop.f32.mrb[17].mxu1 }
 0x422   : > { %v1652_v62 = vpop.f32.mrb[8].mxu0 }
 0x423   : > { %v1653_v63 = vadd.f32 %v1652_v62, %v1580_v58  ;;  %v1909_v2 = vpop.f32.mrb[18].mxu1  ;;  %v16947_v3 = vpop.f32.mrb[9].mxu0  ;;  %v18742_v58 = vpack.c.bf16 %v15079_v54, %v15077_v53  ;;  %v18744_v62 = vpack.c.bf16 %v15084_v56, %v15082_v55  ;;  %v18774_v53 = vpack.c.bf16 %v15115_v49, %v15113_v48  ;;  %v15112_v54 = vld [vmem:[%s26632_s1 + $0xe0] sm:$0xff]  ;;  %v15114_v55 = vld [vmem:[%s26632_s1 + $0xf0] sm:$0xf]  ;;  %v15122_v56 = vld [vmem:[%s26632_s1 + $0x108] sm:$0xff] }
 0x424   : > { %v17010_v4 = vpop.f32.mrb[19].mxu1  ;;  %v21616_v3 = vld [vmem:[%s20894_s17 + $0x28] sm:$0xff] }
 0x425   : > { %v1741_v5 = vadd.f32 %v1737_v59, %v1653_v63  ;;  %v15081_v59 = vld [vmem:[%s26632_s1 + $0x60] sm:$0xff]  ;;  %v15083_v63 = vld [vmem:[%s26632_s1 + $0x70] sm:$0xf]  ;;  %v2262_v4 = vld [vmem:[%s26632_s1 + $0x8] sm:$0xff]  ;;  %v2487_v45 = vrot.slane %v21616_v3, 2 }
 0x434   : > { %v1823_v6 = vpop.f32.mrb[10].mxu0 }
 0x435   : > { %v1827_v7 = vadd.f32 %v1823_v6, %v1741_v5  ;;  %v16989_v8 = vpop.f32.mrb[11].mxu0  ;;  %v2264_v5 = vld [vmem:[%s26632_s1 + $0x18] sm:$0xff]  ;;  %v18747_v6 = vpack.c.bf16 %v15083_v63, %v15081_v59  ;;  %v2491_v59 = vrot.slane %v21650_v20, 2 }
 0x436   : > { %v2282_v8 = vrot.slane %v21616_v3, 1 }
 0x437   : > { %v1913_v10 = vadd.f32 %v1909_v2, %v1827_v7  ;;  %v21613_v2 = vld [vmem:[%s20894_s17 + $0x20] sm:$0xff] }
 0x438   : > { %v2281_v7 = vrot.slane %v21613_v2, 1  ;;  %v2602_v63 = vrot.slane %v21613_v2, 3 }
 0x439   : > { %v1921_v11 = vadd.f32 %v15053_v9, %v1913_v10  ;;  %v18750_v9 = vpack.c.bf16 %v2264_v5, %v2262_v4  ;;  %v2261_v10 = vld [vmem:[%s26632_s1] sm:$0xff]  ;;  %v2603_v4 = vrot.slane %v21616_v3, 3 }
 0x43a   : > { %v2283_v17 = vsel %vm538_vm3, %v2281_v7, %v2282_v8  ;;  %v15121_v5 = vld [vmem:[%s26632_s1 + $0x100] sm:$0xff]  ;;  %v15126_v7 = vld [vmem:[%s26632_s1 + $0x128] sm:$0xff] }
 0x43b   : > { %v1922_v12 = vmax.f32 %v1921_v11, 0.0  ;;  %v2263_v11 = vld [vmem:[%s26632_s1 + $0x10] sm:$0xff] }
 0x43d   : > { %17012 = vmatpush3.msra.mxu0 %v1922_v12 }
 0x43e   : > { %17014 = vmatmul.mubr.msk.f32.vlgmr.msra.gmra.mrb[12].mxu0 %vm1924_vm11, %v1923_v15  ;;  %17016 = vmatprep.subr.mxu0 %v20715_v0  ;;  %v2266_v15 = vld [vmem:[%s26632_s1 + $0x28] sm:$0xff] }
 0x43f   : > { %17017 = vmatpush3.msra.mxu0 %v1922_v12  ;;  %17018 = vmatprep.mubr.msk.f32.mxu0 %vm20718_vm9, %v20715_v0  ;;  %v21636_v12 = vld [vmem:[%s20894_s17 + $0x30] sm:$0xff]  ;;  %v18754_v21 = vpack.c.bf16 %v2268_v16, %v2266_v15  ;;  %v15125_v16 = vld [vmem:[%s26632_s1 + $0x120] sm:$0xff] }
 0x440   : > { %18692 = vmatprep.subr.bf16.mxu0 %v20717_v14 }
 0x442   : > { %17019 = vmatmul.mubr.msk.f32.vlgmr.msra.gmra.mrb[14].mxu0 %vm1924_vm11, %v15055_v18  ;;  %v18752_v18 = vpack.c.bf16 %v2263_v11, %v2261_v10  ;;  %v2605_v11 = vrot.slane %v21636_v12, 3 }
 0x443   : > { %18694 = vmatpush3.bf16.msra.mxu0 %v18693_v19  ;;  %17053 = vmatprep.mubr.msk.f32.mxu0 %vm20718_vm9, %v20715_v0  ;;  %v2284_v19 = vrot.slane %v21636_v12, 1 }
 0x444   : > { %18695 = vmatprep.subr.bf16.mxu0 %v20717_v14 }
 0x445   : > { %v2285_v27 = vsel %vm538_vm3, %v2282_v8, %v2284_v19  ;;  %v2287_v32 = vsel %vm538_vm3, %v2284_v19, %v2286_v28  ;;  %v15128_v8 = vld [vmem:[%s26632_s1 + $0x138] sm:$0xf]  ;;  %v2607_v19 = vrot.slane %v21650_v20, 3 }
 0x446   : > { %v18784_v15 = vpack.c.bf16 %v15128_v8, %v15126_v7  ;;  %v3030_v8 = vld [vmem:[%s26635_s4 + $0x30] sm:$0xff] }
 0x447   : > { %18697 = vmatpush3.bf16.msra.mxu0 %v18696_v22  ;;  %v2265_v22 = vld [vmem:[%s26632_s1 + $0x20] sm:$0xff] }
 0x448   : > { %18698 = vmatprep.subr.bf16.mxu0 %v20717_v14 }
 0x44b   : > { %18700 = vmatpush3.bf16.msra.mxu0 %v18699_v26  ;;  %v15098_v26 = vld [vmem:[%s26632_s1 + $0x98] sm:$0xff] }
 0x44c   : > { %18701 = vmatprep.subr.bf16.mxu0 %v20717_v14  ;;  %v18760_v31 = vpack.c.bf16 %v15098_v26, %v15096_v25  ;;  %v2719_v25 = vrot.slane %v21616_v3, 4 }
 0x44f   : > { %18703 = vmatpush3.bf16.msra.mxu0 %v18702_v30  ;;  %v18757_v30 = vpack.c.bf16 %v2267_v24, %v2265_v22  ;;  %v2608_v22 = vsel %vm865_vm6, %v2605_v11, %v2607_v19  ;;  %v2718_v24 = vrot.slane %v21613_v2, 4 }
 0x450   : > { %18704 = vmatprep.subr.bf16.mxu0 %v20717_v14 }
 0x451   : > { %v2720_v26 = vsel %vm553_vm0, %v2718_v24, %v2719_v25 }
 0x453   : > { %18706 = vmatpush3.bf16.msra.mxu0 %v18705_v33  ;;  %v15095_v33 = vld [vmem:[%s26632_s1 + $0x80] sm:$0xff] }
 0x454   : > { %18707 = vmatprep.subr.bf16.mxu0 %v20717_v14  ;;  %v18762_v35 = vpack.c.bf16 %v15097_v34, %v15095_v33  ;;  %v2826_v33 = vld [vmem:[%s26633_s2] sm:$0x3] }
 0x455   : > { %v2831_v34 = vrot.slane %v2826_v33, %v21109_v36 }
 0x457   : > { %18709 = vmatpush3.bf16.msra.mxu0 %v18708_v23  ;;  %v15102_v23 = vld [vmem:[%s26632_s1 + $0xb8] sm:$0xf] }
 0x458   : > { %18710 = vmatprep.subr.bf16.mxu0 %v20717_v14  ;;  %v18764_v37 = vpack.c.bf16 %v15102_v23, %v15100_v13  ;;  %v2835_v23 = vrot.slane %v2826_v33, %v21114_v29  ;;  %v15143_v33 = vld [vmem:[%s26635_s4 + $0x98] sm:$0xff] }
 0x45b   : > { %18712 = vmatpush3.bf16.msra.mxu0 %v18711_v38  ;;  %v15099_v38 = vld [vmem:[%s26632_s1 + $0xa0] sm:$0xff] }
 0x45c   : > { %18713 = vmatprep.subr.bf16.mxu0 %v20717_v14  ;;  %v18767_v42 = vpack.c.bf16 %v15101_v39, %v15099_v38 }
 0x45f   : > { %18715 = vmatpush3.bf16.msra.mxu0 %v18714_v44  ;;  %v2486_v44 = vrot.slane %v21613_v2, 2 }
 0x460   : > { %18741 = vmatprep.subr.bf16.mxu0 %v18740_v50 }
 0x461   : > { %v2488_v50 = vsel %vm747_vm5, %v2486_v44, %v2487_v45 }
 0x511   : > { %v1994_v51 = vpop.f32.mrb[12].mxu0 }
 0x512   : > { %v17015_v52 = vpop.f32.mrb[13].mxu0 }
 0x513   : > { %v2489_v52 = vrot.slane %v21636_v12, 2 }
 0x515   : > { %v2069_v57 = vpop.f32.mrb[14].mxu0 }
 0x516   : > { %v2073_v60 = vmax.f32 %v1994_v51, %v2069_v57  ;;  %v17020_v61 = vpop.f32.mrb[15].mxu0  ;;  %v18772_v51 = vpack.c.bf16 %v15110_v47, %v15108_v46  ;;  %v15124_v57 = vld [vmem:[%s26632_s1 + $0x118] sm:$0xff] }
 0x517   : > { %v18780_v61 = vpack.c.bf16 %v15124_v57, %v15122_v56  ;;  %v2851_v56 = vld [vmem:[%s26634_s3 + $0x8] sm:$0xf]  ;;  %v3024_v57 = vld [vmem:[%s26635_s4] sm:$0xff] }
 0x518   : > { %17054 = vmatmul.mubr.f32.vlgmr.msra.gmra.mrb[16].mxu0 %v2073_v60  ;;  %17089 = vmatmul.mubr.f32.vlgmr.msra.gmra.mrb[20].mxu1 %v2073_v60  ;;  %v18777_v60 = vpack.c.bf16 %v15114_v55, %v15112_v54  ;;  %v2850_v55 = vld [vmem:[%s26634_s3] sm:$0xff] }
 0x519   : > { %18743 = vmatpush1.bf16.msra.mxu0 %v18742_v58  ;;  %2364 = vmatprep.mubr.f32.mxu0 %v20715_v0  ;;  %v2490_v58 = vsel %vm747_vm5, %v2487_v45, %v2489_v52 }
 0x51a   : > { %18746 = vmatprep.subr.msk.bf16.mxu0 %vm20887_vm2, %v18744_v62  ;;  %2922 = vmatprep.mubr.f32.mxu1 %v20715_v0  ;;  %v2492_v62 = vsel %vm747_vm5, %v2489_v52, %v2491_v59  ;;  %v15136_v59 = vld [vmem:[%s26634_s3 + $0x10] sm:$0xff] }
 0x51d   : > { %18749 = vmatpush1.bf16.msk.msra.mxu0 %vm20887_vm2, %v18747_v6  ;;  %v15123_v6 = vld [vmem:[%s26632_s1 + $0x110] sm:$0xff] }
 0x51e   : > { %18751 = vmatprep.subr.bf16.mxu0 %v18750_v9  ;;  %v2604_v9 = vsel %vm865_vm6, %v2602_v63, %v2603_v4  ;;  %v18782_v10 = vpack.c.bf16 %v15123_v6, %v15121_v5  ;;  %v15137_v63 = vld [vmem:[%s26634_s3 + $0x18] sm:$0xf]  ;;  %v3028_v5 = vld [vmem:[%s26635_s4 + $0x20] sm:$0xff]  ;;  %v3029_v6 = vld [vmem:[%s26635_s4 + $0x28] sm:$0xff] }
 0x51f   : > { %v18805_v7 = vpack.c.bf16 %v3029_v6, %v3028_v5  ;;  %v15162_v6 = vld [vmem:[%s26636_s5 + $0x48] sm:$0xff] }
 0x520   : > { %15087 = vmatmul.mubr.msk.f32.vlgmr.msra.gmra.mrb[18].mxu0 %vm546_vm4, %v2283_v17  ;;  %v15127_v17 = vld [vmem:[%s26632_s1 + $0x130] sm:$0xf] }
 0x521   : > { %2370 = vmatprep.mubr.f32.mxu0 %v20715_v0  ;;  %18753 = vmatpush1.bf16.msra.mxu0 %v18752_v18  ;;  %v2606_v18 = vsel %vm865_vm6, %v2603_v4, %v2605_v11  ;;  %v3032_v11 = vld [vmem:[%s26635_s4 + $0x40] sm:$0xff] }
 0x522   : > { %18756 = vmatprep.subr.msk.bf16.mxu0 %vm20887_vm2, %v18754_v21  ;;  %v18787_v21 = vpack.c.bf16 %v15127_v17, %v15125_v16  ;;  %v3034_v17 = vld [vmem:[%s26635_s4 + $0x50] sm:$0xff] }
 0x524   : > { %15088 = vmatmul.mubr.msk.f32.gmra.mrb[20].mxu0 %vm546_vm4, %v2285_v27  ;;  %v2721_v27 = vrot.slane %v21636_v12, 4 }
 0x525   : > { %2376 = vmatprep.mubr.f32.mxu0 %v20715_v0  ;;  %18759 = vmatpush1.bf16.msk.msra.mxu0 %vm20887_vm2, %v18757_v30 }
 0x526   : > { %18761 = vmatprep.subr.bf16.mxu0 %v18760_v31  ;;  %v2722_v28 = vsel %vm553_vm0, %v2719_v25, %v2721_v27  ;;  %v3038_v25 = vld [vmem:[%s26635_s4 + $0x70] sm:$0xff] }
 0x528   : > { %15089 = vmatmul.mubr.msk.f32.gmra.mrb[22].mxu0 %vm546_vm4, %v2287_v32 }
 0x529   : > { %2459 = vmatprep.mubr.f32.mxu0 %v20715_v0 }
 0x52c   : > { %15092 = vmatmul.mubr.msk.f32.vlgmr.msra.gmra.mrb[18].mxu0 %vm546_vm4, %v21613_v2  ;;  %v2723_v2 = vrot.slane %v21650_v20, 4 }
 0x52d   : > { %2465 = vmatprep.mubr.f32.mxu0 %v20715_v0  ;;  %18763 = vmatpush1.bf16.msra.mxu0 %v18762_v35 }
 0x52e   : > { %18766 = vmatprep.subr.msk.bf16.mxu0 %vm20887_vm2, %v18764_v37 }
 0x530   : > { %15093 = vmatmul.mubr.msk.f32.gmra.mrb[20].mxu0 %vm546_vm4, %v21616_v3  ;;  %v2724_v3 = vsel %vm553_vm0, %v2721_v27, %v2723_v2  ;;  %v3041_v2 = vld [vmem:[%s26635_s4 + $0x88] sm:$0xff] }
 0x531   : > { %2471 = vmatprep.mubr.f32.mxu0 %v20715_v0  ;;  %18769 = vmatpush1.bf16.msk.msra.mxu0 %vm20887_vm2, %v18767_v42 }
 0x532   : > { %18771 = vmatprep.subr.bf16.mxu0 %v18770_v43 }
 0x534   : > { %15094 = vmatmul.mubr.msk.f32.gmra.mrb[22].mxu0 %vm546_vm4, %v21636_v12 }
 0x535   : > { %2569 = vmatprep.mubr.f32.mxu0 %v20715_v0 }
 0x538   : > { %15105 = vmatmul.mubr.msk.f32.vlgmr.msra.gmra.mrb[18].mxu0 %vm546_vm4, %v2488_v50 }
 0x539   : > { %2575 = vmatprep.mubr.f32.mxu0 %v20715_v0  ;;  %18773 = vmatpush1.bf16.msra.mxu0 %v18772_v51 }
 0x53a   : > { %18776 = vmatprep.subr.msk.bf16.mxu0 %vm20887_vm2, %v18774_v53 }
 0x53c   : > { %15106 = vmatmul.mubr.msk.f32.gmra.mrb[20].mxu0 %vm546_vm4, %v2490_v58  ;;  %v3025_v58 = vld [vmem:[%s26635_s4 + $0x8] sm:$0xff] }
 0x53d   : > { %2581 = vmatprep.mubr.f32.mxu0 %v20715_v0  ;;  %18779 = vmatpush1.bf16.msk.msra.mxu0 %vm20887_vm2, %v18777_v60  ;;  %v18799_v60 = vpack.c.bf16 %v3025_v58, %v3024_v57  ;;  %v15154_v57 = vld [vmem:[%s26635_s4 + $0xf0] sm:$0xff]  ;;  %v15155_v58 = vld [vmem:[%s26635_s4 + $0xf8] sm:$0xff] }
 0x53e   : > { %18781 = vmatprep.subr.bf16.mxu0 %v18780_v61  ;;  %v3026_v61 = vld [vmem:[%s26635_s4 + $0x10] sm:$0xff] }
 0x540   : > { %15107 = vmatmul.mubr.msk.f32.gmra.mrb[22].mxu0 %vm546_vm4, %v2492_v62  ;;  %v3027_v62 = vld [vmem:[%s26635_s4 + $0x18] sm:$0xff] }
 0x541   : > { %2685 = vmatprep.mubr.f32.mxu0 %v20715_v0  ;;  %v18802_v4 = vpack.c.bf16 %v3027_v62, %v3026_v61  ;;  %v15157_v61 = vld [vmem:[%s26635_s4 + $0x108] sm:$0xff] }
 0x544   : > { %15118 = vmatmul.mubr.msk.f32.vlgmr.msra.gmra.mrb[18].mxu0 %vm546_vm4, %v2604_v9  ;;  %v3031_v9 = vld [vmem:[%s26635_s4 + $0x38] sm:$0xff] }
 0x545   : > { %2691 = vmatprep.mubr.f32.mxu0 %v20715_v0  ;;  %18783 = vmatpush1.bf16.msra.mxu0 %v18782_v10  ;;  %v18808_v10 = vpack.c.bf16 %v3031_v9, %v3030_v8  ;;  %v15173_v8 = vld [vmem:[%s26636_s5 + $0x90] sm:$0xff] }
 0x546   : > { %18786 = vmatprep.subr.msk.bf16.mxu0 %vm20887_vm2, %v18784_v15  ;;  %v3033_v15 = vld [vmem:[%s26635_s4 + $0x48] sm:$0xff] }
 0x547   : > { %v18811_v16 = vpack.c.bf16 %v3033_v15, %v3032_v11  ;;  %v15164_v11 = vld [vmem:[%s26636_s5 + $0x58] sm:$0xff]  ;;  %v15165_v15 = vld [vmem:[%s26636_s5 + $0x60] sm:$0xff] }
 0x548   : > { %15119 = vmatmul.mubr.msk.f32.gmra.mrb[20].mxu0 %vm546_vm4, %v2606_v18  ;;  %v3035_v18 = vld [vmem:[%s26635_s4 + $0x58] sm:$0xff] }
 0x549   : > { %2697 = vmatprep.mubr.f32.mxu0 %v20715_v0  ;;  %18789 = vmatpush1.bf16.msk.msra.mxu0 %vm20887_vm2, %v18787_v21  ;;  %v18814_v19 = vpack.c.bf16 %v3035_v18, %v3034_v17  ;;  %v3036_v21 = vld [vmem:[%s26635_s4 + $0x60] sm:$0xff]  ;;  %v15176_v18 = vld [vmem:[%s26636_s5 + $0xa8] sm:$0xff] }
 0x54a   : > { %18852 = vmatprep.subr.bf16.mxu0 %v20717_v14  ;;  %v15175_v17 = vld [vmem:[%s26636_s5 + $0xa0] sm:$0xff] }
 0x54c   : > { %15120 = vmatmul.mubr.msk.f32.gmra.mrb[22].mxu0 %vm546_vm4, %v2608_v22  ;;  %v3037_v22 = vld [vmem:[%s26635_s4 + $0x68] sm:$0xff] }
 0x54d   : > { %2801 = vmatprep.mubr.f32.mxu0 %v20715_v0  ;;  %v18817_v24 = vpack.c.bf16 %v3037_v22, %v3036_v21  ;;  %v18880_v21 = vpack.c.bf16 %v15176_v18, %v15175_v17  ;;  %v15166_v22 = vld [vmem:[%s26636_s5 + $0x68] sm:$0xff]  ;;  %v3225_v17 = vld [vmem:[%s26636_s5 + $0x38] sm:$0xff]  ;;  %v15199_v18 = vld [vmem:[%s26636_s5 + $0x150] sm:$0xff] }
 0x550   : > { %15131 = vmatmul.mubr.msk.f32.vlgmr.msra.gmra.mrb[18].mxu0 %vm546_vm4, %v2720_v26  ;;  %v3039_v26 = vld [vmem:[%s26635_s4 + $0x78] sm:$0xff] }
 0x551   : > { %2807 = vmatprep.mubr.f32.mxu0 %v20715_v0  ;;  %v18820_v27 = vpack.c.bf16 %v3039_v26, %v3038_v25  ;;  %v15177_v25 = vld [vmem:[%s26636_s5 + $0xb0] sm:$0xff] }
 0x554   : > { %15132 = vmatmul.mubr.msk.f32.gmra.mrb[20].mxu0 %vm546_vm4, %v2722_v28  ;;  %v3040_v28 = vld [vmem:[%s26635_s4 + $0x80] sm:$0xff] }
 0x555   : > { %2813 = vmatprep.mubr.f32.mxu0 %v20715_v0 }
 0x558   : > { %15133 = vmatmul.mubr.msk.f32.gmra.mrb[22].mxu0 %vm546_vm4, %v2724_v3  ;;  %v18823_v3 = vpack.c.bf16 %v3041_v2, %v3040_v28  ;;  %v15168_v2 = vld [vmem:[%s26636_s5 + $0x78] sm:$0xff] }
 0x559   : > { %17109 = vmatprep.mubr.msk.f32.mxu0 %vm20718_vm9, %v20715_v0 }
 0x5eb   : > { %v2156_v12 = vpop.f32.mrb[16].mxu0  ;;  %v2243_v30 = vpop.f32.mrb[20].mxu1 }
 0x5ec   : > { %v2247_v31 = vmax.f32 %v2156_v12, %v2243_v30  ;;  %v17055_v32 = vpop.f32.mrb[17].mxu0  ;;  %v17090_v20 = vpop.f32.mrb[21].mxu1 }
 0x5ed   : > { %v15142_v20 = vld [vmem:[%s26635_s4 + $0x90] sm:$0xff] }
 0x5ee   : > { %2249 = vst.msk [vmem:[#allocation2] sm:$0x1] %vm2248_vm12, %v2247_v31 }
 0x5ef   : > { %2251 = vst.msk [vmem:[#allocation2 + $0x7] sm:$0x2] %vm2250_vm13, %v2247_v31 }
 0x5f0   : > { %2253 = vst.msk [vmem:[#allocation2 + $0xe] sm:$0x4] %vm2252_vm14, %v2247_v31 }
 0x5f1   : > { %2255 = vst.msk [vmem:[#allocation2 + $0x15] sm:$0x8] %vm2254_vm15, %v2247_v31 }
 0x623   : > { %v2803_v13 = vpop.f32.mrb[18].mxu0 }
 0x624   : > { %v2805_v35 = vpop.f32.mrb[19].mxu0  ;;  %v2838_v37 = vadd.f32 %v2831_v34, %v2803_v13 }
 0x625   : > { %v2839_v38 = vadd.f32 %v2835_v23, %v2805_v35 }
 0x626   : > { %v2844_v43 = vmax.f32 %v2838_v37, 0.0  ;;  %v18826_v37 = vpack.c.bf16 %v15143_v33, %v15142_v20  ;;  %v15170_v20 = vld [vmem:[%s26636_s5 + $0x88] sm:$0xff]  ;;  %v15181_v33 = vld [vmem:[%s26636_s5 + $0xd0] sm:$0xff] }
 0x627   : > { %v2809_v39 = vpop.f32.mrb[20].mxu0  ;;  %v2845_v45 = vmax.f32 %v2839_v38, 0.0  ;;  %v15144_v38 = vld [vmem:[%s26635_s4 + $0xa0] sm:$0xff] }
 0x628   : > { %v2840_v40 = vadd.f32 %v2831_v34, %v2809_v39  ;;  %v2811_v41 = vpop.f32.mrb[21].mxu0  ;;  %v15145_v39 = vld [vmem:[%s26635_s4 + $0xa8] sm:$0xff] }
 0x629   : > { %v2841_v42 = vadd.f32 %v2835_v23, %v2811_v41 }
 0x62a   : > { %v2846_v44 = vmax.f32 %v2840_v40, 0.0 }
 0x62b   : > { %v2847_v46 = vmax.f32 %v2841_v42, 0.0  ;;  %v2815_v47 = vpop.f32.mrb[22].mxu0 }
 0x62c   : > { %v18792_v48 = vpack.c.bf16 %v2846_v44, %v2844_v43  ;;  %v2817_v49 = vpop.f32.mrb[23].mxu0  ;;  %v2842_v52 = vadd.f32 %v2831_v34, %v2815_v47  ;;  %v18829_v44 = vpack.c.bf16 %v15145_v39, %v15144_v38 }
 0x62d   : > { %v18790_v50 = vpack.c.bf16 %v2847_v46, %v2845_v45  ;;  %v2843_v51 = vadd.f32 %v2835_v23, %v2817_v49  ;;  %v15146_v45 = vld [vmem:[%s26635_s4 + $0xb0] sm:$0xff]  ;;  %v15147_v46 = vld [vmem:[%s26635_s4 + $0xb8] sm:$0xff]  ;;  %v15149_v49 = vld [vmem:[%s26635_s4 + $0xc8] sm:$0xff] }
 0x62e   : > { %v2848_v54 = vmax.f32 %v2842_v52, 0.0  ;;  %v18832_v47 = vpack.c.bf16 %v15147_v46, %v15146_v45  ;;  %v15151_v52 = vld [vmem:[%s26635_s4 + $0xd8] sm:$0xff] }
 0x62f   : > { %v2849_v53 = vmax.f32 %v2843_v51, 0.0  ;;  %18791 = vmatprep.subr.bf16.mxu1 %v18790_v50  ;;  %v15150_v51 = vld [vmem:[%s26635_s4 + $0xd0] sm:$0xff] }
 0x630   : > { %18793 = vmatpush1.bf16.msra.mxu1 %v18792_v48 }
 0x631   : > { %2862 = vmatprep.subr.mxu1 %v2849_v53 }
 0x634   : > { %2863 = vmatpush1.msra.mxu1 %v2848_v54 }
 0x635   : > { %15134 = vmatmul.mubr.msk.f32.vlgmr.msra.gmra.mrb[22].mxu1 %vm1117_vm7, %v2850_v55  ;;  %18795 = vmatprep.subr.bf16.mxu1 %v18790_v50  ;;  %v15153_v55 = vld [vmem:[%s26635_s4 + $0xe8] sm:$0xff] }
 0x636   : > { %18797 = vmatpush1.bf16.msra.mxu1 %v18792_v48  ;;  %2928 = vmatprep.mubr.f32.mxu1 %v20715_v0  ;;  %v15148_v48 = vld [vmem:[%s26635_s4 + $0xc0] sm:$0xff] }
 0x637   : > { %2947 = vmatprep.subr.mxu1 %v2849_v53  ;;  %v18835_v50 = vpack.c.bf16 %v15149_v49, %v15148_v48  ;;  %v18838_v53 = vpack.c.bf16 %v15151_v52, %v15150_v51 }
 0x639   : > { %15135 = vmatmul.mubr.msk.f32.gmra.mrb[24].mxu1 %vm1117_vm7, %v2851_v56 }
 0x63a   : > { %2948 = vmatpush1.msra.mxu1 %v2848_v54  ;;  %3007 = vmatprep.mubr.f32.mxu1 %v20715_v0  ;;  %v15152_v54 = vld [vmem:[%s26635_s4 + $0xe0] sm:$0xff] }
 0x63b   : > { %18798 = vmatprep.subr.bf16.mxu1 %v20717_v14  ;;  %v18841_v56 = vpack.c.bf16 %v15153_v55, %v15152_v54 }
 0x63d   : > { %15138 = vmatmul.mubr.msk.f32.vlgmr.msra.gmra.mrb[26].mxu1 %vm1117_vm7, %v15136_v59  ;;  %v18844_v59 = vpack.c.bf16 %v15155_v58, %v15154_v57  ;;  %v3220_v57 = vld [vmem:[%s26636_s5 + $0x10] sm:$0xff]  ;;  %v3221_v58 = vld [vmem:[%s26636_s5 + $0x18] sm:$0xff] }
 0x63e   : > { %3013 = vmatprep.mubr.f32.mxu1 %v20715_v0  ;;  %18800 = vmatpush1.bf16.msra.mxu1 %v18799_v60  ;;  %v15156_v60 = vld [vmem:[%s26635_s4 + $0x100] sm:$0xff] }
 0x63f   : > { %18801 = vmatprep.subr.bf16.mxu1 %v20717_v14  ;;  %v18847_v62 = vpack.c.bf16 %v15157_v61, %v15156_v60  ;;  %v15196_v60 = vld [vmem:[%s26636_s5 + $0x138] sm:$0xff] }
 0x641   : > { %15139 = vmatmul.mubr.msk.f32.gmra.mrb[28].mxu1 %vm1117_vm7, %v15137_v63  ;;  %v15158_v63 = vld [vmem:[%s26635_s4 + $0x110] sm:$0xff] }
 0x642   : > { %18803 = vmatpush1.bf16.msra.mxu1 %v18802_v4  ;;  %v15159_v4 = vld [vmem:[%s26635_s4 + $0x118] sm:$0xff] }
 0x643   : > { %18804 = vmatprep.subr.bf16.mxu1 %v20717_v14  ;;  %v18850_v5 = vpack.c.bf16 %v15159_v4, %v15158_v63 }
 0x646   : > { %18806 = vmatpush1.bf16.msra.mxu1 %v18805_v7  ;;  %v15163_v7 = vld [vmem:[%s26636_s5 + $0x50] sm:$0xff] }
 0x647   : > { %18807 = vmatprep.subr.bf16.mxu1 %v20717_v14  ;;  %v18853_v9 = vpack.c.bf16 %v15163_v7, %v15162_v6  ;;  %v3222_v7 = vld [vmem:[%s26636_s5 + $0x20] sm:$0xff] }
 0x649   : > { %18854 = vmatpush3.bf16.msra.mxu0 %v18853_v9  ;;  %v15197_v9 = vld [vmem:[%s26636_s5 + $0x140] sm:$0xff] }
 0x64a   : > { %18809 = vmatpush1.bf16.msra.mxu1 %v18808_v10  ;;  %v15174_v10 = vld [vmem:[%s26636_s5 + $0x98] sm:$0xff]  ;;  %18855 = vmatprep.subr.bf16.mxu0 %v20717_v14 }
 0x64b   : > { %18810 = vmatprep.subr.bf16.mxu1 %v20717_v14 }
 0x64e   : > { %18812 = vmatpush1.bf16.msra.mxu1 %v18811_v16  ;;  %v18877_v16 = vpack.c.bf16 %v15174_v10, %v15173_v8  ;;  %v3223_v8 = vld [vmem:[%s26636_s5 + $0x28] sm:$0xff] }
 0x64f   : > { %18813 = vmatprep.subr.bf16.mxu1 %v20717_v14  ;;  %v15198_v10 = vld [vmem:[%s26636_s5 + $0x148] sm:$0xff] }
 0x652   : > { %18815 = vmatpush1.bf16.msra.mxu1 %v18814_v19  ;;  %v18856_v19 = vpack.c.bf16 %v15165_v15, %v15164_v11  ;;  %v18871_v11 = vpack.c.bf16 %v3223_v8, %v3222_v7  ;;  %v18907_v15 = vpack.c.bf16 %v15198_v10, %v15197_v9  ;;  %v3649_v10 = vld [vmem:[%s26638_s7] sm:$0xf] }
 0x653   : > { %18816 = vmatprep.subr.bf16.mxu1 %v20717_v14 }
 0x654   : > { %18857 = vmatpush3.bf16.msra.mxu0 %v18856_v19  ;;  %v15200_v19 = vld [vmem:[%s26636_s5 + $0x158] sm:$0xff] }
 0x655   : > { %18858 = vmatprep.subr.bf16.mxu0 %v20717_v14 }
 0x656   : > { %18818 = vmatpush1.bf16.msra.mxu1 %v18817_v24  ;;  %v15167_v24 = vld [vmem:[%s26636_s5 + $0x70] sm:$0xff] }
 0x657   : > { %18819 = vmatprep.subr.bf16.mxu1 %v20717_v14  ;;  %v18859_v26 = vpack.c.bf16 %v15167_v24, %v15166_v22  ;;  %v18910_v22 = vpack.c.bf16 %v15200_v19, %v15199_v18  ;;  %v15183_v24 = vld [vmem:[%s26636_s5 + $0xd8] sm:$0xff]  ;;  %v3800_v18 = vld [vmem:[%s26639_s8 + $0x10] sm:$0xff] }
 0x658   : > { %v3801_v19 = vld [vmem:[%s26639_s8 + $0x18] sm:$0xff] }
 0x659   : > { %18860 = vmatpush3.bf16.msra.mxu0 %v18859_v26  ;;  %v3226_v26 = vld [vmem:[%s26636_s5 + $0x40] sm:$0xff] }
 0x65a   : > { %18821 = vmatpush1.bf16.msra.mxu1 %v18820_v27  ;;  %v15178_v27 = vld [vmem:[%s26636_s5 + $0xb8] sm:$0xff]  ;;  %18861 = vmatprep.subr.bf16.mxu0 %v20717_v14 }
 0x65b   : > { %18822 = vmatprep.subr.bf16.mxu1 %v20717_v14  ;;  %v18883_v28 = vpack.c.bf16 %v15178_v27, %v15177_v25  ;;  %v15184_v25 = vld [vmem:[%s26636_s5 + $0xe0] sm:$0xff] }
 0x65c   : > { %v15201_v27 = vld [vmem:[%s26636_s5 + $0x160] sm:$0xff] }
 0x65e   : > { %18824 = vmatpush1.bf16.msra.mxu1 %v18823_v3  ;;  %v15169_v3 = vld [vmem:[%s26636_s5 + $0x80] sm:$0xff] }
 0x65f   : > { %18825 = vmatprep.subr.bf16.mxu1 %v20717_v14 }
 0x708   : > { %v2924_v12 = vpop.f32.mrb[22].mxu1 }
 0x709   : > { %v2926_v30 = vpop.f32.mrb[23].mxu1 }
 0x70c   : > { %v2930_v31 = vpop.f32.mrb[24].mxu1 }
 0x70d   : > { %v2932_v32 = vpop.f32.mrb[25].mxu1 }
 0x710   : > { %v3009_v34 = vpop.f32.mrb[26].mxu1 }
 0x711   : > { %v3020_v13 = vmax.f32 %v2924_v12, %v3009_v34  ;;  %v3011_v23 = vpop.f32.mrb[27].mxu1  ;;  %v15179_v12 = vld [vmem:[%s26636_s5 + $0xc0] sm:$0xff] }
 0x712   : > { %v3021_v35 = vmax.f32 %v2926_v30, %v3011_v23  ;;  %v18862_v30 = vpack.c.bf16 %v15169_v3, %v15168_v2  ;;  %v15185_v2 = vld [vmem:[%s26636_s5 + $0xe8] sm:$0xff]  ;;  %v15186_v3 = vld [vmem:[%s26636_s5 + $0xf0] sm:$0xff] }
 0x714   : > { %v3015_v40 = vpop.f32.mrb[28].mxu1  ;;  %15140 = vmatprep.mubr.msk.f32.mxu1 %vm1309_vm8, %v3021_v35  ;;  %18863 = vmatpush3.bf16.msra.mxu0 %v18862_v30  ;;  %v15187_v30 = vld [vmem:[%s26636_s5 + $0xf8] sm:$0xff] }
 0x715   : > { %v3022_v41 = vmax.f32 %v2930_v31, %v3015_v40  ;;  %v3017_v42 = vpop.f32.mrb[29].mxu1  ;;  %3113 = vmatmul.mubr.f32.vlgmr.msra.gmra.mrb[30].mxu1 %v3020_v13  ;;  %v15180_v31 = vld [vmem:[%s26636_s5 + $0xc8] sm:$0xff]  ;;  %17107 = vmatprep.subr.mxu0 %v20715_v0  ;;  %v3218_v40 = vld [vmem:[%s26636_s5] sm:$0xff] }
 0x716   : > { %v3023_v43 = vmax.f32 %v2932_v32, %v3017_v42  ;;  %18827 = vmatpush1.bf16.msra.mxu1 %v18826_v37  ;;  %v18886_v32 = vpack.c.bf16 %v15180_v31, %v15179_v12  ;;  %v15193_v42 = vld [vmem:[%s26636_s5 + $0x120] sm:$0xff]  ;;  %v18892_v12 = vpack.c.bf16 %v15186_v3, %v15185_v2  ;;  %v3807_v3 = vld [vmem:[%s26639_s8 + $0x48] sm:$0xff] }
 0x717   : > { %18828 = vmatprep.subr.bf16.mxu1 %v20717_v14  ;;  %v15188_v31 = vld [vmem:[%s26636_s5 + $0x100] sm:$0xff] }
 0x718   : > { %15141 = vmatprep.mubr.msk.f32.mxu1 %vm1309_vm8, %v3023_v43  ;;  %17108 = vmatpush3.msra.mxu0 %v15170_v20  ;;  %v15189_v20 = vld [vmem:[%s26636_s5 + $0x108] sm:$0xff]  ;;  %v3806_v2 = vld [vmem:[%s26639_s8 + $0x40] sm:$0xff] }
 0x719   : > { %3118 = vmatmul.mubr.f32.gmra.mrb[32].mxu1 %v3022_v41  ;;  %18864 = vmatprep.subr.bf16.mxu0 %v20717_v14 }
 0x71a   : > { %18830 = vmatpush1.bf16.msra.mxu1 %v18829_v44  ;;  %15160 = vmatprep.mubr.msk.f32.mxu1 %vm1309_vm8, %v3021_v35 }
 0x71b   : > { %18831 = vmatprep.subr.bf16.mxu1 %v20717_v14 }
 0x71e   : > { %18833 = vmatpush1.bf16.msra.mxu1 %v18832_v47 }
 0x71f   : > { %18834 = vmatprep.subr.bf16.mxu1 %v20717_v14 }
 0x722   : > { %18836 = vmatpush1.bf16.msra.mxu1 %v18835_v50 }
 0x723   : > { %18837 = vmatprep.subr.bf16.mxu1 %v20717_v14 }
 0x726   : > { %18839 = vmatpush1.bf16.msra.mxu1 %v18838_v53 }
 0x727   : > { %18840 = vmatprep.subr.bf16.mxu1 %v20717_v14 }
 0x72a   : > { %18842 = vmatpush1.bf16.msra.mxu1 %v18841_v56 }
 0x72b   : > { %18843 = vmatprep.subr.bf16.mxu1 %v20717_v14 }
 0x72e   : > { %18845 = vmatpush1.bf16.msra.mxu1 %v18844_v59  ;;  %v15195_v59 = vld [vmem:[%s26636_s5 + $0x130] sm:$0xff] }
 0x72f   : > { %18846 = vmatprep.subr.bf16.mxu1 %v20717_v14  ;;  %v18904_v6 = vpack.c.bf16 %v15196_v60, %v15195_v59 }
 0x732   : > { %18848 = vmatpush1.bf16.msra.mxu1 %v18847_v62 }
 0x733   : > { %18849 = vmatprep.subr.bf16.mxu1 %v20717_v14 }
 0x736   : > { %18851 = vmatpush1.bf16.msra.mxu1 %v18850_v5  ;;  %v18868_v5 = vpack.c.bf16 %v3221_v58, %v3220_v57 }
 0x737   : > { %18876 = vmatprep.subr.bf16.mxu1 %v20717_v14 }
 0x739   : > { %3206 = vmatmul.mubr.f32.vlgmr.msra.gmra.mrb[34].mxu1 %v3020_v13 }
 0x73a   : > { %15161 = vmatprep.mubr.msk.f32.mxu1 %vm1309_vm8, %v3023_v43  ;;  %18878 = vmatpush3.bf16.msra.mxu1 %v18877_v16  ;;  %v15194_v43 = vld [vmem:[%s26636_s5 + $0x128] sm:$0xff]  ;;  %v3224_v16 = vld [vmem:[%s26636_s5 + $0x30] sm:$0xff] }
 0x73b   : > { %18879 = vmatprep.subr.bf16.mxu1 %v20717_v14  ;;  %v18901_v48 = vpack.c.bf16 %v15194_v43, %v15193_v42  ;;  %v15212_v42 = vld [vmem:[%s26639_s8 + $0xa8] sm:$0xff] }
 0x73d   : > { %3211 = vmatmul.mubr.f32.gmra.mrb[36].mxu1 %v3022_v41  ;;  %v3219_v41 = vld [vmem:[%s26636_s5 + $0x8] sm:$0xff] }
 0x73e   : > { %17151 = vmatprep.mubr.msk.f32.mxu1 %vm20718_vm9, %v20715_v0  ;;  %18881 = vmatpush3.bf16.msra.mxu1 %v18880_v21  ;;  %v18865_v47 = vpack.c.bf16 %v3219_v41, %v3218_v40  ;;  %v18874_v21 = vpack.c.bf16 %v3225_v17, %v3224_v16  ;;  %v15211_v41 = vld [vmem:[%s26639_s8 + $0xa0] sm:$0xff] }
 0x73f   : > { %18882 = vmatprep.subr.bf16.mxu1 %v20717_v14  ;;  %v18943_v43 = vpack.c.bf16 %v15212_v42, %v15211_v41  ;;  %v15205_v16 = vld [vmem:[%s26638_s7 + $0x4] sm:$0xf]  ;;  %v15222_v41 = vld [vmem:[%s26639_s8 + $0xf8] sm:$0xff] }
 0x742   : > { %18884 = vmatpush3.bf16.msra.mxu1 %v18883_v28  ;;  %v18889_v28 = vpack.c.bf16 %v15184_v25, %v15183_v24  ;;  %v3803_v24 = vld [vmem:[%s26639_s8 + $0x28] sm:$0xff] }
 0x743   : > { %18885 = vmatprep.subr.bf16.mxu1 %v20717_v14 }
 0x746   : > { %18887 = vmatpush3.bf16.msra.mxu1 %v18886_v32  ;;  %v18895_v32 = vpack.c.bf16 %v15188_v31, %v15187_v30  ;;  %v3808_v30 = vld [vmem:[%s26639_s8 + $0x50] sm:$0xff]  ;;  %v3809_v31 = vld [vmem:[%s26639_s8 + $0x58] sm:$0xff] }
 0x747   : > { %17149 = vmatprep.subr.mxu1 %v20715_v0 }
 0x74a   : > { %17150 = vmatpush3.msra.mxu1 %v15181_v33  ;;  %v15190_v33 = vld [vmem:[%s26636_s5 + $0x110] sm:$0xff] }
 0x74b   : > { %18900 = vmatprep.subr.bf16.mxu1 %v20717_v14 }
 0x7e8   : > { %v3114_v34 = vpop.f32.mrb[30].mxu1 }
 0x7e9   : > { %v3116_v13 = vpop.f32.mrb[31].mxu1 }
 0x7ea   : > { %v15191_v13 = vld [vmem:[%s26636_s5 + $0x118] sm:$0xff] }
 0x7ec   : > { %v3119_v23 = vpop.f32.mrb[32].mxu1 }
 0x7ed   : > { %v3121_v35 = vpop.f32.mrb[33].mxu1 }
 0x7ee   : > { %v15208_v35 = vld [vmem:[%s26639_s8 + $0x88] sm:$0xff] }
 0x80c   : > { %v3207_v37 = vpop.f32.mrb[34].mxu1 }
 0x80d   : > { %v22030_v38 = vmax.f32 %v3114_v34, %v3207_v37  ;;  %v3209_v39 = vpop.f32.mrb[35].mxu1  ;;  %v18898_v34 = vpack.c.bf16 %v15190_v33, %v15189_v20  ;;  %v3810_v20 = vld [vmem:[%s26639_s8 + $0x60] sm:$0xff]  ;;  %v3811_v33 = vld [vmem:[%s26639_s8 + $0x68] sm:$0xff] }
 0x80e   : > { %v15210_v39 = vld [vmem:[%s26639_s8 + $0x98] sm:$0xff] }
 0x80f   : > { %v3238_v49 = vrot.slane %v22030_v38, 1  ;;  %v3394_v50 = vrot.slane %v22030_v38, 2  ;;  %v3564_v51 = vrot.slane %v22030_v38, 4  ;;  %v3479_v52 = vrot.slane %v22030_v38, 3 }
 0x810   : > { %v3212_v44 = vpop.f32.mrb[36].mxu1 }
 0x811   : > { %v3217_v45 = vmax.f32 %v3119_v23, %v3212_v44  ;;  %v3214_v46 = vpop.f32.mrb[37].mxu1  ;;  %v15207_v23 = vld [vmem:[%s26639_s8 + $0x80] sm:$0xff]  ;;  %v15213_v44 = vld [vmem:[%s26639_s8 + $0xb0] sm:$0xff] }
 0x812   : > { %v18937_v37 = vpack.c.bf16 %v15208_v35, %v15207_v23  ;;  %v15220_v23 = vld [vmem:[%s26639_s8 + $0xe8] sm:$0xff] }
 0x813   : > { %v3239_v53 = vrot.slane %v3217_v45, 1  ;;  %v3395_v54 = vrot.slane %v3217_v45, 2  ;;  %v3480_v55 = vrot.slane %v3217_v45, 3  ;;  %v3565_v56 = vrot.slane %v3217_v45, 4  ;;  %v15214_v45 = vld [vmem:[%s26639_s8 + $0xb8] sm:$0xff] }
 0x814   : > { %v18946_v46 = vpack.c.bf16 %v15214_v45, %v15213_v44  ;;  %v15230_v44 = vld [vmem:[%s26632_s1 + $0x58] sm:$0xff] }
 0x815   : > { %v3240_v61 = vsel %vm538_vm3, %v3238_v49, %v3239_v53  ;;  %v3396_v62 = vsel %vm747_vm5, %v3394_v50, %v3395_v54  ;;  %v3566_v63 = vsel %vm553_vm0, %v3564_v51, %v3565_v56  ;;  %v22064_v4 = vsel %vm865_vm6, %v3479_v52, %v3480_v55  ;;  %v15217_v50 = vld [vmem:[%s26639_s8 + $0xd0] sm:$0xff]  ;;  %v15218_v51 = vld [vmem:[%s26639_s8 + $0xd8] sm:$0xff] }
 0x816   : > { %17110 = vmatmul.mubr.msk.f32.vlgmr.msra.gmra.mrb[24].mxu0 %vm1511_vm10, %v3240_v61  ;;  %17152 = vmatmul.mubr.msk.f32.vlgmr.msra.gmra.mrb[38].mxu1 %vm1511_vm10, %v3396_v62  ;;  %v18952_v52 = vpack.c.bf16 %v15218_v51, %v15217_v50  ;;  %v15232_v50 = vld [vmem:[%s26632_s1 + $0x68] sm:$0xff]  ;;  %v15234_v51 = vld [vmem:[%s26632_s1 + $0x78] sm:$0xf] }
 0x817   : > { %18866 = vmatpush3.bf16.msra.mxu0 %v18865_v47  ;;  %18902 = vmatpush3.bf16.msra.mxu1 %v18901_v48  ;;  %v15215_v47 = vld [vmem:[%s26639_s8 + $0xc0] sm:$0xff]  ;;  %v15216_v48 = vld [vmem:[%s26639_s8 + $0xc8] sm:$0xff] }
 0x818   : > { %18867 = vmatprep.subr.bf16.mxu0 %v20717_v14  ;;  %18903 = vmatprep.subr.bf16.mxu1 %v20717_v14  ;;  %v18949_v49 = vpack.c.bf16 %v15216_v48, %v15215_v47  ;;  %v15227_v48 = vld [vmem:[%s26632_s1 + $0x40] sm:$0xff] }
 0x819   : > { %17130 = vmatprep.mubr.msk.f32.mxu0 %vm20718_vm9, %v20715_v0  ;;  %17193 = vmatprep.mubr.msk.f32.mxu1 %vm20718_vm9, %v20715_v0 }
 0x81b   : > { %18869 = vmatpush3.bf16.msra.mxu0 %v18868_v5  ;;  %18905 = vmatpush3.bf16.msra.mxu1 %v18904_v6  ;;  %v15203_v6 = vld [vmem:[%s26637_s6] ss:$0 sm:$0xff] }
 0x81c   : > { %18870 = vmatprep.subr.bf16.mxu0 %v20717_v14  ;;  %18906 = vmatprep.subr.bf16.mxu1 %v20717_v14 }
 0x81f   : > { %18872 = vmatpush3.bf16.msra.mxu0 %v18871_v11  ;;  %18908 = vmatpush3.bf16.msra.mxu1 %v18907_v15  ;;  %v3798_v11 = vld [vmem:[%s26639_s8] sm:$0xff]  ;;  %v3799_v15 = vld [vmem:[%s26639_s8 + $0x8] sm:$0xff] }
 0x820   : > { %18873 = vmatprep.subr.bf16.mxu0 %v20717_v14  ;;  %18909 = vmatprep.subr.bf16.mxu1 %v20717_v14  ;;  %v18913_v17 = vpack.c.bf16 %v3799_v15, %v3798_v11  ;;  %v3987_v11 = vld [vmem:[%s26632_s1 + $0x38] sm:$0xf] }
 0x823   : > { %18875 = vmatpush3.bf16.msra.mxu0 %v18874_v21  ;;  %18911 = vmatpush3.bf16.msra.mxu1 %v18910_v22  ;;  %v18916_v21 = vpack.c.bf16 %v3801_v19, %v3800_v18  ;;  %v3802_v22 = vld [vmem:[%s26639_s8 + $0x20] sm:$0xff]  ;;  %v22344_v18 = vld [vmem:[%s20894_s17 + $0x58] sm:$0xf] }
 0x824   : > { %17128 = vmatprep.subr.mxu0 %v20715_v0  ;;  %17191 = vmatprep.subr.mxu1 %v20715_v0  ;;  %v18919_v25 = vpack.c.bf16 %v3803_v24, %v3802_v22  ;;  %v3986_v22 = vld [vmem:[%s26632_s1 + $0x30] sm:$0xf]  ;;  %v15246_v24 = vld [vmem:[%s26632_s1 + $0x88] sm:$0xff] }
 0x827   : > { %17129 = vmatpush3.msra.mxu0 %v3226_v26  ;;  %17192 = vmatpush3.msra.mxu1 %v15201_v27  ;;  %v3804_v26 = vld [vmem:[%s26639_s8 + $0x30] sm:$0xff]  ;;  %v3805_v27 = vld [vmem:[%s26639_s8 + $0x38] sm:$0xff] }
 0x828   : > { %17131 = vmatmul.mubr.msk.f32.vlgmr.msra.gmra.mrb[26].mxu0 %vm1511_vm10, %v22030_v38  ;;  %18888 = vmatprep.subr.bf16.mxu0 %v20717_v14  ;;  %v15209_v38 = vld [vmem:[%s26639_s8 + $0x90] sm:$0xff] }
 0x829   : > { %17194 = vmatmul.mubr.msk.f32.vlgmr.msra.gmra.mrb[40].mxu1 %vm1511_vm10, %v3566_v63  ;;  %18890 = vmatpush3.bf16.msra.mxu0 %v18889_v28  ;;  %v18940_v40 = vpack.c.bf16 %v15210_v39, %v15209_v38  ;;  %v18922_v28 = vpack.c.bf16 %v3805_v27, %v3804_v26  ;;  %v3813_v38 = vld [vmem:[%s26639_s8 + $0x78] sm:$0xff]  ;;  %v4005_v27 = vrot.slane %v22344_v18, 1 }
 0x82a   : > { %18891 = vmatprep.subr.bf16.mxu0 %v20717_v14  ;;  %17172 = vmatprep.mubr.msk.f32.mxu0 %vm20718_vm9, %v20715_v0 }
 0x82b   : > { %18936 = vmatprep.subr.bf16.mxu1 %v20717_v14  ;;  %17273 = vmatprep.mubr.msk.f32.mxu1 %vm20718_vm9, %v20715_v0 }
 0x82c   : > { %18938 = vmatpush3.bf16.msra.mxu1 %v18937_v37  ;;  %v3812_v37 = vld [vmem:[%s26639_s8 + $0x70] sm:$0xff] }
 0x82d   : > { %18893 = vmatpush3.bf16.msra.mxu0 %v18892_v12  ;;  %18939 = vmatprep.subr.bf16.mxu1 %v20717_v14  ;;  %v18925_v12 = vpack.c.bf16 %v3807_v3, %v3806_v2  ;;  %v18934_v39 = vpack.c.bf16 %v3813_v38, %v3812_v37 }
 0x82e   : > { %18894 = vmatprep.subr.bf16.mxu0 %v20717_v14 }
 0x830   : > { %18941 = vmatpush3.bf16.msra.mxu1 %v18940_v40  ;;  %v15221_v40 = vld [vmem:[%s26639_s8 + $0xf0] sm:$0xff] }
 0x831   : > { %18896 = vmatpush3.bf16.msra.mxu0 %v18895_v32  ;;  %18942 = vmatprep.subr.bf16.mxu1 %v20717_v14  ;;  %v18928_v32 = vpack.c.bf16 %v3809_v31, %v3808_v30  ;;  %v18958_v42 = vpack.c.bf16 %v15222_v41, %v15221_v40  ;;  %v15247_v30 = vld [vmem:[%s26632_s1 + $0x90] sm:$0xff]  ;;  %v15250_v31 = vld [vmem:[%s26632_s1 + $0xa8] sm:$0xff]  ;;  %v15258_v41 = vld [vmem:[%s26632_s1 + $0xc0] sm:$0xff] }
 0x832   : > { %18897 = vmatprep.subr.bf16.mxu0 %v20717_v14 }
 0x834   : > { %18944 = vmatpush3.bf16.msra.mxu1 %v18943_v43  ;;  %v15228_v43 = vld [vmem:[%s26632_s1 + $0x48] sm:$0xff] }
 0x835   : > { %18899 = vmatpush3.bf16.msra.mxu0 %v18898_v34  ;;  %18945 = vmatprep.subr.bf16.mxu1 %v20717_v14  ;;  %v18931_v34 = vpack.c.bf16 %v3811_v33, %v3810_v20  ;;  %v18960_v45 = vpack.c.bf16 %v15230_v44, %v15228_v43  ;;  %v15263_v43 = vld [vmem:[%s26632_s1 + $0xe8] sm:$0xff]  ;;  %v15265_v44 = vld [vmem:[%s26632_s1 + $0xf8] sm:$0xf] }
 0x836   : > { %17170 = vmatprep.subr.mxu0 %v20715_v0 }
 0x838   : > { %18947 = vmatpush3.bf16.msra.mxu1 %v18946_v46 }
 0x839   : > { %17171 = vmatpush3.msra.mxu0 %v15191_v13  ;;  %18948 = vmatprep.subr.bf16.mxu1 %v20717_v14  ;;  %v15219_v13 = vld [vmem:[%s26639_s8 + $0xe0] sm:$0xff] }
 0x83a   : > { %17173 = vmatmul.mubr.msk.f32.vlgmr.msra.gmra.mrb[28].mxu0 %vm1511_vm10, %v22064_v4  ;;  %17196 = vmatprep.subr.mxu0 %v20715_v0  ;;  %v18955_v35 = vpack.c.bf16 %v15220_v23, %v15219_v13  ;;  %v15251_v13 = vld [vmem:[%s26632_s1 + $0xb0] sm:$0xf]  ;;  %v15259_v23 = vld [vmem:[%s26632_s1 + $0xc8] sm:$0xff] }
 0x83b   : > { %17198 = vmatprep.mubr.msk.f32.mxu0 %vm20718_vm9, %v20715_v0 }
 0x83c   : > { %18950 = vmatpush3.bf16.msra.mxu1 %v18949_v49  ;;  %v15229_v49 = vld [vmem:[%s26632_s1 + $0x50] sm:$0xff] }
 0x83d   : > { %18951 = vmatprep.subr.bf16.mxu1 %v20717_v14 }
 0x840   : > { %18953 = vmatpush3.bf16.msra.mxu1 %v18952_v52 }
 0x841   : > { %18954 = vmatprep.subr.bf16.mxu1 %v20717_v14 }
 0x844   : > { %18956 = vmatpush3.bf16.msra.mxu1 %v18955_v35  ;;  %v15261_v35 = vld [vmem:[%s26632_s1 + $0xd8] sm:$0xff] }
 0x845   : > { %18957 = vmatprep.subr.bf16.mxu1 %v20717_v14  ;;  %v18990_v38 = vpack.c.bf16 %v15261_v35, %v15259_v23  ;;  %v15301_v23 = vld [vmem:[%s26635_s4 + $0xd8] sm:$0xff] }
 0x848   : > { %18959 = vmatpush3.bf16.msra.mxu1 %v18958_v42  ;;  %v15260_v42 = vld [vmem:[%s26632_s1 + $0xd0] sm:$0xff] }
 0x8e9   : > { %v3309_v53 = vpop.f32.mrb[24].mxu0  ;;  %v3465_v54 = vpop.f32.mrb[38].mxu1 }
 0x8ea   : > { %v17111_v55 = vpop.f32.mrb[25].mxu0  ;;  %v17153_v56 = vpop.f32.mrb[39].mxu1 }
 0x8fb   : > { %v3381_v57 = vpop.f32.mrb[26].mxu0 }
 0x8fc   : > { %v3382_v58 = vadd.f32 %v3381_v57, %v3309_v53  ;;  %v3635_v59 = vpop.f32.mrb[40].mxu1  ;;  %v17132_v60 = vpop.f32.mrb[27].mxu0  ;;  %v18962_v53 = vpack.c.bf16 %v15229_v49, %v15227_v48  ;;  %v18964_v57 = vpack.c.bf16 %v15234_v51, %v15232_v50  ;;  %v18994_v48 = vpack.c.bf16 %v15265_v44, %v15263_v43  ;;  %v15262_v49 = vld [vmem:[%s26632_s1 + $0xe0] sm:$0xff]  ;;  %v15264_v50 = vld [vmem:[%s26632_s1 + $0xf0] sm:$0xf]  ;;  %v15272_v51 = vld [vmem:[%s26632_s1 + $0x108] sm:$0xff] }
 0x8fd   : > { %v17195_v61 = vpop.f32.mrb[41].mxu1  ;;  %v22310_v60 = vld [vmem:[%s20894_s17 + $0x48] sm:$0xff] }
 0x8fe   : > { %v3469_v62 = vadd.f32 %v3465_v54, %v3382_v58  ;;  %v15231_v54 = vld [vmem:[%s26632_s1 + $0x60] sm:$0xff]  ;;  %v15233_v58 = vld [vmem:[%s26632_s1 + $0x70] sm:$0xf]  ;;  %v3981_v61 = vld [vmem:[%s26632_s1 + $0x8] sm:$0xff]  ;;  %v4206_v40 = vrot.slane %v22310_v60, 2 }
 0x90d   : > { %v3550_v63 = vpop.f32.mrb[28].mxu0 }
 0x90e   : > { %v3554_v4 = vadd.f32 %v3550_v63, %v3469_v62  ;;  %v17174_v5 = vpop.f32.mrb[29].mxu0  ;;  %v3983_v62 = vld [vmem:[%s26632_s1 + $0x18] sm:$0xff]  ;;  %v18967_v63 = vpack.c.bf16 %v15233_v58, %v15231_v54  ;;  %v4210_v54 = vrot.slane %v22344_v18, 2 }
 0x90f   : > { %v4001_v5 = vrot.slane %v22310_v60, 1 }
 0x910   : > { %v3639_v7 = vadd.f32 %v3635_v59, %v3554_v4  ;;  %v22307_v59 = vld [vmem:[%s20894_s17 + $0x40] sm:$0xff] }
 0x911   : > { %v4000_v4 = vrot.slane %v22307_v59, 1  ;;  %v4321_v58 = vrot.slane %v22307_v59, 3 }
 0x912   : > { %v3647_v8 = vadd.f32 %v15203_v6, %v3639_v7  ;;  %v18970_v6 = vpack.c.bf16 %v3983_v62, %v3981_v61  ;;  %v3980_v7 = vld [vmem:[%s26632_s1] sm:$0xff]  ;;  %v4322_v61 = vrot.slane %v22310_v60, 3 }
 0x913   : > { %v4002_v15 = vsel %vm538_vm3, %v4000_v4, %v4001_v5  ;;  %v15271_v62 = vld [vmem:[%s26632_s1 + $0x100] sm:$0xff]  ;;  %v15276_v4 = vld [vmem:[%s26632_s1 + $0x128] sm:$0xff] }
 0x914   : > { %v3648_v9 = vmax.f32 %v3647_v8, 0.0  ;;  %v3982_v8 = vld [vmem:[%s26632_s1 + $0x10] sm:$0xff] }
 0x916   : > { %17197 = vmatpush3.msra.mxu0 %v3648_v9 }
 0x917   : > { %17199 = vmatmul.mubr.msk.f32.vlgmr.msra.gmra.mrb[30].mxu0 %vm1924_vm11, %v3649_v10  ;;  %17201 = vmatprep.subr.mxu0 %v20715_v0  ;;  %v3985_v10 = vld [vmem:[%s26632_s1 + $0x28] sm:$0xff] }
 0x918   : > { %17202 = vmatpush3.msra.mxu0 %v3648_v9  ;;  %17203 = vmatprep.mubr.msk.f32.mxu0 %vm20718_vm9, %v20715_v0  ;;  %v22330_v9 = vld [vmem:[%s20894_s17 + $0x50] sm:$0xff]  ;;  %v18974_v19 = vpack.c.bf16 %v3987_v11, %v3985_v10  ;;  %v15275_v11 = vld [vmem:[%s26632_s1 + $0x120] sm:$0xff] }
 0x919   : > { %18912 = vmatprep.subr.bf16.mxu0 %v20717_v14 }
 0x91b   : > { %17204 = vmatmul.mubr.msk.f32.vlgmr.msra.gmra.mrb[32].mxu0 %vm1924_vm11, %v15205_v16  ;;  %v18972_v16 = vpack.c.bf16 %v3982_v8, %v3980_v7  ;;  %v4324_v8 = vrot.slane %v22330_v9, 3 }
 0x91c   : > { %18914 = vmatpush3.bf16.msra.mxu0 %v18913_v17  ;;  %17238 = vmatprep.mubr.msk.f32.mxu0 %vm20718_vm9, %v20715_v0  ;;  %v4003_v17 = vrot.slane %v22330_v9, 1 }
 0x91d   : > { %18915 = vmatprep.subr.bf16.mxu0 %v20717_v14 }
 0x91e   : > { %v4004_v26 = vsel %vm538_vm3, %v4001_v5, %v4003_v17  ;;  %v4006_v3 = vsel %vm538_vm3, %v4003_v17, %v4005_v27  ;;  %v15278_v5 = vld [vmem:[%s26632_s1 + $0x138] sm:$0xf]  ;;  %v4326_v17 = vrot.slane %v22344_v18, 3 }
 0x91f   : > { %v19004_v10 = vpack.c.bf16 %v15278_v5, %v15276_v4 }
 0x920   : > { %18917 = vmatpush3.bf16.msra.mxu0 %v18916_v21  ;;  %v3984_v21 = vld [vmem:[%s26632_s1 + $0x20] sm:$0xff] }
 0x921   : > { %18918 = vmatprep.subr.bf16.mxu0 %v20717_v14 }
 0x924   : > { %18920 = vmatpush3.bf16.msra.mxu0 %v18919_v25  ;;  %v15248_v25 = vld [vmem:[%s26632_s1 + $0x98] sm:$0xff] }
 0x925   : > { %18921 = vmatprep.subr.bf16.mxu0 %v20717_v14  ;;  %v18980_v2 = vpack.c.bf16 %v15248_v25, %v15246_v24  ;;  %v4438_v24 = vrot.slane %v22310_v60, 4 }
 0x928   : > { %18923 = vmatpush3.bf16.msra.mxu0 %v18922_v28  ;;  %v18977_v28 = vpack.c.bf16 %v3986_v22, %v3984_v21  ;;  %v4327_v21 = vsel %vm865_vm6, %v4324_v8, %v4326_v17  ;;  %v4437_v22 = vrot.slane %v22307_v59, 4  ;;  %v4744_v17 = vld [vmem:[%s26635_s4 + $0x8] sm:$0xff] }
 0x929   : > { %18924 = vmatprep.subr.bf16.mxu0 %v20717_v14 }
 0x92a   : > { %v4439_v25 = vsel %vm553_vm0, %v4437_v22, %v4438_v24  ;;  %v4745_v22 = vld [vmem:[%s26635_s4 + $0x10] sm:$0xff] }
 0x92c   : > { %18926 = vmatpush3.bf16.msra.mxu0 %v18925_v12  ;;  %v15245_v12 = vld [vmem:[%s26632_s1 + $0x80] sm:$0xff] }
 0x92d   : > { %18927 = vmatprep.subr.bf16.mxu0 %v20717_v14  ;;  %v18982_v20 = vpack.c.bf16 %v15247_v30, %v15245_v12  ;;  %v15296_v30 = vld [vmem:[%s26635_s4 + $0xb0] sm:$0xff] }
 0x930   : > { %18929 = vmatpush3.bf16.msra.mxu0 %v18928_v32  ;;  %v15252_v32 = vld [vmem:[%s26632_s1 + $0xb8] sm:$0xf] }
 0x931   : > { %18930 = vmatprep.subr.bf16.mxu0 %v20717_v14  ;;  %v18984_v33 = vpack.c.bf16 %v15252_v32, %v15250_v31  ;;  %v15297_v31 = vld [vmem:[%s26635_s4 + $0xb8] sm:$0xff] }
 0x932   : > { %v19052_v32 = vpack.c.bf16 %v15297_v31, %v15296_v30  ;;  %v4753_v30 = vld [vmem:[%s26635_s4 + $0x50] sm:$0xff]  ;;  %v4754_v31 = vld [vmem:[%s26635_s4 + $0x58] sm:$0xff] }
 0x934   : > { %18932 = vmatpush3.bf16.msra.mxu0 %v18931_v34  ;;  %v15249_v34 = vld [vmem:[%s26632_s1 + $0xa0] sm:$0xff] }
 0x935   : > { %18933 = vmatprep.subr.bf16.mxu0 %v20717_v14  ;;  %v18987_v37 = vpack.c.bf16 %v15251_v13, %v15249_v34  ;;  %v15300_v13 = vld [vmem:[%s26635_s4 + $0xd0] sm:$0xff] }
 0x936   : > { %v19058_v35 = vpack.c.bf16 %v15301_v23, %v15300_v13  ;;  %v15305_v23 = vld [vmem:[%s26635_s4 + $0xf8] sm:$0xff] }
 0x938   : > { %18935 = vmatpush3.bf16.msra.mxu0 %v18934_v39  ;;  %v4205_v39 = vrot.slane %v22307_v59, 2 }
 0x939   : > { %18961 = vmatprep.subr.bf16.mxu0 %v18960_v45 }
 0x93a   : > { %v4207_v45 = vsel %vm747_vm5, %v4205_v39, %v4206_v40 }
 0x9ea   : > { %v3719_v46 = vpop.f32.mrb[30].mxu0 }
 0x9eb   : > { %v17200_v47 = vpop.f32.mrb[31].mxu0 }
 0x9ec   : > { %v4208_v47 = vrot.slane %v22330_v9, 2 }
 0x9ee   : > { %v3793_v52 = vpop.f32.mrb[32].mxu0 }
 0x9ef   : > { %v3797_v55 = vmax.f32 %v3719_v46, %v3793_v52  ;;  %v17205_v56 = vpop.f32.mrb[33].mxu0  ;;  %v18992_v46 = vpack.c.bf16 %v15260_v42, %v15258_v41  ;;  %v15274_v52 = vld [vmem:[%s26632_s1 + $0x118] sm:$0xff] }
 0x9f0   : > { %v19000_v56 = vpack.c.bf16 %v15274_v52, %v15272_v51 }
 0x9f1   : > { %17239 = vmatmul.mubr.f32.vlgmr.msra.gmra.mrb[34].mxu0 %v3797_v55  ;;  %17274 = vmatmul.mubr.f32.vlgmr.msra.gmra.mrb[42].mxu1 %v3797_v55  ;;  %v18997_v55 = vpack.c.bf16 %v15264_v50, %v15262_v49 }
 0x9f2   : > { %18963 = vmatpush1.bf16.msra.mxu0 %v18962_v53  ;;  %4083 = vmatprep.mubr.f32.mxu0 %v20715_v0  ;;  %v4209_v53 = vsel %vm747_vm5, %v4206_v40, %v4208_v47 }
 0x9f3   : > { %18966 = vmatprep.subr.msk.bf16.mxu0 %vm20887_vm2, %v18964_v57  ;;  %4641 = vmatprep.mubr.f32.mxu1 %v20715_v0  ;;  %v4211_v57 = vsel %vm747_vm5, %v4208_v47, %v4210_v54 }
 0x9f6   : > { %18969 = vmatpush1.bf16.msk.msra.mxu0 %vm20887_vm2, %v18967_v63  ;;  %v15273_v63 = vld [vmem:[%s26632_s1 + $0x110] sm:$0xff] }
 0x9f7   : > { %18971 = vmatprep.subr.bf16.mxu0 %v18970_v6  ;;  %v4323_v6 = vsel %vm865_vm6, %v4321_v58, %v4322_v61  ;;  %v19002_v7 = vpack.c.bf16 %v15273_v63, %v15271_v62 }
 0x9f9   : > { %15237 = vmatmul.mubr.msk.f32.vlgmr.msra.gmra.mrb[36].mxu0 %vm546_vm4, %v4002_v15  ;;  %v15277_v15 = vld [vmem:[%s26632_s1 + $0x130] sm:$0xf] }
 0x9fa   : > { %4089 = vmatprep.mubr.f32.mxu0 %v20715_v0  ;;  %18973 = vmatpush1.bf16.msra.mxu0 %v18972_v16  ;;  %v4325_v16 = vsel %vm865_vm6, %v4322_v61, %v4324_v8 }
 0x9fb   : > { %18976 = vmatprep.subr.msk.bf16.mxu0 %vm20887_vm2, %v18974_v19  ;;  %v19007_v19 = vpack.c.bf16 %v15277_v15, %v15275_v11  ;;  %v4569_v11 = vld [vmem:[%s26634_s3] sm:$0xff]  ;;  %v4570_v15 = vld [vmem:[%s26634_s3 + $0x8] sm:$0xf] }
 0x9fd   : > { %15238 = vmatmul.mubr.msk.f32.gmra.mrb[38].mxu0 %vm546_vm4, %v4004_v26  ;;  %v4440_v26 = vrot.slane %v22330_v9, 4 }
 0x9fe   : > { %4095 = vmatprep.mubr.f32.mxu0 %v20715_v0  ;;  %18979 = vmatpush1.bf16.msk.msra.mxu0 %vm20887_vm2, %v18977_v28  ;;  %v15293_v28 = vld [vmem:[%s26635_s4 + $0x98] sm:$0xff] }
 0x9ff   : > { %18981 = vmatprep.subr.bf16.mxu0 %v18980_v2  ;;  %v4441_v27 = vsel %vm553_vm0, %v4438_v24, %v4440_v26  ;;  %v4746_v24 = vld [vmem:[%s26635_s4 + $0x18] sm:$0xff] }
 0xa01   : > { %15239 = vmatmul.mubr.msk.f32.gmra.mrb[40].mxu0 %vm546_vm4, %v4006_v3  ;;  %v15295_v3 = vld [vmem:[%s26635_s4 + $0xa8] sm:$0xff] }
 0xa02   : > { %4178 = vmatprep.mubr.f32.mxu0 %v20715_v0 }
 0xa05   : > { %15242 = vmatmul.mubr.msk.f32.vlgmr.msra.gmra.mrb[36].mxu0 %vm546_vm4, %v22307_v59  ;;  %v4442_v59 = vrot.slane %v22344_v18, 4  ;;  %v15294_v18 = vld [vmem:[%s26635_s4 + $0xa0] sm:$0xff] }
 0xa06   : > { %4184 = vmatprep.mubr.f32.mxu0 %v20715_v0  ;;  %18983 = vmatpush1.bf16.msra.mxu0 %v18982_v20  ;;  %v19049_v12 = vpack.c.bf16 %v15295_v3, %v15294_v18  ;;  %v15298_v20 = vld [vmem:[%s26635_s4 + $0xc0] sm:$0xff]  ;;  %v4752_v3 = vld [vmem:[%s26635_s4 + $0x48] sm:$0xff] }
 0xa07   : > { %18986 = vmatprep.subr.msk.bf16.mxu0 %vm20887_vm2, %v18984_v33  ;;  %v15299_v33 = vld [vmem:[%s26635_s4 + $0xc8] sm:$0xff]  ;;  %v4751_v18 = vld [vmem:[%s26635_s4 + $0x40] sm:$0xff] }
 0xa08   : > { %v19055_v34 = vpack.c.bf16 %v15299_v33, %v15298_v20  ;;  %v4755_v20 = vld [vmem:[%s26635_s4 + $0x60] sm:$0xff]  ;;  %v4756_v33 = vld [vmem:[%s26635_s4 + $0x68] sm:$0xff] }
 0xa09   : > { %15243 = vmatmul.mubr.msk.f32.gmra.mrb[38].mxu0 %vm546_vm4, %v22310_v60  ;;  %v4443_v60 = vsel %vm553_vm0, %v4440_v26, %v4442_v59  ;;  %v19022_v26 = vpack.c.bf16 %v4746_v24, %v4745_v22  ;;  %v4748_v59 = vld [vmem:[%s26635_s4 + $0x28] sm:$0xff]  ;;  %v19037_v13 = vpack.c.bf16 %v4756_v33, %v4755_v20  ;;  %v15317_v22 = vld [vmem:[%s26636_s5 + $0x70] sm:$0xff] }
 0xa0a   : > { %4190 = vmatprep.mubr.f32.mxu0 %v20715_v0  ;;  %18989 = vmatpush1.bf16.msk.msra.mxu0 %vm20887_vm2, %v18987_v37  ;;  %v15302_v37 = vld [vmem:[%s26635_s4 + $0xe0] sm:$0xff]  ;;  %v15327_v24 = vld [vmem:[%s26636_s5 + $0xb0] sm:$0xff] }
 0xa0b   : > { %18991 = vmatprep.subr.bf16.mxu0 %v18990_v38  ;;  %v15303_v38 = vld [vmem:[%s26635_s4 + $0xe8] sm:$0xff] }
 0xa0c   : > { %v19061_v39 = vpack.c.bf16 %v15303_v38, %v15302_v37  ;;  %v4757_v37 = vld [vmem:[%s26635_s4 + $0x70] sm:$0xff]  ;;  %v4758_v38 = vld [vmem:[%s26635_s4 + $0x78] sm:$0xff] }
 0xa0d   : > { %15244 = vmatmul.mubr.msk.f32.gmra.mrb[40].mxu0 %vm546_vm4, %v22330_v9  ;;  %v15292_v9 = vld [vmem:[%s26635_s4 + $0x90] sm:$0xff] }
 0xa0e   : > { %4288 = vmatprep.mubr.f32.mxu0 %v20715_v0  ;;  %v19046_v2 = vpack.c.bf16 %v15293_v28, %v15292_v9  ;;  %v4749_v9 = vld [vmem:[%s26635_s4 + $0x30] sm:$0xff]  ;;  %v4750_v28 = vld [vmem:[%s26635_s4 + $0x38] sm:$0xff] }
 0xa11   : > { %15255 = vmatmul.mubr.msk.f32.vlgmr.msra.gmra.mrb[36].mxu0 %vm546_vm4, %v4207_v45  ;;  %v4545_v45 = vld [vmem:[%s26633_s2] sm:$0x3] }
 0xa12   : > { %4294 = vmatprep.mubr.f32.mxu0 %v20715_v0  ;;  %18993 = vmatpush1.bf16.msra.mxu0 %v18992_v46  ;;  %v4550_v46 = vrot.slane %v4545_v45, %v21109_v36 }
 0xa13   : > { %18996 = vmatprep.subr.msk.bf16.mxu0 %vm20887_vm2, %v18994_v48  ;;  %v4554_v48 = vrot.slane %v4545_v45, %v21114_v29  ;;  %v15308_v45 = vld [vmem:[%s26635_s4 + $0x110] sm:$0xff] }
 0xa15   : > { %15256 = vmatmul.mubr.msk.f32.gmra.mrb[38].mxu0 %vm546_vm4, %v4209_v53 }
 0xa16   : > { %4300 = vmatprep.mubr.f32.mxu0 %v20715_v0  ;;  %18999 = vmatpush1.bf16.msk.msra.mxu0 %vm20887_vm2, %v18997_v55 }
 0xa17   : > { %19001 = vmatprep.subr.bf16.mxu0 %v19000_v56 }
 0xa19   : > { %15257 = vmatmul.mubr.msk.f32.gmra.mrb[40].mxu0 %vm546_vm4, %v4211_v57 }
 0xa1a   : > { %4404 = vmatprep.mubr.f32.mxu0 %v20715_v0 }
 0xa1d   : > { %15268 = vmatmul.mubr.msk.f32.vlgmr.msra.gmra.mrb[36].mxu0 %vm546_vm4, %v4323_v6 }
 0xa1e   : > { %4410 = vmatprep.mubr.f32.mxu0 %v20715_v0  ;;  %19003 = vmatpush1.bf16.msra.mxu0 %v19002_v7 }
 0xa1f   : > { %19006 = vmatprep.subr.msk.bf16.mxu0 %vm20887_vm2, %v19004_v10 }
 0xa21   : > { %15269 = vmatmul.mubr.msk.f32.gmra.mrb[38].mxu0 %vm546_vm4, %v4325_v16  ;;  %v4743_v16 = vld [vmem:[%s26635_s4] sm:$0xff] }
 0xa22   : > { %4416 = vmatprep.mubr.f32.mxu0 %v20715_v0  ;;  %19009 = vmatpush1.bf16.msk.msra.mxu0 %vm20887_vm2, %v19007_v19  ;;  %v15286_v19 = vld [vmem:[%s26634_s3 + $0x10] sm:$0xff] }
 0xa23   : > { %19045 = vmatprep.subr.bf16.mxu0 %v20717_v14 }
 0xa25   : > { %15270 = vmatmul.mubr.msk.f32.gmra.mrb[40].mxu0 %vm546_vm4, %v4327_v21  ;;  %v19019_v21 = vpack.c.bf16 %v4744_v17, %v4743_v16 }
 0xa26   : > { %4520 = vmatprep.mubr.f32.mxu0 %v20715_v0 }
 0xa29   : > { %15281 = vmatmul.mubr.msk.f32.vlgmr.msra.gmra.mrb[36].mxu0 %vm546_vm4, %v4439_v25  ;;  %v15287_v25 = vld [vmem:[%s26634_s3 + $0x18] sm:$0xf] }
 0xa2a   : > { %4526 = vmatprep.mubr.f32.mxu0 %v20715_v0  ;;  %19047 = vmatpush1.bf16.msra.mxu0 %v19046_v2  ;;  %v19028_v2 = vpack.c.bf16 %v4750_v28, %v4749_v9  ;;  %v15329_v9 = vld [vmem:[%s26636_s5 + $0xc0] sm:$0xff] }
 0xa2b   : > { %19048 = vmatprep.subr.bf16.mxu0 %v20717_v14 }
 0xa2d   : > { %15282 = vmatmul.mubr.msk.f32.gmra.mrb[38].mxu0 %vm546_vm4, %v4441_v27  ;;  %v4747_v27 = vld [vmem:[%s26635_s4 + $0x20] sm:$0xff] }
 0xa2e   : > { %4532 = vmatprep.mubr.f32.mxu0 %v20715_v0  ;;  %19050 = vmatpush1.bf16.msra.mxu0 %v19049_v12  ;;  %v19031_v12 = vpack.c.bf16 %v4752_v3, %v4751_v18  ;;  %v15320_v3 = vld [vmem:[%s26636_s5 + $0x88] sm:$0xff] }
 0xa2f   : > { %19051 = vmatprep.subr.bf16.mxu0 %v20717_v14 }
 0xa31   : > { %15283 = vmatmul.mubr.msk.f32.gmra.mrb[40].mxu0 %vm546_vm4, %v4443_v60  ;;  %v19025_v60 = vpack.c.bf16 %v4748_v59, %v4747_v27  ;;  %v15318_v59 = vld [vmem:[%s26636_s5 + $0x78] sm:$0xff] }
 0xa32   : > { %19053 = vmatpush1.bf16.msra.mxu0 %v19052_v32  ;;  %v19034_v32 = vpack.c.bf16 %v4754_v31, %v4753_v30 }
 0xa33   : > { %19054 = vmatprep.subr.bf16.mxu0 %v20717_v14 }
 0xa36   : > { %19056 = vmatpush1.bf16.msra.mxu0 %v19055_v34  ;;  %v15304_v34 = vld [vmem:[%s26635_s4 + $0xf0] sm:$0xff] }
 0xa37   : > { %19057 = vmatprep.subr.bf16.mxu0 %v20717_v14 }
 0xa3a   : > { %19059 = vmatpush1.bf16.msra.mxu0 %v19058_v35  ;;  %v19064_v35 = vpack.c.bf16 %v15305_v23, %v15304_v34  ;;  %v4937_v34 = vld [vmem:[%s26636_s5] sm:$0xff] }
 0xa3b   : > { %19060 = vmatprep.subr.bf16.mxu0 %v20717_v14  ;;  %v15343_v23 = vld [vmem:[%s26636_s5 + $0x120] sm:$0xff] }
 0xa3e   : > { %19062 = vmatpush1.bf16.msra.mxu0 %v19061_v39  ;;  %v15306_v39 = vld [vmem:[%s26635_s4 + $0x100] sm:$0xff] }
 0xa3f   : > { %19063 = vmatprep.subr.bf16.mxu0 %v20717_v14 }
 0xa42   : > { %19065 = vmatpush1.bf16.msra.mxu0 %v19064_v35  ;;  %v15344_v35 = vld [vmem:[%s26636_s5 + $0x128] sm:$0xff] }
 0xa43   : > { %19066 = vmatprep.subr.bf16.mxu0 %v20717_v14 }
 0xac4   : > { %v3880_v40 = vpop.f32.mrb[34].mxu0  ;;  %v3966_v41 = vpop.f32.mrb[42].mxu1 }
 0xac5   : > { %v3970_v42 = vmax.f32 %v3880_v40, %v3966_v41  ;;  %v17240_v43 = vpop.f32.mrb[35].mxu0  ;;  %v17275_v44 = vpop.f32.mrb[43].mxu1  ;;  %v19040_v40 = vpack.c.bf16 %v4758_v38, %v4757_v37  ;;  %v15307_v41 = vld [vmem:[%s26635_s4 + $0x108] sm:$0xff] }
 0xac6   : > { %v4759_v43 = vld [vmem:[%s26635_s4 + $0x80] sm:$0xff]  ;;  %v4760_v44 = vld [vmem:[%s26635_s4 + $0x88] sm:$0xff] }
 0xac7   : > { %3971 = vst.msk [vmem:[#allocation2 + $0x1] sm:$0x1] %vm2248_vm12, %v3970_v42 }
 0xac8   : > { %3972 = vst.msk [vmem:[#allocation2 + $0x8] sm:$0x2] %vm2250_vm13, %v3970_v42 }
 0xac9   : > { %3973 = vst.msk [vmem:[#allocation2 + $0xf] sm:$0x4] %vm2252_vm14, %v3970_v42 }
 0xaca   : > { %3974 = vst.msk [vmem:[#allocation2 + $0x16] sm:$0x8] %vm2254_vm15, %v3970_v42  ;;  %v19067_v42 = vpack.c.bf16 %v15307_v41, %v15306_v39 }
 0xacc   : > { %19068 = vmatpush1.bf16.msra.mxu0 %v19067_v42 }
 0xacd   : > { %19069 = vmatprep.subr.bf16.mxu0 %v20717_v14 }
 0xafc   : > { %v4522_v47 = vpop.f32.mrb[36].mxu0 }
 0xafd   : > { %v4524_v49 = vpop.f32.mrb[37].mxu0  ;;  %v4557_v50 = vadd.f32 %v4550_v46, %v4522_v47  ;;  %v15309_v47 = vld [vmem:[%s26635_s4 + $0x118] sm:$0xff] }
 0xafe   : > { %v4558_v51 = vadd.f32 %v4554_v48, %v4524_v49 }
 0xaff   : > { %v4563_v56 = vmax.f32 %v4557_v50, 0.0 }
 0xb00   : > { %v4528_v52 = vpop.f32.mrb[38].mxu0  ;;  %v4564_v58 = vmax.f32 %v4558_v51, 0.0 }
 0xb01   : > { %v4559_v53 = vadd.f32 %v4550_v46, %v4528_v52  ;;  %v4530_v54 = vpop.f32.mrb[39].mxu0 }
 0xb02   : > { %v4560_v55 = vadd.f32 %v4554_v48, %v4530_v54  ;;  %v15313_v54 = vld [vmem:[%s26636_s5 + $0x50] sm:$0xff] }
 0xb03   : > { %v4565_v57 = vmax.f32 %v4559_v53, 0.0  ;;  %v15312_v53 = vld [vmem:[%s26636_s5 + $0x48] sm:$0xff] }
 0xb04   : > { %v4566_v61 = vmax.f32 %v4560_v55, 0.0  ;;  %v4534_v62 = vpop.f32.mrb[40].mxu0  ;;  %v15323_v55 = vld [vmem:[%s26636_s5 + $0x90] sm:$0xff] }
 0xb05   : > { %v19012_v63 = vpack.c.bf16 %v4565_v57, %v4563_v56  ;;  %v4536_v4 = vpop.f32.mrb[41].mxu0  ;;  %v4561_v7 = vadd.f32 %v4550_v46, %v4534_v62  ;;  %v19043_v46 = vpack.c.bf16 %v4760_v44, %v4759_v43  ;;  %v15324_v56 = vld [vmem:[%s26636_s5 + $0x98] sm:$0xff]  ;;  %v19121_v43 = vpack.c.bf16 %v15344_v35, %v15343_v23  ;;  %v15361_v35 = vld [vmem:[%s26639_s8 + $0xa0] sm:$0xff] }
 0xb06   : > { %v19010_v5 = vpack.c.bf16 %v4566_v61, %v4564_v58  ;;  %v4562_v6 = vadd.f32 %v4554_v48, %v4536_v4  ;;  %v19070_v48 = vpack.c.bf16 %v15309_v47, %v15308_v45  ;;  %v19097_v4 = vpack.c.bf16 %v15324_v56, %v15323_v55  ;;  %v15346_v55 = vld [vmem:[%s26636_s5 + $0x138] sm:$0xff] }
 0xb07   : > { %v4567_v10 = vmax.f32 %v4561_v7, 0.0  ;;  %v15325_v7 = vld [vmem:[%s26636_s5 + $0xa0] sm:$0xff] }
 0xb08   : > { %v4568_v8 = vmax.f32 %v4562_v6, 0.0  ;;  %19011 = vmatprep.subr.bf16.mxu1 %v19010_v5  ;;  %19071 = vmatpush1.bf16.msra.mxu0 %v19070_v48  ;;  %v15315_v6 = vld [vmem:[%s26636_s5 + $0x60] sm:$0xff] }
 0xb09   : > { %19013 = vmatpush1.bf16.msra.mxu1 %v19012_v63  ;;  %19096 = vmatprep.subr.bf16.mxu0 %v20717_v14 }
 0xb0a   : > { %4581 = vmatprep.subr.mxu1 %v4568_v8 }
 0xb0d   : > { %4582 = vmatpush1.msra.mxu1 %v4567_v10 }
 0xb0e   : > { %15284 = vmatmul.mubr.msk.f32.vlgmr.msra.gmra.mrb[44].mxu1 %vm1117_vm7, %v4569_v11  ;;  %19015 = vmatprep.subr.bf16.mxu1 %v19010_v5  ;;  %v15314_v5 = vld [vmem:[%s26636_s5 + $0x58] sm:$0xff] }
 0xb0f   : > { %19017 = vmatpush1.bf16.msra.mxu1 %v19012_v63  ;;  %4647 = vmatprep.mubr.f32.mxu1 %v20715_v0  ;;  %v19073_v63 = vpack.c.bf16 %v15313_v54, %v15312_v53  ;;  %v19076_v17 = vpack.c.bf16 %v15315_v6, %v15314_v5  ;;  %v4940_v53 = vld [vmem:[%s26636_s5 + $0x18] sm:$0xff]  ;;  %v15345_v54 = vld [vmem:[%s26636_s5 + $0x130] sm:$0xff]  ;;  %v4942_v5 = vld [vmem:[%s26636_s5 + $0x28] sm:$0xff] }
 0xb10   : > { %4666 = vmatprep.subr.mxu1 %v4568_v8  ;;  %v15326_v8 = vld [vmem:[%s26636_s5 + $0xa8] sm:$0xff]  ;;  %v15347_v6 = vld [vmem:[%s26636_s5 + $0x140] sm:$0xff] }
 0xb12   : > { %15285 = vmatmul.mubr.msk.f32.gmra.mrb[46].mxu1 %vm1117_vm7, %v4570_v15 }
 0xb13   : > { %4667 = vmatpush1.msra.mxu1 %v4567_v10  ;;  %4726 = vmatprep.mubr.f32.mxu1 %v20715_v0 }
 0xb14   : > { %19018 = vmatprep.subr.bf16.mxu1 %v20717_v14 }
 0xb16   : > { %15288 = vmatmul.mubr.msk.f32.vlgmr.msra.gmra.mrb[48].mxu1 %vm1117_vm7, %v15286_v19  ;;  %v19100_v19 = vpack.c.bf16 %v15326_v8, %v15325_v7  ;;  %v15348_v7 = vld [vmem:[%s26636_s5 + $0x148] sm:$0xff] }
 0xb17   : > { %4732 = vmatprep.mubr.f32.mxu1 %v20715_v0  ;;  %19020 = vmatpush1.bf16.msra.mxu1 %v19019_v21  ;;  %v15316_v21 = vld [vmem:[%s26636_s5 + $0x68] sm:$0xff] }
 0xb18   : > { %19021 = vmatprep.subr.bf16.mxu1 %v20717_v14 }
 0xb1a   : > { %15289 = vmatmul.mubr.msk.f32.gmra.mrb[50].mxu1 %vm1117_vm7, %v15287_v25  ;;  %v19079_v25 = vpack.c.bf16 %v15317_v22, %v15316_v21  ;;  %v15333_v22 = vld [vmem:[%s26636_s5 + $0xd8] sm:$0xff] }
 0xb1b   : > { %19023 = vmatpush1.bf16.msra.mxu1 %v19022_v26  ;;  %v15328_v26 = vld [vmem:[%s26636_s5 + $0xb8] sm:$0xff] }
 0xb1c   : > { %19024 = vmatprep.subr.bf16.mxu1 %v20717_v14  ;;  %v19103_v27 = vpack.c.bf16 %v15328_v26, %v15327_v24  ;;  %v15334_v24 = vld [vmem:[%s26636_s5 + $0xe0] sm:$0xff] }
 0xb1d   : > { %v15351_v26 = vld [vmem:[%s26636_s5 + $0x160] sm:$0xff] }
 0xb1f   : > { %19026 = vmatpush1.bf16.msra.mxu1 %v19025_v60  ;;  %v15319_v60 = vld [vmem:[%s26636_s5 + $0x80] sm:$0xff] }
 0xb20   : > { %19027 = vmatprep.subr.bf16.mxu1 %v20717_v14  ;;  %v19082_v28 = vpack.c.bf16 %v15319_v60, %v15318_v59  ;;  %v15335_v59 = vld [vmem:[%s26636_s5 + $0xe8] sm:$0xff]  ;;  %v15336_v60 = vld [vmem:[%s26636_s5 + $0xf0] sm:$0xff] }
 0xb23   : > { %19029 = vmatpush1.bf16.msra.mxu1 %v19028_v2  ;;  %v15330_v2 = vld [vmem:[%s26636_s5 + $0xc8] sm:$0xff] }
 0xb24   : > { %19030 = vmatprep.subr.bf16.mxu1 %v20717_v14  ;;  %v19106_v18 = vpack.c.bf16 %v15330_v2, %v15329_v9  ;;  %v19112_v9 = vpack.c.bf16 %v15336_v60, %v15335_v59  ;;  %v15338_v2 = vld [vmem:[%s26636_s5 + $0x100] sm:$0xff]  ;;  %v5526_v60 = vld [vmem:[%s26639_s8 + $0x48] sm:$0xff] }
 0xb25   : > { %v5525_v59 = vld [vmem:[%s26639_s8 + $0x40] sm:$0xff] }
 0xb27   : > { %19032 = vmatpush1.bf16.msra.mxu1 %v19031_v12  ;;  %v15331_v12 = vld [vmem:[%s26636_s5 + $0xd0] sm:$0xff] }
 0xb28   : > { %19033 = vmatprep.subr.bf16.mxu1 %v20717_v14 }
 0xb2b   : > { %19035 = vmatpush1.bf16.msra.mxu1 %v19034_v32 }
 0xb2c   : > { %19036 = vmatprep.subr.bf16.mxu1 %v20717_v14 }
 0xb2f   : > { %19038 = vmatpush1.bf16.msra.mxu1 %v19037_v13  ;;  %v4938_v13 = vld [vmem:[%s26636_s5 + $0x8] sm:$0xff] }
 0xb30   : > { %19039 = vmatprep.subr.bf16.mxu1 %v20717_v14  ;;  %v19085_v42 = vpack.c.bf16 %v4938_v13, %v4937_v34  ;;  %v15359_v34 = vld [vmem:[%s26639_s8 + $0x90] sm:$0xff]  ;;  %v15360_v13 = vld [vmem:[%s26639_s8 + $0x98] sm:$0xff] }
 0xb31   : > { %v19160_v23 = vpack.c.bf16 %v15360_v13, %v15359_v34  ;;  %v5532_v34 = vld [vmem:[%s26639_s8 + $0x78] sm:$0xff] }
 0xb33   : > { %19041 = vmatpush1.bf16.msra.mxu1 %v19040_v40 }
 0xb34   : > { %19042 = vmatprep.subr.bf16.mxu1 %v20717_v14 }
 0xb37   : > { %19044 = vmatpush1.bf16.msra.mxu1 %v19043_v46 }
 0xb38   : > { %19072 = vmatprep.subr.bf16.mxu1 %v20717_v14 }
 0xbe1   : > { %v4643_v49 = vpop.f32.mrb[44].mxu1 }
 0xbe2   : > { %v4645_v50 = vpop.f32.mrb[45].mxu1 }
 0xbe5   : > { %v4649_v51 = vpop.f32.mrb[46].mxu1 }
 0xbe6   : > { %v4651_v52 = vpop.f32.mrb[47].mxu1 }
 0xbe9   : > { %v4728_v57 = vpop.f32.mrb[48].mxu1 }
 0xbea   : > { %v4739_v58 = vmax.f32 %v4643_v49, %v4728_v57  ;;  %v4730_v61 = vpop.f32.mrb[49].mxu1 }
 0xbeb   : > { %v4740_v62 = vmax.f32 %v4645_v50, %v4730_v61 }
 0xbed   : > { %v4734_v10 = vpop.f32.mrb[50].mxu1  ;;  %15290 = vmatprep.mubr.msk.f32.mxu1 %vm1309_vm8, %v4740_v62  ;;  %15310 = vmatprep.mubr.msk.f32.mxu0 %vm1309_vm8, %v4740_v62 }
 0xbee   : > { %v4741_v11 = vmax.f32 %v4649_v51, %v4734_v10  ;;  %v4736_v15 = vpop.f32.mrb[51].mxu1  ;;  %4832 = vmatmul.mubr.f32.vlgmr.msra.gmra.mrb[52].mxu1 %v4739_v58  ;;  %4925 = vmatmul.mubr.f32.vlgmr.msra.gmra.mrb[42].mxu0 %v4739_v58  ;;  %v19127_v10 = vpack.c.bf16 %v15348_v7, %v15347_v6  ;;  %v5368_v7 = vld [vmem:[%s26638_s7] sm:$0xf] }
 0xbef   : > { %v4742_v16 = vmax.f32 %v4651_v52, %v4736_v15  ;;  %19074 = vmatpush3.bf16.msra.mxu1 %v19073_v63  ;;  %19098 = vmatpush3.bf16.msra.mxu0 %v19097_v4  ;;  %v4939_v52 = vld [vmem:[%s26636_s5 + $0x10] sm:$0xff]  ;;  %v19124_v63 = vpack.c.bf16 %v15346_v55, %v15345_v54  ;;  %v4941_v4 = vld [vmem:[%s26636_s5 + $0x20] sm:$0xff]  ;;  %v4944_v15 = vld [vmem:[%s26636_s5 + $0x38] sm:$0xff] }
 0xbf0   : > { %19075 = vmatprep.subr.bf16.mxu1 %v20717_v14  ;;  %19099 = vmatprep.subr.bf16.mxu0 %v20717_v14  ;;  %v19088_v62 = vpack.c.bf16 %v4940_v53, %v4939_v52  ;;  %v19091_v8 = vpack.c.bf16 %v4942_v5, %v4941_v4 }
 0xbf1   : > { %15291 = vmatprep.mubr.msk.f32.mxu1 %vm1309_vm8, %v4742_v16  ;;  %15311 = vmatprep.mubr.msk.f32.mxu0 %vm1309_vm8, %v4742_v16  ;;  %v15349_v16 = vld [vmem:[%s26636_s5 + $0x150] sm:$0xff] }
 0xbf2   : > { %4837 = vmatmul.mubr.f32.gmra.mrb[54].mxu1 %v4741_v11  ;;  %4930 = vmatmul.mubr.f32.gmra.mrb[44].mxu0 %v4741_v11  ;;  %v4943_v11 = vld [vmem:[%s26636_s5 + $0x30] sm:$0xff] }
 0xbf3   : > { %19077 = vmatpush3.bf16.msra.mxu1 %v19076_v17  ;;  %19101 = vmatpush3.bf16.msra.mxu0 %v19100_v19  ;;  %v15350_v17 = vld [vmem:[%s26636_s5 + $0x158] sm:$0xff]  ;;  %v19094_v19 = vpack.c.bf16 %v4944_v15, %v4943_v11  ;;  %v15355_v11 = vld [vmem:[%s26638_s7 + $0x4] sm:$0xf] }
 0xbf4   : > { %19078 = vmatprep.subr.bf16.mxu1 %v20717_v14  ;;  %19102 = vmatprep.subr.bf16.mxu0 %v20717_v14  ;;  %v19130_v21 = vpack.c.bf16 %v15350_v17, %v15349_v16  ;;  %v5519_v16 = vld [vmem:[%s26639_s8 + $0x10] sm:$0xff]  ;;  %v5520_v17 = vld [vmem:[%s26639_s8 + $0x18] sm:$0xff] }
 0xbf5   : > { %17294 = vmatprep.mubr.msk.f32.mxu1 %vm20718_vm9, %v20715_v0  ;;  %17336 = vmatprep.mubr.msk.f32.mxu0 %vm20718_vm9, %v20715_v0 }
 0xbf7   : > { %19080 = vmatpush3.bf16.msra.mxu1 %v19079_v25  ;;  %19104 = vmatpush3.bf16.msra.mxu0 %v19103_v27  ;;  %v4945_v25 = vld [vmem:[%s26636_s5 + $0x40] sm:$0xff]  ;;  %v19109_v27 = vpack.c.bf16 %v15334_v24, %v15333_v22  ;;  %v5522_v22 = vld [vmem:[%s26639_s8 + $0x28] sm:$0xff] }
 0xbf8   : > { %19081 = vmatprep.subr.bf16.mxu1 %v20717_v14  ;;  %19105 = vmatprep.subr.bf16.mxu0 %v20717_v14 }
 0xbfb   : > { %19083 = vmatpush3.bf16.msra.mxu1 %v19082_v28  ;;  %19107 = vmatpush3.bf16.msra.mxu0 %v19106_v18  ;;  %v15337_v28 = vld [vmem:[%s26636_s5 + $0xf8] sm:$0xff] }
 0xbfc   : > { %17292 = vmatprep.subr.mxu1 %v20715_v0  ;;  %17334 = vmatprep.subr.mxu0 %v20715_v0  ;;  %v19115_v18 = vpack.c.bf16 %v15338_v2, %v15337_v28  ;;  %v5527_v28 = vld [vmem:[%s26639_s8 + $0x50] sm:$0xff]  ;;  %v5528_v2 = vld [vmem:[%s26639_s8 + $0x58] sm:$0xff] }
 0xbff   : > { %17293 = vmatpush3.msra.mxu1 %v15320_v3  ;;  %17335 = vmatpush3.msra.mxu0 %v15331_v12  ;;  %v15339_v3 = vld [vmem:[%s26636_s5 + $0x108] sm:$0xff]  ;;  %v15340_v12 = vld [vmem:[%s26636_s5 + $0x110] sm:$0xff] }
 0xc00   : > { %19084 = vmatprep.subr.bf16.mxu1 %v20717_v14  ;;  %19120 = vmatprep.subr.bf16.mxu0 %v20717_v14 }
 0xcc1   : > { %v4833_v30 = vpop.f32.mrb[52].mxu1  ;;  %v4926_v31 = vpop.f32.mrb[42].mxu0 }
 0xcc2   : > { %v22724_v32 = vmax.f32 %v4833_v30, %v4926_v31  ;;  %v4835_v20 = vpop.f32.mrb[53].mxu1  ;;  %v4928_v33 = vpop.f32.mrb[43].mxu0  ;;  %v19118_v30 = vpack.c.bf16 %v15340_v12, %v15339_v3  ;;  %v15341_v31 = vld [vmem:[%s26636_s5 + $0x118] sm:$0xff]  ;;  %v5529_v3 = vld [vmem:[%s26639_s8 + $0x60] sm:$0xff]  ;;  %v5530_v12 = vld [vmem:[%s26639_s8 + $0x68] sm:$0xff] }
 0xcc3   : > { %v15358_v20 = vld [vmem:[%s26639_s8 + $0x88] sm:$0xff] }
 0xcc4   : > { %v4957_v44 = vrot.slane %v22724_v32, 1  ;;  %v5113_v45 = vrot.slane %v22724_v32, 2  ;;  %v5283_v46 = vrot.slane %v22724_v32, 4  ;;  %v5198_v47 = vrot.slane %v22724_v32, 3 }
 0xcc5   : > { %v4838_v37 = vpop.f32.mrb[54].mxu1  ;;  %v4931_v38 = vpop.f32.mrb[44].mxu0 }
 0xcc6   : > { %v4936_v39 = vmax.f32 %v4838_v37, %v4931_v38  ;;  %v4840_v40 = vpop.f32.mrb[55].mxu1  ;;  %v4933_v41 = vpop.f32.mrb[45].mxu0  ;;  %v15362_v37 = vld [vmem:[%s26639_s8 + $0xa8] sm:$0xff] }
 0xcc7   : > { %v19163_v38 = vpack.c.bf16 %v15362_v37, %v15361_v35  ;;  %v15364_v40 = vld [vmem:[%s26639_s8 + $0xb8] sm:$0xff] }
 0xcc8   : > { %v4958_v48 = vrot.slane %v4936_v39, 1  ;;  %v5114_v49 = vrot.slane %v4936_v39, 2  ;;  %v5199_v50 = vrot.slane %v4936_v39, 3  ;;  %v5284_v51 = vrot.slane %v4936_v39, 4  ;;  %v15363_v39 = vld [vmem:[%s26639_s8 + $0xb0] sm:$0xff]  ;;  %v15372_v35 = vld [vmem:[%s26639_s8 + $0xf8] sm:$0xff] }
 0xcc9   : > { %v19166_v41 = vpack.c.bf16 %v15364_v40, %v15363_v39  ;;  %v15380_v39 = vld [vmem:[%s26632_s1 + $0x58] sm:$0xff] }
 0xcca   : > { %v4959_v56 = vsel %vm538_vm3, %v4957_v44, %v4958_v48  ;;  %v5115_v57 = vsel %vm747_vm5, %v5113_v45, %v5114_v49  ;;  %v5285_v58 = vsel %vm553_vm0, %v5283_v46, %v5284_v51  ;;  %v22758_v61 = vsel %vm865_vm6, %v5198_v47, %v5199_v50  ;;  %v15367_v45 = vld [vmem:[%s26639_s8 + $0xd0] sm:$0xff]  ;;  %v15368_v46 = vld [vmem:[%s26639_s8 + $0xd8] sm:$0xff] }
 0xccb   : > { %17295 = vmatmul.mubr.msk.f32.vlgmr.msra.gmra.mrb[56].mxu1 %vm1511_vm10, %v4959_v56  ;;  %17337 = vmatmul.mubr.msk.f32.vlgmr.msra.gmra.mrb[46].mxu0 %vm1511_vm10, %v5115_v57  ;;  %v19172_v47 = vpack.c.bf16 %v15368_v46, %v15367_v45  ;;  %v15382_v45 = vld [vmem:[%s26632_s1 + $0x68] sm:$0xff]  ;;  %v15384_v46 = vld [vmem:[%s26632_s1 + $0x78] sm:$0xf] }
 0xccc   : > { %19086 = vmatpush3.bf16.msra.mxu1 %v19085_v42  ;;  %19122 = vmatpush3.bf16.msra.mxu0 %v19121_v43  ;;  %v15365_v42 = vld [vmem:[%s26639_s8 + $0xc0] sm:$0xff]  ;;  %v15366_v43 = vld [vmem:[%s26639_s8 + $0xc8] sm:$0xff] }
 0xccd   : > { %19087 = vmatprep.subr.bf16.mxu1 %v20717_v14  ;;  %19123 = vmatprep.subr.bf16.mxu0 %v20717_v14  ;;  %v19169_v44 = vpack.c.bf16 %v15366_v43, %v15365_v42  ;;  %v15377_v43 = vld [vmem:[%s26632_s1 + $0x40] sm:$0xff] }
 0xcce   : > { %17315 = vmatprep.mubr.msk.f32.mxu1 %vm20718_vm9, %v20715_v0  ;;  %17378 = vmatprep.mubr.msk.f32.mxu0 %vm20718_vm9, %v20715_v0 }
 0xcd0   : > { %19089 = vmatpush3.bf16.msra.mxu1 %v19088_v62  ;;  %19125 = vmatpush3.bf16.msra.mxu0 %v19124_v63  ;;  %v15353_v63 = vld [vmem:[%s26637_s6] ss:$0 sm:$0xff] }
 0xcd1   : > { %19090 = vmatprep.subr.bf16.mxu1 %v20717_v14  ;;  %19126 = vmatprep.subr.bf16.mxu0 %v20717_v14 }
 0xcd4   : > { %19092 = vmatpush3.bf16.msra.mxu1 %v19091_v8  ;;  %19128 = vmatpush3.bf16.msra.mxu0 %v19127_v10  ;;  %v5517_v8 = vld [vmem:[%s26639_s8] sm:$0xff]  ;;  %v5518_v10 = vld [vmem:[%s26639_s8 + $0x8] sm:$0xff] }
 0xcd5   : > { %19093 = vmatprep.subr.bf16.mxu1 %v20717_v14  ;;  %19129 = vmatprep.subr.bf16.mxu0 %v20717_v14  ;;  %v19133_v15 = vpack.c.bf16 %v5518_v10, %v5517_v8  ;;  %v5706_v8 = vld [vmem:[%s26632_s1 + $0x38] sm:$0xf] }
 0xcd8   : > { %19095 = vmatpush3.bf16.msra.mxu1 %v19094_v19  ;;  %19131 = vmatpush3.bf16.msra.mxu0 %v19130_v21  ;;  %v19136_v19 = vpack.c.bf16 %v5520_v17, %v5519_v16  ;;  %v5521_v21 = vld [vmem:[%s26639_s8 + $0x20] sm:$0xff]  ;;  %v23038_v16 = vld [vmem:[%s20894_s17 + $0x78] sm:$0xf] }
 0xcd9   : > { %17313 = vmatprep.subr.mxu1 %v20715_v0  ;;  %17376 = vmatprep.subr.mxu0 %v20715_v0  ;;  %v19139_v24 = vpack.c.bf16 %v5522_v22, %v5521_v21  ;;  %v5705_v21 = vld [vmem:[%s26632_s1 + $0x30] sm:$0xf]  ;;  %v15396_v22 = vld [vmem:[%s26632_s1 + $0x88] sm:$0xff] }
 0xcdc   : > { %17314 = vmatpush3.msra.mxu1 %v4945_v25  ;;  %17377 = vmatpush3.msra.mxu0 %v15351_v26  ;;  %v5523_v25 = vld [vmem:[%s26639_s8 + $0x30] sm:$0xff]  ;;  %v5524_v26 = vld [vmem:[%s26639_s8 + $0x38] sm:$0xff] }
 0xcdd   : > { %17316 = vmatmul.mubr.msk.f32.vlgmr.msra.gmra.mrb[58].mxu1 %vm1511_vm10, %v22724_v32  ;;  %19108 = vmatprep.subr.bf16.mxu1 %v20717_v14  ;;  %v15357_v32 = vld [vmem:[%s26639_s8 + $0x80] sm:$0xff] }
 0xcde   : > { %17379 = vmatmul.mubr.msk.f32.vlgmr.msra.gmra.mrb[48].mxu0 %vm1511_vm10, %v5285_v58  ;;  %19110 = vmatpush3.bf16.msra.mxu1 %v19109_v27  ;;  %v19157_v33 = vpack.c.bf16 %v15358_v20, %v15357_v32  ;;  %v19142_v27 = vpack.c.bf16 %v5524_v26, %v5523_v25  ;;  %v15370_v32 = vld [vmem:[%s26639_s8 + $0xe8] sm:$0xff]  ;;  %v5724_v26 = vrot.slane %v23038_v16, 1 }
 0xcdf   : > { %19111 = vmatprep.subr.bf16.mxu1 %v20717_v14  ;;  %17357 = vmatprep.mubr.msk.f32.mxu1 %vm20718_vm9, %v20715_v0 }
 0xce0   : > { %19156 = vmatprep.subr.bf16.mxu0 %v20717_v14  ;;  %17458 = vmatprep.mubr.msk.f32.mxu0 %vm20718_vm9, %v20715_v0 }
 0xce1   : > { %19158 = vmatpush3.bf16.msra.mxu0 %v19157_v33  ;;  %v5531_v33 = vld [vmem:[%s26639_s8 + $0x70] sm:$0xff] }
 0xce2   : > { %19113 = vmatpush3.bf16.msra.mxu1 %v19112_v9  ;;  %19159 = vmatprep.subr.bf16.mxu0 %v20717_v14  ;;  %v19145_v9 = vpack.c.bf16 %v5526_v60, %v5525_v59  ;;  %v19154_v13 = vpack.c.bf16 %v5532_v34, %v5531_v33 }
 0xce3   : > { %19114 = vmatprep.subr.bf16.mxu1 %v20717_v14 }
 0xce5   : > { %19161 = vmatpush3.bf16.msra.mxu0 %v19160_v23  ;;  %v15371_v23 = vld [vmem:[%s26639_s8 + $0xf0] sm:$0xff] }
 0xce6   : > { %19116 = vmatpush3.bf16.msra.mxu1 %v19115_v18  ;;  %19162 = vmatprep.subr.bf16.mxu0 %v20717_v14  ;;  %v19148_v18 = vpack.c.bf16 %v5528_v2, %v5527_v28  ;;  %v19178_v37 = vpack.c.bf16 %v15372_v35, %v15371_v23  ;;  %v15397_v28 = vld [vmem:[%s26632_s1 + $0x90] sm:$0xff]  ;;  %v15400_v2 = vld [vmem:[%s26632_s1 + $0xa8] sm:$0xff]  ;;  %v15408_v35 = vld [vmem:[%s26632_s1 + $0xc0] sm:$0xff] }
 0xce7   : > { %19117 = vmatprep.subr.bf16.mxu1 %v20717_v14 }
 0xce9   : > { %19164 = vmatpush3.bf16.msra.mxu0 %v19163_v38  ;;  %v15378_v38 = vld [vmem:[%s26632_s1 + $0x48] sm:$0xff] }
 0xcea   : > { %19119 = vmatpush3.bf16.msra.mxu1 %v19118_v30  ;;  %19165 = vmatprep.subr.bf16.mxu0 %v20717_v14  ;;  %v19151_v30 = vpack.c.bf16 %v5530_v12, %v5529_v3  ;;  %v19180_v40 = vpack.c.bf16 %v15380_v39, %v15378_v38  ;;  %v15413_v38 = vld [vmem:[%s26632_s1 + $0xe8] sm:$0xff]  ;;  %v15415_v39 = vld [vmem:[%s26632_s1 + $0xf8] sm:$0xf] }
 0xceb   : > { %17355 = vmatprep.subr.mxu1 %v20715_v0 }
 0xced   : > { %19167 = vmatpush3.bf16.msra.mxu0 %v19166_v41 }
 0xcee   : > { %17356 = vmatpush3.msra.mxu1 %v15341_v31  ;;  %19168 = vmatprep.subr.bf16.mxu0 %v20717_v14  ;;  %v15369_v31 = vld [vmem:[%s26639_s8 + $0xe0] sm:$0xff] }
 0xcef   : > { %17358 = vmatmul.mubr.msk.f32.vlgmr.msra.gmra.mrb[60].mxu1 %vm1511_vm10, %v22758_v61  ;;  %17381 = vmatprep.subr.mxu1 %v20715_v0  ;;  %v19175_v20 = vpack.c.bf16 %v15370_v32, %v15369_v31  ;;  %v15401_v31 = vld [vmem:[%s26632_s1 + $0xb0] sm:$0xf]  ;;  %v15409_v32 = vld [vmem:[%s26632_s1 + $0xc8] sm:$0xff] }
 0xcf0   : > { %17383 = vmatprep.mubr.msk.f32.mxu1 %vm20718_vm9, %v20715_v0 }
 0xcf1   : > { %19170 = vmatpush3.bf16.msra.mxu0 %v19169_v44  ;;  %v15379_v44 = vld [vmem:[%s26632_s1 + $0x50] sm:$0xff] }
 0xcf2   : > { %19171 = vmatprep.subr.bf16.mxu0 %v20717_v14 }
 0xcf5   : > { %19173 = vmatpush3.bf16.msra.mxu0 %v19172_v47 }
 0xcf6   : > { %19174 = vmatprep.subr.bf16.mxu0 %v20717_v14 }
 0xcf9   : > { %19176 = vmatpush3.bf16.msra.mxu0 %v19175_v20  ;;  %v15411_v20 = vld [vmem:[%s26632_s1 + $0xd8] sm:$0xff] }
 0xcfa   : > { %19177 = vmatprep.subr.bf16.mxu0 %v20717_v14  ;;  %v19210_v34 = vpack.c.bf16 %v15411_v20, %v15409_v32  ;;  %v15451_v32 = vld [vmem:[%s26635_s4 + $0xd8] sm:$0xff] }
 0xcfd   : > { %19179 = vmatpush3.bf16.msra.mxu0 %v19178_v37  ;;  %v15410_v37 = vld [vmem:[%s26632_s1 + $0xd0] sm:$0xff] }
 0xd9e   : > { %v5028_v48 = vpop.f32.mrb[56].mxu1  ;;  %v5184_v49 = vpop.f32.mrb[46].mxu0 }
 0xd9f   : > { %v17296_v50 = vpop.f32.mrb[57].mxu1  ;;  %v17338_v51 = vpop.f32.mrb[47].mxu0 }
 0xdb0   : > { %v5100_v52 = vpop.f32.mrb[58].mxu1 }
 0xdb1   : > { %v5101_v53 = vadd.f32 %v5100_v52, %v5028_v48  ;;  %v5354_v54 = vpop.f32.mrb[48].mxu0  ;;  %v17317_v55 = vpop.f32.mrb[59].mxu1  ;;  %v19182_v48 = vpack.c.bf16 %v15379_v44, %v15377_v43  ;;  %v19184_v52 = vpack.c.bf16 %v15384_v46, %v15382_v45  ;;  %v19214_v43 = vpack.c.bf16 %v15415_v39, %v15413_v38  ;;  %v15412_v44 = vld [vmem:[%s26632_s1 + $0xe0] sm:$0xff]  ;;  %v15414_v45 = vld [vmem:[%s26632_s1 + $0xf0] sm:$0xf]  ;;  %v15422_v46 = vld [vmem:[%s26632_s1 + $0x108] sm:$0xff] }
 0xdb2   : > { %v17380_v56 = vpop.f32.mrb[49].mxu0  ;;  %v23004_v55 = vld [vmem:[%s20894_s17 + $0x68] sm:$0xff] }
 0xdb3   : > { %v5188_v57 = vadd.f32 %v5184_v49, %v5101_v53  ;;  %v15381_v49 = vld [vmem:[%s26632_s1 + $0x60] sm:$0xff]  ;;  %v15383_v53 = vld [vmem:[%s26632_s1 + $0x70] sm:$0xf]  ;;  %v5700_v56 = vld [vmem:[%s26632_s1 + $0x8] sm:$0xff]  ;;  %v5925_v23 = vrot.slane %v23004_v55, 2 }
 0xdc2   : > { %v5269_v58 = vpop.f32.mrb[60].mxu1 }
 0xdc3   : > { %v5273_v61 = vadd.f32 %v5269_v58, %v5188_v57  ;;  %v17359_v62 = vpop.f32.mrb[61].mxu1  ;;  %v5702_v57 = vld [vmem:[%s26632_s1 + $0x18] sm:$0xff]  ;;  %v19187_v58 = vpack.c.bf16 %v15383_v53, %v15381_v49  ;;  %v5929_v49 = vrot.slane %v23038_v16, 2 }
 0xdc4   : > { %v5720_v62 = vrot.slane %v23004_v55, 1 }
 0xdc5   : > { %v5358_v4 = vadd.f32 %v5354_v54, %v5273_v61  ;;  %v23001_v54 = vld [vmem:[%s20894_s17 + $0x60] sm:$0xff] }
 0xdc6   : > { %v5719_v61 = vrot.slane %v23001_v54, 1  ;;  %v6040_v53 = vrot.slane %v23001_v54, 3 }
 0xdc7   : > { %v5366_v5 = vadd.f32 %v15353_v63, %v5358_v4  ;;  %v19190_v63 = vpack.c.bf16 %v5702_v57, %v5700_v56  ;;  %v5699_v4 = vld [vmem:[%s26632_s1] sm:$0xff]  ;;  %v6041_v56 = vrot.slane %v23004_v55, 3 }
 0xdc8   : > { %v5721_v10 = vsel %vm538_vm3, %v5719_v61, %v5720_v62  ;;  %v15421_v57 = vld [vmem:[%s26632_s1 + $0x100] sm:$0xff]  ;;  %v15426_v61 = vld [vmem:[%s26632_s1 + $0x128] sm:$0xff] }
 0xdc9   : > { %v5367_v6 = vmax.f32 %v5366_v5, 0.0  ;;  %v5701_v5 = vld [vmem:[%s26632_s1 + $0x10] sm:$0xff] }
 0xdcb   : > { %17382 = vmatpush3.msra.mxu1 %v5367_v6 }
 0xdcc   : > { %17384 = vmatmul.mubr.msk.f32.vlgmr.msra.gmra.mrb[62].mxu1 %vm1924_vm11, %v5368_v7  ;;  %17386 = vmatprep.subr.mxu1 %v20715_v0  ;;  %v5704_v7 = vld [vmem:[%s26632_s1 + $0x28] sm:$0xff] }
 0xdcd   : > { %17387 = vmatpush3.msra.mxu1 %v5367_v6  ;;  %17388 = vmatprep.mubr.msk.f32.mxu1 %vm20718_vm9, %v20715_v0  ;;  %v23024_v6 = vld [vmem:[%s20894_s17 + $0x70] sm:$0xff]  ;;  %v19194_v17 = vpack.c.bf16 %v5706_v8, %v5704_v7  ;;  %v15425_v8 = vld [vmem:[%s26632_s1 + $0x120] sm:$0xff] }
 0xdce   : > { %19132 = vmatprep.subr.bf16.mxu1 %v20717_v14 }
 0xdd0   : > { %17389 = vmatmul.mubr.msk.f32.vlgmr.msra.gmra.mrb[64].mxu1 %vm1924_vm11, %v15355_v11  ;;  %v19192_v11 = vpack.c.bf16 %v5701_v5, %v5699_v4  ;;  %v6043_v5 = vrot.slane %v23024_v6, 3 }
 0xdd1   : > { %19134 = vmatpush3.bf16.msra.mxu1 %v19133_v15  ;;  %17423 = vmatprep.mubr.msk.f32.mxu1 %vm20718_vm9, %v20715_v0  ;;  %v5722_v15 = vrot.slane %v23024_v6, 1 }
 0xdd2   : > { %19135 = vmatprep.subr.bf16.mxu1 %v20717_v14 }
 0xdd3   : > { %v5723_v25 = vsel %vm538_vm3, %v5720_v62, %v5722_v15  ;;  %v5725_v60 = vsel %vm538_vm3, %v5722_v15, %v5724_v26  ;;  %v15428_v62 = vld [vmem:[%s26632_s1 + $0x138] sm:$0xf]  ;;  %v6045_v15 = vrot.slane %v23038_v16, 3 }
 0xdd4   : > { %v19224_v7 = vpack.c.bf16 %v15428_v62, %v15426_v61 }
 0xdd5   : > { %19137 = vmatpush3.bf16.msra.mxu1 %v19136_v19  ;;  %v5703_v19 = vld [vmem:[%s26632_s1 + $0x20] sm:$0xff] }
 0xdd6   : > { %19138 = vmatprep.subr.bf16.mxu1 %v20717_v14 }
 0xdd9   : > { %19140 = vmatpush3.bf16.msra.mxu1 %v19139_v24  ;;  %v15398_v24 = vld [vmem:[%s26632_s1 + $0x98] sm:$0xff] }
 0xdda   : > { %19141 = vmatprep.subr.bf16.mxu1 %v20717_v14  ;;  %v19200_v59 = vpack.c.bf16 %v15398_v24, %v15396_v22  ;;  %v6157_v22 = vrot.slane %v23004_v55, 4 }
 0xddd   : > { %19143 = vmatpush3.bf16.msra.mxu1 %v19142_v27  ;;  %v19197_v27 = vpack.c.bf16 %v5705_v21, %v5703_v19  ;;  %v6046_v19 = vsel %vm865_vm6, %v6043_v5, %v6045_v15  ;;  %v6156_v21 = vrot.slane %v23001_v54, 4  ;;  %v6463_v15 = vld [vmem:[%s26635_s4 + $0x8] sm:$0xff] }
 0xdde   : > { %19144 = vmatprep.subr.bf16.mxu1 %v20717_v14 }
 0xddf   : > { %v6158_v24 = vsel %vm553_vm0, %v6156_v21, %v6157_v22  ;;  %v6464_v21 = vld [vmem:[%s26635_s4 + $0x10] sm:$0xff] }
 0xde1   : > { %19146 = vmatpush3.bf16.msra.mxu1 %v19145_v9  ;;  %v15395_v9 = vld [vmem:[%s26632_s1 + $0x80] sm:$0xff] }
 0xde2   : > { %19147 = vmatprep.subr.bf16.mxu1 %v20717_v14  ;;  %v19202_v3 = vpack.c.bf16 %v15397_v28, %v15395_v9  ;;  %v15446_v28 = vld [vmem:[%s26635_s4 + $0xb0] sm:$0xff] }
 0xde5   : > { %19149 = vmatpush3.bf16.msra.mxu1 %v19148_v18  ;;  %v15402_v18 = vld [vmem:[%s26632_s1 + $0xb8] sm:$0xf] }
 0xde6   : > { %19150 = vmatprep.subr.bf16.mxu1 %v20717_v14  ;;  %v19204_v12 = vpack.c.bf16 %v15402_v18, %v15400_v2  ;;  %v15447_v2 = vld [vmem:[%s26635_s4 + $0xb8] sm:$0xff] }
 0xde7   : > { %v19272_v18 = vpack.c.bf16 %v15447_v2, %v15446_v28  ;;  %v6472_v28 = vld [vmem:[%s26635_s4 + $0x50] sm:$0xff]  ;;  %v6473_v2 = vld [vmem:[%s26635_s4 + $0x58] sm:$0xff] }
 0xde9   : > { %19152 = vmatpush3.bf16.msra.mxu1 %v19151_v30  ;;  %v15399_v30 = vld [vmem:[%s26632_s1 + $0xa0] sm:$0xff] }
 0xdea   : > { %19153 = vmatprep.subr.bf16.mxu1 %v20717_v14  ;;  %v19207_v33 = vpack.c.bf16 %v15401_v31, %v15399_v30  ;;  %v15450_v31 = vld [vmem:[%s26635_s4 + $0xd0] sm:$0xff] }
 0xdeb   : > { %v19278_v20 = vpack.c.bf16 %v15451_v32, %v15450_v31  ;;  %v15455_v32 = vld [vmem:[%s26635_s4 + $0xf8] sm:$0xff] }
 0xded   : > { %19155 = vmatpush3.bf16.msra.mxu1 %v19154_v13  ;;  %v5924_v13 = vrot.slane %v23001_v54, 2 }
 0xdee   : > { %19181 = vmatprep.subr.bf16.mxu1 %v19180_v40 }
 0xdef   : > { %v5926_v40 = vsel %vm747_vm5, %v5924_v13, %v5925_v23 }
 0xe9f   : > { %v5438_v41 = vpop.f32.mrb[62].mxu1 }
 0xea0   : > { %v17385_v42 = vpop.f32.mrb[63].mxu1 }
 0xea1   : > { %v5927_v42 = vrot.slane %v23024_v6, 2 }
 0xea3   : > { %v5512_v47 = vpop.f32.mrb[64].mxu1 }
 0xea4   : > { %v5516_v50 = vmax.f32 %v5438_v41, %v5512_v47  ;;  %v17390_v51 = vpop.f32.mrb[65].mxu1  ;;  %v19212_v41 = vpack.c.bf16 %v15410_v37, %v15408_v35  ;;  %v15424_v47 = vld [vmem:[%s26632_s1 + $0x118] sm:$0xff] }
 0xea5   : > { %v19220_v51 = vpack.c.bf16 %v15424_v47, %v15422_v46 }
 0xea6   : > { %17424 = vmatmul.mubr.f32.vlgmr.msra.gmra.mrb[66].mxu1 %v5516_v50  ;;  %17459 = vmatmul.mubr.f32.vlgmr.msra.gmra.mrb[50].mxu0 %v5516_v50  ;;  %v19217_v50 = vpack.c.bf16 %v15414_v45, %v15412_v44 }
 0xea7   : > { %19183 = vmatpush1.bf16.msra.mxu1 %v19182_v48  ;;  %5802 = vmatprep.mubr.f32.mxu1 %v20715_v0  ;;  %v5928_v48 = vsel %vm747_vm5, %v5925_v23, %v5927_v42 }
 0xea8   : > { %19186 = vmatprep.subr.msk.bf16.mxu1 %vm20887_vm2, %v19184_v52  ;;  %6360 = vmatprep.mubr.f32.mxu0 %v20715_v0  ;;  %v5930_v52 = vsel %vm747_vm5, %v5927_v42, %v5929_v49 }
 0xeab   : > { %19189 = vmatpush1.bf16.msk.msra.mxu1 %vm20887_vm2, %v19187_v58  ;;  %v15423_v58 = vld [vmem:[%s26632_s1 + $0x110] sm:$0xff] }
 0xeac   : > { %19191 = vmatprep.subr.bf16.mxu1 %v19190_v63  ;;  %v6042_v63 = vsel %vm865_vm6, %v6040_v53, %v6041_v56  ;;  %v19222_v4 = vpack.c.bf16 %v15423_v58, %v15421_v57 }
 0xeae   : > { %15387 = vmatmul.mubr.msk.f32.vlgmr.msra.gmra.mrb[68].mxu1 %vm546_vm4, %v5721_v10  ;;  %v15427_v10 = vld [vmem:[%s26632_s1 + $0x130] sm:$0xf] }
 0xeaf   : > { %5808 = vmatprep.mubr.f32.mxu1 %v20715_v0  ;;  %19193 = vmatpush1.bf16.msra.mxu1 %v19192_v11  ;;  %v6044_v11 = vsel %vm865_vm6, %v6041_v56, %v6043_v5 }
 0xeb0   : > { %19196 = vmatprep.subr.msk.bf16.mxu1 %vm20887_vm2, %v19194_v17  ;;  %v19227_v17 = vpack.c.bf16 %v15427_v10, %v15425_v8  ;;  %v6288_v8 = vld [vmem:[%s26634_s3] sm:$0xff]  ;;  %v6289_v10 = vld [vmem:[%s26634_s3 + $0x8] sm:$0xf] }
 0xeb2   : > { %15388 = vmatmul.mubr.msk.f32.gmra.mrb[70].mxu1 %vm546_vm4, %v5723_v25  ;;  %v6159_v25 = vrot.slane %v23024_v6, 4 }
 0xeb3   : > { %5814 = vmatprep.mubr.f32.mxu1 %v20715_v0  ;;  %19199 = vmatpush1.bf16.msk.msra.mxu1 %vm20887_vm2, %v19197_v27  ;;  %v15443_v27 = vld [vmem:[%s26635_s4 + $0x98] sm:$0xff] }
 0xeb4   : > { %19201 = vmatprep.subr.bf16.mxu1 %v19200_v59  ;;  %v6160_v26 = vsel %vm553_vm0, %v6157_v22, %v6159_v25  ;;  %v6465_v22 = vld [vmem:[%s26635_s4 + $0x18] sm:$0xff] }
 0xeb6   : > { %15389 = vmatmul.mubr.msk.f32.gmra.mrb[72].mxu1 %vm546_vm4, %v5725_v60  ;;  %v15445_v60 = vld [vmem:[%s26635_s4 + $0xa8] sm:$0xff] }
 0xeb7   : > { %5897 = vmatprep.mubr.f32.mxu1 %v20715_v0 }
 0xeba   : > { %15392 = vmatmul.mubr.msk.f32.vlgmr.msra.gmra.mrb[68].mxu1 %vm546_vm4, %v23001_v54  ;;  %v6161_v54 = vrot.slane %v23038_v16, 4  ;;  %v15444_v16 = vld [vmem:[%s26635_s4 + $0xa0] sm:$0xff] }
 0xebb   : > { %5903 = vmatprep.mubr.f32.mxu1 %v20715_v0  ;;  %19203 = vmatpush1.bf16.msra.mxu1 %v19202_v3  ;;  %v19269_v9 = vpack.c.bf16 %v15445_v60, %v15444_v16  ;;  %v15448_v3 = vld [vmem:[%s26635_s4 + $0xc0] sm:$0xff]  ;;  %v6471_v60 = vld [vmem:[%s26635_s4 + $0x48] sm:$0xff] }
 0xebc   : > { %19206 = vmatprep.subr.msk.bf16.mxu1 %vm20887_vm2, %v19204_v12  ;;  %v15449_v12 = vld [vmem:[%s26635_s4 + $0xc8] sm:$0xff]  ;;  %v6470_v16 = vld [vmem:[%s26635_s4 + $0x40] sm:$0xff] }
 0xebd   : > { %v19275_v30 = vpack.c.bf16 %v15449_v12, %v15448_v3  ;;  %v6474_v3 = vld [vmem:[%s26635_s4 + $0x60] sm:$0xff]  ;;  %v6475_v12 = vld [vmem:[%s26635_s4 + $0x68] sm:$0xff] }
 0xebe   : > { %15393 = vmatmul.mubr.msk.f32.gmra.mrb[70].mxu1 %vm546_vm4, %v23004_v55  ;;  %v6162_v55 = vsel %vm553_vm0, %v6159_v25, %v6161_v54  ;;  %v19242_v25 = vpack.c.bf16 %v6465_v22, %v6464_v21  ;;  %v6467_v54 = vld [vmem:[%s26635_s4 + $0x28] sm:$0xff]  ;;  %v19257_v31 = vpack.c.bf16 %v6475_v12, %v6474_v3  ;;  %v15467_v21 = vld [vmem:[%s26636_s5 + $0x70] sm:$0xff] }
 0xebf   : > { %5909 = vmatprep.mubr.f32.mxu1 %v20715_v0  ;;  %19209 = vmatpush1.bf16.msk.msra.mxu1 %vm20887_vm2, %v19207_v33  ;;  %v15452_v33 = vld [vmem:[%s26635_s4 + $0xe0] sm:$0xff]  ;;  %v15477_v22 = vld [vmem:[%s26636_s5 + $0xb0] sm:$0xff] }
 0xec0   : > { %19211 = vmatprep.subr.bf16.mxu1 %v19210_v34  ;;  %v15453_v34 = vld [vmem:[%s26635_s4 + $0xe8] sm:$0xff] }
 0xec1   : > { %v19281_v13 = vpack.c.bf16 %v15453_v34, %v15452_v33  ;;  %v6476_v33 = vld [vmem:[%s26635_s4 + $0x70] sm:$0xff]  ;;  %v6477_v34 = vld [vmem:[%s26635_s4 + $0x78] sm:$0xff] }
 0xec2   : > { %15394 = vmatmul.mubr.msk.f32.gmra.mrb[72].mxu1 %vm546_vm4, %v23024_v6  ;;  %v15442_v6 = vld [vmem:[%s26635_s4 + $0x90] sm:$0xff] }
 0xec3   : > { %6007 = vmatprep.mubr.f32.mxu1 %v20715_v0  ;;  %v19266_v59 = vpack.c.bf16 %v15443_v27, %v15442_v6  ;;  %v6468_v6 = vld [vmem:[%s26635_s4 + $0x30] sm:$0xff]  ;;  %v6469_v27 = vld [vmem:[%s26635_s4 + $0x38] sm:$0xff] }
 0xec6   : > { %15405 = vmatmul.mubr.msk.f32.vlgmr.msra.gmra.mrb[68].mxu1 %vm546_vm4, %v5926_v40  ;;  %v6264_v40 = vld [vmem:[%s26633_s2] sm:$0x3] }
 0xec7   : > { %6013 = vmatprep.mubr.f32.mxu1 %v20715_v0  ;;  %19213 = vmatpush1.bf16.msra.mxu1 %v19212_v41  ;;  %v6269_v41 = vrot.slane %v6264_v40, %v21109_v36 }
 0xec8   : > { %19216 = vmatprep.subr.msk.bf16.mxu1 %vm20887_vm2, %v19214_v43  ;;  %v6273_v43 = vrot.slane %v6264_v40, %v21114_v29  ;;  %v15458_v40 = vld [vmem:[%s26635_s4 + $0x110] sm:$0xff] }
 0xeca   : > { %15406 = vmatmul.mubr.msk.f32.gmra.mrb[70].mxu1 %vm546_vm4, %v5928_v48 }
 0xecb   : > { %6019 = vmatprep.mubr.f32.mxu1 %v20715_v0  ;;  %19219 = vmatpush1.bf16.msk.msra.mxu1 %vm20887_vm2, %v19217_v50 }
 0xecc   : > { %19221 = vmatprep.subr.bf16.mxu1 %v19220_v51 }
 0xece   : > { %15407 = vmatmul.mubr.msk.f32.gmra.mrb[72].mxu1 %vm546_vm4, %v5930_v52 }
 0xecf   : > { %6123 = vmatprep.mubr.f32.mxu1 %v20715_v0 }
 0xed2   : > { %15418 = vmatmul.mubr.msk.f32.vlgmr.msra.gmra.mrb[68].mxu1 %vm546_vm4, %v6042_v63 }
 0xed3   : > { %6129 = vmatprep.mubr.f32.mxu1 %v20715_v0  ;;  %19223 = vmatpush1.bf16.msra.mxu1 %v19222_v4 }
 0xed4   : > { %19226 = vmatprep.subr.msk.bf16.mxu1 %vm20887_vm2, %v19224_v7 }
 0xed6   : > { %15419 = vmatmul.mubr.msk.f32.gmra.mrb[70].mxu1 %vm546_vm4, %v6044_v11  ;;  %v6462_v11 = vld [vmem:[%s26635_s4] sm:$0xff] }
 0xed7   : > { %6135 = vmatprep.mubr.f32.mxu1 %v20715_v0  ;;  %19229 = vmatpush1.bf16.msk.msra.mxu1 %vm20887_vm2, %v19227_v17  ;;  %v15436_v17 = vld [vmem:[%s26634_s3 + $0x10] sm:$0xff] }
 0xed8   : > { %19265 = vmatprep.subr.bf16.mxu1 %v20717_v14 }
 0xeda   : > { %15420 = vmatmul.mubr.msk.f32.gmra.mrb[72].mxu1 %vm546_vm4, %v6046_v19  ;;  %v19239_v19 = vpack.c.bf16 %v6463_v15, %v6462_v11 }
 0xedb   : > { %6239 = vmatprep.mubr.f32.mxu1 %v20715_v0 }
 0xede   : > { %15431 = vmatmul.mubr.msk.f32.vlgmr.msra.gmra.mrb[68].mxu1 %vm546_vm4, %v6158_v24  ;;  %v15437_v24 = vld [vmem:[%s26634_s3 + $0x18] sm:$0xf] }
 0xedf   : > { %6245 = vmatprep.mubr.f32.mxu1 %v20715_v0  ;;  %19267 = vmatpush1.bf16.msra.mxu1 %v19266_v59  ;;  %v19248_v59 = vpack.c.bf16 %v6469_v27, %v6468_v6  ;;  %v15479_v6 = vld [vmem:[%s26636_s5 + $0xc0] sm:$0xff] }
 0xee0   : > { %19268 = vmatprep.subr.bf16.mxu1 %v20717_v14 }
 0xee2   : > { %15432 = vmatmul.mubr.msk.f32.gmra.mrb[70].mxu1 %vm546_vm4, %v6160_v26  ;;  %v6466_v26 = vld [vmem:[%s26635_s4 + $0x20] sm:$0xff] }
 0xee3   : > { %6251 = vmatprep.mubr.f32.mxu1 %v20715_v0  ;;  %19270 = vmatpush1.bf16.msra.mxu1 %v19269_v9  ;;  %v19251_v9 = vpack.c.bf16 %v6471_v60, %v6470_v16  ;;  %v15470_v60 = vld [vmem:[%s26636_s5 + $0x88] sm:$0xff] }
 0xee4   : > { %19271 = vmatprep.subr.bf16.mxu1 %v20717_v14 }
 0xee6   : > { %15433 = vmatmul.mubr.msk.f32.gmra.mrb[72].mxu1 %vm546_vm4, %v6162_v55  ;;  %v19245_v55 = vpack.c.bf16 %v6467_v54, %v6466_v26  ;;  %v15468_v54 = vld [vmem:[%s26636_s5 + $0x78] sm:$0xff] }
 0xee7   : > { %19273 = vmatpush1.bf16.msra.mxu1 %v19272_v18  ;;  %v19254_v18 = vpack.c.bf16 %v6473_v2, %v6472_v28 }
 0xee8   : > { %19274 = vmatprep.subr.bf16.mxu1 %v20717_v14 }
 0xeeb   : > { %19276 = vmatpush1.bf16.msra.mxu1 %v19275_v30  ;;  %v15454_v30 = vld [vmem:[%s26635_s4 + $0xf0] sm:$0xff] }
 0xeec   : > { %19277 = vmatprep.subr.bf16.mxu1 %v20717_v14 }
 0xeef   : > { %19279 = vmatpush1.bf16.msra.mxu1 %v19278_v20  ;;  %v19284_v20 = vpack.c.bf16 %v15455_v32, %v15454_v30  ;;  %v6656_v30 = vld [vmem:[%s26636_s5] sm:$0xff] }
 0xef0   : > { %19280 = vmatprep.subr.bf16.mxu1 %v20717_v14  ;;  %v15493_v32 = vld [vmem:[%s26636_s5 + $0x120] sm:$0xff] }
 0xef3   : > { %19282 = vmatpush1.bf16.msra.mxu1 %v19281_v13  ;;  %v15456_v13 = vld [vmem:[%s26635_s4 + $0x100] sm:$0xff] }
 0xef4   : > { %19283 = vmatprep.subr.bf16.mxu1 %v20717_v14 }
 0xef7   : > { %19285 = vmatpush1.bf16.msra.mxu1 %v19284_v20  ;;  %v15494_v20 = vld [vmem:[%s26636_s5 + $0x128] sm:$0xff] }
 0xef8   : > { %19286 = vmatprep.subr.bf16.mxu1 %v20717_v14 }
 0xf79   : > { %v5599_v23 = vpop.f32.mrb[66].mxu1  ;;  %v5685_v35 = vpop.f32.mrb[50].mxu0 }
 0xf7a   : > { %v5689_v37 = vmax.f32 %v5599_v23, %v5685_v35  ;;  %v17425_v38 = vpop.f32.mrb[67].mxu1  ;;  %v17460_v39 = vpop.f32.mrb[51].mxu0  ;;  %v19260_v23 = vpack.c.bf16 %v6477_v34, %v6476_v33  ;;  %v15457_v35 = vld [vmem:[%s26635_s4 + $0x108] sm:$0xff] }
 0xf7b   : > { %v6478_v38 = vld [vmem:[%s26635_s4 + $0x80] sm:$0xff]  ;;  %v6479_v39 = vld [vmem:[%s26635_s4 + $0x88] sm:$0xff] }
 0xf7c   : > { %5690 = vst.msk [vmem:[#allocation2 + $0x2] sm:$0x1] %vm2248_vm12, %v5689_v37 }
 0xf7d   : > { %5691 = vst.msk [vmem:[#allocation2 + $0x9] sm:$0x2] %vm2250_vm13, %v5689_v37 }
 0xf7e   : > { %5692 = vst.msk [vmem:[#allocation2 + $0x10] sm:$0x4] %vm2252_vm14, %v5689_v37 }
 0xf7f   : > { %5693 = vst.msk [vmem:[#allocation2 + $0x17] sm:$0x8] %vm2254_vm15, %v5689_v37  ;;  %v19287_v37 = vpack.c.bf16 %v15457_v35, %v15456_v13 }
 0xf81   : > { %19288 = vmatpush1.bf16.msra.mxu1 %v19287_v37 }
 0xf82   : > { %19289 = vmatprep.subr.bf16.mxu1 %v20717_v14 }
 0xfb1   : > { %v6241_v42 = vpop.f32.mrb[68].mxu1 }
 0xfb2   : > { %v6243_v44 = vpop.f32.mrb[69].mxu1  ;;  %v6276_v45 = vadd.f32 %v6269_v41, %v6241_v42  ;;  %v15459_v42 = vld [vmem:[%s26635_s4 + $0x118] sm:$0xff] }
 0xfb3   : > { %v6277_v46 = vadd.f32 %v6273_v43, %v6243_v44 }
 0xfb4   : > { %v6282_v51 = vmax.f32 %v6276_v45, 0.0 }
 0xfb5   : > { %v6247_v47 = vpop.f32.mrb[70].mxu1  ;;  %v6283_v53 = vmax.f32 %v6277_v46, 0.0 }
 0xfb6   : > { %v6278_v48 = vadd.f32 %v6269_v41, %v6247_v47  ;;  %v6249_v49 = vpop.f32.mrb[71].mxu1 }
 0xfb7   : > { %v6279_v50 = vadd.f32 %v6273_v43, %v6249_v49  ;;  %v15463_v49 = vld [vmem:[%s26636_s5 + $0x50] sm:$0xff] }
 0xfb8   : > { %v6284_v52 = vmax.f32 %v6278_v48, 0.0  ;;  %v15462_v48 = vld [vmem:[%s26636_s5 + $0x48] sm:$0xff] }
 0xfb9   : > { %v6285_v56 = vmax.f32 %v6279_v50, 0.0  ;;  %v6253_v57 = vpop.f32.mrb[72].mxu1  ;;  %v15473_v50 = vld [vmem:[%s26636_s5 + $0x90] sm:$0xff] }
 0xfba   : > { %v19232_v58 = vpack.c.bf16 %v6284_v52, %v6282_v51  ;;  %v6255_v61 = vpop.f32.mrb[73].mxu1  ;;  %v6280_v4 = vadd.f32 %v6269_v41, %v6253_v57  ;;  %v19263_v41 = vpack.c.bf16 %v6479_v39, %v6478_v38  ;;  %v15474_v51 = vld [vmem:[%s26636_s5 + $0x98] sm:$0xff]  ;;  %v19341_v38 = vpack.c.bf16 %v15494_v20, %v15493_v32  ;;  %v15511_v20 = vld [vmem:[%s26639_s8 + $0xa0] sm:$0xff] }
 0xfbb   : > { %v19230_v62 = vpack.c.bf16 %v6285_v56, %v6283_v53  ;;  %v6281_v63 = vadd.f32 %v6273_v43, %v6255_v61  ;;  %v19290_v43 = vpack.c.bf16 %v15459_v42, %v15458_v40  ;;  %v19317_v61 = vpack.c.bf16 %v15474_v51, %v15473_v50  ;;  %v15496_v50 = vld [vmem:[%s26636_s5 + $0x138] sm:$0xff] }
 0xfbc   : > { %v6286_v7 = vmax.f32 %v6280_v4, 0.0  ;;  %v15475_v4 = vld [vmem:[%s26636_s5 + $0xa0] sm:$0xff] }
 0xfbd   : > { %v6287_v5 = vmax.f32 %v6281_v63, 0.0  ;;  %19231 = vmatprep.subr.bf16.mxu0 %v19230_v62  ;;  %19291 = vmatpush1.bf16.msra.mxu1 %v19290_v43  ;;  %v15465_v63 = vld [vmem:[%s26636_s5 + $0x60] sm:$0xff] }
 0xfbe   : > { %19233 = vmatpush1.bf16.msra.mxu0 %v19232_v58  ;;  %19316 = vmatprep.subr.bf16.mxu1 %v20717_v14 }
 0xfbf   : > { %6300 = vmatprep.subr.mxu0 %v6287_v5 }
 0xfc2   : > { %6301 = vmatpush1.msra.mxu0 %v6286_v7 }
 0xfc3   : > { %15434 = vmatmul.mubr.msk.f32.vlgmr.msra.gmra.mrb[52].mxu0 %vm1117_vm7, %v6288_v8  ;;  %19235 = vmatprep.subr.bf16.mxu0 %v19230_v62  ;;  %v15464_v62 = vld [vmem:[%s26636_s5 + $0x58] sm:$0xff] }
 0xfc4   : > { %19237 = vmatpush1.bf16.msra.mxu0 %v19232_v58  ;;  %6366 = vmatprep.mubr.f32.mxu0 %v20715_v0  ;;  %v19293_v58 = vpack.c.bf16 %v15463_v49, %v15462_v48  ;;  %v19296_v15 = vpack.c.bf16 %v15465_v63, %v15464_v62  ;;  %v6659_v48 = vld [vmem:[%s26636_s5 + $0x18] sm:$0xff]  ;;  %v15495_v49 = vld [vmem:[%s26636_s5 + $0x130] sm:$0xff]  ;;  %v6661_v62 = vld [vmem:[%s26636_s5 + $0x28] sm:$0xff] }
 0xfc5   : > { %6385 = vmatprep.subr.mxu0 %v6287_v5  ;;  %v15476_v5 = vld [vmem:[%s26636_s5 + $0xa8] sm:$0xff]  ;;  %v15497_v63 = vld [vmem:[%s26636_s5 + $0x140] sm:$0xff] }
 0xfc7   : > { %15435 = vmatmul.mubr.msk.f32.gmra.mrb[54].mxu0 %vm1117_vm7, %v6289_v10 }
 0xfc8   : > { %6386 = vmatpush1.msra.mxu0 %v6286_v7  ;;  %6445 = vmatprep.mubr.f32.mxu0 %v20715_v0 }
 0xfc9   : > { %19238 = vmatprep.subr.bf16.mxu0 %v20717_v14 }
 0xfcb   : > { %15438 = vmatmul.mubr.msk.f32.vlgmr.msra.gmra.mrb[56].mxu0 %vm1117_vm7, %v15436_v17  ;;  %v19320_v17 = vpack.c.bf16 %v15476_v5, %v15475_v4  ;;  %v15498_v4 = vld [vmem:[%s26636_s5 + $0x148] sm:$0xff] }
 0xfcc   : > { %6451 = vmatprep.mubr.f32.mxu0 %v20715_v0  ;;  %19240 = vmatpush1.bf16.msra.mxu0 %v19239_v19  ;;  %v15466_v19 = vld [vmem:[%s26636_s5 + $0x68] sm:$0xff] }
 0xfcd   : > { %19241 = vmatprep.subr.bf16.mxu0 %v20717_v14 }
 0xfcf   : > { %15439 = vmatmul.mubr.msk.f32.gmra.mrb[58].mxu0 %vm1117_vm7, %v15437_v24  ;;  %v19299_v24 = vpack.c.bf16 %v15467_v21, %v15466_v19  ;;  %v15483_v21 = vld [vmem:[%s26636_s5 + $0xd8] sm:$0xff] }
 0xfd0   : > { %19243 = vmatpush1.bf16.msra.mxu0 %v19242_v25  ;;  %v15478_v25 = vld [vmem:[%s26636_s5 + $0xb8] sm:$0xff] }
 0xfd1   : > { %19244 = vmatprep.subr.bf16.mxu0 %v20717_v14  ;;  %v19323_v26 = vpack.c.bf16 %v15478_v25, %v15477_v22  ;;  %v15484_v22 = vld [vmem:[%s26636_s5 + $0xe0] sm:$0xff] }
 0xfd2   : > { %v15501_v25 = vld [vmem:[%s26636_s5 + $0x160] sm:$0xff] }
 0xfd4   : > { %19246 = vmatpush1.bf16.msra.mxu0 %v19245_v55  ;;  %v15469_v55 = vld [vmem:[%s26636_s5 + $0x80] sm:$0xff] }
 0xfd5   : > { %19247 = vmatprep.subr.bf16.mxu0 %v20717_v14  ;;  %v19302_v27 = vpack.c.bf16 %v15469_v55, %v15468_v54  ;;  %v15485_v54 = vld [vmem:[%s26636_s5 + $0xe8] sm:$0xff]  ;;  %v15486_v55 = vld [vmem:[%s26636_s5 + $0xf0] sm:$0xff] }
 0xfd8   : > { %19249 = vmatpush1.bf16.msra.mxu0 %v19248_v59  ;;  %v15480_v59 = vld [vmem:[%s26636_s5 + $0xc8] sm:$0xff] }
 0xfd9   : > { %19250 = vmatprep.subr.bf16.mxu0 %v20717_v14  ;;  %v19326_v16 = vpack.c.bf16 %v15480_v59, %v15479_v6  ;;  %v19332_v6 = vpack.c.bf16 %v15486_v55, %v15485_v54  ;;  %v15488_v59 = vld [vmem:[%s26636_s5 + $0x100] sm:$0xff]  ;;  %v7245_v55 = vld [vmem:[%s26639_s8 + $0x48] sm:$0xff] }
 0xfda   : > { %v7244_v54 = vld [vmem:[%s26639_s8 + $0x40] sm:$0xff] }
 0xfdc   : > { %19252 = vmatpush1.bf16.msra.mxu0 %v19251_v9  ;;  %v15481_v9 = vld [vmem:[%s26636_s5 + $0xd0] sm:$0xff] }
 0xfdd   : > { %19253 = vmatprep.subr.bf16.mxu0 %v20717_v14 }
 0xfe0   : > { %19255 = vmatpush1.bf16.msra.mxu0 %v19254_v18 }
 0xfe1   : > { %19256 = vmatprep.subr.bf16.mxu0 %v20717_v14 }
 0xfe4   : > { %19258 = vmatpush1.bf16.msra.mxu0 %v19257_v31  ;;  %v6657_v31 = vld [vmem:[%s26636_s5 + $0x8] sm:$0xff] }
 0xfe5   : > { %19259 = vmatprep.subr.bf16.mxu0 %v20717_v14  ;;  %v19305_v37 = vpack.c.bf16 %v6657_v31, %v6656_v30  ;;  %v15509_v30 = vld [vmem:[%s26639_s8 + $0x90] sm:$0xff]  ;;  %v15510_v31 = vld [vmem:[%s26639_s8 + $0x98] sm:$0xff] }
 0xfe6   : > { %v19380_v32 = vpack.c.bf16 %v15510_v31, %v15509_v30  ;;  %v7251_v30 = vld [vmem:[%s26639_s8 + $0x78] sm:$0xff] }
 0xfe8   : > { %19261 = vmatpush1.bf16.msra.mxu0 %v19260_v23 }
 0xfe9   : > { %19262 = vmatprep.subr.bf16.mxu0 %v20717_v14 }
 0xfec   : > { %19264 = vmatpush1.bf16.msra.mxu0 %v19263_v41 }
 0xfed   : > { %19292 = vmatprep.subr.bf16.mxu0 %v20717_v14 }
0x1096   : > { %v6362_v44 = vpop.f32.mrb[52].mxu0 }
0x1097   : > { %v6364_v45 = vpop.f32.mrb[53].mxu0 }
0x109a   : > { %v6368_v46 = vpop.f32.mrb[54].mxu0 }
0x109b   : > { %v6370_v47 = vpop.f32.mrb[55].mxu0 }
0x109e   : > { %v6447_v52 = vpop.f32.mrb[56].mxu0 }
0x109f   : > { %v6458_v53 = vmax.f32 %v6362_v44, %v6447_v52  ;;  %v6449_v56 = vpop.f32.mrb[57].mxu0 }
0x10a0   : > { %v6459_v57 = vmax.f32 %v6364_v45, %v6449_v56 }
0x10a2   : > { %v6453_v7 = vpop.f32.mrb[58].mxu0  ;;  %15440 = vmatprep.mubr.msk.f32.mxu0 %vm1309_vm8, %v6459_v57  ;;  %15460 = vmatprep.mubr.msk.f32.mxu1 %vm1309_vm8, %v6459_v57 }
0x10a3   : > { %v6460_v8 = vmax.f32 %v6368_v46, %v6453_v7  ;;  %v6455_v10 = vpop.f32.mrb[59].mxu0  ;;  %6551 = vmatmul.mubr.f32.vlgmr.msra.gmra.mrb[60].mxu0 %v6458_v53  ;;  %6644 = vmatmul.mubr.f32.vlgmr.msra.gmra.mrb[74].mxu1 %v6458_v53  ;;  %v19347_v7 = vpack.c.bf16 %v15498_v4, %v15497_v63  ;;  %v7087_v4 = vld [vmem:[%s26638_s7] sm:$0xf] }
0x10a4   : > { %v6461_v11 = vmax.f32 %v6370_v47, %v6455_v10  ;;  %19294 = vmatpush3.bf16.msra.mxu0 %v19293_v58  ;;  %19318 = vmatpush3.bf16.msra.mxu1 %v19317_v61  ;;  %v6658_v47 = vld [vmem:[%s26636_s5 + $0x10] sm:$0xff]  ;;  %v19344_v58 = vpack.c.bf16 %v15496_v50, %v15495_v49  ;;  %v6660_v61 = vld [vmem:[%s26636_s5 + $0x20] sm:$0xff]  ;;  %v6663_v10 = vld [vmem:[%s26636_s5 + $0x38] sm:$0xff] }
0x10a5   : > { %19295 = vmatprep.subr.bf16.mxu0 %v20717_v14  ;;  %19319 = vmatprep.subr.bf16.mxu1 %v20717_v14  ;;  %v19308_v57 = vpack.c.bf16 %v6659_v48, %v6658_v47  ;;  %v19311_v5 = vpack.c.bf16 %v6661_v62, %v6660_v61 }
0x10a6   : > { %15441 = vmatprep.mubr.msk.f32.mxu0 %vm1309_vm8, %v6461_v11  ;;  %15461 = vmatprep.mubr.msk.f32.mxu1 %vm1309_vm8, %v6461_v11  ;;  %v15499_v11 = vld [vmem:[%s26636_s5 + $0x150] sm:$0xff] }
0x10a7   : > { %6556 = vmatmul.mubr.f32.gmra.mrb[62].mxu0 %v6460_v8  ;;  %6649 = vmatmul.mubr.f32.gmra.mrb[76].mxu1 %v6460_v8  ;;  %v6662_v8 = vld [vmem:[%s26636_s5 + $0x30] sm:$0xff] }
0x10a8   : > { %19297 = vmatpush3.bf16.msra.mxu0 %v19296_v15  ;;  %19321 = vmatpush3.bf16.msra.mxu1 %v19320_v17  ;;  %v15500_v15 = vld [vmem:[%s26636_s5 + $0x158] sm:$0xff]  ;;  %v19314_v17 = vpack.c.bf16 %v6663_v10, %v6662_v8  ;;  %v15505_v8 = vld [vmem:[%s26638_s7 + $0x4] sm:$0xf] }
0x10a9   : > { %19298 = vmatprep.subr.bf16.mxu0 %v20717_v14  ;;  %19322 = vmatprep.subr.bf16.mxu1 %v20717_v14  ;;  %v19350_v19 = vpack.c.bf16 %v15500_v15, %v15499_v11  ;;  %v7238_v11 = vld [vmem:[%s26639_s8 + $0x10] sm:$0xff]  ;;  %v7239_v15 = vld [vmem:[%s26639_s8 + $0x18] sm:$0xff] }
0x10aa   : > { %17479 = vmatprep.mubr.msk.f32.mxu0 %vm20718_vm9, %v20715_v0  ;;  %17521 = vmatprep.mubr.msk.f32.mxu1 %vm20718_vm9, %v20715_v0 }
0x10ac   : > { %19300 = vmatpush3.bf16.msra.mxu0 %v19299_v24  ;;  %19324 = vmatpush3.bf16.msra.mxu1 %v19323_v26  ;;  %v6664_v24 = vld [vmem:[%s26636_s5 + $0x40] sm:$0xff]  ;;  %v19329_v26 = vpack.c.bf16 %v15484_v22, %v15483_v21  ;;  %v7241_v21 = vld [vmem:[%s26639_s8 + $0x28] sm:$0xff] }
0x10ad   : > { %19301 = vmatprep.subr.bf16.mxu0 %v20717_v14  ;;  %19325 = vmatprep.subr.bf16.mxu1 %v20717_v14 }
0x10b0   : > { %19303 = vmatpush3.bf16.msra.mxu0 %v19302_v27  ;;  %19327 = vmatpush3.bf16.msra.mxu1 %v19326_v16  ;;  %v15487_v27 = vld [vmem:[%s26636_s5 + $0xf8] sm:$0xff] }
0x10b1   : > { %17477 = vmatprep.subr.mxu0 %v20715_v0  ;;  %17519 = vmatprep.subr.mxu1 %v20715_v0  ;;  %v19335_v16 = vpack.c.bf16 %v15488_v59, %v15487_v27  ;;  %v7246_v27 = vld [vmem:[%s26639_s8 + $0x50] sm:$0xff]  ;;  %v7247_v59 = vld [vmem:[%s26639_s8 + $0x58] sm:$0xff] }
0x10b4   : > { %17478 = vmatpush3.msra.mxu0 %v15470_v60  ;;  %17520 = vmatpush3.msra.mxu1 %v15481_v9  ;;  %v15489_v60 = vld [vmem:[%s26636_s5 + $0x108] sm:$0xff]  ;;  %v15490_v9 = vld [vmem:[%s26636_s5 + $0x110] sm:$0xff] }
0x10b5   : > { %19304 = vmatprep.subr.bf16.mxu0 %v20717_v14  ;;  %19340 = vmatprep.subr.bf16.mxu1 %v20717_v14 }
0x1176   : > { %v6552_v28 = vpop.f32.mrb[60].mxu0  ;;  %v6645_v2 = vpop.f32.mrb[74].mxu1 }
0x1177   : > { %v23418_v18 = vmax.f32 %v6552_v28, %v6645_v2  ;;  %v6554_v3 = vpop.f32.mrb[61].mxu0  ;;  %v6647_v12 = vpop.f32.mrb[75].mxu1  ;;  %v19338_v28 = vpack.c.bf16 %v15490_v9, %v15489_v60  ;;  %v15491_v2 = vld [vmem:[%s26636_s5 + $0x118] sm:$0xff]  ;;  %v7248_v60 = vld [vmem:[%s26639_s8 + $0x60] sm:$0xff]  ;;  %v7249_v9 = vld [vmem:[%s26639_s8 + $0x68] sm:$0xff] }
0x1178   : > { %v15508_v3 = vld [vmem:[%s26639_s8 + $0x88] sm:$0xff] }
0x1179   : > { %v6676_v39 = vrot.slane %v23418_v18, 1  ;;  %v6832_v40 = vrot.slane %v23418_v18, 2  ;;  %v7002_v41 = vrot.slane %v23418_v18, 4  ;;  %v6917_v42 = vrot.slane %v23418_v18, 3 }
0x117a   : > { %v6557_v33 = vpop.f32.mrb[62].mxu0  ;;  %v6650_v34 = vpop.f32.mrb[76].mxu1 }
0x117b   : > { %v6655_v13 = vmax.f32 %v6557_v33, %v6650_v34  ;;  %v6559_v23 = vpop.f32.mrb[63].mxu0  ;;  %v6652_v35 = vpop.f32.mrb[77].mxu1  ;;  %v15512_v33 = vld [vmem:[%s26639_s8 + $0xa8] sm:$0xff] }
0x117c   : > { %v19383_v34 = vpack.c.bf16 %v15512_v33, %v15511_v20  ;;  %v15514_v23 = vld [vmem:[%s26639_s8 + $0xb8] sm:$0xff] }
0x117d   : > { %v6677_v43 = vrot.slane %v6655_v13, 1  ;;  %v6833_v44 = vrot.slane %v6655_v13, 2  ;;  %v6918_v45 = vrot.slane %v6655_v13, 3  ;;  %v7003_v46 = vrot.slane %v6655_v13, 4  ;;  %v15513_v13 = vld [vmem:[%s26639_s8 + $0xb0] sm:$0xff]  ;;  %v15522_v20 = vld [vmem:[%s26639_s8 + $0xf8] sm:$0xff] }
0x117e   : > { %v19386_v35 = vpack.c.bf16 %v15514_v23, %v15513_v13  ;;  %v15530_v13 = vld [vmem:[%s26632_s1 + $0x58] sm:$0xff] }
0x117f   : > { %v6678_v51 = vsel %vm538_vm3, %v6676_v39, %v6677_v43  ;;  %v6834_v52 = vsel %vm747_vm5, %v6832_v40, %v6833_v44  ;;  %v7004_v53 = vsel %vm553_vm0, %v7002_v41, %v7003_v46  ;;  %v23452_v56 = vsel %vm865_vm6, %v6917_v42, %v6918_v45  ;;  %v15517_v40 = vld [vmem:[%s26639_s8 + $0xd0] sm:$0xff]  ;;  %v15518_v41 = vld [vmem:[%s26639_s8 + $0xd8] sm:$0xff] }
0x1180   : > { %17480 = vmatmul.mubr.msk.f32.vlgmr.msra.gmra.mrb[64].mxu0 %vm1511_vm10, %v6678_v51  ;;  %17522 = vmatmul.mubr.msk.f32.vlgmr.msra.gmra.mrb[78].mxu1 %vm1511_vm10, %v6834_v52  ;;  %v19392_v42 = vpack.c.bf16 %v15518_v41, %v15517_v40  ;;  %v15532_v40 = vld [vmem:[%s26632_s1 + $0x68] sm:$0xff]  ;;  %v15534_v41 = vld [vmem:[%s26632_s1 + $0x78] sm:$0xf] }
0x1181   : > { %19306 = vmatpush3.bf16.msra.mxu0 %v19305_v37  ;;  %19342 = vmatpush3.bf16.msra.mxu1 %v19341_v38  ;;  %v15515_v37 = vld [vmem:[%s26639_s8 + $0xc0] sm:$0xff]  ;;  %v15516_v38 = vld [vmem:[%s26639_s8 + $0xc8] sm:$0xff] }
0x1182   : > { %19307 = vmatprep.subr.bf16.mxu0 %v20717_v14  ;;  %19343 = vmatprep.subr.bf16.mxu1 %v20717_v14  ;;  %v19389_v39 = vpack.c.bf16 %v15516_v38, %v15515_v37  ;;  %v15527_v38 = vld [vmem:[%s26632_s1 + $0x40] sm:$0xff] }
0x1183   : > { %17500 = vmatprep.mubr.msk.f32.mxu0 %vm20718_vm9, %v20715_v0  ;;  %17563 = vmatprep.mubr.msk.f32.mxu1 %vm20718_vm9, %v20715_v0 }
0x1185   : > { %19309 = vmatpush3.bf16.msra.mxu0 %v19308_v57  ;;  %19345 = vmatpush3.bf16.msra.mxu1 %v19344_v58  ;;  %v15503_v58 = vld [vmem:[%s26637_s6] ss:$0 sm:$0xff] }
0x1186   : > { %19310 = vmatprep.subr.bf16.mxu0 %v20717_v14  ;;  %19346 = vmatprep.subr.bf16.mxu1 %v20717_v14 }
0x1189   : > { %19312 = vmatpush3.bf16.msra.mxu0 %v19311_v5  ;;  %19348 = vmatpush3.bf16.msra.mxu1 %v19347_v7  ;;  %v7236_v5 = vld [vmem:[%s26639_s8] sm:$0xff]  ;;  %v7237_v7 = vld [vmem:[%s26639_s8 + $0x8] sm:$0xff] }
0x118a   : > { %19313 = vmatprep.subr.bf16.mxu0 %v20717_v14  ;;  %19349 = vmatprep.subr.bf16.mxu1 %v20717_v14  ;;  %v19353_v10 = vpack.c.bf16 %v7237_v7, %v7236_v5  ;;  %v7425_v5 = vld [vmem:[%s26632_s1 + $0x38] sm:$0xf] }
0x118d   : > { %19315 = vmatpush3.bf16.msra.mxu0 %v19314_v17  ;;  %19351 = vmatpush3.bf16.msra.mxu1 %v19350_v19  ;;  %v19356_v17 = vpack.c.bf16 %v7239_v15, %v7238_v11  ;;  %v7240_v19 = vld [vmem:[%s26639_s8 + $0x20] sm:$0xff]  ;;  %v23732_v11 = vld [vmem:[%s20894_s17 + $0x98] sm:$0xf] }
0x118e   : > { %17498 = vmatprep.subr.mxu0 %v20715_v0  ;;  %17561 = vmatprep.subr.mxu1 %v20715_v0  ;;  %v19359_v22 = vpack.c.bf16 %v7241_v21, %v7240_v19  ;;  %v7424_v19 = vld [vmem:[%s26632_s1 + $0x30] sm:$0xf]  ;;  %v15546_v21 = vld [vmem:[%s26632_s1 + $0x88] sm:$0xff] }
0x1191   : > { %17499 = vmatpush3.msra.mxu0 %v6664_v24  ;;  %17562 = vmatpush3.msra.mxu1 %v15501_v25  ;;  %v7242_v24 = vld [vmem:[%s26639_s8 + $0x30] sm:$0xff]  ;;  %v7243_v25 = vld [vmem:[%s26639_s8 + $0x38] sm:$0xff] }
0x1192   : > { %17501 = vmatmul.mubr.msk.f32.vlgmr.msra.gmra.mrb[66].mxu0 %vm1511_vm10, %v23418_v18  ;;  %19328 = vmatprep.subr.bf16.mxu0 %v20717_v14  ;;  %v15507_v18 = vld [vmem:[%s26639_s8 + $0x80] sm:$0xff] }
0x1193   : > { %17564 = vmatmul.mubr.msk.f32.vlgmr.msra.gmra.mrb[80].mxu1 %vm1511_vm10, %v7004_v53  ;;  %19330 = vmatpush3.bf16.msra.mxu0 %v19329_v26  ;;  %v19377_v12 = vpack.c.bf16 %v15508_v3, %v15507_v18  ;;  %v19362_v26 = vpack.c.bf16 %v7243_v25, %v7242_v24  ;;  %v15520_v18 = vld [vmem:[%s26639_s8 + $0xe8] sm:$0xff]  ;;  %v7443_v25 = vrot.slane %v23732_v11, 1 }
0x1194   : > { %19331 = vmatprep.subr.bf16.mxu0 %v20717_v14  ;;  %17542 = vmatprep.mubr.msk.f32.mxu0 %vm20718_vm9, %v20715_v0 }
0x1195   : > { %19376 = vmatprep.subr.bf16.mxu1 %v20717_v14  ;;  %17643 = vmatprep.mubr.msk.f32.mxu1 %vm20718_vm9, %v20715_v0 }
0x1196   : > { %19378 = vmatpush3.bf16.msra.mxu1 %v19377_v12  ;;  %v7250_v12 = vld [vmem:[%s26639_s8 + $0x70] sm:$0xff] }
0x1197   : > { %19333 = vmatpush3.bf16.msra.mxu0 %v19332_v6  ;;  %19379 = vmatprep.subr.bf16.mxu1 %v20717_v14  ;;  %v19365_v6 = vpack.c.bf16 %v7245_v55, %v7244_v54  ;;  %v19374_v31 = vpack.c.bf16 %v7251_v30, %v7250_v12 }
0x1198   : > { %19334 = vmatprep.subr.bf16.mxu0 %v20717_v14 }
0x119a   : > { %19381 = vmatpush3.bf16.msra.mxu1 %v19380_v32  ;;  %v15521_v32 = vld [vmem:[%s26639_s8 + $0xf0] sm:$0xff] }
0x119b   : > { %19336 = vmatpush3.bf16.msra.mxu0 %v19335_v16  ;;  %19382 = vmatprep.subr.bf16.mxu1 %v20717_v14  ;;  %v19368_v16 = vpack.c.bf16 %v7247_v59, %v7246_v27  ;;  %v19398_v33 = vpack.c.bf16 %v15522_v20, %v15521_v32  ;;  %v15547_v27 = vld [vmem:[%s26632_s1 + $0x90] sm:$0xff]  ;;  %v15550_v59 = vld [vmem:[%s26632_s1 + $0xa8] sm:$0xff]  ;;  %v15558_v20 = vld [vmem:[%s26632_s1 + $0xc0] sm:$0xff] }
0x119c   : > { %19337 = vmatprep.subr.bf16.mxu0 %v20717_v14 }
0x119e   : > { %19384 = vmatpush3.bf16.msra.mxu1 %v19383_v34  ;;  %v15528_v34 = vld [vmem:[%s26632_s1 + $0x48] sm:$0xff] }
0x119f   : > { %19339 = vmatpush3.bf16.msra.mxu0 %v19338_v28  ;;  %19385 = vmatprep.subr.bf16.mxu1 %v20717_v14  ;;  %v19371_v28 = vpack.c.bf16 %v7249_v9, %v7248_v60  ;;  %v19400_v23 = vpack.c.bf16 %v15530_v13, %v15528_v34  ;;  %v15563_v34 = vld [vmem:[%s26632_s1 + $0xe8] sm:$0xff]  ;;  %v15565_v13 = vld [vmem:[%s26632_s1 + $0xf8] sm:$0xf] }
0x11a0   : > { %17540 = vmatprep.subr.mxu0 %v20715_v0 }
0x11a2   : > { %19387 = vmatpush3.bf16.msra.mxu1 %v19386_v35 }
0x11a3   : > { %17541 = vmatpush3.msra.mxu0 %v15491_v2  ;;  %19388 = vmatprep.subr.bf16.mxu1 %v20717_v14  ;;  %v15519_v2 = vld [vmem:[%s26639_s8 + $0xe0] sm:$0xff] }
0x11a4   : > { %17543 = vmatmul.mubr.msk.f32.vlgmr.msra.gmra.mrb[68].mxu0 %vm1511_vm10, %v23452_v56  ;;  %17566 = vmatprep.subr.mxu0 %v20715_v0  ;;  %v19395_v3 = vpack.c.bf16 %v15520_v18, %v15519_v2  ;;  %v15551_v2 = vld [vmem:[%s26632_s1 + $0xb0] sm:$0xf]  ;;  %v15559_v18 = vld [vmem:[%s26632_s1 + $0xc8] sm:$0xff] }
0x11a5   : > { %17568 = vmatprep.mubr.msk.f32.mxu0 %vm20718_vm9, %v20715_v0 }
0x11a6   : > { %19390 = vmatpush3.bf16.msra.mxu1 %v19389_v39  ;;  %v15529_v39 = vld [vmem:[%s26632_s1 + $0x50] sm:$0xff] }
0x11a7   : > { %19391 = vmatprep.subr.bf16.mxu1 %v20717_v14 }
0x11aa   : > { %19393 = vmatpush3.bf16.msra.mxu1 %v19392_v42 }
0x11ab   : > { %19394 = vmatprep.subr.bf16.mxu1 %v20717_v14 }
0x11ae   : > { %19396 = vmatpush3.bf16.msra.mxu1 %v19395_v3  ;;  %v15561_v3 = vld [vmem:[%s26632_s1 + $0xd8] sm:$0xff] }
0x11af   : > { %19397 = vmatprep.subr.bf16.mxu1 %v20717_v14  ;;  %v19430_v30 = vpack.c.bf16 %v15561_v3, %v15559_v18  ;;  %v15601_v18 = vld [vmem:[%s26635_s4 + $0xd8] sm:$0xff] }
0x11b2   : > { %19399 = vmatpush3.bf16.msra.mxu1 %v19398_v33  ;;  %v15560_v33 = vld [vmem:[%s26632_s1 + $0xd0] sm:$0xff] }
0x1253   : > { %v6747_v43 = vpop.f32.mrb[64].mxu0  ;;  %v6903_v44 = vpop.f32.mrb[78].mxu1 }
0x1254   : > { %v17481_v45 = vpop.f32.mrb[65].mxu0  ;;  %v17523_v46 = vpop.f32.mrb[79].mxu1 }
0x1265   : > { %v6819_v47 = vpop.f32.mrb[66].mxu0 }
0x1266   : > { %v6820_v48 = vadd.f32 %v6819_v47, %v6747_v43  ;;  %v7073_v49 = vpop.f32.mrb[80].mxu1  ;;  %v17502_v50 = vpop.f32.mrb[67].mxu0  ;;  %v19402_v43 = vpack.c.bf16 %v15529_v39, %v15527_v38  ;;  %v19404_v47 = vpack.c.bf16 %v15534_v41, %v15532_v40  ;;  %v19434_v38 = vpack.c.bf16 %v15565_v13, %v15563_v34  ;;  %v15562_v39 = vld [vmem:[%s26632_s1 + $0xe0] sm:$0xff]  ;;  %v15564_v40 = vld [vmem:[%s26632_s1 + $0xf0] sm:$0xf]  ;;  %v15572_v41 = vld [vmem:[%s26632_s1 + $0x108] sm:$0xff] }
0x1267   : > { %v17565_v51 = vpop.f32.mrb[81].mxu1  ;;  %v23698_v50 = vld [vmem:[%s20894_s17 + $0x88] sm:$0xff] }
0x1268   : > { %v6907_v52 = vadd.f32 %v6903_v44, %v6820_v48  ;;  %v15531_v44 = vld [vmem:[%s26632_s1 + $0x60] sm:$0xff]  ;;  %v15533_v48 = vld [vmem:[%s26632_s1 + $0x70] sm:$0xf]  ;;  %v7419_v51 = vld [vmem:[%s26632_s1 + $0x8] sm:$0xff]  ;;  %v7644_v32 = vrot.slane %v23698_v50, 2 }
0x1277   : > { %v6988_v53 = vpop.f32.mrb[68].mxu0 }
0x1278   : > { %v6992_v56 = vadd.f32 %v6988_v53, %v6907_v52  ;;  %v17544_v57 = vpop.f32.mrb[69].mxu0  ;;  %v7421_v52 = vld [vmem:[%s26632_s1 + $0x18] sm:$0xff]  ;;  %v19407_v53 = vpack.c.bf16 %v15533_v48, %v15531_v44  ;;  %v7648_v44 = vrot.slane %v23732_v11, 2 }
0x1279   : > { %v7439_v57 = vrot.slane %v23698_v50, 1 }
0x127a   : > { %v7077_v61 = vadd.f32 %v7073_v49, %v6992_v56  ;;  %v23695_v49 = vld [vmem:[%s20894_s17 + $0x80] sm:$0xff] }
0x127b   : > { %v7438_v56 = vrot.slane %v23695_v49, 1  ;;  %v7759_v48 = vrot.slane %v23695_v49, 3 }
0x127c   : > { %v7085_v62 = vadd.f32 %v15503_v58, %v7077_v61  ;;  %v19410_v58 = vpack.c.bf16 %v7421_v52, %v7419_v51  ;;  %v7418_v61 = vld [vmem:[%s26632_s1] sm:$0xff]  ;;  %v7760_v51 = vrot.slane %v23698_v50, 3 }
0x127d   : > { %v7440_v7 = vsel %vm538_vm3, %v7438_v56, %v7439_v57  ;;  %v15571_v52 = vld [vmem:[%s26632_s1 + $0x100] sm:$0xff]  ;;  %v15576_v56 = vld [vmem:[%s26632_s1 + $0x128] sm:$0xff] }
0x127e   : > { %v7086_v63 = vmax.f32 %v7085_v62, 0.0  ;;  %v7420_v62 = vld [vmem:[%s26632_s1 + $0x10] sm:$0xff] }
0x1280   : > { %17567 = vmatpush3.msra.mxu0 %v7086_v63 }
0x1281   : > { %17569 = vmatmul.mubr.msk.f32.vlgmr.msra.gmra.mrb[70].mxu0 %vm1924_vm11, %v7087_v4  ;;  %17571 = vmatprep.subr.mxu0 %v20715_v0  ;;  %v7423_v4 = vld [vmem:[%s26632_s1 + $0x28] sm:$0xff] }
0x1282   : > { %17572 = vmatpush3.msra.mxu0 %v7086_v63  ;;  %17573 = vmatprep.mubr.msk.f32.mxu0 %vm20718_vm9, %v20715_v0  ;;  %v23718_v63 = vld [vmem:[%s20894_s17 + $0x90] sm:$0xff]  ;;  %v19414_v15 = vpack.c.bf16 %v7425_v5, %v7423_v4  ;;  %v15575_v5 = vld [vmem:[%s26632_s1 + $0x120] sm:$0xff] }
0x1283   : > { %19352 = vmatprep.subr.bf16.mxu0 %v20717_v14 }
0x1285   : > { %17574 = vmatmul.mubr.msk.f32.vlgmr.msra.gmra.mrb[72].mxu0 %vm1924_vm11, %v15505_v8  ;;  %v19412_v8 = vpack.c.bf16 %v7420_v62, %v7418_v61  ;;  %v7762_v62 = vrot.slane %v23718_v63, 3 }
0x1286   : > { %19354 = vmatpush3.bf16.msra.mxu0 %v19353_v10  ;;  %17608 = vmatprep.mubr.msk.f32.mxu0 %vm20718_vm9, %v20715_v0  ;;  %v7441_v10 = vrot.slane %v23718_v63, 1 }
0x1287   : > { %19355 = vmatprep.subr.bf16.mxu0 %v20717_v14 }
0x1288   : > { %v7442_v24 = vsel %vm538_vm3, %v7439_v57, %v7441_v10  ;;  %v7444_v55 = vsel %vm538_vm3, %v7441_v10, %v7443_v25  ;;  %v15578_v57 = vld [vmem:[%s26632_s1 + $0x138] sm:$0xf]  ;;  %v7764_v10 = vrot.slane %v23732_v11, 3 }
0x1289   : > { %v19444_v4 = vpack.c.bf16 %v15578_v57, %v15576_v56 }
0x128a   : > { %19357 = vmatpush3.bf16.msra.mxu0 %v19356_v17  ;;  %v7422_v17 = vld [vmem:[%s26632_s1 + $0x20] sm:$0xff] }
0x128b   : > { %19358 = vmatprep.subr.bf16.mxu0 %v20717_v14 }
0x128e   : > { %19360 = vmatpush3.bf16.msra.mxu0 %v19359_v22  ;;  %v15548_v22 = vld [vmem:[%s26632_s1 + $0x98] sm:$0xff] }
0x128f   : > { %19361 = vmatprep.subr.bf16.mxu0 %v20717_v14  ;;  %v19420_v54 = vpack.c.bf16 %v15548_v22, %v15546_v21  ;;  %v7876_v21 = vrot.slane %v23698_v50, 4 }
0x1292   : > { %19363 = vmatpush3.bf16.msra.mxu0 %v19362_v26  ;;  %v19417_v26 = vpack.c.bf16 %v7424_v19, %v7422_v17  ;;  %v7765_v17 = vsel %vm865_vm6, %v7762_v62, %v7764_v10  ;;  %v7875_v19 = vrot.slane %v23695_v49, 4  ;;  %v8182_v10 = vld [vmem:[%s26635_s4 + $0x8] sm:$0xff] }
0x1293   : > { %19364 = vmatprep.subr.bf16.mxu0 %v20717_v14 }
0x1294   : > { %v7877_v22 = vsel %vm553_vm0, %v7875_v19, %v7876_v21  ;;  %v8183_v19 = vld [vmem:[%s26635_s4 + $0x10] sm:$0xff] }
0x1296   : > { %19366 = vmatpush3.bf16.msra.mxu0 %v19365_v6  ;;  %v15545_v6 = vld [vmem:[%s26632_s1 + $0x80] sm:$0xff] }
0x1297   : > { %19367 = vmatprep.subr.bf16.mxu0 %v20717_v14  ;;  %v19422_v60 = vpack.c.bf16 %v15547_v27, %v15545_v6  ;;  %v15596_v27 = vld [vmem:[%s26635_s4 + $0xb0] sm:$0xff] }
0x129a   : > { %19369 = vmatpush3.bf16.msra.mxu0 %v19368_v16  ;;  %v15552_v16 = vld [vmem:[%s26632_s1 + $0xb8] sm:$0xf] }
0x129b   : > { %19370 = vmatprep.subr.bf16.mxu0 %v20717_v14  ;;  %v19424_v9 = vpack.c.bf16 %v15552_v16, %v15550_v59  ;;  %v15597_v59 = vld [vmem:[%s26635_s4 + $0xb8] sm:$0xff] }
0x129c   : > { %v19492_v16 = vpack.c.bf16 %v15597_v59, %v15596_v27  ;;  %v8191_v27 = vld [vmem:[%s26635_s4 + $0x50] sm:$0xff]  ;;  %v8192_v59 = vld [vmem:[%s26635_s4 + $0x58] sm:$0xff] }
0x129e   : > { %19372 = vmatpush3.bf16.msra.mxu0 %v19371_v28  ;;  %v15549_v28 = vld [vmem:[%s26632_s1 + $0xa0] sm:$0xff] }
0x129f   : > { %19373 = vmatprep.subr.bf16.mxu0 %v20717_v14  ;;  %v19427_v12 = vpack.c.bf16 %v15551_v2, %v15549_v28  ;;  %v15600_v2 = vld [vmem:[%s26635_s4 + $0xd0] sm:$0xff] }
0x12a0   : > { %v19498_v3 = vpack.c.bf16 %v15601_v18, %v15600_v2  ;;  %v15605_v18 = vld [vmem:[%s26635_s4 + $0xf8] sm:$0xff] }
0x12a2   : > { %19375 = vmatpush3.bf16.msra.mxu0 %v19374_v31  ;;  %v7643_v31 = vrot.slane %v23695_v49, 2 }
0x12a3   : > { %19401 = vmatprep.subr.bf16.mxu0 %v19400_v23 }
0x12a4   : > { %v7645_v23 = vsel %vm747_vm5, %v7643_v31, %v7644_v32 }
0x1354   : > { %v7157_v35 = vpop.f32.mrb[70].mxu0 }
0x1355   : > { %v17570_v37 = vpop.f32.mrb[71].mxu0 }
0x1356   : > { %v7646_v37 = vrot.slane %v23718_v63, 2 }
0x1358   : > { %v7231_v42 = vpop.f32.mrb[72].mxu0 }
0x1359   : > { %v7235_v45 = vmax.f32 %v7157_v35, %v7231_v42  ;;  %v17575_v46 = vpop.f32.mrb[73].mxu0  ;;  %v19432_v35 = vpack.c.bf16 %v15560_v33, %v15558_v20  ;;  %v15574_v42 = vld [vmem:[%s26632_s1 + $0x118] sm:$0xff] }
0x135a   : > { %v19440_v46 = vpack.c.bf16 %v15574_v42, %v15572_v41 }
0x135b   : > { %17609 = vmatmul.mubr.f32.vlgmr.msra.gmra.mrb[74].mxu0 %v7235_v45  ;;  %17644 = vmatmul.mubr.f32.vlgmr.msra.gmra.mrb[82].mxu1 %v7235_v45  ;;  %v19437_v45 = vpack.c.bf16 %v15564_v40, %v15562_v39 }
0x135c   : > { %19403 = vmatpush1.bf16.msra.mxu0 %v19402_v43  ;;  %7521 = vmatprep.mubr.f32.mxu0 %v20715_v0  ;;  %v7647_v43 = vsel %vm747_vm5, %v7644_v32, %v7646_v37 }
0x135d   : > { %19406 = vmatprep.subr.msk.bf16.mxu0 %vm20887_vm2, %v19404_v47  ;;  %8079 = vmatprep.mubr.f32.mxu1 %v20715_v0  ;;  %v7649_v47 = vsel %vm747_vm5, %v7646_v37, %v7648_v44 }
0x1360   : > { %19409 = vmatpush1.bf16.msk.msra.mxu0 %vm20887_vm2, %v19407_v53  ;;  %v15573_v53 = vld [vmem:[%s26632_s1 + $0x110] sm:$0xff] }
0x1361   : > { %19411 = vmatprep.subr.bf16.mxu0 %v19410_v58  ;;  %v7761_v58 = vsel %vm865_vm6, %v7759_v48, %v7760_v51  ;;  %v19442_v61 = vpack.c.bf16 %v15573_v53, %v15571_v52 }
0x1363   : > { %15537 = vmatmul.mubr.msk.f32.vlgmr.msra.gmra.mrb[76].mxu0 %vm546_vm4, %v7440_v7  ;;  %v15577_v7 = vld [vmem:[%s26632_s1 + $0x130] sm:$0xf] }
0x1364   : > { %7527 = vmatprep.mubr.f32.mxu0 %v20715_v0  ;;  %19413 = vmatpush1.bf16.msra.mxu0 %v19412_v8  ;;  %v7763_v8 = vsel %vm865_vm6, %v7760_v51, %v7762_v62 }
0x1365   : > { %19416 = vmatprep.subr.msk.bf16.mxu0 %vm20887_vm2, %v19414_v15  ;;  %v19447_v15 = vpack.c.bf16 %v15577_v7, %v15575_v5  ;;  %v8007_v5 = vld [vmem:[%s26634_s3] sm:$0xff]  ;;  %v8008_v7 = vld [vmem:[%s26634_s3 + $0x8] sm:$0xf] }
0x1367   : > { %15538 = vmatmul.mubr.msk.f32.gmra.mrb[78].mxu0 %vm546_vm4, %v7442_v24  ;;  %v7878_v24 = vrot.slane %v23718_v63, 4 }
0x1368   : > { %7533 = vmatprep.mubr.f32.mxu0 %v20715_v0  ;;  %19419 = vmatpush1.bf16.msk.msra.mxu0 %vm20887_vm2, %v19417_v26  ;;  %v15593_v26 = vld [vmem:[%s26635_s4 + $0x98] sm:$0xff] }
0x1369   : > { %19421 = vmatprep.subr.bf16.mxu0 %v19420_v54  ;;  %v7879_v25 = vsel %vm553_vm0, %v7876_v21, %v7878_v24  ;;  %v8184_v21 = vld [vmem:[%s26635_s4 + $0x18] sm:$0xff] }
0x136b   : > { %15539 = vmatmul.mubr.msk.f32.gmra.mrb[80].mxu0 %vm546_vm4, %v7444_v55  ;;  %v15595_v55 = vld [vmem:[%s26635_s4 + $0xa8] sm:$0xff] }
0x136c   : > { %7616 = vmatprep.mubr.f32.mxu0 %v20715_v0 }
0x136f   : > { %15542 = vmatmul.mubr.msk.f32.vlgmr.msra.gmra.mrb[76].mxu0 %vm546_vm4, %v23695_v49  ;;  %v7880_v49 = vrot.slane %v23732_v11, 4  ;;  %v15594_v11 = vld [vmem:[%s26635_s4 + $0xa0] sm:$0xff] }
0x1370   : > { %7622 = vmatprep.mubr.f32.mxu0 %v20715_v0  ;;  %19423 = vmatpush1.bf16.msra.mxu0 %v19422_v60  ;;  %v19489_v6 = vpack.c.bf16 %v15595_v55, %v15594_v11  ;;  %v15598_v60 = vld [vmem:[%s26635_s4 + $0xc0] sm:$0xff]  ;;  %v8190_v55 = vld [vmem:[%s26635_s4 + $0x48] sm:$0xff] }
0x1371   : > { %19426 = vmatprep.subr.msk.bf16.mxu0 %vm20887_vm2, %v19424_v9  ;;  %v15599_v9 = vld [vmem:[%s26635_s4 + $0xc8] sm:$0xff]  ;;  %v8189_v11 = vld [vmem:[%s26635_s4 + $0x40] sm:$0xff] }
0x1372   : > { %v19495_v28 = vpack.c.bf16 %v15599_v9, %v15598_v60  ;;  %v8193_v60 = vld [vmem:[%s26635_s4 + $0x60] sm:$0xff]  ;;  %v8194_v9 = vld [vmem:[%s26635_s4 + $0x68] sm:$0xff] }
0x1373   : > { %15543 = vmatmul.mubr.msk.f32.gmra.mrb[78].mxu0 %vm546_vm4, %v23698_v50  ;;  %v7881_v50 = vsel %vm553_vm0, %v7878_v24, %v7880_v49  ;;  %v19462_v24 = vpack.c.bf16 %v8184_v21, %v8183_v19  ;;  %v8186_v49 = vld [vmem:[%s26635_s4 + $0x28] sm:$0xff]  ;;  %v19477_v2 = vpack.c.bf16 %v8194_v9, %v8193_v60  ;;  %v15617_v19 = vld [vmem:[%s26636_s5 + $0x70] sm:$0xff] }
0x1374   : > { %7628 = vmatprep.mubr.f32.mxu0 %v20715_v0  ;;  %19429 = vmatpush1.bf16.msk.msra.mxu0 %vm20887_vm2, %v19427_v12  ;;  %v15602_v12 = vld [vmem:[%s26635_s4 + $0xe0] sm:$0xff]  ;;  %v15627_v21 = vld [vmem:[%s26636_s5 + $0xb0] sm:$0xff] }
0x1375   : > { %19431 = vmatprep.subr.bf16.mxu0 %v19430_v30  ;;  %v15603_v30 = vld [vmem:[%s26635_s4 + $0xe8] sm:$0xff] }
0x1376   : > { %v19501_v31 = vpack.c.bf16 %v15603_v30, %v15602_v12  ;;  %v8195_v12 = vld [vmem:[%s26635_s4 + $0x70] sm:$0xff]  ;;  %v8196_v30 = vld [vmem:[%s26635_s4 + $0x78] sm:$0xff] }
0x1377   : > { %15544 = vmatmul.mubr.msk.f32.gmra.mrb[80].mxu0 %vm546_vm4, %v23718_v63  ;;  %v15592_v63 = vld [vmem:[%s26635_s4 + $0x90] sm:$0xff] }
0x1378   : > { %7726 = vmatprep.mubr.f32.mxu0 %v20715_v0  ;;  %v19486_v54 = vpack.c.bf16 %v15593_v26, %v15592_v63  ;;  %v8187_v63 = vld [vmem:[%s26635_s4 + $0x30] sm:$0xff]  ;;  %v8188_v26 = vld [vmem:[%s26635_s4 + $0x38] sm:$0xff] }
0x137b   : > { %15555 = vmatmul.mubr.msk.f32.vlgmr.msra.gmra.mrb[76].mxu0 %vm546_vm4, %v7645_v23  ;;  %v7983_v23 = vld [vmem:[%s26633_s2] sm:$0x3] }
0x137c   : > { %7732 = vmatprep.mubr.f32.mxu0 %v20715_v0  ;;  %19433 = vmatpush1.bf16.msra.mxu0 %v19432_v35  ;;  %v7988_v35 = vrot.slane %v7983_v23, %v21109_v36 }
0x137d   : > { %19436 = vmatprep.subr.msk.bf16.mxu0 %vm20887_vm2, %v19434_v38  ;;  %v7992_v38 = vrot.slane %v7983_v23, %v21114_v29  ;;  %v15608_v23 = vld [vmem:[%s26635_s4 + $0x110] sm:$0xff] }
0x137f   : > { %15556 = vmatmul.mubr.msk.f32.gmra.mrb[78].mxu0 %vm546_vm4, %v7647_v43 }
0x1380   : > { %7738 = vmatprep.mubr.f32.mxu0 %v20715_v0  ;;  %19439 = vmatpush1.bf16.msk.msra.mxu0 %vm20887_vm2, %v19437_v45 }
0x1381   : > { %19441 = vmatprep.subr.bf16.mxu0 %v19440_v46 }
0x1383   : > { %15557 = vmatmul.mubr.msk.f32.gmra.mrb[80].mxu0 %vm546_vm4, %v7649_v47 }
0x1384   : > { %7842 = vmatprep.mubr.f32.mxu0 %v20715_v0 }
0x1387   : > { %15568 = vmatmul.mubr.msk.f32.vlgmr.msra.gmra.mrb[76].mxu0 %vm546_vm4, %v7761_v58 }
0x1388   : > { %7848 = vmatprep.mubr.f32.mxu0 %v20715_v0  ;;  %19443 = vmatpush1.bf16.msra.mxu0 %v19442_v61 }
0x1389   : > { %19446 = vmatprep.subr.msk.bf16.mxu0 %vm20887_vm2, %v19444_v4 }
0x138b   : > { %15569 = vmatmul.mubr.msk.f32.gmra.mrb[78].mxu0 %vm546_vm4, %v7763_v8  ;;  %v8181_v8 = vld [vmem:[%s26635_s4] sm:$0xff] }
0x138c   : > { %7854 = vmatprep.mubr.f32.mxu0 %v20715_v0  ;;  %19449 = vmatpush1.bf16.msk.msra.mxu0 %vm20887_vm2, %v19447_v15  ;;  %v15586_v15 = vld [vmem:[%s26634_s3 + $0x10] sm:$0xff] }
0x138d   : > { %19485 = vmatprep.subr.bf16.mxu0 %v20717_v14 }
0x138f   : > { %15570 = vmatmul.mubr.msk.f32.gmra.mrb[80].mxu0 %vm546_vm4, %v7765_v17  ;;  %v19459_v17 = vpack.c.bf16 %v8182_v10, %v8181_v8 }
0x1390   : > { %7958 = vmatprep.mubr.f32.mxu0 %v20715_v0 }
0x1393   : > { %15581 = vmatmul.mubr.msk.f32.vlgmr.msra.gmra.mrb[76].mxu0 %vm546_vm4, %v7877_v22  ;;  %v15587_v22 = vld [vmem:[%s26634_s3 + $0x18] sm:$0xf] }
0x1394   : > { %7964 = vmatprep.mubr.f32.mxu0 %v20715_v0  ;;  %19487 = vmatpush1.bf16.msra.mxu0 %v19486_v54  ;;  %v19468_v54 = vpack.c.bf16 %v8188_v26, %v8187_v63  ;;  %v15629_v63 = vld [vmem:[%s26636_s5 + $0xc0] sm:$0xff] }
0x1395   : > { %19488 = vmatprep.subr.bf16.mxu0 %v20717_v14 }
0x1397   : > { %15582 = vmatmul.mubr.msk.f32.gmra.mrb[78].mxu0 %vm546_vm4, %v7879_v25  ;;  %v8185_v25 = vld [vmem:[%s26635_s4 + $0x20] sm:$0xff] }
0x1398   : > { %7970 = vmatprep.mubr.f32.mxu0 %v20715_v0  ;;  %19490 = vmatpush1.bf16.msra.mxu0 %v19489_v6  ;;  %v19471_v6 = vpack.c.bf16 %v8190_v55, %v8189_v11  ;;  %v15620_v55 = vld [vmem:[%s26636_s5 + $0x88] sm:$0xff] }
0x1399   : > { %19491 = vmatprep.subr.bf16.mxu0 %v20717_v14 }
0x139b   : > { %15583 = vmatmul.mubr.msk.f32.gmra.mrb[80].mxu0 %vm546_vm4, %v7881_v50  ;;  %v19465_v50 = vpack.c.bf16 %v8186_v49, %v8185_v25  ;;  %v15618_v49 = vld [vmem:[%s26636_s5 + $0x78] sm:$0xff] }
0x139c   : > { %19493 = vmatpush1.bf16.msra.mxu0 %v19492_v16  ;;  %v19474_v16 = vpack.c.bf16 %v8192_v59, %v8191_v27 }
0x139d   : > { %19494 = vmatprep.subr.bf16.mxu0 %v20717_v14 }
0x13a0   : > { %19496 = vmatpush1.bf16.msra.mxu0 %v19495_v28  ;;  %v15604_v28 = vld [vmem:[%s26635_s4 + $0xf0] sm:$0xff] }
0x13a1   : > { %19497 = vmatprep.subr.bf16.mxu0 %v20717_v14 }
0x13a4   : > { %19499 = vmatpush1.bf16.msra.mxu0 %v19498_v3  ;;  %v19504_v3 = vpack.c.bf16 %v15605_v18, %v15604_v28  ;;  %v8375_v28 = vld [vmem:[%s26636_s5] sm:$0xff] }
0x13a5   : > { %19500 = vmatprep.subr.bf16.mxu0 %v20717_v14  ;;  %v15643_v18 = vld [vmem:[%s26636_s5 + $0x120] sm:$0xff] }
0x13a8   : > { %19502 = vmatpush1.bf16.msra.mxu0 %v19501_v31  ;;  %v15606_v31 = vld [vmem:[%s26635_s4 + $0x100] sm:$0xff] }
0x13a9   : > { %19503 = vmatprep.subr.bf16.mxu0 %v20717_v14 }
0x13ac   : > { %19505 = vmatpush1.bf16.msra.mxu0 %v19504_v3  ;;  %v15644_v3 = vld [vmem:[%s26636_s5 + $0x128] sm:$0xff] }
0x13ad   : > { %19506 = vmatprep.subr.bf16.mxu0 %v20717_v14 }
0x142e   : > { %v7318_v32 = vpop.f32.mrb[74].mxu0  ;;  %v7404_v20 = vpop.f32.mrb[82].mxu1 }
0x142f   : > { %v7408_v33 = vmax.f32 %v7318_v32, %v7404_v20  ;;  %v17610_v34 = vpop.f32.mrb[75].mxu0  ;;  %v17645_v13 = vpop.f32.mrb[83].mxu1  ;;  %v19480_v32 = vpack.c.bf16 %v8196_v30, %v8195_v12  ;;  %v15607_v20 = vld [vmem:[%s26635_s4 + $0x108] sm:$0xff] }
0x1430   : > { %v8197_v34 = vld [vmem:[%s26635_s4 + $0x80] sm:$0xff]  ;;  %v8198_v13 = vld [vmem:[%s26635_s4 + $0x88] sm:$0xff] }
0x1431   : > { %7409 = vst.msk [vmem:[#allocation2 + $0x3] sm:$0x1] %vm2248_vm12, %v7408_v33 }
0x1432   : > { %7410 = vst.msk [vmem:[#allocation2 + $0xa] sm:$0x2] %vm2250_vm13, %v7408_v33 }
0x1433   : > { %7411 = vst.msk [vmem:[#allocation2 + $0x11] sm:$0x4] %vm2252_vm14, %v7408_v33 }
0x1434   : > { %7412 = vst.msk [vmem:[#allocation2 + $0x18] sm:$0x8] %vm2254_vm15, %v7408_v33  ;;  %v19507_v33 = vpack.c.bf16 %v15607_v20, %v15606_v31 }
0x1436   : > { %19508 = vmatpush1.bf16.msra.mxu0 %v19507_v33 }
0x1437   : > { %19509 = vmatprep.subr.bf16.mxu0 %v20717_v14 }
0x1466   : > { %v7960_v37 = vpop.f32.mrb[76].mxu0 }
0x1467   : > { %v7962_v39 = vpop.f32.mrb[77].mxu0  ;;  %v7995_v40 = vadd.f32 %v7988_v35, %v7960_v37  ;;  %v15609_v37 = vld [vmem:[%s26635_s4 + $0x118] sm:$0xff] }
0x1468   : > { %v7996_v41 = vadd.f32 %v7992_v38, %v7962_v39 }
0x1469   : > { %v8001_v46 = vmax.f32 %v7995_v40, 0.0 }
0x146a   : > { %v7966_v42 = vpop.f32.mrb[78].mxu0  ;;  %v8002_v48 = vmax.f32 %v7996_v41, 0.0 }
0x146b   : > { %v7997_v43 = vadd.f32 %v7988_v35, %v7966_v42  ;;  %v7968_v44 = vpop.f32.mrb[79].mxu0 }
0x146c   : > { %v7998_v45 = vadd.f32 %v7992_v38, %v7968_v44  ;;  %v15613_v44 = vld [vmem:[%s26636_s5 + $0x50] sm:$0xff] }
0x146d   : > { %v8003_v47 = vmax.f32 %v7997_v43, 0.0  ;;  %v15612_v43 = vld [vmem:[%s26636_s5 + $0x48] sm:$0xff] }
0x146e   : > { %v8004_v51 = vmax.f32 %v7998_v45, 0.0  ;;  %v7972_v52 = vpop.f32.mrb[80].mxu0  ;;  %v15623_v45 = vld [vmem:[%s26636_s5 + $0x90] sm:$0xff] }
0x146f   : > { %v19452_v53 = vpack.c.bf16 %v8003_v47, %v8001_v46  ;;  %v7974_v56 = vpop.f32.mrb[81].mxu0  ;;  %v7999_v61 = vadd.f32 %v7988_v35, %v7972_v52  ;;  %v19483_v35 = vpack.c.bf16 %v8198_v13, %v8197_v34  ;;  %v15624_v46 = vld [vmem:[%s26636_s5 + $0x98] sm:$0xff]  ;;  %v19561_v34 = vpack.c.bf16 %v15644_v3, %v15643_v18  ;;  %v15661_v3 = vld [vmem:[%s26639_s8 + $0xa0] sm:$0xff] }
0x1470   : > { %v19450_v57 = vpack.c.bf16 %v8004_v51, %v8002_v48  ;;  %v8000_v58 = vadd.f32 %v7992_v38, %v7974_v56  ;;  %v19510_v38 = vpack.c.bf16 %v15609_v37, %v15608_v23  ;;  %v19537_v56 = vpack.c.bf16 %v15624_v46, %v15623_v45  ;;  %v15646_v45 = vld [vmem:[%s26636_s5 + $0x138] sm:$0xff] }
0x1471   : > { %v8005_v4 = vmax.f32 %v7999_v61, 0.0  ;;  %v15625_v61 = vld [vmem:[%s26636_s5 + $0xa0] sm:$0xff] }
0x1472   : > { %v8006_v62 = vmax.f32 %v8000_v58, 0.0  ;;  %19451 = vmatprep.subr.bf16.mxu1 %v19450_v57  ;;  %19511 = vmatpush1.bf16.msra.mxu0 %v19510_v38  ;;  %v15615_v58 = vld [vmem:[%s26636_s5 + $0x60] sm:$0xff] }
0x1473   : > { %19453 = vmatpush1.bf16.msra.mxu1 %v19452_v53  ;;  %19536 = vmatprep.subr.bf16.mxu0 %v20717_v14 }
0x1474   : > { %8019 = vmatprep.subr.mxu1 %v8006_v62 }
0x1477   : > { %8020 = vmatpush1.msra.mxu1 %v8005_v4 }
0x1478   : > { %15584 = vmatmul.mubr.msk.f32.vlgmr.msra.gmra.mrb[84].mxu1 %vm1117_vm7, %v8007_v5  ;;  %19455 = vmatprep.subr.bf16.mxu1 %v19450_v57  ;;  %v15614_v57 = vld [vmem:[%s26636_s5 + $0x58] sm:$0xff] }
0x1479   : > { %19457 = vmatpush1.bf16.msra.mxu1 %v19452_v53  ;;  %8085 = vmatprep.mubr.f32.mxu1 %v20715_v0  ;;  %v19513_v53 = vpack.c.bf16 %v15613_v44, %v15612_v43  ;;  %v19516_v10 = vpack.c.bf16 %v15615_v58, %v15614_v57  ;;  %v8378_v43 = vld [vmem:[%s26636_s5 + $0x18] sm:$0xff]  ;;  %v15645_v44 = vld [vmem:[%s26636_s5 + $0x130] sm:$0xff]  ;;  %v8380_v57 = vld [vmem:[%s26636_s5 + $0x28] sm:$0xff] }
0x147a   : > { %8104 = vmatprep.subr.mxu1 %v8006_v62  ;;  %v15626_v62 = vld [vmem:[%s26636_s5 + $0xa8] sm:$0xff]  ;;  %v15647_v58 = vld [vmem:[%s26636_s5 + $0x140] sm:$0xff] }
0x147c   : > { %15585 = vmatmul.mubr.msk.f32.gmra.mrb[86].mxu1 %vm1117_vm7, %v8008_v7 }
0x147d   : > { %8105 = vmatpush1.msra.mxu1 %v8005_v4  ;;  %8164 = vmatprep.mubr.f32.mxu1 %v20715_v0 }
0x147e   : > { %19458 = vmatprep.subr.bf16.mxu1 %v20717_v14 }
0x1480   : > { %15588 = vmatmul.mubr.msk.f32.vlgmr.msra.gmra.mrb[88].mxu1 %vm1117_vm7, %v15586_v15  ;;  %v19540_v15 = vpack.c.bf16 %v15626_v62, %v15625_v61  ;;  %v15648_v61 = vld [vmem:[%s26636_s5 + $0x148] sm:$0xff] }
0x1481   : > { %8170 = vmatprep.mubr.f32.mxu1 %v20715_v0  ;;  %19460 = vmatpush1.bf16.msra.mxu1 %v19459_v17  ;;  %v15616_v17 = vld [vmem:[%s26636_s5 + $0x68] sm:$0xff] }
0x1482   : > { %19461 = vmatprep.subr.bf16.mxu1 %v20717_v14 }
0x1484   : > { %15589 = vmatmul.mubr.msk.f32.gmra.mrb[90].mxu1 %vm1117_vm7, %v15587_v22  ;;  %v19519_v22 = vpack.c.bf16 %v15617_v19, %v15616_v17  ;;  %v15633_v19 = vld [vmem:[%s26636_s5 + $0xd8] sm:$0xff] }
0x1485   : > { %19463 = vmatpush1.bf16.msra.mxu1 %v19462_v24  ;;  %v15628_v24 = vld [vmem:[%s26636_s5 + $0xb8] sm:$0xff] }
0x1486   : > { %19464 = vmatprep.subr.bf16.mxu1 %v20717_v14  ;;  %v19543_v25 = vpack.c.bf16 %v15628_v24, %v15627_v21  ;;  %v15634_v21 = vld [vmem:[%s26636_s5 + $0xe0] sm:$0xff] }
0x1487   : > { %v15651_v24 = vld [vmem:[%s26636_s5 + $0x160] sm:$0xff] }
0x1489   : > { %19466 = vmatpush1.bf16.msra.mxu1 %v19465_v50  ;;  %v15619_v50 = vld [vmem:[%s26636_s5 + $0x80] sm:$0xff] }
0x148a   : > { %19467 = vmatprep.subr.bf16.mxu1 %v20717_v14  ;;  %v19522_v26 = vpack.c.bf16 %v15619_v50, %v15618_v49  ;;  %v15635_v49 = vld [vmem:[%s26636_s5 + $0xe8] sm:$0xff]  ;;  %v15636_v50 = vld [vmem:[%s26636_s5 + $0xf0] sm:$0xff] }
0x148d   : > { %19469 = vmatpush1.bf16.msra.mxu1 %v19468_v54  ;;  %v15630_v54 = vld [vmem:[%s26636_s5 + $0xc8] sm:$0xff] }
0x148e   : > { %19470 = vmatprep.subr.bf16.mxu1 %v20717_v14  ;;  %v19546_v11 = vpack.c.bf16 %v15630_v54, %v15629_v63  ;;  %v19552_v63 = vpack.c.bf16 %v15636_v50, %v15635_v49  ;;  %v15638_v54 = vld [vmem:[%s26636_s5 + $0x100] sm:$0xff]  ;;  %v8964_v50 = vld [vmem:[%s26639_s8 + $0x48] sm:$0xff] }
0x148f   : > { %v8963_v49 = vld [vmem:[%s26639_s8 + $0x40] sm:$0xff] }
0x1491   : > { %19472 = vmatpush1.bf16.msra.mxu1 %v19471_v6  ;;  %v15631_v6 = vld [vmem:[%s26636_s5 + $0xd0] sm:$0xff] }
0x1492   : > { %19473 = vmatprep.subr.bf16.mxu1 %v20717_v14 }
0x1495   : > { %19475 = vmatpush1.bf16.msra.mxu1 %v19474_v16 }
0x1496   : > { %19476 = vmatprep.subr.bf16.mxu1 %v20717_v14 }
0x1499   : > { %19478 = vmatpush1.bf16.msra.mxu1 %v19477_v2  ;;  %v8376_v2 = vld [vmem:[%s26636_s5 + $0x8] sm:$0xff] }
0x149a   : > { %19479 = vmatprep.subr.bf16.mxu1 %v20717_v14  ;;  %v19525_v33 = vpack.c.bf16 %v8376_v2, %v8375_v28  ;;  %v15659_v28 = vld [vmem:[%s26639_s8 + $0x90] sm:$0xff]  ;;  %v15660_v2 = vld [vmem:[%s26639_s8 + $0x98] sm:$0xff] }
0x149b   : > { %v19600_v18 = vpack.c.bf16 %v15660_v2, %v15659_v28  ;;  %v8970_v28 = vld [vmem:[%s26639_s8 + $0x78] sm:$0xff] }
0x149d   : > { %19481 = vmatpush1.bf16.msra.mxu1 %v19480_v32 }
0x149e   : > { %19482 = vmatprep.subr.bf16.mxu1 %v20717_v14 }
0x14a1   : > { %19484 = vmatpush1.bf16.msra.mxu1 %v19483_v35 }
0x14a2   : > { %19512 = vmatprep.subr.bf16.mxu1 %v20717_v14 }
0x154b   : > { %v8081_v39 = vpop.f32.mrb[84].mxu1 }
0x154c   : > { %v8083_v40 = vpop.f32.mrb[85].mxu1 }
0x154f   : > { %v8087_v41 = vpop.f32.mrb[86].mxu1 }
0x1550   : > { %v8089_v42 = vpop.f32.mrb[87].mxu1 }
0x1553   : > { %v8166_v47 = vpop.f32.mrb[88].mxu1 }
0x1554   : > { %v8177_v48 = vmax.f32 %v8081_v39, %v8166_v47  ;;  %v8168_v51 = vpop.f32.mrb[89].mxu1 }
0x1555   : > { %v8178_v52 = vmax.f32 %v8083_v40, %v8168_v51 }
0x1557   : > { %v8172_v4 = vpop.f32.mrb[90].mxu1  ;;  %15590 = vmatprep.mubr.msk.f32.mxu1 %vm1309_vm8, %v8178_v52  ;;  %15610 = vmatprep.mubr.msk.f32.mxu0 %vm1309_vm8, %v8178_v52 }
0x1558   : > { %v8179_v5 = vmax.f32 %v8087_v41, %v8172_v4  ;;  %v8174_v7 = vpop.f32.mrb[91].mxu1  ;;  %8270 = vmatmul.mubr.f32.vlgmr.msra.gmra.mrb[92].mxu1 %v8177_v48  ;;  %8363 = vmatmul.mubr.f32.vlgmr.msra.gmra.mrb[82].mxu0 %v8177_v48  ;;  %v19567_v4 = vpack.c.bf16 %v15648_v61, %v15647_v58  ;;  %v8806_v61 = vld [vmem:[%s26638_s7] sm:$0xf] }
0x1559   : > { %v8180_v8 = vmax.f32 %v8089_v42, %v8174_v7  ;;  %19514 = vmatpush3.bf16.msra.mxu1 %v19513_v53  ;;  %19538 = vmatpush3.bf16.msra.mxu0 %v19537_v56  ;;  %v8377_v42 = vld [vmem:[%s26636_s5 + $0x10] sm:$0xff]  ;;  %v19564_v53 = vpack.c.bf16 %v15646_v45, %v15645_v44  ;;  %v8379_v56 = vld [vmem:[%s26636_s5 + $0x20] sm:$0xff]  ;;  %v8382_v7 = vld [vmem:[%s26636_s5 + $0x38] sm:$0xff] }
0x155a   : > { %19515 = vmatprep.subr.bf16.mxu1 %v20717_v14  ;;  %19539 = vmatprep.subr.bf16.mxu0 %v20717_v14  ;;  %v19528_v52 = vpack.c.bf16 %v8378_v43, %v8377_v42  ;;  %v19531_v62 = vpack.c.bf16 %v8380_v57, %v8379_v56 }
0x155b   : > { %15591 = vmatprep.mubr.msk.f32.mxu1 %vm1309_vm8, %v8180_v8  ;;  %15611 = vmatprep.mubr.msk.f32.mxu0 %vm1309_vm8, %v8180_v8  ;;  %v15649_v8 = vld [vmem:[%s26636_s5 + $0x150] sm:$0xff] }
0x155c   : > { %8275 = vmatmul.mubr.f32.gmra.mrb[94].mxu1 %v8179_v5  ;;  %8368 = vmatmul.mubr.f32.gmra.mrb[84].mxu0 %v8179_v5  ;;  %v8381_v5 = vld [vmem:[%s26636_s5 + $0x30] sm:$0xff] }
0x155d   : > { %19517 = vmatpush3.bf16.msra.mxu1 %v19516_v10  ;;  %19541 = vmatpush3.bf16.msra.mxu0 %v19540_v15  ;;  %v15650_v10 = vld [vmem:[%s26636_s5 + $0x158] sm:$0xff]  ;;  %v19534_v15 = vpack.c.bf16 %v8382_v7, %v8381_v5  ;;  %v15655_v5 = vld [vmem:[%s26638_s7 + $0x4] sm:$0xf] }
0x155e   : > { %19518 = vmatprep.subr.bf16.mxu1 %v20717_v14  ;;  %19542 = vmatprep.subr.bf16.mxu0 %v20717_v14  ;;  %v19570_v17 = vpack.c.bf16 %v15650_v10, %v15649_v8  ;;  %v8957_v8 = vld [vmem:[%s26639_s8 + $0x10] sm:$0xff]  ;;  %v8958_v10 = vld [vmem:[%s26639_s8 + $0x18] sm:$0xff] }
0x155f   : > { %17664 = vmatprep.mubr.msk.f32.mxu1 %vm20718_vm9, %v20715_v0  ;;  %17706 = vmatprep.mubr.msk.f32.mxu0 %vm20718_vm9, %v20715_v0 }
0x1561   : > { %19520 = vmatpush3.bf16.msra.mxu1 %v19519_v22  ;;  %19544 = vmatpush3.bf16.msra.mxu0 %v19543_v25  ;;  %v8383_v22 = vld [vmem:[%s26636_s5 + $0x40] sm:$0xff]  ;;  %v19549_v25 = vpack.c.bf16 %v15634_v21, %v15633_v19  ;;  %v8960_v19 = vld [vmem:[%s26639_s8 + $0x28] sm:$0xff] }
0x1562   : > { %19521 = vmatprep.subr.bf16.mxu1 %v20717_v14  ;;  %19545 = vmatprep.subr.bf16.mxu0 %v20717_v14 }
0x1565   : > { %19523 = vmatpush3.bf16.msra.mxu1 %v19522_v26  ;;  %19547 = vmatpush3.bf16.msra.mxu0 %v19546_v11  ;;  %v15637_v26 = vld [vmem:[%s26636_s5 + $0xf8] sm:$0xff] }
0x1566   : > { %17662 = vmatprep.subr.mxu1 %v20715_v0  ;;  %17704 = vmatprep.subr.mxu0 %v20715_v0  ;;  %v19555_v11 = vpack.c.bf16 %v15638_v54, %v15637_v26  ;;  %v8965_v26 = vld [vmem:[%s26639_s8 + $0x50] sm:$0xff]  ;;  %v8966_v54 = vld [vmem:[%s26639_s8 + $0x58] sm:$0xff] }
0x1569   : > { %17663 = vmatpush3.msra.mxu1 %v15620_v55  ;;  %17705 = vmatpush3.msra.mxu0 %v15631_v6  ;;  %v15639_v55 = vld [vmem:[%s26636_s5 + $0x108] sm:$0xff]  ;;  %v15640_v6 = vld [vmem:[%s26636_s5 + $0x110] sm:$0xff] }
0x156a   : > { %19524 = vmatprep.subr.bf16.mxu1 %v20717_v14  ;;  %19560 = vmatprep.subr.bf16.mxu0 %v20717_v14 }
0x162b   : > { %v8271_v27 = vpop.f32.mrb[92].mxu1  ;;  %v8364_v59 = vpop.f32.mrb[82].mxu0 }
0x162c   : > { %v24112_v16 = vmax.f32 %v8271_v27, %v8364_v59  ;;  %v8273_v60 = vpop.f32.mrb[93].mxu1  ;;  %v8366_v9 = vpop.f32.mrb[83].mxu0  ;;  %v19558_v27 = vpack.c.bf16 %v15640_v6, %v15639_v55  ;;  %v15641_v59 = vld [vmem:[%s26636_s5 + $0x118] sm:$0xff]  ;;  %v8967_v55 = vld [vmem:[%s26639_s8 + $0x60] sm:$0xff]  ;;  %v8968_v6 = vld [vmem:[%s26639_s8 + $0x68] sm:$0xff] }
0x162d   : > { %v15658_v60 = vld [vmem:[%s26639_s8 + $0x88] sm:$0xff] }
0x162e   : > { %v8395_v13 = vrot.slane %v24112_v16, 1  ;;  %v8551_v23 = vrot.slane %v24112_v16, 2  ;;  %v8721_v35 = vrot.slane %v24112_v16, 4  ;;  %v8636_v37 = vrot.slane %v24112_v16, 3 }
0x162f   : > { %v8276_v12 = vpop.f32.mrb[94].mxu1  ;;  %v8369_v30 = vpop.f32.mrb[84].mxu0 }
0x1630   : > { %v8374_v31 = vmax.f32 %v8276_v12, %v8369_v30  ;;  %v8278_v32 = vpop.f32.mrb[95].mxu1  ;;  %v8371_v20 = vpop.f32.mrb[85].mxu0  ;;  %v15662_v12 = vld [vmem:[%s26639_s8 + $0xa8] sm:$0xff] }
0x1631   : > { %v19603_v30 = vpack.c.bf16 %v15662_v12, %v15661_v3  ;;  %v15664_v32 = vld [vmem:[%s26639_s8 + $0xb8] sm:$0xff] }
0x1632   : > { %v8396_v38 = vrot.slane %v8374_v31, 1  ;;  %v8552_v39 = vrot.slane %v8374_v31, 2  ;;  %v8637_v40 = vrot.slane %v8374_v31, 3  ;;  %v8722_v41 = vrot.slane %v8374_v31, 4  ;;  %v15663_v31 = vld [vmem:[%s26639_s8 + $0xb0] sm:$0xff]  ;;  %v15672_v3 = vld [vmem:[%s26639_s8 + $0xf8] sm:$0xff] }
0x1633   : > { %v19606_v20 = vpack.c.bf16 %v15664_v32, %v15663_v31  ;;  %v15680_v31 = vld [vmem:[%s26632_s1 + $0x58] sm:$0xff] }
0x1634   : > { %v8397_v46 = vsel %vm538_vm3, %v8395_v13, %v8396_v38  ;;  %v8553_v47 = vsel %vm747_vm5, %v8551_v23, %v8552_v39  ;;  %v8723_v48 = vsel %vm553_vm0, %v8721_v35, %v8722_v41  ;;  %v24146_v51 = vsel %vm865_vm6, %v8636_v37, %v8637_v40  ;;  %v15667_v23 = vld [vmem:[%s26639_s8 + $0xd0] sm:$0xff]  ;;  %v15668_v35 = vld [vmem:[%s26639_s8 + $0xd8] sm:$0xff] }
0x1635   : > { %17665 = vmatmul.mubr.msk.f32.vlgmr.msra.gmra.mrb[96].mxu1 %vm1511_vm10, %v8397_v46  ;;  %17707 = vmatmul.mubr.msk.f32.vlgmr.msra.gmra.mrb[86].mxu0 %vm1511_vm10, %v8553_v47  ;;  %v19612_v37 = vpack.c.bf16 %v15668_v35, %v15667_v23  ;;  %v15682_v23 = vld [vmem:[%s26632_s1 + $0x68] sm:$0xff]  ;;  %v15684_v35 = vld [vmem:[%s26632_s1 + $0x78] sm:$0xf] }
0x1636   : > { %19526 = vmatpush3.bf16.msra.mxu1 %v19525_v33  ;;  %19562 = vmatpush3.bf16.msra.mxu0 %v19561_v34  ;;  %v15665_v33 = vld [vmem:[%s26639_s8 + $0xc0] sm:$0xff]  ;;  %v15666_v34 = vld [vmem:[%s26639_s8 + $0xc8] sm:$0xff] }
0x1637   : > { %19527 = vmatprep.subr.bf16.mxu1 %v20717_v14  ;;  %19563 = vmatprep.subr.bf16.mxu0 %v20717_v14  ;;  %v19609_v13 = vpack.c.bf16 %v15666_v34, %v15665_v33  ;;  %v15677_v34 = vld [vmem:[%s26632_s1 + $0x40] sm:$0xff] }
0x1638   : > { %17685 = vmatprep.mubr.msk.f32.mxu1 %vm20718_vm9, %v20715_v0  ;;  %17748 = vmatprep.mubr.msk.f32.mxu0 %vm20718_vm9, %v20715_v0 }
0x163a   : > { %19529 = vmatpush3.bf16.msra.mxu1 %v19528_v52  ;;  %19565 = vmatpush3.bf16.msra.mxu0 %v19564_v53  ;;  %v15653_v53 = vld [vmem:[%s26637_s6] ss:$0 sm:$0xff] }
0x163b   : > { %19530 = vmatprep.subr.bf16.mxu1 %v20717_v14  ;;  %19566 = vmatprep.subr.bf16.mxu0 %v20717_v14 }
0x163e   : > { %19532 = vmatpush3.bf16.msra.mxu1 %v19531_v62  ;;  %19568 = vmatpush3.bf16.msra.mxu0 %v19567_v4  ;;  %v8955_v62 = vld [vmem:[%s26639_s8] sm:$0xff]  ;;  %v8956_v4 = vld [vmem:[%s26639_s8 + $0x8] sm:$0xff] }
0x163f   : > { %19533 = vmatprep.subr.bf16.mxu1 %v20717_v14  ;;  %19569 = vmatprep.subr.bf16.mxu0 %v20717_v14  ;;  %v19573_v7 = vpack.c.bf16 %v8956_v4, %v8955_v62  ;;  %v9144_v62 = vld [vmem:[%s26632_s1 + $0x38] sm:$0xf] }
0x1642   : > { %19535 = vmatpush3.bf16.msra.mxu1 %v19534_v15  ;;  %19571 = vmatpush3.bf16.msra.mxu0 %v19570_v17  ;;  %v19576_v15 = vpack.c.bf16 %v8958_v10, %v8957_v8  ;;  %v8959_v17 = vld [vmem:[%s26639_s8 + $0x20] sm:$0xff]  ;;  %v24426_v8 = vld [vmem:[%s20894_s17 + $0xb8] sm:$0xf] }
0x1643   : > { %17683 = vmatprep.subr.mxu1 %v20715_v0  ;;  %17746 = vmatprep.subr.mxu0 %v20715_v0  ;;  %v19579_v21 = vpack.c.bf16 %v8960_v19, %v8959_v17  ;;  %v9143_v17 = vld [vmem:[%s26632_s1 + $0x30] sm:$0xf]  ;;  %v15696_v19 = vld [vmem:[%s26632_s1 + $0x88] sm:$0xff] }
0x1646   : > { %17684 = vmatpush3.msra.mxu1 %v8383_v22  ;;  %17747 = vmatpush3.msra.mxu0 %v15651_v24  ;;  %v8961_v22 = vld [vmem:[%s26639_s8 + $0x30] sm:$0xff]  ;;  %v8962_v24 = vld [vmem:[%s26639_s8 + $0x38] sm:$0xff] }
0x1647   : > { %17686 = vmatmul.mubr.msk.f32.vlgmr.msra.gmra.mrb[98].mxu1 %vm1511_vm10, %v24112_v16  ;;  %19548 = vmatprep.subr.bf16.mxu1 %v20717_v14  ;;  %v15657_v16 = vld [vmem:[%s26639_s8 + $0x80] sm:$0xff] }
0x1648   : > { %17749 = vmatmul.mubr.msk.f32.vlgmr.msra.gmra.mrb[88].mxu0 %vm1511_vm10, %v8723_v48  ;;  %19550 = vmatpush3.bf16.msra.mxu1 %v19549_v25  ;;  %v19597_v9 = vpack.c.bf16 %v15658_v60, %v15657_v16  ;;  %v19582_v25 = vpack.c.bf16 %v8962_v24, %v8961_v22  ;;  %v15670_v16 = vld [vmem:[%s26639_s8 + $0xe8] sm:$0xff]  ;;  %v9162_v24 = vrot.slane %v24426_v8, 1 }
0x1649   : > { %19551 = vmatprep.subr.bf16.mxu1 %v20717_v14  ;;  %17727 = vmatprep.mubr.msk.f32.mxu1 %vm20718_vm9, %v20715_v0 }
0x164a   : > { %19596 = vmatprep.subr.bf16.mxu0 %v20717_v14  ;;  %17828 = vmatprep.mubr.msk.f32.mxu0 %vm20718_vm9, %v20715_v0 }
0x164b   : > { %19598 = vmatpush3.bf16.msra.mxu0 %v19597_v9  ;;  %v8969_v9 = vld [vmem:[%s26639_s8 + $0x70] sm:$0xff] }
0x164c   : > { %19553 = vmatpush3.bf16.msra.mxu1 %v19552_v63  ;;  %19599 = vmatprep.subr.bf16.mxu0 %v20717_v14  ;;  %v19585_v63 = vpack.c.bf16 %v8964_v50, %v8963_v49  ;;  %v19594_v2 = vpack.c.bf16 %v8970_v28, %v8969_v9 }
0x164d   : > { %19554 = vmatprep.subr.bf16.mxu1 %v20717_v14 }
0x164f   : > { %19601 = vmatpush3.bf16.msra.mxu0 %v19600_v18  ;;  %v15671_v18 = vld [vmem:[%s26639_s8 + $0xf0] sm:$0xff] }
0x1650   : > { %19556 = vmatpush3.bf16.msra.mxu1 %v19555_v11  ;;  %19602 = vmatprep.subr.bf16.mxu0 %v20717_v14  ;;  %v19588_v11 = vpack.c.bf16 %v8966_v54, %v8965_v26  ;;  %v19618_v12 = vpack.c.bf16 %v15672_v3, %v15671_v18  ;;  %v15697_v26 = vld [vmem:[%s26632_s1 + $0x90] sm:$0xff]  ;;  %v15700_v54 = vld [vmem:[%s26632_s1 + $0xa8] sm:$0xff]  ;;  %v15708_v3 = vld [vmem:[%s26632_s1 + $0xc0] sm:$0xff] }
0x1651   : > { %19557 = vmatprep.subr.bf16.mxu1 %v20717_v14 }
0x1653   : > { %19604 = vmatpush3.bf16.msra.mxu0 %v19603_v30  ;;  %v15678_v30 = vld [vmem:[%s26632_s1 + $0x48] sm:$0xff] }
0x1654   : > { %19559 = vmatpush3.bf16.msra.mxu1 %v19558_v27  ;;  %19605 = vmatprep.subr.bf16.mxu0 %v20717_v14  ;;  %v19591_v27 = vpack.c.bf16 %v8968_v6, %v8967_v55  ;;  %v19620_v32 = vpack.c.bf16 %v15680_v31, %v15678_v30  ;;  %v15713_v30 = vld [vmem:[%s26632_s1 + $0xe8] sm:$0xff]  ;;  %v15715_v31 = vld [vmem:[%s26632_s1 + $0xf8] sm:$0xf] }
0x1655   : > { %17725 = vmatprep.subr.mxu1 %v20715_v0 }
0x1657   : > { %19607 = vmatpush3.bf16.msra.mxu0 %v19606_v20 }
0x1658   : > { %17726 = vmatpush3.msra.mxu1 %v15641_v59  ;;  %19608 = vmatprep.subr.bf16.mxu0 %v20717_v14  ;;  %v15669_v59 = vld [vmem:[%s26639_s8 + $0xe0] sm:$0xff] }
0x1659   : > { %17728 = vmatmul.mubr.msk.f32.vlgmr.msra.gmra.mrb[100].mxu1 %vm1511_vm10, %v24146_v51  ;;  %17751 = vmatprep.subr.mxu1 %v20715_v0  ;;  %v19615_v60 = vpack.c.bf16 %v15670_v16, %v15669_v59  ;;  %v15701_v59 = vld [vmem:[%s26632_s1 + $0xb0] sm:$0xf]  ;;  %v15709_v16 = vld [vmem:[%s26632_s1 + $0xc8] sm:$0xff] }
0x165a   : > { %17753 = vmatprep.mubr.msk.f32.mxu1 %vm20718_vm9, %v20715_v0 }
0x165b   : > { %19610 = vmatpush3.bf16.msra.mxu0 %v19609_v13  ;;  %v15679_v13 = vld [vmem:[%s26632_s1 + $0x50] sm:$0xff] }
0x165c   : > { %19611 = vmatprep.subr.bf16.mxu0 %v20717_v14 }
0x165f   : > { %19613 = vmatpush3.bf16.msra.mxu0 %v19612_v37 }
0x1660   : > { %19614 = vmatprep.subr.bf16.mxu0 %v20717_v14 }
0x1663   : > { %19616 = vmatpush3.bf16.msra.mxu0 %v19615_v60  ;;  %v15711_v60 = vld [vmem:[%s26632_s1 + $0xd8] sm:$0xff] }
0x1664   : > { %19617 = vmatprep.subr.bf16.mxu0 %v20717_v14  ;;  %v19650_v28 = vpack.c.bf16 %v15711_v60, %v15709_v16  ;;  %v15751_v16 = vld [vmem:[%s26635_s4 + $0xd8] sm:$0xff] }
0x1667   : > { %19619 = vmatpush3.bf16.msra.mxu0 %v19618_v12  ;;  %v15710_v12 = vld [vmem:[%s26632_s1 + $0xd0] sm:$0xff] }
0x1708   : > { %v8466_v38 = vpop.f32.mrb[96].mxu1  ;;  %v8622_v39 = vpop.f32.mrb[86].mxu0 }
0x1709   : > { %v17666_v40 = vpop.f32.mrb[97].mxu1  ;;  %v17708_v41 = vpop.f32.mrb[87].mxu0 }
0x171a   : > { %v8538_v42 = vpop.f32.mrb[98].mxu1 }
0x171b   : > { %v8539_v43 = vadd.f32 %v8538_v42, %v8466_v38  ;;  %v8792_v44 = vpop.f32.mrb[88].mxu0  ;;  %v17687_v45 = vpop.f32.mrb[99].mxu1  ;;  %v19622_v38 = vpack.c.bf16 %v15679_v13, %v15677_v34  ;;  %v19624_v42 = vpack.c.bf16 %v15684_v35, %v15682_v23  ;;  %v19654_v34 = vpack.c.bf16 %v15715_v31, %v15713_v30  ;;  %v15712_v13 = vld [vmem:[%s26632_s1 + $0xe0] sm:$0xff]  ;;  %v15714_v23 = vld [vmem:[%s26632_s1 + $0xf0] sm:$0xf]  ;;  %v15722_v35 = vld [vmem:[%s26632_s1 + $0x108] sm:$0xff] }
0x171c   : > { %v17750_v46 = vpop.f32.mrb[89].mxu0  ;;  %v24392_v45 = vld [vmem:[%s20894_s17 + $0xa8] sm:$0xff] }
0x171d   : > { %v8626_v47 = vadd.f32 %v8622_v39, %v8539_v43  ;;  %v15681_v39 = vld [vmem:[%s26632_s1 + $0x60] sm:$0xff]  ;;  %v15683_v43 = vld [vmem:[%s26632_s1 + $0x70] sm:$0xf]  ;;  %v9138_v46 = vld [vmem:[%s26632_s1 + $0x8] sm:$0xff]  ;;  %v9363_v18 = vrot.slane %v24392_v45, 2 }
0x172c   : > { %v8707_v48 = vpop.f32.mrb[100].mxu1 }
0x172d   : > { %v8711_v51 = vadd.f32 %v8707_v48, %v8626_v47  ;;  %v17729_v52 = vpop.f32.mrb[101].mxu1  ;;  %v9140_v47 = vld [vmem:[%s26632_s1 + $0x18] sm:$0xff]  ;;  %v19627_v48 = vpack.c.bf16 %v15683_v43, %v15681_v39  ;;  %v9367_v39 = vrot.slane %v24426_v8, 2 }
0x172e   : > { %v9158_v52 = vrot.slane %v24392_v45, 1 }
0x172f   : > { %v8796_v56 = vadd.f32 %v8792_v44, %v8711_v51  ;;  %v24389_v44 = vld [vmem:[%s20894_s17 + $0xa0] sm:$0xff] }
0x1730   : > { %v9157_v51 = vrot.slane %v24389_v44, 1  ;;  %v9478_v43 = vrot.slane %v24389_v44, 3 }
0x1731   : > { %v8804_v57 = vadd.f32 %v15653_v53, %v8796_v56  ;;  %v19630_v53 = vpack.c.bf16 %v9140_v47, %v9138_v46  ;;  %v9137_v56 = vld [vmem:[%s26632_s1] sm:$0xff]  ;;  %v9479_v46 = vrot.slane %v24392_v45, 3 }
0x1732   : > { %v9159_v4 = vsel %vm538_vm3, %v9157_v51, %v9158_v52  ;;  %v15721_v47 = vld [vmem:[%s26632_s1 + $0x100] sm:$0xff]  ;;  %v15726_v51 = vld [vmem:[%s26632_s1 + $0x128] sm:$0xff] }
0x1733   : > { %v8805_v58 = vmax.f32 %v8804_v57, 0.0  ;;  %v9139_v57 = vld [vmem:[%s26632_s1 + $0x10] sm:$0xff] }
0x1735   : > { %17752 = vmatpush3.msra.mxu1 %v8805_v58 }
0x1736   : > { %17754 = vmatmul.mubr.msk.f32.vlgmr.msra.gmra.mrb[102].mxu1 %vm1924_vm11, %v8806_v61  ;;  %17756 = vmatprep.subr.mxu1 %v20715_v0  ;;  %v9142_v61 = vld [vmem:[%s26632_s1 + $0x28] sm:$0xff] }
0x1737   : > { %17757 = vmatpush3.msra.mxu1 %v8805_v58  ;;  %17758 = vmatprep.mubr.msk.f32.mxu1 %vm20718_vm9, %v20715_v0  ;;  %v24412_v58 = vld [vmem:[%s20894_s17 + $0xb0] sm:$0xff]  ;;  %v19634_v10 = vpack.c.bf16 %v9144_v62, %v9142_v61  ;;  %v15725_v62 = vld [vmem:[%s26632_s1 + $0x120] sm:$0xff] }
0x1738   : > { %19572 = vmatprep.subr.bf16.mxu1 %v20717_v14 }
0x173a   : > { %17759 = vmatmul.mubr.msk.f32.vlgmr.msra.gmra.mrb[104].mxu1 %vm1924_vm11, %v15655_v5  ;;  %v19632_v5 = vpack.c.bf16 %v9139_v57, %v9137_v56  ;;  %v9481_v57 = vrot.slane %v24412_v58, 3 }
0x173b   : > { %19574 = vmatpush3.bf16.msra.mxu1 %v19573_v7  ;;  %17793 = vmatprep.mubr.msk.f32.mxu1 %vm20718_vm9, %v20715_v0  ;;  %v9160_v7 = vrot.slane %v24412_v58, 1 }
0x173c   : > { %19575 = vmatprep.subr.bf16.mxu1 %v20717_v14 }
0x173d   : > { %v9161_v22 = vsel %vm538_vm3, %v9158_v52, %v9160_v7  ;;  %v9163_v50 = vsel %vm538_vm3, %v9160_v7, %v9162_v24  ;;  %v15728_v52 = vld [vmem:[%s26632_s1 + $0x138] sm:$0xf]  ;;  %v9483_v7 = vrot.slane %v24426_v8, 3 }
0x173e   : > { %v19664_v61 = vpack.c.bf16 %v15728_v52, %v15726_v51 }
0x173f   : > { %19577 = vmatpush3.bf16.msra.mxu1 %v19576_v15  ;;  %v9141_v15 = vld [vmem:[%s26632_s1 + $0x20] sm:$0xff] }
0x1740   : > { %19578 = vmatprep.subr.bf16.mxu1 %v20717_v14 }
0x1743   : > { %19580 = vmatpush3.bf16.msra.mxu1 %v19579_v21  ;;  %v15698_v21 = vld [vmem:[%s26632_s1 + $0x98] sm:$0xff] }
0x1744   : > { %19581 = vmatprep.subr.bf16.mxu1 %v20717_v14  ;;  %v19640_v49 = vpack.c.bf16 %v15698_v21, %v15696_v19  ;;  %v9595_v19 = vrot.slane %v24392_v45, 4 }
0x1747   : > { %19583 = vmatpush3.bf16.msra.mxu1 %v19582_v25  ;;  %v19637_v25 = vpack.c.bf16 %v9143_v17, %v9141_v15  ;;  %v9484_v15 = vsel %vm865_vm6, %v9481_v57, %v9483_v7  ;;  %v9594_v17 = vrot.slane %v24389_v44, 4  ;;  %v9901_v7 = vld [vmem:[%s26635_s4 + $0x8] sm:$0xff] }
0x1748   : > { %19584 = vmatprep.subr.bf16.mxu1 %v20717_v14 }
0x1749   : > { %v9596_v21 = vsel %vm553_vm0, %v9594_v17, %v9595_v19  ;;  %v9902_v17 = vld [vmem:[%s26635_s4 + $0x10] sm:$0xff] }
0x174b   : > { %19586 = vmatpush3.bf16.msra.mxu1 %v19585_v63  ;;  %v15695_v63 = vld [vmem:[%s26632_s1 + $0x80] sm:$0xff] }
0x174c   : > { %19587 = vmatprep.subr.bf16.mxu1 %v20717_v14  ;;  %v19642_v55 = vpack.c.bf16 %v15697_v26, %v15695_v63  ;;  %v15746_v26 = vld [vmem:[%s26635_s4 + $0xb0] sm:$0xff] }
0x174f   : > { %19589 = vmatpush3.bf16.msra.mxu1 %v19588_v11  ;;  %v15702_v11 = vld [vmem:[%s26632_s1 + $0xb8] sm:$0xf] }
0x1750   : > { %19590 = vmatprep.subr.bf16.mxu1 %v20717_v14  ;;  %v19644_v6 = vpack.c.bf16 %v15702_v11, %v15700_v54  ;;  %v15747_v54 = vld [vmem:[%s26635_s4 + $0xb8] sm:$0xff] }
0x1751   : > { %v19712_v11 = vpack.c.bf16 %v15747_v54, %v15746_v26  ;;  %v9910_v26 = vld [vmem:[%s26635_s4 + $0x50] sm:$0xff]  ;;  %v9911_v54 = vld [vmem:[%s26635_s4 + $0x58] sm:$0xff] }
0x1753   : > { %19592 = vmatpush3.bf16.msra.mxu1 %v19591_v27  ;;  %v15699_v27 = vld [vmem:[%s26632_s1 + $0xa0] sm:$0xff] }
0x1754   : > { %19593 = vmatprep.subr.bf16.mxu1 %v20717_v14  ;;  %v19647_v9 = vpack.c.bf16 %v15701_v59, %v15699_v27  ;;  %v15750_v59 = vld [vmem:[%s26635_s4 + $0xd0] sm:$0xff] }
0x1755   : > { %v19718_v60 = vpack.c.bf16 %v15751_v16, %v15750_v59  ;;  %v15755_v16 = vld [vmem:[%s26635_s4 + $0xf8] sm:$0xff] }
0x1757   : > { %19595 = vmatpush3.bf16.msra.mxu1 %v19594_v2  ;;  %v9362_v2 = vrot.slane %v24389_v44, 2 }
0x1758   : > { %19621 = vmatprep.subr.bf16.mxu1 %v19620_v32 }
0x1759   : > { %v9364_v32 = vsel %vm747_vm5, %v9362_v2, %v9363_v18 }
0x1809   : > { %v8876_v20 = vpop.f32.mrb[102].mxu1 }
0x180a   : > { %v17755_v33 = vpop.f32.mrb[103].mxu1 }
0x180b   : > { %v9365_v33 = vrot.slane %v24412_v58, 2 }
0x180d   : > { %v8950_v37 = vpop.f32.mrb[104].mxu1 }
0x180e   : > { %v8954_v40 = vmax.f32 %v8876_v20, %v8950_v37  ;;  %v17760_v41 = vpop.f32.mrb[105].mxu1  ;;  %v19652_v20 = vpack.c.bf16 %v15710_v12, %v15708_v3  ;;  %v15724_v37 = vld [vmem:[%s26632_s1 + $0x118] sm:$0xff] }
0x180f   : > { %v19660_v41 = vpack.c.bf16 %v15724_v37, %v15722_v35 }
0x1810   : > { %17794 = vmatmul.mubr.f32.vlgmr.msra.gmra.mrb[106].mxu1 %v8954_v40  ;;  %17829 = vmatmul.mubr.f32.vlgmr.msra.gmra.mrb[90].mxu0 %v8954_v40  ;;  %v19657_v40 = vpack.c.bf16 %v15714_v23, %v15712_v13 }
0x1811   : > { %19623 = vmatpush1.bf16.msra.mxu1 %v19622_v38  ;;  %9240 = vmatprep.mubr.f32.mxu1 %v20715_v0  ;;  %v9366_v38 = vsel %vm747_vm5, %v9363_v18, %v9365_v33 }
0x1812   : > { %19626 = vmatprep.subr.msk.bf16.mxu1 %vm20887_vm2, %v19624_v42  ;;  %9798 = vmatprep.mubr.f32.mxu0 %v20715_v0  ;;  %v9368_v42 = vsel %vm747_vm5, %v9365_v33, %v9367_v39 }
0x1815   : > { %19629 = vmatpush1.bf16.msk.msra.mxu1 %vm20887_vm2, %v19627_v48  ;;  %v15723_v48 = vld [vmem:[%s26632_s1 + $0x110] sm:$0xff] }
0x1816   : > { %19631 = vmatprep.subr.bf16.mxu1 %v19630_v53  ;;  %v9480_v53 = vsel %vm865_vm6, %v9478_v43, %v9479_v46  ;;  %v19662_v56 = vpack.c.bf16 %v15723_v48, %v15721_v47 }
0x1818   : > { %15687 = vmatmul.mubr.msk.f32.vlgmr.msra.gmra.mrb[108].mxu1 %vm546_vm4, %v9159_v4  ;;  %v15727_v4 = vld [vmem:[%s26632_s1 + $0x130] sm:$0xf] }
0x1819   : > { %9246 = vmatprep.mubr.f32.mxu1 %v20715_v0  ;;  %19633 = vmatpush1.bf16.msra.mxu1 %v19632_v5  ;;  %v9482_v5 = vsel %vm865_vm6, %v9479_v46, %v9481_v57 }
0x181a   : > { %19636 = vmatprep.subr.msk.bf16.mxu1 %vm20887_vm2, %v19634_v10  ;;  %v19667_v10 = vpack.c.bf16 %v15727_v4, %v15725_v62  ;;  %v9726_v62 = vld [vmem:[%s26634_s3] sm:$0xff]  ;;  %v9727_v4 = vld [vmem:[%s26634_s3 + $0x8] sm:$0xf] }
0x181c   : > { %15688 = vmatmul.mubr.msk.f32.gmra.mrb[110].mxu1 %vm546_vm4, %v9161_v22  ;;  %v9597_v22 = vrot.slane %v24412_v58, 4 }
0x181d   : > { %9252 = vmatprep.mubr.f32.mxu1 %v20715_v0  ;;  %19639 = vmatpush1.bf16.msk.msra.mxu1 %vm20887_vm2, %v19637_v25  ;;  %v15743_v25 = vld [vmem:[%s26635_s4 + $0x98] sm:$0xff] }
0x181e   : > { %19641 = vmatprep.subr.bf16.mxu1 %v19640_v49  ;;  %v9598_v24 = vsel %vm553_vm0, %v9595_v19, %v9597_v22  ;;  %v9903_v19 = vld [vmem:[%s26635_s4 + $0x18] sm:$0xff] }
0x1820   : > { %15689 = vmatmul.mubr.msk.f32.gmra.mrb[112].mxu1 %vm546_vm4, %v9163_v50  ;;  %v15745_v50 = vld [vmem:[%s26635_s4 + $0xa8] sm:$0xff] }
0x1821   : > { %9335 = vmatprep.mubr.f32.mxu1 %v20715_v0 }
0x1824   : > { %15692 = vmatmul.mubr.msk.f32.vlgmr.msra.gmra.mrb[108].mxu1 %vm546_vm4, %v24389_v44  ;;  %v9599_v44 = vrot.slane %v24426_v8, 4  ;;  %v15744_v8 = vld [vmem:[%s26635_s4 + $0xa0] sm:$0xff] }
0x1825   : > { %9341 = vmatprep.mubr.f32.mxu1 %v20715_v0  ;;  %19643 = vmatpush1.bf16.msra.mxu1 %v19642_v55  ;;  %v19709_v63 = vpack.c.bf16 %v15745_v50, %v15744_v8  ;;  %v15748_v55 = vld [vmem:[%s26635_s4 + $0xc0] sm:$0xff]  ;;  %v9909_v50 = vld [vmem:[%s26635_s4 + $0x48] sm:$0xff] }
0x1826   : > { %19646 = vmatprep.subr.msk.bf16.mxu1 %vm20887_vm2, %v19644_v6  ;;  %v15749_v6 = vld [vmem:[%s26635_s4 + $0xc8] sm:$0xff]  ;;  %v9908_v8 = vld [vmem:[%s26635_s4 + $0x40] sm:$0xff] }
0x1827   : > { %v19715_v27 = vpack.c.bf16 %v15749_v6, %v15748_v55  ;;  %v9912_v55 = vld [vmem:[%s26635_s4 + $0x60] sm:$0xff]  ;;  %v9913_v6 = vld [vmem:[%s26635_s4 + $0x68] sm:$0xff] }
0x1828   : > { %15693 = vmatmul.mubr.msk.f32.gmra.mrb[110].mxu1 %vm546_vm4, %v24392_v45  ;;  %v9600_v45 = vsel %vm553_vm0, %v9597_v22, %v9599_v44  ;;  %v19682_v22 = vpack.c.bf16 %v9903_v19, %v9902_v17  ;;  %v9905_v44 = vld [vmem:[%s26635_s4 + $0x28] sm:$0xff]  ;;  %v19697_v59 = vpack.c.bf16 %v9913_v6, %v9912_v55  ;;  %v15767_v17 = vld [vmem:[%s26636_s5 + $0x70] sm:$0xff] }
0x1829   : > { %9347 = vmatprep.mubr.f32.mxu1 %v20715_v0  ;;  %19649 = vmatpush1.bf16.msk.msra.mxu1 %vm20887_vm2, %v19647_v9  ;;  %v15752_v9 = vld [vmem:[%s26635_s4 + $0xe0] sm:$0xff]  ;;  %v15777_v19 = vld [vmem:[%s26636_s5 + $0xb0] sm:$0xff] }
0x182a   : > { %19651 = vmatprep.subr.bf16.mxu1 %v19650_v28  ;;  %v15753_v28 = vld [vmem:[%s26635_s4 + $0xe8] sm:$0xff] }
0x182b   : > { %v19721_v2 = vpack.c.bf16 %v15753_v28, %v15752_v9  ;;  %v9914_v9 = vld [vmem:[%s26635_s4 + $0x70] sm:$0xff]  ;;  %v9915_v28 = vld [vmem:[%s26635_s4 + $0x78] sm:$0xff] }
0x182c   : > { %15694 = vmatmul.mubr.msk.f32.gmra.mrb[112].mxu1 %vm546_vm4, %v24412_v58  ;;  %v15742_v58 = vld [vmem:[%s26635_s4 + $0x90] sm:$0xff] }
0x182d   : > { %9445 = vmatprep.mubr.f32.mxu1 %v20715_v0  ;;  %v19706_v49 = vpack.c.bf16 %v15743_v25, %v15742_v58  ;;  %v9906_v58 = vld [vmem:[%s26635_s4 + $0x30] sm:$0xff]  ;;  %v9907_v25 = vld [vmem:[%s26635_s4 + $0x38] sm:$0xff] }
0x1830   : > { %15705 = vmatmul.mubr.msk.f32.vlgmr.msra.gmra.mrb[108].mxu1 %vm546_vm4, %v9364_v32  ;;  %v9702_v32 = vld [vmem:[%s26633_s2] sm:$0x3] }
0x1831   : > { %9451 = vmatprep.mubr.f32.mxu1 %v20715_v0  ;;  %19653 = vmatpush1.bf16.msra.mxu1 %v19652_v20  ;;  %v9707_v20 = vrot.slane %v9702_v32, %v21109_v36 }
0x1832   : > { %19656 = vmatprep.subr.msk.bf16.mxu1 %vm20887_vm2, %v19654_v34  ;;  %v9711_v34 = vrot.slane %v9702_v32, %v21114_v29  ;;  %v15758_v32 = vld [vmem:[%s26635_s4 + $0x110] sm:$0xff] }
0x1834   : > { %15706 = vmatmul.mubr.msk.f32.gmra.mrb[110].mxu1 %vm546_vm4, %v9366_v38 }
0x1835   : > { %9457 = vmatprep.mubr.f32.mxu1 %v20715_v0  ;;  %19659 = vmatpush1.bf16.msk.msra.mxu1 %vm20887_vm2, %v19657_v40 }
0x1836   : > { %19661 = vmatprep.subr.bf16.mxu1 %v19660_v41 }
0x1838   : > { %15707 = vmatmul.mubr.msk.f32.gmra.mrb[112].mxu1 %vm546_vm4, %v9368_v42 }
0x1839   : > { %9561 = vmatprep.mubr.f32.mxu1 %v20715_v0 }
0x183c   : > { %15718 = vmatmul.mubr.msk.f32.vlgmr.msra.gmra.mrb[108].mxu1 %vm546_vm4, %v9480_v53 }
0x183d   : > { %9567 = vmatprep.mubr.f32.mxu1 %v20715_v0  ;;  %19663 = vmatpush1.bf16.msra.mxu1 %v19662_v56 }
0x183e   : > { %19666 = vmatprep.subr.msk.bf16.mxu1 %vm20887_vm2, %v19664_v61 }
0x1840   : > { %15719 = vmatmul.mubr.msk.f32.gmra.mrb[110].mxu1 %vm546_vm4, %v9482_v5  ;;  %v9900_v5 = vld [vmem:[%s26635_s4] sm:$0xff] }
0x1841   : > { %9573 = vmatprep.mubr.f32.mxu1 %v20715_v0  ;;  %19669 = vmatpush1.bf16.msk.msra.mxu1 %vm20887_vm2, %v19667_v10  ;;  %v15736_v10 = vld [vmem:[%s26634_s3 + $0x10] sm:$0xff] }
0x1842   : > { %19705 = vmatprep.subr.bf16.mxu1 %v20717_v14 }
0x1844   : > { %15720 = vmatmul.mubr.msk.f32.gmra.mrb[112].mxu1 %vm546_vm4, %v9484_v15  ;;  %v19679_v15 = vpack.c.bf16 %v9901_v7, %v9900_v5 }
0x1845   : > { %9677 = vmatprep.mubr.f32.mxu1 %v20715_v0 }
0x1848   : > { %15731 = vmatmul.mubr.msk.f32.vlgmr.msra.gmra.mrb[108].mxu1 %vm546_vm4, %v9596_v21  ;;  %v15737_v21 = vld [vmem:[%s26634_s3 + $0x18] sm:$0xf] }
0x1849   : > { %9683 = vmatprep.mubr.f32.mxu1 %v20715_v0  ;;  %19707 = vmatpush1.bf16.msra.mxu1 %v19706_v49  ;;  %v19688_v49 = vpack.c.bf16 %v9907_v25, %v9906_v58  ;;  %v15779_v58 = vld [vmem:[%s26636_s5 + $0xc0] sm:$0xff] }
0x184a   : > { %19708 = vmatprep.subr.bf16.mxu1 %v20717_v14 }
0x184c   : > { %15732 = vmatmul.mubr.msk.f32.gmra.mrb[110].mxu1 %vm546_vm4, %v9598_v24  ;;  %v9904_v24 = vld [vmem:[%s26635_s4 + $0x20] sm:$0xff] }
0x184d   : > { %9689 = vmatprep.mubr.f32.mxu1 %v20715_v0  ;;  %19710 = vmatpush1.bf16.msra.mxu1 %v19709_v63  ;;  %v19691_v63 = vpack.c.bf16 %v9909_v50, %v9908_v8  ;;  %v15770_v50 = vld [vmem:[%s26636_s5 + $0x88] sm:$0xff] }
0x184e   : > { %19711 = vmatprep.subr.bf16.mxu1 %v20717_v14 }
0x1850   : > { %15733 = vmatmul.mubr.msk.f32.gmra.mrb[112].mxu1 %vm546_vm4, %v9600_v45  ;;  %v19685_v45 = vpack.c.bf16 %v9905_v44, %v9904_v24  ;;  %v15768_v44 = vld [vmem:[%s26636_s5 + $0x78] sm:$0xff] }
0x1851   : > { %19713 = vmatpush1.bf16.msra.mxu1 %v19712_v11  ;;  %v19694_v11 = vpack.c.bf16 %v9911_v54, %v9910_v26 }
0x1852   : > { %19714 = vmatprep.subr.bf16.mxu1 %v20717_v14 }
0x1855   : > { %19716 = vmatpush1.bf16.msra.mxu1 %v19715_v27  ;;  %v15754_v27 = vld [vmem:[%s26635_s4 + $0xf0] sm:$0xff] }
0x1856   : > { %19717 = vmatprep.subr.bf16.mxu1 %v20717_v14 }
0x1859   : > { %19719 = vmatpush1.bf16.msra.mxu1 %v19718_v60  ;;  %v19724_v60 = vpack.c.bf16 %v15755_v16, %v15754_v27  ;;  %v10094_v27 = vld [vmem:[%s26636_s5] sm:$0xff] }
0x185a   : > { %19720 = vmatprep.subr.bf16.mxu1 %v20717_v14  ;;  %v15793_v16 = vld [vmem:[%s26636_s5 + $0x120] sm:$0xff] }
0x185d   : > { %19722 = vmatpush1.bf16.msra.mxu1 %v19721_v2  ;;  %v15756_v2 = vld [vmem:[%s26635_s4 + $0x100] sm:$0xff] }
0x185e   : > { %19723 = vmatprep.subr.bf16.mxu1 %v20717_v14 }
0x1861   : > { %19725 = vmatpush1.bf16.msra.mxu1 %v19724_v60  ;;  %v15794_v60 = vld [vmem:[%s26636_s5 + $0x128] sm:$0xff] }
0x1862   : > { %19726 = vmatprep.subr.bf16.mxu1 %v20717_v14 }
0x18e3   : > { %v9037_v18 = vpop.f32.mrb[106].mxu1  ;;  %v9123_v3 = vpop.f32.mrb[90].mxu0 }
0x18e4   : > { %v9127_v12 = vmax.f32 %v9037_v18, %v9123_v3  ;;  %v17795_v30 = vpop.f32.mrb[107].mxu1  ;;  %v17830_v31 = vpop.f32.mrb[91].mxu0  ;;  %v19700_v18 = vpack.c.bf16 %v9915_v28, %v9914_v9  ;;  %v15757_v3 = vld [vmem:[%s26635_s4 + $0x108] sm:$0xff] }
0x18e5   : > { %v9916_v30 = vld [vmem:[%s26635_s4 + $0x80] sm:$0xff]  ;;  %v9917_v31 = vld [vmem:[%s26635_s4 + $0x88] sm:$0xff] }
0x18e6   : > { %9128 = vst.msk [vmem:[#allocation2 + $0x4] sm:$0x1] %vm2248_vm12, %v9127_v12 }
0x18e7   : > { %9129 = vst.msk [vmem:[#allocation2 + $0xb] sm:$0x2] %vm2250_vm13, %v9127_v12 }
0x18e8   : > { %9130 = vst.msk [vmem:[#allocation2 + $0x12] sm:$0x4] %vm2252_vm14, %v9127_v12 }
0x18e9   : > { %9131 = vst.msk [vmem:[#allocation2 + $0x19] sm:$0x8] %vm2254_vm15, %v9127_v12  ;;  %v19727_v12 = vpack.c.bf16 %v15757_v3, %v15756_v2 }
0x18eb   : > { %19728 = vmatpush1.bf16.msra.mxu1 %v19727_v12 }
0x18ec   : > { %19729 = vmatprep.subr.bf16.mxu1 %v20717_v14 }
0x191b   : > { %v9679_v33 = vpop.f32.mrb[108].mxu1 }
0x191c   : > { %v9681_v13 = vpop.f32.mrb[109].mxu1  ;;  %v9714_v23 = vadd.f32 %v9707_v20, %v9679_v33  ;;  %v15759_v33 = vld [vmem:[%s26635_s4 + $0x118] sm:$0xff] }
0x191d   : > { %v9715_v35 = vadd.f32 %v9711_v34, %v9681_v13 }
0x191e   : > { %v9720_v41 = vmax.f32 %v9714_v23, 0.0 }
0x191f   : > { %v9685_v37 = vpop.f32.mrb[110].mxu1  ;;  %v9721_v43 = vmax.f32 %v9715_v35, 0.0 }
0x1920   : > { %v9716_v38 = vadd.f32 %v9707_v20, %v9685_v37  ;;  %v9687_v39 = vpop.f32.mrb[111].mxu1 }
0x1921   : > { %v9717_v40 = vadd.f32 %v9711_v34, %v9687_v39  ;;  %v15763_v39 = vld [vmem:[%s26636_s5 + $0x50] sm:$0xff] }
0x1922   : > { %v9722_v42 = vmax.f32 %v9716_v38, 0.0  ;;  %v15762_v38 = vld [vmem:[%s26636_s5 + $0x48] sm:$0xff] }
0x1923   : > { %v9723_v46 = vmax.f32 %v9717_v40, 0.0  ;;  %v9691_v47 = vpop.f32.mrb[112].mxu1  ;;  %v15773_v40 = vld [vmem:[%s26636_s5 + $0x90] sm:$0xff] }
0x1924   : > { %v19672_v48 = vpack.c.bf16 %v9722_v42, %v9720_v41  ;;  %v9693_v51 = vpop.f32.mrb[113].mxu1  ;;  %v9718_v56 = vadd.f32 %v9707_v20, %v9691_v47  ;;  %v19703_v20 = vpack.c.bf16 %v9917_v31, %v9916_v30  ;;  %v15774_v41 = vld [vmem:[%s26636_s5 + $0x98] sm:$0xff]  ;;  %v19781_v30 = vpack.c.bf16 %v15794_v60, %v15793_v16  ;;  %v15811_v60 = vld [vmem:[%s26639_s8 + $0xa0] sm:$0xff] }
0x1925   : > { %v19670_v52 = vpack.c.bf16 %v9723_v46, %v9721_v43  ;;  %v9719_v53 = vadd.f32 %v9711_v34, %v9693_v51  ;;  %v19730_v34 = vpack.c.bf16 %v15759_v33, %v15758_v32  ;;  %v19757_v51 = vpack.c.bf16 %v15774_v41, %v15773_v40  ;;  %v15796_v40 = vld [vmem:[%s26636_s5 + $0x138] sm:$0xff] }
0x1926   : > { %v9724_v61 = vmax.f32 %v9718_v56, 0.0  ;;  %v15775_v56 = vld [vmem:[%s26636_s5 + $0xa0] sm:$0xff] }
0x1927   : > { %v9725_v57 = vmax.f32 %v9719_v53, 0.0  ;;  %19671 = vmatprep.subr.bf16.mxu0 %v19670_v52  ;;  %19731 = vmatpush1.bf16.msra.mxu1 %v19730_v34  ;;  %v15765_v53 = vld [vmem:[%s26636_s5 + $0x60] sm:$0xff] }
0x1928   : > { %19673 = vmatpush1.bf16.msra.mxu0 %v19672_v48  ;;  %19756 = vmatprep.subr.bf16.mxu1 %v20717_v14 }
0x1929   : > { %9738 = vmatprep.subr.mxu0 %v9725_v57 }
0x192c   : > { %9739 = vmatpush1.msra.mxu0 %v9724_v61 }
0x192d   : > { %15734 = vmatmul.mubr.msk.f32.vlgmr.msra.gmra.mrb[92].mxu0 %vm1117_vm7, %v9726_v62  ;;  %19675 = vmatprep.subr.bf16.mxu0 %v19670_v52  ;;  %v15764_v52 = vld [vmem:[%s26636_s5 + $0x58] sm:$0xff] }
0x192e   : > { %19677 = vmatpush1.bf16.msra.mxu0 %v19672_v48  ;;  %9804 = vmatprep.mubr.f32.mxu0 %v20715_v0  ;;  %v19733_v48 = vpack.c.bf16 %v15763_v39, %v15762_v38  ;;  %v19736_v7 = vpack.c.bf16 %v15765_v53, %v15764_v52  ;;  %v10097_v38 = vld [vmem:[%s26636_s5 + $0x18] sm:$0xff]  ;;  %v15795_v39 = vld [vmem:[%s26636_s5 + $0x130] sm:$0xff]  ;;  %v10099_v52 = vld [vmem:[%s26636_s5 + $0x28] sm:$0xff] }
0x192f   : > { %9823 = vmatprep.subr.mxu0 %v9725_v57  ;;  %v15776_v57 = vld [vmem:[%s26636_s5 + $0xa8] sm:$0xff]  ;;  %v15797_v53 = vld [vmem:[%s26636_s5 + $0x140] sm:$0xff] }
0x1931   : > { %15735 = vmatmul.mubr.msk.f32.gmra.mrb[94].mxu0 %vm1117_vm7, %v9727_v4 }
0x1932   : > { %9824 = vmatpush1.msra.mxu0 %v9724_v61  ;;  %9883 = vmatprep.mubr.f32.mxu0 %v20715_v0 }
0x1933   : > { %19678 = vmatprep.subr.bf16.mxu0 %v20717_v14 }
0x1935   : > { %15738 = vmatmul.mubr.msk.f32.vlgmr.msra.gmra.mrb[96].mxu0 %vm1117_vm7, %v15736_v10  ;;  %v19760_v10 = vpack.c.bf16 %v15776_v57, %v15775_v56  ;;  %v15798_v56 = vld [vmem:[%s26636_s5 + $0x148] sm:$0xff] }
0x1936   : > { %9889 = vmatprep.mubr.f32.mxu0 %v20715_v0  ;;  %19680 = vmatpush1.bf16.msra.mxu0 %v19679_v15  ;;  %v15766_v15 = vld [vmem:[%s26636_s5 + $0x68] sm:$0xff] }
0x1937   : > { %19681 = vmatprep.subr.bf16.mxu0 %v20717_v14 }
0x1939   : > { %15739 = vmatmul.mubr.msk.f32.gmra.mrb[98].mxu0 %vm1117_vm7, %v15737_v21  ;;  %v19739_v21 = vpack.c.bf16 %v15767_v17, %v15766_v15  ;;  %v15783_v17 = vld [vmem:[%s26636_s5 + $0xd8] sm:$0xff] }
0x193a   : > { %19683 = vmatpush1.bf16.msra.mxu0 %v19682_v22  ;;  %v15778_v22 = vld [vmem:[%s26636_s5 + $0xb8] sm:$0xff] }
0x193b   : > { %19684 = vmatprep.subr.bf16.mxu0 %v20717_v14  ;;  %v19763_v24 = vpack.c.bf16 %v15778_v22, %v15777_v19  ;;  %v15784_v19 = vld [vmem:[%s26636_s5 + $0xe0] sm:$0xff] }
0x193c   : > { %v15801_v22 = vld [vmem:[%s26636_s5 + $0x160] sm:$0xff] }
0x193e   : > { %19686 = vmatpush1.bf16.msra.mxu0 %v19685_v45  ;;  %v15769_v45 = vld [vmem:[%s26636_s5 + $0x80] sm:$0xff] }
0x193f   : > { %19687 = vmatprep.subr.bf16.mxu0 %v20717_v14  ;;  %v19742_v25 = vpack.c.bf16 %v15769_v45, %v15768_v44  ;;  %v15785_v44 = vld [vmem:[%s26636_s5 + $0xe8] sm:$0xff]  ;;  %v15786_v45 = vld [vmem:[%s26636_s5 + $0xf0] sm:$0xff] }
0x1942   : > { %19689 = vmatpush1.bf16.msra.mxu0 %v19688_v49  ;;  %v15780_v49 = vld [vmem:[%s26636_s5 + $0xc8] sm:$0xff] }
0x1943   : > { %19690 = vmatprep.subr.bf16.mxu0 %v20717_v14  ;;  %v19766_v8 = vpack.c.bf16 %v15780_v49, %v15779_v58  ;;  %v19772_v58 = vpack.c.bf16 %v15786_v45, %v15785_v44  ;;  %v15788_v49 = vld [vmem:[%s26636_s5 + $0x100] sm:$0xff]  ;;  %v10683_v45 = vld [vmem:[%s26639_s8 + $0x48] sm:$0xff] }
0x1944   : > { %v10682_v44 = vld [vmem:[%s26639_s8 + $0x40] sm:$0xff] }
0x1946   : > { %19692 = vmatpush1.bf16.msra.mxu0 %v19691_v63  ;;  %v15781_v63 = vld [vmem:[%s26636_s5 + $0xd0] sm:$0xff] }
0x1947   : > { %19693 = vmatprep.subr.bf16.mxu0 %v20717_v14 }
0x194a   : > { %19695 = vmatpush1.bf16.msra.mxu0 %v19694_v11 }
0x194b   : > { %19696 = vmatprep.subr.bf16.mxu0 %v20717_v14 }
0x194e   : > { %19698 = vmatpush1.bf16.msra.mxu0 %v19697_v59  ;;  %v10095_v59 = vld [vmem:[%s26636_s5 + $0x8] sm:$0xff] }
0x194f   : > { %19699 = vmatprep.subr.bf16.mxu0 %v20717_v14  ;;  %v19745_v12 = vpack.c.bf16 %v10095_v59, %v10094_v27  ;;  %v15809_v27 = vld [vmem:[%s26639_s8 + $0x90] sm:$0xff]  ;;  %v15810_v59 = vld [vmem:[%s26639_s8 + $0x98] sm:$0xff] }
0x1950   : > { %v19820_v16 = vpack.c.bf16 %v15810_v59, %v15809_v27  ;;  %v10689_v27 = vld [vmem:[%s26639_s8 + $0x78] sm:$0xff] }
0x1952   : > { %19701 = vmatpush1.bf16.msra.mxu0 %v19700_v18 }
0x1953   : > { %19702 = vmatprep.subr.bf16.mxu0 %v20717_v14 }
0x1956   : > { %19704 = vmatpush1.bf16.msra.mxu0 %v19703_v20 }
0x1957   : > { %19732 = vmatprep.subr.bf16.mxu0 %v20717_v14 }
0x1a00   : > { %v9800_v13 = vpop.f32.mrb[92].mxu0 }
0x1a01   : > { %v9802_v23 = vpop.f32.mrb[93].mxu0 }
0x1a04   : > { %v9806_v35 = vpop.f32.mrb[94].mxu0 }
0x1a05   : > { %v9808_v37 = vpop.f32.mrb[95].mxu0 }
0x1a08   : > { %v9885_v42 = vpop.f32.mrb[96].mxu0 }
0x1a09   : > { %v9896_v43 = vmax.f32 %v9800_v13, %v9885_v42  ;;  %v9887_v46 = vpop.f32.mrb[97].mxu0 }
0x1a0a   : > { %v9897_v47 = vmax.f32 %v9802_v23, %v9887_v46 }
0x1a0c   : > { %v9891_v61 = vpop.f32.mrb[98].mxu0  ;;  %15740 = vmatprep.mubr.msk.f32.mxu0 %vm1309_vm8, %v9897_v47  ;;  %15760 = vmatprep.mubr.msk.f32.mxu1 %vm1309_vm8, %v9897_v47 }
0x1a0d   : > { %v9898_v62 = vmax.f32 %v9806_v35, %v9891_v61  ;;  %v9893_v4 = vpop.f32.mrb[99].mxu0  ;;  %9989 = vmatmul.mubr.f32.vlgmr.msra.gmra.mrb[100].mxu0 %v9896_v43  ;;  %10082 = vmatmul.mubr.f32.vlgmr.msra.gmra.mrb[114].mxu1 %v9896_v43  ;;  %v19787_v61 = vpack.c.bf16 %v15798_v56, %v15797_v53  ;;  %v10525_v56 = vld [vmem:[%s26638_s7] sm:$0xf] }
0x1a0e   : > { %v9899_v5 = vmax.f32 %v9808_v37, %v9893_v4  ;;  %19734 = vmatpush3.bf16.msra.mxu0 %v19733_v48  ;;  %19758 = vmatpush3.bf16.msra.mxu1 %v19757_v51  ;;  %v10096_v37 = vld [vmem:[%s26636_s5 + $0x10] sm:$0xff]  ;;  %v19784_v48 = vpack.c.bf16 %v15796_v40, %v15795_v39  ;;  %v10098_v51 = vld [vmem:[%s26636_s5 + $0x20] sm:$0xff]  ;;  %v10101_v4 = vld [vmem:[%s26636_s5 + $0x38] sm:$0xff] }
0x1a0f   : > { %19735 = vmatprep.subr.bf16.mxu0 %v20717_v14  ;;  %19759 = vmatprep.subr.bf16.mxu1 %v20717_v14  ;;  %v19748_v47 = vpack.c.bf16 %v10097_v38, %v10096_v37  ;;  %v19751_v57 = vpack.c.bf16 %v10099_v52, %v10098_v51 }
0x1a10   : > { %15741 = vmatprep.mubr.msk.f32.mxu0 %vm1309_vm8, %v9899_v5  ;;  %15761 = vmatprep.mubr.msk.f32.mxu1 %vm1309_vm8, %v9899_v5  ;;  %v15799_v5 = vld [vmem:[%s26636_s5 + $0x150] sm:$0xff] }
0x1a11   : > { %9994 = vmatmul.mubr.f32.gmra.mrb[102].mxu0 %v9898_v62  ;;  %10087 = vmatmul.mubr.f32.gmra.mrb[116].mxu1 %v9898_v62  ;;  %v10100_v62 = vld [vmem:[%s26636_s5 + $0x30] sm:$0xff] }
0x1a12   : > { %19737 = vmatpush3.bf16.msra.mxu0 %v19736_v7  ;;  %19761 = vmatpush3.bf16.msra.mxu1 %v19760_v10  ;;  %v15800_v7 = vld [vmem:[%s26636_s5 + $0x158] sm:$0xff]  ;;  %v19754_v10 = vpack.c.bf16 %v10101_v4, %v10100_v62  ;;  %v15805_v62 = vld [vmem:[%s26638_s7 + $0x4] sm:$0xf] }
0x1a13   : > { %19738 = vmatprep.subr.bf16.mxu0 %v20717_v14  ;;  %19762 = vmatprep.subr.bf16.mxu1 %v20717_v14  ;;  %v19790_v15 = vpack.c.bf16 %v15800_v7, %v15799_v5  ;;  %v10676_v5 = vld [vmem:[%s26639_s8 + $0x10] sm:$0xff]  ;;  %v10677_v7 = vld [vmem:[%s26639_s8 + $0x18] sm:$0xff] }
0x1a14   : > { %17849 = vmatprep.mubr.msk.f32.mxu0 %vm20718_vm9, %v20715_v0  ;;  %17891 = vmatprep.mubr.msk.f32.mxu1 %vm20718_vm9, %v20715_v0 }
0x1a16   : > { %19740 = vmatpush3.bf16.msra.mxu0 %v19739_v21  ;;  %19764 = vmatpush3.bf16.msra.mxu1 %v19763_v24  ;;  %v10102_v21 = vld [vmem:[%s26636_s5 + $0x40] sm:$0xff]  ;;  %v19769_v24 = vpack.c.bf16 %v15784_v19, %v15783_v17  ;;  %v10679_v17 = vld [vmem:[%s26639_s8 + $0x28] sm:$0xff] }
0x1a17   : > { %19741 = vmatprep.subr.bf16.mxu0 %v20717_v14  ;;  %19765 = vmatprep.subr.bf16.mxu1 %v20717_v14 }
0x1a1a   : > { %19743 = vmatpush3.bf16.msra.mxu0 %v19742_v25  ;;  %19767 = vmatpush3.bf16.msra.mxu1 %v19766_v8  ;;  %v15787_v25 = vld [vmem:[%s26636_s5 + $0xf8] sm:$0xff] }
0x1a1b   : > { %17847 = vmatprep.subr.mxu0 %v20715_v0  ;;  %17889 = vmatprep.subr.mxu1 %v20715_v0  ;;  %v19775_v8 = vpack.c.bf16 %v15788_v49, %v15787_v25  ;;  %v10684_v25 = vld [vmem:[%s26639_s8 + $0x50] sm:$0xff]  ;;  %v10685_v49 = vld [vmem:[%s26639_s8 + $0x58] sm:$0xff] }
0x1a1e   : > { %17848 = vmatpush3.msra.mxu0 %v15770_v50  ;;  %17890 = vmatpush3.msra.mxu1 %v15781_v63  ;;  %v15789_v50 = vld [vmem:[%s26636_s5 + $0x108] sm:$0xff]  ;;  %v15790_v63 = vld [vmem:[%s26636_s5 + $0x110] sm:$0xff] }
0x1a1f   : > { %19744 = vmatprep.subr.bf16.mxu0 %v20717_v14  ;;  %19780 = vmatprep.subr.bf16.mxu1 %v20717_v14 }
0x1ae0   : > { %v9990_v26 = vpop.f32.mrb[100].mxu0  ;;  %v10083_v54 = vpop.f32.mrb[114].mxu1 }
0x1ae1   : > { %v24806_v11 = vmax.f32 %v9990_v26, %v10083_v54  ;;  %v9992_v55 = vpop.f32.mrb[101].mxu0  ;;  %v10085_v6 = vpop.f32.mrb[115].mxu1  ;;  %v19778_v26 = vpack.c.bf16 %v15790_v63, %v15789_v50  ;;  %v15791_v54 = vld [vmem:[%s26636_s5 + $0x118] sm:$0xff]  ;;  %v10686_v50 = vld [vmem:[%s26639_s8 + $0x60] sm:$0xff]  ;;  %v10687_v63 = vld [vmem:[%s26639_s8 + $0x68] sm:$0xff] }
0x1ae2   : > { %v15808_v55 = vld [vmem:[%s26639_s8 + $0x88] sm:$0xff] }
0x1ae3   : > { %v10114_v31 = vrot.slane %v24806_v11, 1  ;;  %v10270_v32 = vrot.slane %v24806_v11, 2  ;;  %v10440_v20 = vrot.slane %v24806_v11, 4  ;;  %v10355_v33 = vrot.slane %v24806_v11, 3 }
0x1ae4   : > { %v9995_v9 = vpop.f32.mrb[102].mxu0  ;;  %v10088_v28 = vpop.f32.mrb[116].mxu1 }
0x1ae5   : > { %v10093_v2 = vmax.f32 %v9995_v9, %v10088_v28  ;;  %v9997_v18 = vpop.f32.mrb[103].mxu0  ;;  %v10090_v3 = vpop.f32.mrb[117].mxu1  ;;  %v15812_v9 = vld [vmem:[%s26639_s8 + $0xa8] sm:$0xff] }
0x1ae6   : > { %v19823_v28 = vpack.c.bf16 %v15812_v9, %v15811_v60  ;;  %v15814_v18 = vld [vmem:[%s26639_s8 + $0xb8] sm:$0xff] }
0x1ae7   : > { %v10115_v34 = vrot.slane %v10093_v2, 1  ;;  %v10271_v13 = vrot.slane %v10093_v2, 2  ;;  %v10356_v23 = vrot.slane %v10093_v2, 3  ;;  %v10441_v35 = vrot.slane %v10093_v2, 4  ;;  %v15813_v2 = vld [vmem:[%s26639_s8 + $0xb0] sm:$0xff]  ;;  %v15822_v60 = vld [vmem:[%s26639_s8 + $0xf8] sm:$0xff] }
0x1ae8   : > { %v19826_v3 = vpack.c.bf16 %v15814_v18, %v15813_v2  ;;  %v15830_v2 = vld [vmem:[%s26632_s1 + $0x58] sm:$0xff] }
0x1ae9   : > { %v10116_v41 = vsel %vm538_vm3, %v10114_v31, %v10115_v34  ;;  %v10272_v42 = vsel %vm747_vm5, %v10270_v32, %v10271_v13  ;;  %v10442_v43 = vsel %vm553_vm0, %v10440_v20, %v10441_v35  ;;  %v24840_v46 = vsel %vm865_vm6, %v10355_v33, %v10356_v23  ;;  %v15817_v32 = vld [vmem:[%s26639_s8 + $0xd0] sm:$0xff]  ;;  %v15818_v20 = vld [vmem:[%s26639_s8 + $0xd8] sm:$0xff] }
0x1aea   : > { %17850 = vmatmul.mubr.msk.f32.vlgmr.msra.gmra.mrb[104].mxu0 %vm1511_vm10, %v10116_v41  ;;  %17892 = vmatmul.mubr.msk.f32.vlgmr.msra.gmra.mrb[118].mxu1 %vm1511_vm10, %v10272_v42  ;;  %v19832_v33 = vpack.c.bf16 %v15818_v20, %v15817_v32  ;;  %v15832_v32 = vld [vmem:[%s26632_s1 + $0x68] sm:$0xff]  ;;  %v15834_v20 = vld [vmem:[%s26632_s1 + $0x78] sm:$0xf] }
0x1aeb   : > { %19746 = vmatpush3.bf16.msra.mxu0 %v19745_v12  ;;  %19782 = vmatpush3.bf16.msra.mxu1 %v19781_v30  ;;  %v15815_v12 = vld [vmem:[%s26639_s8 + $0xc0] sm:$0xff]  ;;  %v15816_v30 = vld [vmem:[%s26639_s8 + $0xc8] sm:$0xff] }
0x1aec   : > { %19747 = vmatprep.subr.bf16.mxu0 %v20717_v14  ;;  %19783 = vmatprep.subr.bf16.mxu1 %v20717_v14  ;;  %v19829_v31 = vpack.c.bf16 %v15816_v30, %v15815_v12  ;;  %v15827_v30 = vld [vmem:[%s26632_s1 + $0x40] sm:$0xff] }
0x1aed   : > { %17870 = vmatprep.mubr.msk.f32.mxu0 %vm20718_vm9, %v20715_v0  ;;  %17933 = vmatprep.mubr.msk.f32.mxu1 %vm20718_vm9, %v20715_v0 }
0x1aef   : > { %19749 = vmatpush3.bf16.msra.mxu0 %v19748_v47  ;;  %19785 = vmatpush3.bf16.msra.mxu1 %v19784_v48  ;;  %v15803_v48 = vld [vmem:[%s26637_s6] ss:$0 sm:$0xff] }
0x1af0   : > { %19750 = vmatprep.subr.bf16.mxu0 %v20717_v14  ;;  %19786 = vmatprep.subr.bf16.mxu1 %v20717_v14 }
0x1af3   : > { %19752 = vmatpush3.bf16.msra.mxu0 %v19751_v57  ;;  %19788 = vmatpush3.bf16.msra.mxu1 %v19787_v61  ;;  %v10674_v57 = vld [vmem:[%s26639_s8] sm:$0xff]  ;;  %v10675_v61 = vld [vmem:[%s26639_s8 + $0x8] sm:$0xff] }
0x1af4   : > { %19753 = vmatprep.subr.bf16.mxu0 %v20717_v14  ;;  %19789 = vmatprep.subr.bf16.mxu1 %v20717_v14  ;;  %v19793_v4 = vpack.c.bf16 %v10675_v61, %v10674_v57  ;;  %v10863_v57 = vld [vmem:[%s26632_s1 + $0x38] sm:$0xf] }
0x1af7   : > { %19755 = vmatpush3.bf16.msra.mxu0 %v19754_v10  ;;  %19791 = vmatpush3.bf16.msra.mxu1 %v19790_v15  ;;  %v19796_v10 = vpack.c.bf16 %v10677_v7, %v10676_v5  ;;  %v10678_v15 = vld [vmem:[%s26639_s8 + $0x20] sm:$0xff]  ;;  %v25120_v5 = vld [vmem:[%s20894_s17 + $0xd8] sm:$0xf] }
0x1af8   : > { %17868 = vmatprep.subr.mxu0 %v20715_v0  ;;  %17931 = vmatprep.subr.mxu1 %v20715_v0  ;;  %v19799_v19 = vpack.c.bf16 %v10679_v17, %v10678_v15  ;;  %v10862_v15 = vld [vmem:[%s26632_s1 + $0x30] sm:$0xf]  ;;  %v15846_v17 = vld [vmem:[%s26632_s1 + $0x88] sm:$0xff] }
0x1afb   : > { %17869 = vmatpush3.msra.mxu0 %v10102_v21  ;;  %17932 = vmatpush3.msra.mxu1 %v15801_v22  ;;  %v10680_v21 = vld [vmem:[%s26639_s8 + $0x30] sm:$0xff]  ;;  %v10681_v22 = vld [vmem:[%s26639_s8 + $0x38] sm:$0xff] }
0x1afc   : > { %17871 = vmatmul.mubr.msk.f32.vlgmr.msra.gmra.mrb[106].mxu0 %vm1511_vm10, %v24806_v11  ;;  %19768 = vmatprep.subr.bf16.mxu0 %v20717_v14  ;;  %v15807_v11 = vld [vmem:[%s26639_s8 + $0x80] sm:$0xff] }
0x1afd   : > { %17934 = vmatmul.mubr.msk.f32.vlgmr.msra.gmra.mrb[120].mxu1 %vm1511_vm10, %v10442_v43  ;;  %19770 = vmatpush3.bf16.msra.mxu0 %v19769_v24  ;;  %v19817_v6 = vpack.c.bf16 %v15808_v55, %v15807_v11  ;;  %v19802_v24 = vpack.c.bf16 %v10681_v22, %v10680_v21  ;;  %v15820_v11 = vld [vmem:[%s26639_s8 + $0xe8] sm:$0xff]  ;;  %v10881_v22 = vrot.slane %v25120_v5, 1 }
0x1afe   : > { %19771 = vmatprep.subr.bf16.mxu0 %v20717_v14  ;;  %17912 = vmatprep.mubr.msk.f32.mxu0 %vm20718_vm9, %v20715_v0 }
0x1aff   : > { %19816 = vmatprep.subr.bf16.mxu1 %v20717_v14  ;;  %18013 = vmatprep.mubr.msk.f32.mxu1 %vm20718_vm9, %v20715_v0 }
0x1b00   : > { %19818 = vmatpush3.bf16.msra.mxu1 %v19817_v6  ;;  %v10688_v6 = vld [vmem:[%s26639_s8 + $0x70] sm:$0xff] }
0x1b01   : > { %19773 = vmatpush3.bf16.msra.mxu0 %v19772_v58  ;;  %19819 = vmatprep.subr.bf16.mxu1 %v20717_v14  ;;  %v19805_v58 = vpack.c.bf16 %v10683_v45, %v10682_v44  ;;  %v19814_v59 = vpack.c.bf16 %v10689_v27, %v10688_v6 }
0x1b02   : > { %19774 = vmatprep.subr.bf16.mxu0 %v20717_v14 }
0x1b04   : > { %19821 = vmatpush3.bf16.msra.mxu1 %v19820_v16  ;;  %v15821_v16 = vld [vmem:[%s26639_s8 + $0xf0] sm:$0xff] }
0x1b05   : > { %19776 = vmatpush3.bf16.msra.mxu0 %v19775_v8  ;;  %19822 = vmatprep.subr.bf16.mxu1 %v20717_v14  ;;  %v19808_v8 = vpack.c.bf16 %v10685_v49, %v10684_v25  ;;  %v19838_v9 = vpack.c.bf16 %v15822_v60, %v15821_v16  ;;  %v15847_v25 = vld [vmem:[%s26632_s1 + $0x90] sm:$0xff]  ;;  %v15850_v49 = vld [vmem:[%s26632_s1 + $0xa8] sm:$0xff]  ;;  %v15858_v60 = vld [vmem:[%s26632_s1 + $0xc0] sm:$0xff] }
0x1b06   : > { %19777 = vmatprep.subr.bf16.mxu0 %v20717_v14 }
0x1b08   : > { %19824 = vmatpush3.bf16.msra.mxu1 %v19823_v28  ;;  %v15828_v28 = vld [vmem:[%s26632_s1 + $0x48] sm:$0xff] }
0x1b09   : > { %19779 = vmatpush3.bf16.msra.mxu0 %v19778_v26  ;;  %19825 = vmatprep.subr.bf16.mxu1 %v20717_v14  ;;  %v19811_v26 = vpack.c.bf16 %v10687_v63, %v10686_v50  ;;  %v19840_v18 = vpack.c.bf16 %v15830_v2, %v15828_v28  ;;  %v15863_v28 = vld [vmem:[%s26632_s1 + $0xe8] sm:$0xff]  ;;  %v15865_v2 = vld [vmem:[%s26632_s1 + $0xf8] sm:$0xf] }
0x1b0a   : > { %17910 = vmatprep.subr.mxu0 %v20715_v0 }
0x1b0c   : > { %19827 = vmatpush3.bf16.msra.mxu1 %v19826_v3 }
0x1b0d   : > { %17911 = vmatpush3.msra.mxu0 %v15791_v54  ;;  %19828 = vmatprep.subr.bf16.mxu1 %v20717_v14  ;;  %v15819_v54 = vld [vmem:[%s26639_s8 + $0xe0] sm:$0xff] }
0x1b0e   : > { %17913 = vmatmul.mubr.msk.f32.vlgmr.msra.gmra.mrb[108].mxu0 %vm1511_vm10, %v24840_v46  ;;  %17936 = vmatprep.subr.mxu0 %v20715_v0  ;;  %v19835_v55 = vpack.c.bf16 %v15820_v11, %v15819_v54  ;;  %v15851_v54 = vld [vmem:[%s26632_s1 + $0xb0] sm:$0xf]  ;;  %v15859_v11 = vld [vmem:[%s26632_s1 + $0xc8] sm:$0xff] }
0x1b0f   : > { %17938 = vmatprep.mubr.msk.f32.mxu0 %vm20718_vm9, %v20715_v0 }
0x1b10   : > { %19830 = vmatpush3.bf16.msra.mxu1 %v19829_v31  ;;  %v15829_v31 = vld [vmem:[%s26632_s1 + $0x50] sm:$0xff] }
0x1b11   : > { %19831 = vmatprep.subr.bf16.mxu1 %v20717_v14 }
0x1b14   : > { %19833 = vmatpush3.bf16.msra.mxu1 %v19832_v33 }
0x1b15   : > { %19834 = vmatprep.subr.bf16.mxu1 %v20717_v14 }
0x1b18   : > { %19836 = vmatpush3.bf16.msra.mxu1 %v19835_v55  ;;  %v15861_v55 = vld [vmem:[%s26632_s1 + $0xd8] sm:$0xff] }
0x1b19   : > { %19837 = vmatprep.subr.bf16.mxu1 %v20717_v14  ;;  %v19870_v27 = vpack.c.bf16 %v15861_v55, %v15859_v11  ;;  %v15901_v11 = vld [vmem:[%s26635_s4 + $0xd8] sm:$0xff] }
0x1b1c   : > { %19839 = vmatpush3.bf16.msra.mxu1 %v19838_v9  ;;  %v15860_v9 = vld [vmem:[%s26632_s1 + $0xd0] sm:$0xff] }
0x1bbd   : > { %v10185_v34 = vpop.f32.mrb[104].mxu0  ;;  %v10341_v13 = vpop.f32.mrb[118].mxu1 }
0x1bbe   : > { %v17851_v23 = vpop.f32.mrb[105].mxu0  ;;  %v17893_v35 = vpop.f32.mrb[119].mxu1 }
0x1bcf   : > { %v10257_v37 = vpop.f32.mrb[106].mxu0 }
0x1bd0   : > { %v10258_v38 = vadd.f32 %v10257_v37, %v10185_v34  ;;  %v10511_v39 = vpop.f32.mrb[120].mxu1  ;;  %v17872_v40 = vpop.f32.mrb[107].mxu0  ;;  %v19842_v34 = vpack.c.bf16 %v15829_v31, %v15827_v30  ;;  %v19844_v37 = vpack.c.bf16 %v15834_v20, %v15832_v32  ;;  %v19874_v30 = vpack.c.bf16 %v15865_v2, %v15863_v28  ;;  %v15862_v31 = vld [vmem:[%s26632_s1 + $0xe0] sm:$0xff]  ;;  %v15864_v32 = vld [vmem:[%s26632_s1 + $0xf0] sm:$0xf]  ;;  %v15872_v20 = vld [vmem:[%s26632_s1 + $0x108] sm:$0xff] }
0x1bd1   : > { %v17935_v41 = vpop.f32.mrb[121].mxu1  ;;  %v25086_v40 = vld [vmem:[%s20894_s17 + $0xc8] sm:$0xff] }
0x1bd2   : > { %v10345_v42 = vadd.f32 %v10341_v13, %v10258_v38  ;;  %v15831_v13 = vld [vmem:[%s26632_s1 + $0x60] sm:$0xff]  ;;  %v15833_v38 = vld [vmem:[%s26632_s1 + $0x70] sm:$0xf]  ;;  %v10857_v41 = vld [vmem:[%s26632_s1 + $0x8] sm:$0xff]  ;;  %v11082_v16 = vrot.slane %v25086_v40, 2 }
0x1be1   : > { %v10426_v43 = vpop.f32.mrb[108].mxu0 }
0x1be2   : > { %v10430_v46 = vadd.f32 %v10426_v43, %v10345_v42  ;;  %v17914_v47 = vpop.f32.mrb[109].mxu0  ;;  %v10859_v42 = vld [vmem:[%s26632_s1 + $0x18] sm:$0xff]  ;;  %v19847_v43 = vpack.c.bf16 %v15833_v38, %v15831_v13  ;;  %v11086_v13 = vrot.slane %v25120_v5, 2 }
0x1be3   : > { %v10877_v47 = vrot.slane %v25086_v40, 1 }
0x1be4   : > { %v10515_v51 = vadd.f32 %v10511_v39, %v10430_v46  ;;  %v25083_v39 = vld [vmem:[%s20894_s17 + $0xc0] sm:$0xff] }
0x1be5   : > { %v10876_v46 = vrot.slane %v25083_v39, 1  ;;  %v11197_v38 = vrot.slane %v25083_v39, 3 }
0x1be6   : > { %v10523_v52 = vadd.f32 %v15803_v48, %v10515_v51  ;;  %v19850_v48 = vpack.c.bf16 %v10859_v42, %v10857_v41  ;;  %v10856_v51 = vld [vmem:[%s26632_s1] sm:$0xff]  ;;  %v11198_v41 = vrot.slane %v25086_v40, 3 }
0x1be7   : > { %v10878_v61 = vsel %vm538_vm3, %v10876_v46, %v10877_v47  ;;  %v15871_v42 = vld [vmem:[%s26632_s1 + $0x100] sm:$0xff]  ;;  %v15876_v46 = vld [vmem:[%s26632_s1 + $0x128] sm:$0xff] }
0x1be8   : > { %v10524_v53 = vmax.f32 %v10523_v52, 0.0  ;;  %v10858_v52 = vld [vmem:[%s26632_s1 + $0x10] sm:$0xff] }
0x1bea   : > { %17937 = vmatpush3.msra.mxu0 %v10524_v53 }
0x1beb   : > { %17939 = vmatmul.mubr.msk.f32.vlgmr.msra.gmra.mrb[110].mxu0 %vm1924_vm11, %v10525_v56  ;;  %17941 = vmatprep.subr.mxu0 %v20715_v0  ;;  %v10861_v56 = vld [vmem:[%s26632_s1 + $0x28] sm:$0xff] }
0x1bec   : > { %17942 = vmatpush3.msra.mxu0 %v10524_v53  ;;  %17943 = vmatprep.mubr.msk.f32.mxu0 %vm20718_vm9, %v20715_v0  ;;  %v25106_v53 = vld [vmem:[%s20894_s17 + $0xd0] sm:$0xff]  ;;  %v19854_v7 = vpack.c.bf16 %v10863_v57, %v10861_v56  ;;  %v15875_v57 = vld [vmem:[%s26632_s1 + $0x120] sm:$0xff] }
0x1bed   : > { %19792 = vmatprep.subr.bf16.mxu0 %v20717_v14 }
0x1bef   : > { %17944 = vmatmul.mubr.msk.f32.vlgmr.msra.gmra.mrb[112].mxu0 %vm1924_vm11, %v15805_v62  ;;  %v19852_v62 = vpack.c.bf16 %v10858_v52, %v10856_v51  ;;  %v11200_v52 = vrot.slane %v25106_v53, 3 }
0x1bf0   : > { %19794 = vmatpush3.bf16.msra.mxu0 %v19793_v4  ;;  %17978 = vmatprep.mubr.msk.f32.mxu0 %vm20718_vm9, %v20715_v0  ;;  %v10879_v4 = vrot.slane %v25106_v53, 1 }
0x1bf1   : > { %19795 = vmatprep.subr.bf16.mxu0 %v20717_v14 }
0x1bf2   : > { %v10880_v21 = vsel %vm538_vm3, %v10877_v47, %v10879_v4  ;;  %v10882_v45 = vsel %vm538_vm3, %v10879_v4, %v10881_v22  ;;  %v15878_v47 = vld [vmem:[%s26632_s1 + $0x138] sm:$0xf]  ;;  %v11202_v4 = vrot.slane %v25120_v5, 3 }
0x1bf3   : > { %v19884_v56 = vpack.c.bf16 %v15878_v47, %v15876_v46 }
0x1bf4   : > { %19797 = vmatpush3.bf16.msra.mxu0 %v19796_v10  ;;  %v10860_v10 = vld [vmem:[%s26632_s1 + $0x20] sm:$0xff] }
0x1bf5   : > { %19798 = vmatprep.subr.bf16.mxu0 %v20717_v14 }
0x1bf8   : > { %19800 = vmatpush3.bf16.msra.mxu0 %v19799_v19  ;;  %v15848_v19 = vld [vmem:[%s26632_s1 + $0x98] sm:$0xff] }
0x1bf9   : > { %19801 = vmatprep.subr.bf16.mxu0 %v20717_v14  ;;  %v19860_v44 = vpack.c.bf16 %v15848_v19, %v15846_v17  ;;  %v11314_v17 = vrot.slane %v25086_v40, 4 }
0x1bfc   : > { %19803 = vmatpush3.bf16.msra.mxu0 %v19802_v24  ;;  %v19857_v24 = vpack.c.bf16 %v10862_v15, %v10860_v10  ;;  %v11203_v10 = vsel %vm865_vm6, %v11200_v52, %v11202_v4  ;;  %v11313_v15 = vrot.slane %v25083_v39, 4  ;;  %v11620_v4 = vld [vmem:[%s26635_s4 + $0x8] sm:$0xff] }
0x1bfd   : > { %19804 = vmatprep.subr.bf16.mxu0 %v20717_v14 }
0x1bfe   : > { %v11315_v19 = vsel %vm553_vm0, %v11313_v15, %v11314_v17  ;;  %v11621_v15 = vld [vmem:[%s26635_s4 + $0x10] sm:$0xff] }
0x1c00   : > { %19806 = vmatpush3.bf16.msra.mxu0 %v19805_v58  ;;  %v15845_v58 = vld [vmem:[%s26632_s1 + $0x80] sm:$0xff] }
0x1c01   : > { %19807 = vmatprep.subr.bf16.mxu0 %v20717_v14  ;;  %v19862_v50 = vpack.c.bf16 %v15847_v25, %v15845_v58  ;;  %v15896_v25 = vld [vmem:[%s26635_s4 + $0xb0] sm:$0xff] }
0x1c04   : > { %19809 = vmatpush3.bf16.msra.mxu0 %v19808_v8  ;;  %v15852_v8 = vld [vmem:[%s26632_s1 + $0xb8] sm:$0xf] }
0x1c05   : > { %19810 = vmatprep.subr.bf16.mxu0 %v20717_v14  ;;  %v19864_v63 = vpack.c.bf16 %v15852_v8, %v15850_v49  ;;  %v15897_v49 = vld [vmem:[%s26635_s4 + $0xb8] sm:$0xff] }
0x1c06   : > { %v19932_v8 = vpack.c.bf16 %v15897_v49, %v15896_v25  ;;  %v11629_v25 = vld [vmem:[%s26635_s4 + $0x50] sm:$0xff]  ;;  %v11630_v49 = vld [vmem:[%s26635_s4 + $0x58] sm:$0xff] }
0x1c08   : > { %19812 = vmatpush3.bf16.msra.mxu0 %v19811_v26  ;;  %v15849_v26 = vld [vmem:[%s26632_s1 + $0xa0] sm:$0xff] }
0x1c09   : > { %19813 = vmatprep.subr.bf16.mxu0 %v20717_v14  ;;  %v19867_v6 = vpack.c.bf16 %v15851_v54, %v15849_v26  ;;  %v15900_v54 = vld [vmem:[%s26635_s4 + $0xd0] sm:$0xff] }
0x1c0a   : > { %v19938_v55 = vpack.c.bf16 %v15901_v11, %v15900_v54  ;;  %v15905_v11 = vld [vmem:[%s26635_s4 + $0xf8] sm:$0xff] }
0x1c0c   : > { %19815 = vmatpush3.bf16.msra.mxu0 %v19814_v59  ;;  %v11081_v59 = vrot.slane %v25083_v39, 2 }
0x1c0d   : > { %19841 = vmatprep.subr.bf16.mxu0 %v19840_v18 }
0x1c0e   : > { %v11083_v18 = vsel %vm747_vm5, %v11081_v59, %v11082_v16 }
0x1cbe   : > { %v10595_v3 = vpop.f32.mrb[110].mxu0 }
0x1cbf   : > { %v17940_v12 = vpop.f32.mrb[111].mxu0 }
0x1cc0   : > { %v11084_v12 = vrot.slane %v25106_v53, 2 }
0x1cc2   : > { %v10669_v33 = vpop.f32.mrb[112].mxu0 }
0x1cc3   : > { %v10673_v23 = vmax.f32 %v10595_v3, %v10669_v33  ;;  %v17945_v35 = vpop.f32.mrb[113].mxu0  ;;  %v19872_v3 = vpack.c.bf16 %v15860_v9, %v15858_v60  ;;  %v15874_v33 = vld [vmem:[%s26632_s1 + $0x118] sm:$0xff] }
0x1cc4   : > { %v19880_v35 = vpack.c.bf16 %v15874_v33, %v15872_v20 }
0x1cc5   : > { %17979 = vmatmul.mubr.f32.vlgmr.msra.gmra.mrb[114].mxu0 %v10673_v23  ;;  %18014 = vmatmul.mubr.f32.vlgmr.msra.gmra.mrb[122].mxu1 %v10673_v23  ;;  %v19877_v23 = vpack.c.bf16 %v15864_v32, %v15862_v31 }
0x1cc6   : > { %19843 = vmatpush1.bf16.msra.mxu0 %v19842_v34  ;;  %10959 = vmatprep.mubr.f32.mxu0 %v20715_v0  ;;  %v11085_v34 = vsel %vm747_vm5, %v11082_v16, %v11084_v12 }
0x1cc7   : > { %19846 = vmatprep.subr.msk.bf16.mxu0 %vm20887_vm2, %v19844_v37  ;;  %11517 = vmatprep.mubr.f32.mxu1 %v20715_v0  ;;  %v11087_v37 = vsel %vm747_vm5, %v11084_v12, %v11086_v13 }
0x1cca   : > { %19849 = vmatpush1.bf16.msk.msra.mxu0 %vm20887_vm2, %v19847_v43  ;;  %v15873_v43 = vld [vmem:[%s26632_s1 + $0x110] sm:$0xff] }
0x1ccb   : > { %19851 = vmatprep.subr.bf16.mxu0 %v19850_v48  ;;  %v11199_v48 = vsel %vm865_vm6, %v11197_v38, %v11198_v41  ;;  %v19882_v51 = vpack.c.bf16 %v15873_v43, %v15871_v42 }
0x1ccd   : > { %15837 = vmatmul.mubr.msk.f32.vlgmr.msra.gmra.mrb[116].mxu0 %vm546_vm4, %v10878_v61  ;;  %v15877_v61 = vld [vmem:[%s26632_s1 + $0x130] sm:$0xf] }
0x1cce   : > { %10965 = vmatprep.mubr.f32.mxu0 %v20715_v0  ;;  %19853 = vmatpush1.bf16.msra.mxu0 %v19852_v62  ;;  %v11201_v62 = vsel %vm865_vm6, %v11198_v41, %v11200_v52 }
0x1ccf   : > { %19856 = vmatprep.subr.msk.bf16.mxu0 %vm20887_vm2, %v19854_v7  ;;  %v19887_v7 = vpack.c.bf16 %v15877_v61, %v15875_v57  ;;  %v11445_v57 = vld [vmem:[%s26634_s3] sm:$0xff]  ;;  %v11446_v61 = vld [vmem:[%s26634_s3 + $0x8] sm:$0xf] }
0x1cd1   : > { %15838 = vmatmul.mubr.msk.f32.gmra.mrb[118].mxu0 %vm546_vm4, %v10880_v21  ;;  %v11316_v21 = vrot.slane %v25106_v53, 4 }
0x1cd2   : > { %10971 = vmatprep.mubr.f32.mxu0 %v20715_v0  ;;  %19859 = vmatpush1.bf16.msk.msra.mxu0 %vm20887_vm2, %v19857_v24  ;;  %v15893_v24 = vld [vmem:[%s26635_s4 + $0x98] sm:$0xff] }
0x1cd3   : > { %19861 = vmatprep.subr.bf16.mxu0 %v19860_v44  ;;  %v11317_v22 = vsel %vm553_vm0, %v11314_v17, %v11316_v21  ;;  %v11622_v17 = vld [vmem:[%s26635_s4 + $0x18] sm:$0xff] }
0x1cd5   : > { %15839 = vmatmul.mubr.msk.f32.gmra.mrb[120].mxu0 %vm546_vm4, %v10882_v45  ;;  %v15895_v45 = vld [vmem:[%s26635_s4 + $0xa8] sm:$0xff] }
0x1cd6   : > { %11054 = vmatprep.mubr.f32.mxu0 %v20715_v0 }
0x1cd9   : > { %15842 = vmatmul.mubr.msk.f32.vlgmr.msra.gmra.mrb[116].mxu0 %vm546_vm4, %v25083_v39  ;;  %v11318_v39 = vrot.slane %v25120_v5, 4  ;;  %v15894_v5 = vld [vmem:[%s26635_s4 + $0xa0] sm:$0xff] }
0x1cda   : > { %11060 = vmatprep.mubr.f32.mxu0 %v20715_v0  ;;  %19863 = vmatpush1.bf16.msra.mxu0 %v19862_v50  ;;  %v19929_v58 = vpack.c.bf16 %v15895_v45, %v15894_v5  ;;  %v15898_v50 = vld [vmem:[%s26635_s4 + $0xc0] sm:$0xff]  ;;  %v11628_v45 = vld [vmem:[%s26635_s4 + $0x48] sm:$0xff] }
0x1cdb   : > { %19866 = vmatprep.subr.msk.bf16.mxu0 %vm20887_vm2, %v19864_v63  ;;  %v15899_v63 = vld [vmem:[%s26635_s4 + $0xc8] sm:$0xff]  ;;  %v11627_v5 = vld [vmem:[%s26635_s4 + $0x40] sm:$0xff] }
0x1cdc   : > { %v19935_v26 = vpack.c.bf16 %v15899_v63, %v15898_v50  ;;  %v11631_v50 = vld [vmem:[%s26635_s4 + $0x60] sm:$0xff]  ;;  %v11632_v63 = vld [vmem:[%s26635_s4 + $0x68] sm:$0xff] }
0x1cdd   : > { %15843 = vmatmul.mubr.msk.f32.gmra.mrb[118].mxu0 %vm546_vm4, %v25086_v40  ;;  %v11319_v40 = vsel %vm553_vm0, %v11316_v21, %v11318_v39  ;;  %v19902_v21 = vpack.c.bf16 %v11622_v17, %v11621_v15  ;;  %v11624_v39 = vld [vmem:[%s26635_s4 + $0x28] sm:$0xff]  ;;  %v19917_v54 = vpack.c.bf16 %v11632_v63, %v11631_v50  ;;  %v15917_v15 = vld [vmem:[%s26636_s5 + $0x70] sm:$0xff] }
0x1cde   : > { %11066 = vmatprep.mubr.f32.mxu0 %v20715_v0  ;;  %19869 = vmatpush1.bf16.msk.msra.mxu0 %vm20887_vm2, %v19867_v6  ;;  %v15902_v6 = vld [vmem:[%s26635_s4 + $0xe0] sm:$0xff]  ;;  %v15927_v17 = vld [vmem:[%s26636_s5 + $0xb0] sm:$0xff] }
0x1cdf   : > { %19871 = vmatprep.subr.bf16.mxu0 %v19870_v27  ;;  %v15903_v27 = vld [vmem:[%s26635_s4 + $0xe8] sm:$0xff] }
0x1ce0   : > { %v19941_v59 = vpack.c.bf16 %v15903_v27, %v15902_v6  ;;  %v11633_v6 = vld [vmem:[%s26635_s4 + $0x70] sm:$0xff]  ;;  %v11634_v27 = vld [vmem:[%s26635_s4 + $0x78] sm:$0xff] }
0x1ce1   : > { %15844 = vmatmul.mubr.msk.f32.gmra.mrb[120].mxu0 %vm546_vm4, %v25106_v53  ;;  %v15892_v53 = vld [vmem:[%s26635_s4 + $0x90] sm:$0xff] }
0x1ce2   : > { %11164 = vmatprep.mubr.f32.mxu0 %v20715_v0  ;;  %v19926_v44 = vpack.c.bf16 %v15893_v24, %v15892_v53  ;;  %v11625_v53 = vld [vmem:[%s26635_s4 + $0x30] sm:$0xff]  ;;  %v11626_v24 = vld [vmem:[%s26635_s4 + $0x38] sm:$0xff] }
0x1ce5   : > { %15855 = vmatmul.mubr.msk.f32.vlgmr.msra.gmra.mrb[116].mxu0 %vm546_vm4, %v11083_v18  ;;  %v11421_v18 = vld [vmem:[%s26633_s2] sm:$0x3] }
0x1ce6   : > { %11170 = vmatprep.mubr.f32.mxu0 %v20715_v0  ;;  %19873 = vmatpush1.bf16.msra.mxu0 %v19872_v3  ;;  %v11426_v3 = vrot.slane %v11421_v18, %v21109_v36 }
0x1ce7   : > { %19876 = vmatprep.subr.msk.bf16.mxu0 %vm20887_vm2, %v19874_v30  ;;  %v11430_v30 = vrot.slane %v11421_v18, %v21114_v29  ;;  %v15908_v18 = vld [vmem:[%s26635_s4 + $0x110] sm:$0xff] }
0x1ce9   : > { %15856 = vmatmul.mubr.msk.f32.gmra.mrb[118].mxu0 %vm546_vm4, %v11085_v34 }
0x1cea   : > { %11176 = vmatprep.mubr.f32.mxu0 %v20715_v0  ;;  %19879 = vmatpush1.bf16.msk.msra.mxu0 %vm20887_vm2, %v19877_v23 }
0x1ceb   : > { %19881 = vmatprep.subr.bf16.mxu0 %v19880_v35 }
0x1ced   : > { %15857 = vmatmul.mubr.msk.f32.gmra.mrb[120].mxu0 %vm546_vm4, %v11087_v37 }
0x1cee   : > { %11280 = vmatprep.mubr.f32.mxu0 %v20715_v0 }
0x1cf1   : > { %15868 = vmatmul.mubr.msk.f32.vlgmr.msra.gmra.mrb[116].mxu0 %vm546_vm4, %v11199_v48 }
0x1cf2   : > { %11286 = vmatprep.mubr.f32.mxu0 %v20715_v0  ;;  %19883 = vmatpush1.bf16.msra.mxu0 %v19882_v51 }
0x1cf3   : > { %19886 = vmatprep.subr.msk.bf16.mxu0 %vm20887_vm2, %v19884_v56 }
0x1cf5   : > { %15869 = vmatmul.mubr.msk.f32.gmra.mrb[118].mxu0 %vm546_vm4, %v11201_v62  ;;  %v11619_v62 = vld [vmem:[%s26635_s4] sm:$0xff] }
0x1cf6   : > { %11292 = vmatprep.mubr.f32.mxu0 %v20715_v0  ;;  %19889 = vmatpush1.bf16.msk.msra.mxu0 %vm20887_vm2, %v19887_v7  ;;  %v15886_v7 = vld [vmem:[%s26634_s3 + $0x10] sm:$0xff] }
0x1cf7   : > { %19925 = vmatprep.subr.bf16.mxu0 %v20717_v14 }
0x1cf9   : > { %15870 = vmatmul.mubr.msk.f32.gmra.mrb[120].mxu0 %vm546_vm4, %v11203_v10  ;;  %v19899_v10 = vpack.c.bf16 %v11620_v4, %v11619_v62 }
0x1cfa   : > { %11396 = vmatprep.mubr.f32.mxu0 %v20715_v0 }
0x1cfd   : > { %15881 = vmatmul.mubr.msk.f32.vlgmr.msra.gmra.mrb[116].mxu0 %vm546_vm4, %v11315_v19  ;;  %v15887_v19 = vld [vmem:[%s26634_s3 + $0x18] sm:$0xf] }
0x1cfe   : > { %11402 = vmatprep.mubr.f32.mxu0 %v20715_v0  ;;  %19927 = vmatpush1.bf16.msra.mxu0 %v19926_v44  ;;  %v19908_v44 = vpack.c.bf16 %v11626_v24, %v11625_v53  ;;  %v15929_v53 = vld [vmem:[%s26636_s5 + $0xc0] sm:$0xff] }
0x1cff   : > { %19928 = vmatprep.subr.bf16.mxu0 %v20717_v14 }
0x1d01   : > { %15882 = vmatmul.mubr.msk.f32.gmra.mrb[118].mxu0 %vm546_vm4, %v11317_v22  ;;  %v11623_v22 = vld [vmem:[%s26635_s4 + $0x20] sm:$0xff] }
0x1d02   : > { %11408 = vmatprep.mubr.f32.mxu0 %v20715_v0  ;;  %19930 = vmatpush1.bf16.msra.mxu0 %v19929_v58  ;;  %v19911_v58 = vpack.c.bf16 %v11628_v45, %v11627_v5  ;;  %v15920_v45 = vld [vmem:[%s26636_s5 + $0x88] sm:$0xff] }
0x1d03   : > { %19931 = vmatprep.subr.bf16.mxu0 %v20717_v14 }
0x1d05   : > { %15883 = vmatmul.mubr.msk.f32.gmra.mrb[120].mxu0 %vm546_vm4, %v11319_v40  ;;  %v19905_v40 = vpack.c.bf16 %v11624_v39, %v11623_v22  ;;  %v15918_v39 = vld [vmem:[%s26636_s5 + $0x78] sm:$0xff] }
0x1d06   : > { %19933 = vmatpush1.bf16.msra.mxu0 %v19932_v8  ;;  %v19914_v8 = vpack.c.bf16 %v11630_v49, %v11629_v25 }
0x1d07   : > { %19934 = vmatprep.subr.bf16.mxu0 %v20717_v14 }
0x1d0a   : > { %19936 = vmatpush1.bf16.msra.mxu0 %v19935_v26  ;;  %v15904_v26 = vld [vmem:[%s26635_s4 + $0xf0] sm:$0xff] }
0x1d0b   : > { %19937 = vmatprep.subr.bf16.mxu0 %v20717_v14 }
0x1d0e   : > { %19939 = vmatpush1.bf16.msra.mxu0 %v19938_v55  ;;  %v19944_v55 = vpack.c.bf16 %v15905_v11, %v15904_v26  ;;  %v11813_v26 = vld [vmem:[%s26636_s5] sm:$0xff] }
0x1d0f   : > { %19940 = vmatprep.subr.bf16.mxu0 %v20717_v14  ;;  %v15943_v11 = vld [vmem:[%s26636_s5 + $0x120] sm:$0xff] }
0x1d12   : > { %19942 = vmatpush1.bf16.msra.mxu0 %v19941_v59  ;;  %v15906_v59 = vld [vmem:[%s26635_s4 + $0x100] sm:$0xff] }
0x1d13   : > { %19943 = vmatprep.subr.bf16.mxu0 %v20717_v14 }
0x1d16   : > { %19945 = vmatpush1.bf16.msra.mxu0 %v19944_v55  ;;  %v15944_v55 = vld [vmem:[%s26636_s5 + $0x128] sm:$0xff] }
0x1d17   : > { %19946 = vmatprep.subr.bf16.mxu0 %v20717_v14 }
0x1d98   : > { %v10756_v16 = vpop.f32.mrb[114].mxu0  ;;  %v10842_v60 = vpop.f32.mrb[122].mxu1 }
0x1d99   : > { %v10846_v9 = vmax.f32 %v10756_v16, %v10842_v60  ;;  %v17980_v28 = vpop.f32.mrb[115].mxu0  ;;  %v18015_v2 = vpop.f32.mrb[123].mxu1  ;;  %v19920_v16 = vpack.c.bf16 %v11634_v27, %v11633_v6  ;;  %v15907_v60 = vld [vmem:[%s26635_s4 + $0x108] sm:$0xff] }
0x1d9a   : > { %v11635_v28 = vld [vmem:[%s26635_s4 + $0x80] sm:$0xff]  ;;  %v11636_v2 = vld [vmem:[%s26635_s4 + $0x88] sm:$0xff] }
0x1d9b   : > { %10847 = vst.msk [vmem:[#allocation2 + $0x5] sm:$0x1] %vm2248_vm12, %v10846_v9 }
0x1d9c   : > { %10848 = vst.msk [vmem:[#allocation2 + $0xc] sm:$0x2] %vm2250_vm13, %v10846_v9 }
0x1d9d   : > { %10849 = vst.msk [vmem:[#allocation2 + $0x13] sm:$0x4] %vm2252_vm14, %v10846_v9 }
0x1d9e   : > { %10850 = vst.msk [vmem:[#allocation2 + $0x1a] sm:$0x8] %vm2254_vm15, %v10846_v9  ;;  %v19947_v9 = vpack.c.bf16 %v15907_v60, %v15906_v59 }
0x1da0   : > { %19948 = vmatpush1.bf16.msra.mxu0 %v19947_v9 }
0x1da1   : > { %19949 = vmatprep.subr.bf16.mxu0 %v20717_v14 }
0x1dd0   : > { %v11398_v12 = vpop.f32.mrb[116].mxu0 }
0x1dd1   : > { %v11400_v31 = vpop.f32.mrb[117].mxu0  ;;  %v11433_v32 = vadd.f32 %v11426_v3, %v11398_v12  ;;  %v15909_v12 = vld [vmem:[%s26635_s4 + $0x118] sm:$0xff] }
0x1dd2   : > { %v11434_v20 = vadd.f32 %v11430_v30, %v11400_v31 }
0x1dd3   : > { %v11439_v35 = vmax.f32 %v11433_v32, 0.0 }
0x1dd4   : > { %v11404_v33 = vpop.f32.mrb[118].mxu0  ;;  %v11440_v38 = vmax.f32 %v11434_v20, 0.0 }
0x1dd5   : > { %v11435_v34 = vadd.f32 %v11426_v3, %v11404_v33  ;;  %v11406_v13 = vpop.f32.mrb[119].mxu0 }
0x1dd6   : > { %v11436_v23 = vadd.f32 %v11430_v30, %v11406_v13  ;;  %v15913_v13 = vld [vmem:[%s26636_s5 + $0x50] sm:$0xff] }
0x1dd7   : > { %v11441_v37 = vmax.f32 %v11435_v34, 0.0  ;;  %v15912_v34 = vld [vmem:[%s26636_s5 + $0x48] sm:$0xff] }
0x1dd8   : > { %v11442_v41 = vmax.f32 %v11436_v23, 0.0  ;;  %v11410_v42 = vpop.f32.mrb[120].mxu0  ;;  %v15923_v23 = vld [vmem:[%s26636_s5 + $0x90] sm:$0xff] }
0x1dd9   : > { %v19892_v43 = vpack.c.bf16 %v11441_v37, %v11439_v35  ;;  %v11412_v46 = vpop.f32.mrb[121].mxu0  ;;  %v11437_v51 = vadd.f32 %v11426_v3, %v11410_v42  ;;  %v19923_v3 = vpack.c.bf16 %v11636_v2, %v11635_v28  ;;  %v15924_v35 = vld [vmem:[%s26636_s5 + $0x98] sm:$0xff]  ;;  %v20001_v28 = vpack.c.bf16 %v15944_v55, %v15943_v11  ;;  %v15961_v55 = vld [vmem:[%s26639_s8 + $0xa0] sm:$0xff] }
0x1dda   : > { %v19890_v47 = vpack.c.bf16 %v11442_v41, %v11440_v38  ;;  %v11438_v48 = vadd.f32 %v11430_v30, %v11412_v46  ;;  %v19950_v30 = vpack.c.bf16 %v15909_v12, %v15908_v18  ;;  %v19977_v46 = vpack.c.bf16 %v15924_v35, %v15923_v23  ;;  %v15946_v23 = vld [vmem:[%s26636_s5 + $0x138] sm:$0xff] }
0x1ddb   : > { %v11443_v56 = vmax.f32 %v11437_v51, 0.0  ;;  %v15925_v51 = vld [vmem:[%s26636_s5 + $0xa0] sm:$0xff] }
0x1ddc   : > { %v11444_v52 = vmax.f32 %v11438_v48, 0.0  ;;  %19891 = vmatprep.subr.bf16.mxu1 %v19890_v47  ;;  %19951 = vmatpush1.bf16.msra.mxu0 %v19950_v30  ;;  %v15915_v48 = vld [vmem:[%s26636_s5 + $0x60] sm:$0xff] }
0x1ddd   : > { %19893 = vmatpush1.bf16.msra.mxu1 %v19892_v43  ;;  %19976 = vmatprep.subr.bf16.mxu0 %v20717_v14 }
0x1dde   : > { %11457 = vmatprep.subr.mxu1 %v11444_v52 }
0x1de1   : > { %11458 = vmatpush1.msra.mxu1 %v11443_v56 }
0x1de2   : > { %15884 = vmatmul.mubr.msk.f32.vlgmr.msra.gmra.mrb[124].mxu1 %vm1117_vm7, %v11445_v57  ;;  %19895 = vmatprep.subr.bf16.mxu1 %v19890_v47  ;;  %v15914_v47 = vld [vmem:[%s26636_s5 + $0x58] sm:$0xff] }
0x1de3   : > { %19897 = vmatpush1.bf16.msra.mxu1 %v19892_v43  ;;  %11523 = vmatprep.mubr.f32.mxu1 %v20715_v0  ;;  %v19953_v43 = vpack.c.bf16 %v15913_v13, %v15912_v34  ;;  %v19956_v4 = vpack.c.bf16 %v15915_v48, %v15914_v47  ;;  %v11816_v34 = vld [vmem:[%s26636_s5 + $0x18] sm:$0xff]  ;;  %v15945_v13 = vld [vmem:[%s26636_s5 + $0x130] sm:$0xff]  ;;  %v11818_v47 = vld [vmem:[%s26636_s5 + $0x28] sm:$0xff] }
0x1de4   : > { %11542 = vmatprep.subr.mxu1 %v11444_v52  ;;  %v15926_v52 = vld [vmem:[%s26636_s5 + $0xa8] sm:$0xff]  ;;  %v15947_v48 = vld [vmem:[%s26636_s5 + $0x140] sm:$0xff] }
0x1de6   : > { %15885 = vmatmul.mubr.msk.f32.gmra.mrb[126].mxu1 %vm1117_vm7, %v11446_v61 }
0x1de7   : > { %11543 = vmatpush1.msra.mxu1 %v11443_v56  ;;  %11602 = vmatprep.mubr.f32.mxu1 %v20715_v0 }
0x1de8   : > { %19898 = vmatprep.subr.bf16.mxu1 %v20717_v14 }
0x1dea   : > { %15888 = vmatmul.mubr.msk.f32.vlgmr.msra.gmra.mrb[128].mxu1 %vm1117_vm7, %v15886_v7  ;;  %v19980_v7 = vpack.c.bf16 %v15926_v52, %v15925_v51  ;;  %v15948_v51 = vld [vmem:[%s26636_s5 + $0x148] sm:$0xff] }
0x1deb   : > { %11608 = vmatprep.mubr.f32.mxu1 %v20715_v0  ;;  %19900 = vmatpush1.bf16.msra.mxu1 %v19899_v10  ;;  %v15916_v10 = vld [vmem:[%s26636_s5 + $0x68] sm:$0xff] }
0x1dec   : > { %19901 = vmatprep.subr.bf16.mxu1 %v20717_v14 }
0x1dee   : > { %15889 = vmatmul.mubr.msk.f32.gmra.mrb[130].mxu1 %vm1117_vm7, %v15887_v19  ;;  %v19959_v19 = vpack.c.bf16 %v15917_v15, %v15916_v10  ;;  %v15933_v15 = vld [vmem:[%s26636_s5 + $0xd8] sm:$0xff] }
0x1def   : > { %19903 = vmatpush1.bf16.msra.mxu1 %v19902_v21  ;;  %v15928_v21 = vld [vmem:[%s26636_s5 + $0xb8] sm:$0xff] }
0x1df0   : > { %19904 = vmatprep.subr.bf16.mxu1 %v20717_v14  ;;  %v19983_v22 = vpack.c.bf16 %v15928_v21, %v15927_v17  ;;  %v15934_v17 = vld [vmem:[%s26636_s5 + $0xe0] sm:$0xff] }
0x1df1   : > { %v15951_v21 = vld [vmem:[%s26636_s5 + $0x160] sm:$0xff] }
0x1df3   : > { %19906 = vmatpush1.bf16.msra.mxu1 %v19905_v40  ;;  %v15919_v40 = vld [vmem:[%s26636_s5 + $0x80] sm:$0xff] }
0x1df4   : > { %19907 = vmatprep.subr.bf16.mxu1 %v20717_v14  ;;  %v19962_v24 = vpack.c.bf16 %v15919_v40, %v15918_v39  ;;  %v15935_v39 = vld [vmem:[%s26636_s5 + $0xe8] sm:$0xff]  ;;  %v15936_v40 = vld [vmem:[%s26636_s5 + $0xf0] sm:$0xff] }
0x1df7   : > { %19909 = vmatpush1.bf16.msra.mxu1 %v19908_v44  ;;  %v15930_v44 = vld [vmem:[%s26636_s5 + $0xc8] sm:$0xff] }
0x1df8   : > { %19910 = vmatprep.subr.bf16.mxu1 %v20717_v14  ;;  %v19986_v5 = vpack.c.bf16 %v15930_v44, %v15929_v53  ;;  %v19992_v53 = vpack.c.bf16 %v15936_v40, %v15935_v39  ;;  %v15938_v44 = vld [vmem:[%s26636_s5 + $0x100] sm:$0xff]  ;;  %v12402_v40 = vld [vmem:[%s26639_s8 + $0x48] sm:$0xff] }
0x1df9   : > { %v12401_v39 = vld [vmem:[%s26639_s8 + $0x40] sm:$0xff] }
0x1dfb   : > { %19912 = vmatpush1.bf16.msra.mxu1 %v19911_v58  ;;  %v15931_v58 = vld [vmem:[%s26636_s5 + $0xd0] sm:$0xff] }
0x1dfc   : > { %19913 = vmatprep.subr.bf16.mxu1 %v20717_v14 }
0x1dff   : > { %19915 = vmatpush1.bf16.msra.mxu1 %v19914_v8 }
0x1e00   : > { %19916 = vmatprep.subr.bf16.mxu1 %v20717_v14 }
0x1e03   : > { %19918 = vmatpush1.bf16.msra.mxu1 %v19917_v54  ;;  %v11814_v54 = vld [vmem:[%s26636_s5 + $0x8] sm:$0xff] }
0x1e04   : > { %19919 = vmatprep.subr.bf16.mxu1 %v20717_v14  ;;  %v19965_v9 = vpack.c.bf16 %v11814_v54, %v11813_v26  ;;  %v15959_v26 = vld [vmem:[%s26639_s8 + $0x90] sm:$0xff]  ;;  %v15960_v54 = vld [vmem:[%s26639_s8 + $0x98] sm:$0xff] }
0x1e05   : > { %v20040_v11 = vpack.c.bf16 %v15960_v54, %v15959_v26  ;;  %v12408_v26 = vld [vmem:[%s26639_s8 + $0x78] sm:$0xff] }
0x1e07   : > { %19921 = vmatpush1.bf16.msra.mxu1 %v19920_v16 }
0x1e08   : > { %19922 = vmatprep.subr.bf16.mxu1 %v20717_v14 }
0x1e0b   : > { %19924 = vmatpush1.bf16.msra.mxu1 %v19923_v3 }
0x1e0c   : > { %19952 = vmatprep.subr.bf16.mxu1 %v20717_v14 }
0x1eb5   : > { %v11519_v31 = vpop.f32.mrb[124].mxu1 }
0x1eb6   : > { %v11521_v32 = vpop.f32.mrb[125].mxu1 }
0x1eb9   : > { %v11525_v20 = vpop.f32.mrb[126].mxu1 }
0x1eba   : > { %v11527_v33 = vpop.f32.mrb[127].mxu1 }
0x1ebd   : > { %v11604_v37 = vpop.f32.mrb[128].mxu1 }
0x1ebe   : > { %v11615_v38 = vmax.f32 %v11519_v31, %v11604_v37  ;;  %v11606_v41 = vpop.f32.mrb[129].mxu1 }
0x1ebf   : > { %v11616_v42 = vmax.f32 %v11521_v32, %v11606_v41 }
0x1ec1   : > { %v11610_v56 = vpop.f32.mrb[130].mxu1  ;;  %15890 = vmatprep.mubr.msk.f32.mxu1 %vm1309_vm8, %v11616_v42  ;;  %15910 = vmatprep.mubr.msk.f32.mxu0 %vm1309_vm8, %v11616_v42 }
0x1ec2   : > { %v11617_v57 = vmax.f32 %v11525_v20, %v11610_v56  ;;  %v11612_v61 = vpop.f32.mrb[131].mxu1  ;;  %11708 = vmatmul.mubr.f32.vlgmr.msra.gmra.mrb[132].mxu1 %v11615_v38  ;;  %11801 = vmatmul.mubr.f32.vlgmr.msra.gmra.mrb[122].mxu0 %v11615_v38  ;;  %v20007_v56 = vpack.c.bf16 %v15948_v51, %v15947_v48  ;;  %v12244_v51 = vld [vmem:[%s26638_s7] sm:$0xf] }
0x1ec3   : > { %v11618_v62 = vmax.f32 %v11527_v33, %v11612_v61  ;;  %19954 = vmatpush3.bf16.msra.mxu1 %v19953_v43  ;;  %19978 = vmatpush3.bf16.msra.mxu0 %v19977_v46  ;;  %v11815_v33 = vld [vmem:[%s26636_s5 + $0x10] sm:$0xff]  ;;  %v20004_v43 = vpack.c.bf16 %v15946_v23, %v15945_v13  ;;  %v11817_v46 = vld [vmem:[%s26636_s5 + $0x20] sm:$0xff]  ;;  %v11820_v61 = vld [vmem:[%s26636_s5 + $0x38] sm:$0xff] }
0x1ec4   : > { %19955 = vmatprep.subr.bf16.mxu1 %v20717_v14  ;;  %19979 = vmatprep.subr.bf16.mxu0 %v20717_v14  ;;  %v19968_v42 = vpack.c.bf16 %v11816_v34, %v11815_v33  ;;  %v19971_v52 = vpack.c.bf16 %v11818_v47, %v11817_v46 }
0x1ec5   : > { %15891 = vmatprep.mubr.msk.f32.mxu1 %vm1309_vm8, %v11618_v62  ;;  %15911 = vmatprep.mubr.msk.f32.mxu0 %vm1309_vm8, %v11618_v62  ;;  %v15949_v62 = vld [vmem:[%s26636_s5 + $0x150] sm:$0xff] }
0x1ec6   : > { %11713 = vmatmul.mubr.f32.gmra.mrb[134].mxu1 %v11617_v57  ;;  %11806 = vmatmul.mubr.f32.gmra.mrb[124].mxu0 %v11617_v57  ;;  %v11819_v57 = vld [vmem:[%s26636_s5 + $0x30] sm:$0xff] }
0x1ec7   : > { %19957 = vmatpush3.bf16.msra.mxu1 %v19956_v4  ;;  %19981 = vmatpush3.bf16.msra.mxu0 %v19980_v7  ;;  %v15950_v4 = vld [vmem:[%s26636_s5 + $0x158] sm:$0xff]  ;;  %v19974_v7 = vpack.c.bf16 %v11820_v61, %v11819_v57  ;;  %v15955_v57 = vld [vmem:[%s26638_s7 + $0x4] sm:$0xf] }
0x1ec8   : > { %19958 = vmatprep.subr.bf16.mxu1 %v20717_v14  ;;  %19982 = vmatprep.subr.bf16.mxu0 %v20717_v14  ;;  %v20010_v10 = vpack.c.bf16 %v15950_v4, %v15949_v62  ;;  %v12395_v62 = vld [vmem:[%s26639_s8 + $0x10] sm:$0xff]  ;;  %v12396_v4 = vld [vmem:[%s26639_s8 + $0x18] sm:$0xff] }
0x1ec9   : > { %18034 = vmatprep.mubr.msk.f32.mxu1 %vm20718_vm9, %v20715_v0  ;;  %18076 = vmatprep.mubr.msk.f32.mxu0 %vm20718_vm9, %v20715_v0 }
0x1ecb   : > { %19960 = vmatpush3.bf16.msra.mxu1 %v19959_v19  ;;  %19984 = vmatpush3.bf16.msra.mxu0 %v19983_v22  ;;  %v11821_v19 = vld [vmem:[%s26636_s5 + $0x40] sm:$0xff]  ;;  %v19989_v22 = vpack.c.bf16 %v15934_v17, %v15933_v15  ;;  %v12398_v15 = vld [vmem:[%s26639_s8 + $0x28] sm:$0xff] }
0x1ecc   : > { %19961 = vmatprep.subr.bf16.mxu1 %v20717_v14  ;;  %19985 = vmatprep.subr.bf16.mxu0 %v20717_v14 }
0x1ecf   : > { %19963 = vmatpush3.bf16.msra.mxu1 %v19962_v24  ;;  %19987 = vmatpush3.bf16.msra.mxu0 %v19986_v5  ;;  %v15937_v24 = vld [vmem:[%s26636_s5 + $0xf8] sm:$0xff] }
0x1ed0   : > { %18032 = vmatprep.subr.mxu1 %v20715_v0  ;;  %18074 = vmatprep.subr.mxu0 %v20715_v0  ;;  %v19995_v5 = vpack.c.bf16 %v15938_v44, %v15937_v24  ;;  %v12403_v24 = vld [vmem:[%s26639_s8 + $0x50] sm:$0xff]  ;;  %v12404_v44 = vld [vmem:[%s26639_s8 + $0x58] sm:$0xff] }
0x1ed3   : > { %18033 = vmatpush3.msra.mxu1 %v15920_v45  ;;  %18075 = vmatpush3.msra.mxu0 %v15931_v58  ;;  %v15939_v45 = vld [vmem:[%s26636_s5 + $0x108] sm:$0xff]  ;;  %v15940_v58 = vld [vmem:[%s26636_s5 + $0x110] sm:$0xff] }
0x1ed4   : > { %19964 = vmatprep.subr.bf16.mxu1 %v20717_v14  ;;  %20000 = vmatprep.subr.bf16.mxu0 %v20717_v14 }
0x1f95   : > { %v11709_v25 = vpop.f32.mrb[132].mxu1  ;;  %v11802_v49 = vpop.f32.mrb[122].mxu0 }
0x1f96   : > { %v25500_v8 = vmax.f32 %v11709_v25, %v11802_v49  ;;  %v11711_v50 = vpop.f32.mrb[133].mxu1  ;;  %v11804_v63 = vpop.f32.mrb[123].mxu0  ;;  %v19998_v25 = vpack.c.bf16 %v15940_v58, %v15939_v45  ;;  %v15941_v49 = vld [vmem:[%s26636_s5 + $0x118] sm:$0xff]  ;;  %v12405_v45 = vld [vmem:[%s26639_s8 + $0x60] sm:$0xff]  ;;  %v12406_v58 = vld [vmem:[%s26639_s8 + $0x68] sm:$0xff] }
0x1f97   : > { %v15958_v50 = vld [vmem:[%s26639_s8 + $0x88] sm:$0xff] }
0x1f98   : > { %v11833_v2 = vrot.slane %v25500_v8, 1  ;;  %v11989_v18 = vrot.slane %v25500_v8, 2  ;;  %v12159_v3 = vrot.slane %v25500_v8, 4  ;;  %v12074_v12 = vrot.slane %v25500_v8, 3 }
0x1f99   : > { %v11714_v6 = vpop.f32.mrb[134].mxu1  ;;  %v11807_v27 = vpop.f32.mrb[124].mxu0 }
0x1f9a   : > { %v11812_v59 = vmax.f32 %v11714_v6, %v11807_v27  ;;  %v11716_v16 = vpop.f32.mrb[135].mxu1  ;;  %v11809_v60 = vpop.f32.mrb[125].mxu0  ;;  %v15962_v6 = vld [vmem:[%s26639_s8 + $0xa8] sm:$0xff] }
0x1f9b   : > { %v20043_v27 = vpack.c.bf16 %v15962_v6, %v15961_v55  ;;  %v15964_v16 = vld [vmem:[%s26639_s8 + $0xb8] sm:$0xff] }
0x1f9c   : > { %v11834_v30 = vrot.slane %v11812_v59, 1  ;;  %v11990_v31 = vrot.slane %v11812_v59, 2  ;;  %v12075_v32 = vrot.slane %v11812_v59, 3  ;;  %v12160_v20 = vrot.slane %v11812_v59, 4  ;;  %v15963_v59 = vld [vmem:[%s26639_s8 + $0xb0] sm:$0xff]  ;;  %v15972_v55 = vld [vmem:[%s26639_s8 + $0xf8] sm:$0xff] }
0x1f9d   : > { %v20046_v60 = vpack.c.bf16 %v15964_v16, %v15963_v59  ;;  %v15980_v59 = vld [vmem:[%s26632_s1 + $0x58] sm:$0xff] }
0x1f9e   : > { %v11835_v35 = vsel %vm538_vm3, %v11833_v2, %v11834_v30  ;;  %v11991_v37 = vsel %vm747_vm5, %v11989_v18, %v11990_v31  ;;  %v12161_v38 = vsel %vm553_vm0, %v12159_v3, %v12160_v20  ;;  %v25534_v41 = vsel %vm865_vm6, %v12074_v12, %v12075_v32  ;;  %v15967_v18 = vld [vmem:[%s26639_s8 + $0xd0] sm:$0xff]  ;;  %v15968_v3 = vld [vmem:[%s26639_s8 + $0xd8] sm:$0xff] }
0x1f9f   : > { %18035 = vmatmul.mubr.msk.f32.vlgmr.msra.gmra.mrb[136].mxu1 %vm1511_vm10, %v11835_v35  ;;  %18077 = vmatmul.mubr.msk.f32.vlgmr.msra.gmra.mrb[126].mxu0 %vm1511_vm10, %v11991_v37  ;;  %v20052_v12 = vpack.c.bf16 %v15968_v3, %v15967_v18  ;;  %v15982_v18 = vld [vmem:[%s26632_s1 + $0x68] sm:$0xff]  ;;  %v15984_v3 = vld [vmem:[%s26632_s1 + $0x78] sm:$0xf] }
0x1fa0   : > { %19966 = vmatpush3.bf16.msra.mxu1 %v19965_v9  ;;  %20002 = vmatpush3.bf16.msra.mxu0 %v20001_v28  ;;  %v15965_v9 = vld [vmem:[%s26639_s8 + $0xc0] sm:$0xff]  ;;  %v15966_v28 = vld [vmem:[%s26639_s8 + $0xc8] sm:$0xff] }
0x1fa1   : > { %19967 = vmatprep.subr.bf16.mxu1 %v20717_v14  ;;  %20003 = vmatprep.subr.bf16.mxu0 %v20717_v14  ;;  %v20049_v2 = vpack.c.bf16 %v15966_v28, %v15965_v9  ;;  %v15977_v28 = vld [vmem:[%s26632_s1 + $0x40] sm:$0xff] }
0x1fa2   : > { %18055 = vmatprep.mubr.msk.f32.mxu1 %vm20718_vm9, %v20715_v0  ;;  %18118 = vmatprep.mubr.msk.f32.mxu0 %vm20718_vm9, %v20715_v0 }
0x1fa4   : > { %19969 = vmatpush3.bf16.msra.mxu1 %v19968_v42  ;;  %20005 = vmatpush3.bf16.msra.mxu0 %v20004_v43  ;;  %v15953_v43 = vld [vmem:[%s26637_s6] ss:$0 sm:$0xff] }
0x1fa5   : > { %19970 = vmatprep.subr.bf16.mxu1 %v20717_v14  ;;  %20006 = vmatprep.subr.bf16.mxu0 %v20717_v14 }
0x1fa8   : > { %19972 = vmatpush3.bf16.msra.mxu1 %v19971_v52  ;;  %20008 = vmatpush3.bf16.msra.mxu0 %v20007_v56  ;;  %v12393_v52 = vld [vmem:[%s26639_s8] sm:$0xff]  ;;  %v12394_v56 = vld [vmem:[%s26639_s8 + $0x8] sm:$0xff] }
0x1fa9   : > { %19973 = vmatprep.subr.bf16.mxu1 %v20717_v14  ;;  %20009 = vmatprep.subr.bf16.mxu0 %v20717_v14  ;;  %v20013_v61 = vpack.c.bf16 %v12394_v56, %v12393_v52  ;;  %v12582_v52 = vld [vmem:[%s26632_s1 + $0x38] sm:$0xf] }
0x1fac   : > { %19975 = vmatpush3.bf16.msra.mxu1 %v19974_v7  ;;  %20011 = vmatpush3.bf16.msra.mxu0 %v20010_v10  ;;  %v20016_v7 = vpack.c.bf16 %v12396_v4, %v12395_v62  ;;  %v12397_v10 = vld [vmem:[%s26639_s8 + $0x20] sm:$0xff]  ;;  %v25814_v62 = vld [vmem:[%s20894_s17 + $0xf8] sm:$0xf] }
0x1fad   : > { %18053 = vmatprep.subr.mxu1 %v20715_v0  ;;  %18116 = vmatprep.subr.mxu0 %v20715_v0  ;;  %v20019_v17 = vpack.c.bf16 %v12398_v15, %v12397_v10  ;;  %v12581_v10 = vld [vmem:[%s26632_s1 + $0x30] sm:$0xf]  ;;  %v15996_v15 = vld [vmem:[%s26632_s1 + $0x88] sm:$0xff] }
0x1fb0   : > { %18054 = vmatpush3.msra.mxu1 %v11821_v19  ;;  %18117 = vmatpush3.msra.mxu0 %v15951_v21  ;;  %v12399_v19 = vld [vmem:[%s26639_s8 + $0x30] sm:$0xff]  ;;  %v12400_v21 = vld [vmem:[%s26639_s8 + $0x38] sm:$0xff] }
0x1fb1   : > { %18056 = vmatmul.mubr.msk.f32.vlgmr.msra.gmra.mrb[138].mxu1 %vm1511_vm10, %v25500_v8  ;;  %19988 = vmatprep.subr.bf16.mxu1 %v20717_v14  ;;  %v15957_v8 = vld [vmem:[%s26639_s8 + $0x80] sm:$0xff] }
0x1fb2   : > { %18119 = vmatmul.mubr.msk.f32.vlgmr.msra.gmra.mrb[128].mxu0 %vm1511_vm10, %v12161_v38  ;;  %19990 = vmatpush3.bf16.msra.mxu1 %v19989_v22  ;;  %v20037_v63 = vpack.c.bf16 %v15958_v50, %v15957_v8  ;;  %v20022_v22 = vpack.c.bf16 %v12400_v21, %v12399_v19  ;;  %v15970_v8 = vld [vmem:[%s26639_s8 + $0xe8] sm:$0xff]  ;;  %v12600_v21 = vrot.slane %v25814_v62, 1 }
0x1fb3   : > { %19991 = vmatprep.subr.bf16.mxu1 %v20717_v14  ;;  %18097 = vmatprep.mubr.msk.f32.mxu1 %vm20718_vm9, %v20715_v0 }
0x1fb4   : > { %20036 = vmatprep.subr.bf16.mxu0 %v20717_v14  ;;  %18198 = vmatprep.mubr.msk.f32.mxu0 %vm20718_vm9, %v20715_v0 }
0x1fb5   : > { %20038 = vmatpush3.bf16.msra.mxu0 %v20037_v63  ;;  %v12407_v63 = vld [vmem:[%s26639_s8 + $0x70] sm:$0xff] }
0x1fb6   : > { %19993 = vmatpush3.bf16.msra.mxu1 %v19992_v53  ;;  %20039 = vmatprep.subr.bf16.mxu0 %v20717_v14  ;;  %v20025_v53 = vpack.c.bf16 %v12402_v40, %v12401_v39  ;;  %v20034_v54 = vpack.c.bf16 %v12408_v26, %v12407_v63 }
0x1fb7   : > { %19994 = vmatprep.subr.bf16.mxu1 %v20717_v14 }
0x1fb9   : > { %20041 = vmatpush3.bf16.msra.mxu0 %v20040_v11  ;;  %v15971_v11 = vld [vmem:[%s26639_s8 + $0xf0] sm:$0xff] }
0x1fba   : > { %19996 = vmatpush3.bf16.msra.mxu1 %v19995_v5  ;;  %20042 = vmatprep.subr.bf16.mxu0 %v20717_v14  ;;  %v20028_v5 = vpack.c.bf16 %v12404_v44, %v12403_v24  ;;  %v20058_v6 = vpack.c.bf16 %v15972_v55, %v15971_v11  ;;  %v15997_v24 = vld [vmem:[%s26632_s1 + $0x90] sm:$0xff]  ;;  %v16000_v44 = vld [vmem:[%s26632_s1 + $0xa8] sm:$0xff]  ;;  %v16008_v55 = vld [vmem:[%s26632_s1 + $0xc0] sm:$0xff] }
0x1fbb   : > { %19997 = vmatprep.subr.bf16.mxu1 %v20717_v14 }
0x1fbd   : > { %20044 = vmatpush3.bf16.msra.mxu0 %v20043_v27  ;;  %v15978_v27 = vld [vmem:[%s26632_s1 + $0x48] sm:$0xff] }
0x1fbe   : > { %19999 = vmatpush3.bf16.msra.mxu1 %v19998_v25  ;;  %20045 = vmatprep.subr.bf16.mxu0 %v20717_v14  ;;  %v20031_v25 = vpack.c.bf16 %v12406_v58, %v12405_v45  ;;  %v20060_v16 = vpack.c.bf16 %v15980_v59, %v15978_v27  ;;  %v16013_v27 = vld [vmem:[%s26632_s1 + $0xe8] sm:$0xff]  ;;  %v16015_v59 = vld [vmem:[%s26632_s1 + $0xf8] sm:$0xf] }
0x1fbf   : > { %18095 = vmatprep.subr.mxu1 %v20715_v0 }
0x1fc1   : > { %20047 = vmatpush3.bf16.msra.mxu0 %v20046_v60 }
0x1fc2   : > { %18096 = vmatpush3.msra.mxu1 %v15941_v49  ;;  %20048 = vmatprep.subr.bf16.mxu0 %v20717_v14  ;;  %v15969_v49 = vld [vmem:[%s26639_s8 + $0xe0] sm:$0xff] }
0x1fc3   : > { %18098 = vmatmul.mubr.msk.f32.vlgmr.msra.gmra.mrb[140].mxu1 %vm1511_vm10, %v25534_v41  ;;  %18121 = vmatprep.subr.mxu1 %v20715_v0  ;;  %v20055_v50 = vpack.c.bf16 %v15970_v8, %v15969_v49  ;;  %v16001_v49 = vld [vmem:[%s26632_s1 + $0xb0] sm:$0xf]  ;;  %v16009_v8 = vld [vmem:[%s26632_s1 + $0xc8] sm:$0xff] }
0x1fc4   : > { %18123 = vmatprep.mubr.msk.f32.mxu1 %vm20718_vm9, %v20715_v0 }
0x1fc5   : > { %20050 = vmatpush3.bf16.msra.mxu0 %v20049_v2  ;;  %v15979_v2 = vld [vmem:[%s26632_s1 + $0x50] sm:$0xff] }
0x1fc6   : > { %20051 = vmatprep.subr.bf16.mxu0 %v20717_v14 }
0x1fc9   : > { %20053 = vmatpush3.bf16.msra.mxu0 %v20052_v12 }
0x1fca   : > { %20054 = vmatprep.subr.bf16.mxu0 %v20717_v14 }
0x1fcd   : > { %20056 = vmatpush3.bf16.msra.mxu0 %v20055_v50  ;;  %v16011_v50 = vld [vmem:[%s26632_s1 + $0xd8] sm:$0xff] }
0x1fce   : > { %20057 = vmatprep.subr.bf16.mxu0 %v20717_v14  ;;  %v20090_v26 = vpack.c.bf16 %v16011_v50, %v16009_v8  ;;  %v16052_v50 = vld [vmem:[%s26635_s4 + $0xe0] sm:$0xff] }
0x1fd1   : > { %20059 = vmatpush3.bf16.msra.mxu0 %v20058_v6  ;;  %v16010_v6 = vld [vmem:[%s26632_s1 + $0xd0] sm:$0xff] }
0x2072   : > { %v11904_v30 = vpop.f32.mrb[136].mxu1  ;;  %v12060_v31 = vpop.f32.mrb[126].mxu0 }
0x2073   : > { %v18036_v32 = vpop.f32.mrb[137].mxu1  ;;  %v18078_v20 = vpop.f32.mrb[127].mxu0 }
0x2084   : > { %v11976_v33 = vpop.f32.mrb[138].mxu1 }
0x2085   : > { %v11977_v34 = vadd.f32 %v11976_v33, %v11904_v30  ;;  %v12230_v13 = vpop.f32.mrb[128].mxu0  ;;  %v18057_v23 = vpop.f32.mrb[139].mxu1  ;;  %v20062_v30 = vpack.c.bf16 %v15979_v2, %v15977_v28  ;;  %v20064_v33 = vpack.c.bf16 %v15984_v3, %v15982_v18  ;;  %v20094_v28 = vpack.c.bf16 %v16015_v59, %v16013_v27  ;;  %v16012_v2 = vld [vmem:[%s26632_s1 + $0xe0] sm:$0xff]  ;;  %v16014_v18 = vld [vmem:[%s26632_s1 + $0xf0] sm:$0xf]  ;;  %v16022_v3 = vld [vmem:[%s26632_s1 + $0x108] sm:$0xff] }
0x2086   : > { %v18120_v35 = vpop.f32.mrb[129].mxu0  ;;  %v25780_v23 = vld [vmem:[%s20894_s17 + $0xe8] sm:$0xff]  ;;  %v13140_v59 = vld [vmem:[%s26633_s2] sm:$0x3] }
0x2087   : > { %v12064_v37 = vadd.f32 %v12060_v31, %v11977_v34  ;;  %v15981_v31 = vld [vmem:[%s26632_s1 + $0x60] sm:$0xff]  ;;  %v15983_v34 = vld [vmem:[%s26632_s1 + $0x70] sm:$0xf]  ;;  %v12576_v35 = vld [vmem:[%s26632_s1 + $0x8] sm:$0xff]  ;;  %v12801_v11 = vrot.slane %v25780_v23, 2 }
0x2096   : > { %v12145_v38 = vpop.f32.mrb[140].mxu1 }
0x2097   : > { %v12149_v41 = vadd.f32 %v12145_v38, %v12064_v37  ;;  %v18099_v42 = vpop.f32.mrb[141].mxu1  ;;  %v12578_v37 = vld [vmem:[%s26632_s1 + $0x18] sm:$0xff]  ;;  %v20067_v38 = vpack.c.bf16 %v15983_v34, %v15981_v31  ;;  %v12805_v31 = vrot.slane %v25814_v62, 2 }
0x2098   : > { %v12596_v42 = vrot.slane %v25780_v23, 1 }
0x2099   : > { %v12234_v46 = vadd.f32 %v12230_v13, %v12149_v41  ;;  %v25777_v13 = vld [vmem:[%s20894_s17 + $0xe0] sm:$0xff] }
0x209a   : > { %v12595_v41 = vrot.slane %v25777_v13, 1  ;;  %v12916_v34 = vrot.slane %v25777_v13, 3 }
0x209b   : > { %v12242_v47 = vadd.f32 %v15953_v43, %v12234_v46  ;;  %v20070_v43 = vpack.c.bf16 %v12578_v37, %v12576_v35  ;;  %v12575_v46 = vld [vmem:[%s26632_s1] sm:$0xff]  ;;  %v12917_v35 = vrot.slane %v25780_v23, 3 }
0x209c   : > { %v12597_v56 = vsel %vm538_vm3, %v12595_v41, %v12596_v42  ;;  %v16021_v37 = vld [vmem:[%s26632_s1 + $0x100] sm:$0xff]  ;;  %v16026_v41 = vld [vmem:[%s26632_s1 + $0x128] sm:$0xff] }
0x209d   : > { %v12243_v48 = vmax.f32 %v12242_v47, 0.0  ;;  %v12577_v47 = vld [vmem:[%s26632_s1 + $0x10] sm:$0xff] }
0x209f   : > { %18122 = vmatpush3.msra.mxu1 %v12243_v48 }
0x20a0   : > { %18124 = vmatmul.mubr.msk.f32.vlgmr.msra.gmra.mrb[142].mxu1 %vm1924_vm11, %v12244_v51  ;;  %18126 = vmatprep.subr.mxu1 %v20715_v0  ;;  %v12580_v51 = vld [vmem:[%s26632_s1 + $0x28] sm:$0xff] }
0x20a1   : > { %18127 = vmatpush3.msra.mxu1 %v12243_v48  ;;  %18128 = vmatprep.mubr.msk.f32.mxu1 %vm20718_vm9, %v20715_v0  ;;  %v25800_v48 = vld [vmem:[%s20894_s17 + $0xf0] sm:$0xff]  ;;  %v20074_v4 = vpack.c.bf16 %v12582_v52, %v12580_v51  ;;  %v16025_v52 = vld [vmem:[%s26632_s1 + $0x120] sm:$0xff]  ;;  %s14846_s17 = sshll.u32 %s505_s16, 4  ;;  %s26591_s17 = int_to_ptr.vmem [resolvable:$true] %s14846_s17 }
0x20a2   : > { %20012 = vmatprep.subr.bf16.mxu1 %v20717_v14  ;;  %s20644_s26 = scalar_lea.vmem %s26591_s17, 128  ;;  %p20651_p2 = scmp.lt.s32.totalorder %s26591_s17, %s20649_s18 }
0x20a3   : > { %p20645_p6 = scmp.ne.s32.totalorder %s26591_s17, %s20644_s26  ;;  %p20652_p3 = scmp.lt.s32.totalorder %s20650_s27, %s20644_s26 }
0x20a4   : > { %18129 = vmatmul.mubr.msk.f32.vlgmr.msra.gmra.mrb[144].mxu1 %vm1924_vm11, %v15955_v57  ;;  %v20072_v57 = vpack.c.bf16 %v12577_v47, %v12575_v46  ;;  %v12919_v47 = vrot.slane %v25800_v48, 3 }
0x20a5   : > { %20014 = vmatpush3.bf16.msra.mxu1 %v20013_v61  ;;  %18163 = vmatprep.mubr.msk.f32.mxu1 %vm20718_vm9, %v20715_v0  ;;  %v12598_v61 = vrot.slane %v25800_v48, 1  ;;  %p20646_p10 = pnand %p20645_p6, %p26671_p9  ;;  %p20653_p4 = por %p20652_p3, %p20651_p2 }
0x20a6   : > { %20015 = vmatprep.subr.bf16.mxu1 %v20717_v14 }
0x20a7   : > { %v12599_v19 = vsel %vm538_vm3, %v12596_v42, %v12598_v61  ;;  %v12601_v40 = vsel %vm538_vm3, %v12598_v61, %v12600_v21  ;;  %v16028_v42 = vld [vmem:[%s26632_s1 + $0x138] sm:$0xf]  ;;  %v12921_v61 = vrot.slane %v25814_v62, 3  ;;  %p20647_p12 = pneg %p20646_p10 }
0x20a8   : > { %v20104_v51 = vpack.c.bf16 %v16028_v42, %v16026_v41  ;;  %v16043_v21 = vld [vmem:[%s26635_s4 + $0x98] sm:$0xff] }
0x20a9   : > { %20017 = vmatpush3.bf16.msra.mxu1 %v20016_v7  ;;  %v12579_v7 = vld [vmem:[%s26632_s1 + $0x20] sm:$0xff]  ;;  %p20654_p7 = pnand %p20653_p4, %p20647_p12 }
0x20aa   : > { %20018 = vmatprep.subr.bf16.mxu1 %v20717_v14 }
0x20ad   : > { %20020 = vmatpush3.bf16.msra.mxu1 %v20019_v17  ;;  %v15998_v17 = vld [vmem:[%s26632_s1 + $0x98] sm:$0xff] }
0x20ae   : > { %20021 = vmatprep.subr.bf16.mxu1 %v20717_v14  ;;  %v20080_v39 = vpack.c.bf16 %v15998_v17, %v15996_v15  ;;  %v13033_v15 = vrot.slane %v25780_v23, 4 }
0x20b1   : > { %20023 = vmatpush3.bf16.msra.mxu1 %v20022_v22  ;;  %v20077_v22 = vpack.c.bf16 %v12581_v10, %v12579_v7  ;;  %v12922_v7 = vsel %vm865_vm6, %v12919_v47, %v12921_v61  ;;  %v13032_v10 = vrot.slane %v25777_v13, 4  ;;  %v13340_v61 = vld [vmem:[%s26635_s4 + $0x10] sm:$0xff] }
0x20b2   : > { %20024 = vmatprep.subr.bf16.mxu1 %v20717_v14 }
0x20b3   : > { %v13034_v17 = vsel %vm553_vm0, %v13032_v10, %v13033_v15 }
0x20b5   : > { %20026 = vmatpush3.bf16.msra.mxu1 %v20025_v53  ;;  %v15995_v53 = vld [vmem:[%s26632_s1 + $0x80] sm:$0xff] }
0x20b6   : > { %20027 = vmatprep.subr.bf16.mxu1 %v20717_v14  ;;  %v20082_v45 = vpack.c.bf16 %v15997_v24, %v15995_v53  ;;  %v16046_v53 = vld [vmem:[%s26635_s4 + $0xb0] sm:$0xff]  ;;  %v16047_v24 = vld [vmem:[%s26635_s4 + $0xb8] sm:$0xff] }
0x20b9   : > { %20029 = vmatpush3.bf16.msra.mxu1 %v20028_v5  ;;  %v16002_v5 = vld [vmem:[%s26632_s1 + $0xb8] sm:$0xf] }
0x20ba   : > { %20030 = vmatprep.subr.bf16.mxu1 %v20717_v14  ;;  %v20084_v58 = vpack.c.bf16 %v16002_v5, %v16000_v44  ;;  %v20152_v44 = vpack.c.bf16 %v16047_v24, %v16046_v53  ;;  %v16048_v5 = vld [vmem:[%s26635_s4 + $0xc0] sm:$0xff]  ;;  %v13351_v24 = vld [vmem:[%s26635_s4 + $0x68] sm:$0xff] }
0x20bb   : > { %v13350_v53 = vld [vmem:[%s26635_s4 + $0x60] sm:$0xff] }
0x20bd   : > { %20032 = vmatpush3.bf16.msra.mxu1 %v20031_v25  ;;  %v15999_v25 = vld [vmem:[%s26632_s1 + $0xa0] sm:$0xff] }
0x20be   : > { %20033 = vmatprep.subr.bf16.mxu1 %v20717_v14  ;;  %v20087_v63 = vpack.c.bf16 %v16001_v49, %v15999_v25  ;;  %v16050_v25 = vld [vmem:[%s26635_s4 + $0xd0] sm:$0xff]  ;;  %v16051_v49 = vld [vmem:[%s26635_s4 + $0xd8] sm:$0xff] }
0x20bf   : > { %v20158_v8 = vpack.c.bf16 %v16051_v49, %v16050_v25  ;;  %v13352_v25 = vld [vmem:[%s26635_s4 + $0x70] sm:$0xff]  ;;  %v13353_v49 = vld [vmem:[%s26635_s4 + $0x78] sm:$0xff] }
0x20c1   : > { %20035 = vmatpush3.bf16.msra.mxu1 %v20034_v54  ;;  %v12800_v54 = vrot.slane %v25777_v13, 2 }
0x20c2   : > { %20061 = vmatprep.subr.bf16.mxu1 %v20060_v16 }
0x20c3   : > { %v12802_v16 = vsel %vm747_vm5, %v12800_v54, %v12801_v11 }
0x2173   : > { %v12314_v60 = vpop.f32.mrb[142].mxu1 }
0x2174   : > { %v18125_v9 = vpop.f32.mrb[143].mxu1 }
0x2175   : > { %v12803_v9 = vrot.slane %v25800_v48, 2 }
0x2177   : > { %v12388_v12 = vpop.f32.mrb[144].mxu1 }
0x2178   : > { %v12392_v32 = vmax.f32 %v12314_v60, %v12388_v12  ;;  %v18130_v20 = vpop.f32.mrb[145].mxu1  ;;  %v20092_v60 = vpack.c.bf16 %v16010_v6, %v16008_v55  ;;  %v16024_v12 = vld [vmem:[%s26632_s1 + $0x118] sm:$0xff] }
0x2179   : > { %v20100_v20 = vpack.c.bf16 %v16024_v12, %v16022_v3 }
0x217a   : > { %18164 = vmatmul.mubr.f32.vlgmr.msra.gmra.mrb[146].mxu1 %v12392_v32  ;;  %18199 = vmatmul.mubr.f32.vlgmr.msra.gmra.mrb[130].mxu0 %v12392_v32  ;;  %v20097_v32 = vpack.c.bf16 %v16014_v18, %v16012_v2 }
0x217b   : > { %20063 = vmatpush1.bf16.msra.mxu1 %v20062_v30  ;;  %12678 = vmatprep.mubr.f32.mxu1 %v20715_v0  ;;  %v12804_v30 = vsel %vm747_vm5, %v12801_v11, %v12803_v9 }
0x217c   : > { %20066 = vmatprep.subr.msk.bf16.mxu1 %vm20887_vm2, %v20064_v33  ;;  %13236 = vmatprep.mubr.f32.mxu0 %v20715_v0  ;;  %v12806_v33 = vsel %vm747_vm5, %v12803_v9, %v12805_v31  ;;  %v13149_v9 = vrot.slane %v13140_v59, %v21114_v29 }
0x217f   : > { %20069 = vmatpush1.bf16.msk.msra.mxu1 %vm20887_vm2, %v20067_v38  ;;  %v16023_v38 = vld [vmem:[%s26632_s1 + $0x110] sm:$0xff] }
0x2180   : > { %20071 = vmatprep.subr.bf16.mxu1 %v20070_v43  ;;  %v12918_v43 = vsel %vm865_vm6, %v12916_v34, %v12917_v35  ;;  %v20102_v46 = vpack.c.bf16 %v16023_v38, %v16021_v37 }
0x2182   : > { %15987 = vmatmul.mubr.msk.f32.vlgmr.msra.gmra.mrb[148].mxu1 %vm546_vm4, %v12597_v56  ;;  %v16027_v56 = vld [vmem:[%s26632_s1 + $0x130] sm:$0xf] }
0x2183   : > { %12684 = vmatprep.mubr.f32.mxu1 %v20715_v0  ;;  %20073 = vmatpush1.bf16.msra.mxu1 %v20072_v57  ;;  %v12920_v57 = vsel %vm865_vm6, %v12917_v35, %v12919_v47  ;;  %v13165_v47 = vld [vmem:[%s26634_s3 + $0x8] sm:$0xf] }
0x2184   : > { %20076 = vmatprep.subr.msk.bf16.mxu1 %vm20887_vm2, %v20074_v4  ;;  %v20107_v4 = vpack.c.bf16 %v16027_v56, %v16025_v52  ;;  %v13339_v52 = vld [vmem:[%s26635_s4 + $0x8] sm:$0xff]  ;;  %v16036_v56 = vld [vmem:[%s26634_s3 + $0x10] sm:$0xff] }
0x2186   : > { %15988 = vmatmul.mubr.msk.f32.gmra.mrb[150].mxu1 %vm546_vm4, %v12599_v19  ;;  %v13035_v19 = vrot.slane %v25800_v48, 4 }
0x2187   : > { %12690 = vmatprep.mubr.f32.mxu1 %v20715_v0  ;;  %20079 = vmatpush1.bf16.msk.msra.mxu1 %vm20887_vm2, %v20077_v22 }
0x2188   : > { %20081 = vmatprep.subr.bf16.mxu1 %v20080_v39  ;;  %v13036_v1 = vsel %vm553_vm0, %v13033_v15, %v13035_v19  ;;  %v16045_v39 = vld [vmem:[%s26635_s4 + $0xa8] sm:$0xff]  ;;  %v13342_v15 = vld [vmem:[%s26635_s4 + $0x20] sm:$0xff] }
0x218a   : > { %15989 = vmatmul.mubr.msk.f32.gmra.mrb[152].mxu1 %vm546_vm4, %v12601_v40 }
0x218b   : > { %12773 = vmatprep.mubr.f32.mxu1 %v20715_v0 }
0x218e   : > { %15992 = vmatmul.mubr.msk.f32.vlgmr.msra.gmra.mrb[148].mxu1 %vm546_vm4, %v25777_v13  ;;  %v13037_v13 = vrot.slane %v25814_v62, 4  ;;  %v16044_v62 = vld [vmem:[%s26635_s4 + $0xa0] sm:$0xff] }
0x218f   : > { %12779 = vmatprep.mubr.f32.mxu1 %v20715_v0  ;;  %20083 = vmatpush1.bf16.msra.mxu1 %v20082_v45  ;;  %v20149_v40 = vpack.c.bf16 %v16045_v39, %v16044_v62  ;;  %v16049_v45 = vld [vmem:[%s26635_s4 + $0xc8] sm:$0xff]  ;;  %v13348_v62 = vld [vmem:[%s26635_s4 + $0x50] sm:$0xff]  ;;  %v13349_v39 = vld [vmem:[%s26635_s4 + $0x58] sm:$0xff] }
0x2190   : > { %20086 = vmatprep.subr.msk.bf16.mxu1 %vm20887_vm2, %v20084_v58  ;;  %v20155_v58 = vpack.c.bf16 %v16049_v45, %v16048_v5  ;;  %v20137_v5 = vpack.c.bf16 %v13351_v24, %v13350_v53  ;;  %v16055_v45 = vld [vmem:[%s26635_s4 + $0xf8] sm:$0xff]  ;;  %v13533_v53 = vld [vmem:[%s26636_s5 + $0x8] sm:$0xff]  ;;  %v16093_v24 = vld [vmem:[%s26636_s5 + $0x120] sm:$0xff] }
0x2192   : > { %15993 = vmatmul.mubr.msk.f32.gmra.mrb[150].mxu1 %vm546_vm4, %v25780_v23  ;;  %v13038_v23 = vsel %vm553_vm0, %v13035_v19, %v13037_v13  ;;  %v13345_v13 = vld [vmem:[%s26635_s4 + $0x38] sm:$0xff] }
0x2193   : > { %12785 = vmatprep.mubr.f32.mxu1 %v20715_v0  ;;  %20089 = vmatpush1.bf16.msk.msra.mxu1 %vm20887_vm2, %v20087_v63  ;;  %v16053_v63 = vld [vmem:[%s26635_s4 + $0xe8] sm:$0xff] }
0x2194   : > { %20091 = vmatprep.subr.bf16.mxu1 %v20090_v26  ;;  %v20161_v26 = vpack.c.bf16 %v16053_v63, %v16052_v50  ;;  %v20140_v50 = vpack.c.bf16 %v13353_v49, %v13352_v25  ;;  %v16057_v63 = vld [vmem:[%s26635_s4 + $0x108] sm:$0xff] }
0x2196   : > { %15994 = vmatmul.mubr.msk.f32.gmra.mrb[152].mxu1 %vm546_vm4, %v25800_v48  ;;  %v16042_v48 = vld [vmem:[%s26635_s4 + $0x90] sm:$0xff] }
0x2197   : > { %12883 = vmatprep.mubr.f32.mxu1 %v20715_v0  ;;  %v20146_v22 = vpack.c.bf16 %v16043_v21, %v16042_v48  ;;  %v13346_v48 = vld [vmem:[%s26635_s4 + $0x40] sm:$0xff]  ;;  %v13347_v21 = vld [vmem:[%s26635_s4 + $0x48] sm:$0xff] }
0x219a   : > { %16005 = vmatmul.mubr.msk.f32.vlgmr.msra.gmra.mrb[148].mxu1 %vm546_vm4, %v12802_v16  ;;  %v13145_v16 = vrot.slane %v13140_v59, %v21109_v36 }
0x219b   : > { %12889 = vmatprep.mubr.f32.mxu1 %v20715_v0  ;;  %20093 = vmatpush1.bf16.msra.mxu1 %v20092_v60 }
0x219c   : > { %20096 = vmatprep.subr.msk.bf16.mxu1 %vm20887_vm2, %v20094_v28 }
0x219e   : > { %16006 = vmatmul.mubr.msk.f32.gmra.mrb[150].mxu1 %vm546_vm4, %v12804_v30 }
0x219f   : > { %12895 = vmatprep.mubr.f32.mxu1 %v20715_v0  ;;  %20099 = vmatpush1.bf16.msk.msra.mxu1 %vm20887_vm2, %v20097_v32 }
0x21a0   : > { %20101 = vmatprep.subr.bf16.mxu1 %v20100_v20 }
0x21a2   : > { %16007 = vmatmul.mubr.msk.f32.gmra.mrb[152].mxu1 %vm546_vm4, %v12806_v33 }
0x21a3   : > { %12999 = vmatprep.mubr.f32.mxu1 %v20715_v0 }
0x21a6   : > { %16018 = vmatmul.mubr.msk.f32.vlgmr.msra.gmra.mrb[148].mxu1 %vm546_vm4, %v12918_v43 }
0x21a7   : > { %13005 = vmatprep.mubr.f32.mxu1 %v20715_v0  ;;  %20103 = vmatpush1.bf16.msra.mxu1 %v20102_v46  ;;  %v13164_v46 = vld [vmem:[%s26634_s3] sm:$0xff] }
0x21a8   : > { %20106 = vmatprep.subr.msk.bf16.mxu1 %vm20887_vm2, %v20104_v51  ;;  %v13338_v51 = vld [vmem:[%s26635_s4] sm:$0xff] }
0x21aa   : > { %16019 = vmatmul.mubr.msk.f32.gmra.mrb[150].mxu1 %vm546_vm4, %v12920_v57  ;;  %v20119_v57 = vpack.c.bf16 %v13339_v52, %v13338_v51  ;;  %v16066_v51 = vld [vmem:[%s26636_s5 + $0x68] sm:$0xff]  ;;  %v16067_v52 = vld [vmem:[%s26636_s5 + $0x70] sm:$0xff] }
0x21ab   : > { %13011 = vmatprep.mubr.f32.mxu1 %v20715_v0  ;;  %20109 = vmatpush1.bf16.msk.msra.mxu1 %vm20887_vm2, %v20107_v4  ;;  %v13341_v4 = vld [vmem:[%s26635_s4 + $0x18] sm:$0xff]  ;;  %vm14653_vm2 = vcmask 982016  }
0x21ac   : > { %20145 = vmatprep.subr.bf16.mxu1 %v20717_v14  ;;  %v20122_v10 = vpack.c.bf16 %v13341_v4, %v13340_v61  ;;  %v16078_v61 = vld [vmem:[%s26636_s5 + $0xb8] sm:$0xff] }
0x21ae   : > { %16020 = vmatmul.mubr.msk.f32.gmra.mrb[152].mxu1 %vm546_vm4, %v12922_v7  ;;  %v16037_v7 = vld [vmem:[%s26634_s3 + $0x18] sm:$0xf] }
0x21af   : > { %13115 = vmatprep.mubr.f32.mxu1 %v20715_v0 }
0x21b2   : > { %16031 = vmatmul.mubr.msk.f32.vlgmr.msra.gmra.mrb[148].mxu1 %vm546_vm4, %v13034_v17  ;;  %v13343_v17 = vld [vmem:[%s26635_s4 + $0x28] sm:$0xff] }
0x21b3   : > { %13121 = vmatprep.mubr.f32.mxu1 %v20715_v0  ;;  %20147 = vmatpush1.bf16.msra.mxu1 %v20146_v22  ;;  %v20125_v19 = vpack.c.bf16 %v13343_v17, %v13342_v15  ;;  %v20131_v22 = vpack.c.bf16 %v13347_v21, %v13346_v48  ;;  %v16079_v15 = vld [vmem:[%s26636_s5 + $0xc0] sm:$0xff] }
0x21b4   : > { %20148 = vmatprep.subr.bf16.mxu1 %v20717_v14 }
0x21b6   : > { %16032 = vmatmul.mubr.msk.f32.gmra.mrb[150].mxu1 %vm546_vm4, %v13036_v1  ;;  %v13344_v1 = vld [vmem:[%s26635_s4 + $0x30] sm:$0xff] }
0x21b7   : > { %13127 = vmatprep.mubr.f32.mxu1 %v20715_v0  ;;  %20150 = vmatpush1.bf16.msra.mxu1 %v20149_v40  ;;  %v20134_v40 = vpack.c.bf16 %v13349_v39, %v13348_v62 }
0x21b8   : > { %20151 = vmatprep.subr.bf16.mxu1 %v20717_v14 }
0x21ba   : > { %16033 = vmatmul.mubr.msk.f32.gmra.mrb[152].mxu1 %vm546_vm4, %v13038_v23  ;;  %v20128_v23 = vpack.c.bf16 %v13345_v13, %v13344_v1  ;;  %v16070_v13 = vld [vmem:[%s26636_s5 + $0x88] sm:$0xff] }
0x21bb   : > { %20153 = vmatpush1.bf16.msra.mxu1 %v20152_v44  ;;  %v16054_v44 = vld [vmem:[%s26635_s4 + $0xf0] sm:$0xff] }
0x21bc   : > { %20154 = vmatprep.subr.bf16.mxu1 %v20717_v14 }
0x21bf   : > { %20156 = vmatpush1.bf16.msra.mxu1 %v20155_v58  ;;  %v20164_v58 = vpack.c.bf16 %v16055_v45, %v16054_v44  ;;  %v16094_v44 = vld [vmem:[%s26636_s5 + $0x128] sm:$0xff] }
0x21c0   : > { %20157 = vmatprep.subr.bf16.mxu1 %v20717_v14 }
0x21c3   : > { %20159 = vmatpush1.bf16.msra.mxu1 %v20158_v8  ;;  %v16056_v8 = vld [vmem:[%s26635_s4 + $0x100] sm:$0xff] }
0x21c4   : > { %20160 = vmatprep.subr.bf16.mxu1 %v20717_v14 }
0x21c7   : > { %20162 = vmatpush1.bf16.msra.mxu1 %v20161_v26  ;;  %v20167_v26 = vpack.c.bf16 %v16057_v63, %v16056_v8 }
0x21c8   : > { %20163 = vmatprep.subr.bf16.mxu1 %v20717_v14 }
0x21cb   : > { %20165 = vmatpush1.bf16.msra.mxu1 %v20164_v58 }
0x21cc   : > { %20166 = vmatprep.subr.bf16.mxu1 %v20717_v14 }
0x21cf   : > { %20168 = vmatpush1.bf16.msra.mxu1 %v20167_v26 }
0x21d0   : > { %20169 = vmatprep.subr.bf16.mxu1 %v20717_v14 }
0x224d   : > { %v12475_v54 = vpop.f32.mrb[146].mxu1  ;;  %v12561_v11 = vpop.f32.mrb[130].mxu0 }
0x224e   : > { %v12565_v55 = vmax.f32 %v12475_v54, %v12561_v11  ;;  %v18165_v6 = vpop.f32.mrb[147].mxu1  ;;  %v18200_v27 = vpop.f32.mrb[131].mxu0  ;;  %v13354_v54 = vld [vmem:[%s26635_s4 + $0x80] sm:$0xff]  ;;  %v13355_v11 = vld [vmem:[%s26635_s4 + $0x88] sm:$0xff] }
0x224f   : > { %v20143_v6 = vpack.c.bf16 %v13355_v11, %v13354_v54  ;;  %v16059_v27 = vld [vmem:[%s26635_s4 + $0x118] sm:$0xff] }
0x2250   : > { %12566 = vst.msk [vmem:[#allocation2 + $0x6] sm:$0x1] %vm2248_vm12, %v12565_v55 }
0x2251   : > { %12567 = vst.msk [vmem:[#allocation2 + $0xd] sm:$0x2] %vm2250_vm13, %v12565_v55 }
0x2252   : > { %12568 = vst.msk [vmem:[#allocation2 + $0x14] sm:$0x4] %vm2252_vm14, %v12565_v55 }
0x2253   : > { %12569 = vst.msk [vmem:[#allocation2 + $0x1b] sm:$0x8] %vm2254_vm15, %v12565_v55  ;;  %v16058_v55 = vld [vmem:[%s26635_s4 + $0x110] sm:$0xff] }
0x2254   : > { %v20170_v59 = vpack.c.bf16 %v16059_v27, %v16058_v55 }
0x2256   : > { %20171 = vmatpush1.bf16.msra.mxu1 %v20170_v59 }
0x2257   : > { %20196 = vmatprep.subr.bf16.mxu1 %v20717_v14 }
0x2285   : > { %v13117_v60 = vpop.f32.mrb[148].mxu1 }
0x2286   : > { %v13119_v28 = vpop.f32.mrb[149].mxu1  ;;  %v13152_v2 = vadd.f32 %v13145_v16, %v13117_v60 }
0x2287   : > { %v13153_v18 = vadd.f32 %v13149_v9, %v13119_v28 }
0x2288   : > { %v13158_v32 = vmax.f32 %v13152_v2, 0.0  ;;  %v16062_v2 = vld [vmem:[%s26636_s5 + $0x48] sm:$0xff] }
0x2289   : > { %v13123_v3 = vpop.f32.mrb[150].mxu1  ;;  %v13159_v33 = vmax.f32 %v13153_v18, 0.0  ;;  %v16063_v18 = vld [vmem:[%s26636_s5 + $0x50] sm:$0xff] }
0x228a   : > { %v13154_v12 = vadd.f32 %v13145_v16, %v13123_v3  ;;  %v13125_v30 = vpop.f32.mrb[151].mxu1  ;;  %v16073_v3 = vld [vmem:[%s26636_s5 + $0x90] sm:$0xff] }
0x228b   : > { %v13155_v31 = vadd.f32 %v13149_v9, %v13125_v30 }
0x228c   : > { %v13160_v20 = vmax.f32 %v13154_v12, 0.0  ;;  %v16074_v12 = vld [vmem:[%s26636_s5 + $0x98] sm:$0xff] }
0x228d   : > { %v13161_v34 = vmax.f32 %v13155_v31, 0.0  ;;  %v13129_v35 = vpop.f32.mrb[152].mxu1 }
0x228e   : > { %v20112_v37 = vpack.c.bf16 %v13160_v20, %v13158_v32  ;;  %v13131_v38 = vpop.f32.mrb[153].mxu1  ;;  %v13156_v36 = vadd.f32 %v13145_v16, %v13129_v35  ;;  %v16064_v35 = vld [vmem:[%s26636_s5 + $0x58] sm:$0xff] }
0x228f   : > { %v20110_v41 = vpack.c.bf16 %v13161_v34, %v13159_v33  ;;  %v13157_v42 = vadd.f32 %v13149_v9, %v13131_v38  ;;  %v20173_v33 = vpack.c.bf16 %v16063_v18, %v16062_v2  ;;  %v20197_v34 = vpack.c.bf16 %v16074_v12, %v16073_v3  ;;  %v16075_v38 = vld [vmem:[%s26636_s5 + $0xa0] sm:$0xff] }
0x2290   : > { %v13162_v29 = vmax.f32 %v13156_v36, 0.0 }
0x2291   : > { %v13163_v43 = vmax.f32 %v13157_v42, 0.0  ;;  %20111 = vmatprep.subr.bf16.mxu0 %v20110_v41 }
0x2292   : > { %20113 = vmatpush1.bf16.msra.mxu0 %v20112_v37 }
0x2293   : > { %13176 = vmatprep.subr.mxu0 %v13163_v43 }
0x2296   : > { %13177 = vmatpush1.msra.mxu0 %v13162_v29 }
0x2297   : > { %16034 = vmatmul.mubr.msk.f32.vlgmr.msra.gmra.mrb[132].mxu0 %vm1117_vm7, %v13164_v46  ;;  %20115 = vmatprep.subr.bf16.mxu0 %v20110_v41  ;;  %v16076_v41 = vld [vmem:[%s26636_s5 + $0xa8] sm:$0xff] }
0x2298   : > { %20117 = vmatpush1.bf16.msra.mxu0 %v20112_v37  ;;  %13242 = vmatprep.mubr.f32.mxu0 %v20715_v0  ;;  %v16065_v37 = vld [vmem:[%s26636_s5 + $0x60] sm:$0xff] }
0x2299   : > { %13261 = vmatprep.subr.mxu0 %v13163_v43  ;;  %v20176_v46 = vpack.c.bf16 %v16065_v37, %v16064_v35 }
0x229b   : > { %16035 = vmatmul.mubr.msk.f32.gmra.mrb[134].mxu0 %vm1117_vm7, %v13165_v47  ;;  %v20200_v47 = vpack.c.bf16 %v16076_v41, %v16075_v38  ;;  %v13538_v38 = vld [vmem:[%s26636_s5 + $0x30] sm:$0xff]  ;;  %v13539_v41 = vld [vmem:[%s26636_s5 + $0x38] sm:$0xff] }
0x229c   : > { %13262 = vmatpush1.msra.mxu0 %v13162_v29  ;;  %13321 = vmatprep.mubr.f32.mxu0 %v20715_v0 }
0x229d   : > { %20118 = vmatprep.subr.bf16.mxu0 %v20717_v14 }
0x229f   : > { %16038 = vmatmul.mubr.msk.f32.vlgmr.msra.gmra.mrb[136].mxu0 %vm1117_vm7, %v16036_v56  ;;  %v16077_v56 = vld [vmem:[%s26636_s5 + $0xb0] sm:$0xff] }
0x22a0   : > { %13327 = vmatprep.mubr.f32.mxu0 %v20715_v0  ;;  %20120 = vmatpush1.bf16.msra.mxu0 %v20119_v57  ;;  %v20179_v57 = vpack.c.bf16 %v16067_v52, %v16066_v51  ;;  %v20203_v4 = vpack.c.bf16 %v16078_v61, %v16077_v56  ;;  %v13540_v51 = vld [vmem:[%s26636_s5 + $0x40] sm:$0xff]  ;;  %v16086_v61 = vld [vmem:[%s26636_s5 + $0xf0] sm:$0xff] }
0x22a1   : > { %20121 = vmatprep.subr.bf16.mxu0 %v20717_v14  ;;  %v16101_v52 = vld [vmem:[%s26636_s5 + $0x160] sm:$0xff] }
0x22a3   : > { %16039 = vmatmul.mubr.msk.f32.gmra.mrb[138].mxu0 %vm1117_vm7, %v16037_v7  ;;  %v16068_v7 = vld [vmem:[%s26636_s5 + $0x78] sm:$0xff] }
0x22a4   : > { %20123 = vmatpush1.bf16.msra.mxu0 %v20122_v10  ;;  %v16069_v10 = vld [vmem:[%s26636_s5 + $0x80] sm:$0xff] }
0x22a5   : > { %20124 = vmatprep.subr.bf16.mxu0 %v20717_v14  ;;  %v20182_v17 = vpack.c.bf16 %v16069_v10, %v16068_v7  ;;  %v16087_v7 = vld [vmem:[%s26636_s5 + $0xf8] sm:$0xff]  ;;  %v16088_v10 = vld [vmem:[%s26636_s5 + $0x100] sm:$0xff] }
0x22a8   : > { %20126 = vmatpush1.bf16.msra.mxu0 %v20125_v19  ;;  %v16080_v19 = vld [vmem:[%s26636_s5 + $0xc8] sm:$0xff] }
0x22a9   : > { %20127 = vmatprep.subr.bf16.mxu0 %v20717_v14  ;;  %v20206_v1 = vpack.c.bf16 %v16080_v19, %v16079_v15  ;;  %v20215_v15 = vpack.c.bf16 %v16088_v10, %v16087_v7  ;;  %v16090_v19 = vld [vmem:[%s26636_s5 + $0x110] sm:$0xff]  ;;  %v14123_v10 = vld [vmem:[%s26639_s8 + $0x58] sm:$0xff] }
0x22aa   : > { %v14122_v7 = vld [vmem:[%s26639_s8 + $0x50] sm:$0xff] }
0x22ac   : > { %20129 = vmatpush1.bf16.msra.mxu0 %v20128_v23  ;;  %v16081_v23 = vld [vmem:[%s26636_s5 + $0xd0] sm:$0xff] }
0x22ad   : > { %20130 = vmatprep.subr.bf16.mxu0 %v20717_v14 }
0x22b0   : > { %20132 = vmatpush1.bf16.msra.mxu0 %v20131_v22 }
0x22b1   : > { %20133 = vmatprep.subr.bf16.mxu0 %v20717_v14 }
0x22b4   : > { %20135 = vmatpush1.bf16.msra.mxu0 %v20134_v40  ;;  %v13532_v40 = vld [vmem:[%s26636_s5] sm:$0xff] }
0x22b5   : > { %20136 = vmatprep.subr.bf16.mxu0 %v20717_v14  ;;  %v20185_v8 = vpack.c.bf16 %v13533_v53, %v13532_v40  ;;  %v16111_v40 = vld [vmem:[%s26639_s8 + $0xa0] sm:$0xff]  ;;  %v16112_v53 = vld [vmem:[%s26639_s8 + $0xa8] sm:$0xff] }
0x22b8   : > { %20138 = vmatpush1.bf16.msra.mxu0 %v20137_v5 }
0x22b9   : > { %20139 = vmatprep.subr.bf16.mxu0 %v20717_v14 }
0x22bc   : > { %20141 = vmatpush1.bf16.msra.mxu0 %v20140_v50  ;;  %v20221_v50 = vpack.c.bf16 %v16094_v44, %v16093_v24  ;;  %v20263_v24 = vpack.c.bf16 %v16112_v53, %v16111_v40  ;;  %v16113_v44 = vld [vmem:[%s26639_s8 + $0xb0] sm:$0xff]  ;;  %v14300_v40 = vld [vmem:[#allocation3 + $0x40] sm:$0xff] }
0x22bd   : > { %20142 = vmatprep.subr.bf16.mxu0 %v20717_v14 }
0x22c0   : > { %20144 = vmatpush1.bf16.msra.mxu0 %v20143_v6 }
0x22c1   : > { %20172 = vmatprep.subr.bf16.mxu0 %v20717_v14 }
0x236a   : > { %v13238_v16 = vpop.f32.mrb[132].mxu0 }
0x236b   : > { %v13240_v60 = vpop.f32.mrb[133].mxu0 }
0x236e   : > { %v13244_v9 = vpop.f32.mrb[134].mxu0 }
0x236f   : > { %v13246_v28 = vpop.f32.mrb[135].mxu0 }
0x2372   : > { %v13323_v30 = vpop.f32.mrb[136].mxu0 }
0x2373   : > { %v13334_v31 = vmax.f32 %v13238_v16, %v13323_v30  ;;  %v13325_v32 = vpop.f32.mrb[137].mxu0  ;;  %v13534_v16 = vld [vmem:[%s26636_s5 + $0x10] sm:$0xff] }
0x2374   : > { %v13335_v20 = vmax.f32 %v13240_v60, %v13325_v32  ;;  %v13535_v60 = vld [vmem:[%s26636_s5 + $0x18] sm:$0xff]  ;;  %v13536_v32 = vld [vmem:[%s26636_s5 + $0x20] sm:$0xff] }
0x2375   : > { %v20188_v30 = vpack.c.bf16 %v13535_v60, %v13534_v16 }
0x2376   : > { %v13329_v42 = vpop.f32.mrb[138].mxu0  ;;  %16040 = vmatprep.mubr.msk.f32.mxu0 %vm1309_vm8, %v13335_v20  ;;  %16060 = vmatprep.mubr.msk.f32.mxu1 %vm1309_vm8, %v13335_v20  ;;  %v13537_v20 = vld [vmem:[%s26636_s5 + $0x28] sm:$0xff] }
0x2377   : > { %v13336_v36 = vmax.f32 %v13244_v9, %v13329_v42  ;;  %v13331_v43 = vpop.f32.mrb[139].mxu0  ;;  %13427 = vmatmul.mubr.f32.vlgmr.msra.gmra.mrb[140].mxu0 %v13334_v31  ;;  %13520 = vmatmul.mubr.f32.vlgmr.msra.gmra.mrb[154].mxu1 %v13334_v31  ;;  %v16095_v9 = vld [vmem:[%s26636_s5 + $0x130] sm:$0xff]  ;;  %v20191_v35 = vpack.c.bf16 %v13537_v20, %v13536_v32 }
0x2378   : > { %v13337_v29 = vmax.f32 %v13246_v28, %v13331_v43  ;;  %20174 = vmatpush3.bf16.msra.mxu0 %v20173_v33  ;;  %20198 = vmatpush3.bf16.msra.mxu1 %v20197_v34  ;;  %v16096_v28 = vld [vmem:[%s26636_s5 + $0x138] sm:$0xff]  ;;  %v16097_v33 = vld [vmem:[%s26636_s5 + $0x140] sm:$0xff]  ;;  %v16098_v34 = vld [vmem:[%s26636_s5 + $0x148] sm:$0xff]  ;;  %v20194_v43 = vpack.c.bf16 %v13539_v41, %v13538_v38 }
0x2379   : > { %20175 = vmatprep.subr.bf16.mxu0 %v20717_v14  ;;  %20199 = vmatprep.subr.bf16.mxu1 %v20717_v14  ;;  %v20224_v31 = vpack.c.bf16 %v16096_v28, %v16095_v9  ;;  %v20227_v37 = vpack.c.bf16 %v16098_v34, %v16097_v33  ;;  %v16099_v42 = vld [vmem:[%s26636_s5 + $0x150] sm:$0xff]  ;;  %v13963_v34 = vld [vmem:[%s26638_s7] sm:$0xf]  ;;  %v16105_v38 = vld [vmem:[%s26638_s7 + $0x4] sm:$0xf] }
0x237a   : > { %16041 = vmatprep.mubr.msk.f32.mxu0 %vm1309_vm8, %v13337_v29  ;;  %16061 = vmatprep.mubr.msk.f32.mxu1 %vm1309_vm8, %v13337_v29 }
0x237b   : > { %13432 = vmatmul.mubr.f32.gmra.mrb[142].mxu0 %v13336_v36  ;;  %13525 = vmatmul.mubr.f32.gmra.mrb[156].mxu1 %v13336_v36  ;;  %v16100_v36 = vld [vmem:[%s26636_s5 + $0x158] sm:$0xff] }
0x237c   : > { %20177 = vmatpush3.bf16.msra.mxu0 %v20176_v46  ;;  %20201 = vmatpush3.bf16.msra.mxu1 %v20200_v47  ;;  %v20230_v29 = vpack.c.bf16 %v16100_v36, %v16099_v42  ;;  %v16083_v46 = vld [vmem:[%s26636_s5 + $0xd8] sm:$0xff]  ;;  %v16084_v47 = vld [vmem:[%s26636_s5 + $0xe0] sm:$0xff]  ;;  %v14114_v42 = vld [vmem:[%s26639_s8 + $0x10] sm:$0xff] }
0x237d   : > { %20178 = vmatprep.subr.bf16.mxu0 %v20717_v14  ;;  %20202 = vmatprep.subr.bf16.mxu1 %v20717_v14  ;;  %v20209_v56 = vpack.c.bf16 %v16084_v47, %v16083_v46  ;;  %v14115_v36 = vld [vmem:[%s26639_s8 + $0x18] sm:$0xff]  ;;  %v14117_v46 = vld [vmem:[%s26639_s8 + $0x28] sm:$0xff] }
0x237e   : > { %18219 = vmatprep.mubr.msk.f32.mxu0 %vm20718_vm9, %v20715_v0  ;;  %18261 = vmatprep.mubr.msk.f32.mxu1 %vm20718_vm9, %v20715_v0 }
0x2380   : > { %20180 = vmatpush3.bf16.msra.mxu0 %v20179_v57  ;;  %20204 = vmatpush3.bf16.msra.mxu1 %v20203_v4  ;;  %v16085_v57 = vld [vmem:[%s26636_s5 + $0xe8] sm:$0xff] }
0x2381   : > { %20181 = vmatprep.subr.bf16.mxu0 %v20717_v14  ;;  %20205 = vmatprep.subr.bf16.mxu1 %v20717_v14  ;;  %v20212_v4 = vpack.c.bf16 %v16086_v61, %v16085_v57  ;;  %v14120_v57 = vld [vmem:[%s26639_s8 + $0x40] sm:$0xff]  ;;  %v14121_v61 = vld [vmem:[%s26639_s8 + $0x48] sm:$0xff] }
0x2384   : > { %20183 = vmatpush3.bf16.msra.mxu0 %v20182_v17  ;;  %20207 = vmatpush3.bf16.msra.mxu1 %v20206_v1  ;;  %v16089_v17 = vld [vmem:[%s26636_s5 + $0x108] sm:$0xff] }
0x2385   : > { %18217 = vmatprep.subr.mxu0 %v20715_v0  ;;  %18259 = vmatprep.subr.mxu1 %v20715_v0  ;;  %v20218_v1 = vpack.c.bf16 %v16090_v19, %v16089_v17  ;;  %v14124_v17 = vld [vmem:[%s26639_s8 + $0x60] sm:$0xff]  ;;  %v14125_v19 = vld [vmem:[%s26639_s8 + $0x68] sm:$0xff] }
0x2388   : > { %18218 = vmatpush3.msra.mxu0 %v16070_v13  ;;  %18260 = vmatpush3.msra.mxu1 %v16081_v23  ;;  %v16091_v13 = vld [vmem:[%s26636_s5 + $0x118] sm:$0xff]  ;;  %v16107_v23 = vld [vmem:[%s26639_s8 + $0x80] sm:$0xff] }
0x2389   : > { %20184 = vmatprep.subr.bf16.mxu0 %v20717_v14  ;;  %20220 = vmatprep.subr.bf16.mxu1 %v20717_v14 }
0x244a   : > { %v13428_v48 = vpop.f32.mrb[140].mxu0  ;;  %v13521_v21 = vpop.f32.mrb[154].mxu1 }
0x244b   : > { %v26194_v22 = vmax.f32 %v13428_v48, %v13521_v21  ;;  %v13430_v62 = vpop.f32.mrb[141].mxu0  ;;  %v13523_v39 = vpop.f32.mrb[155].mxu1  ;;  %v16108_v48 = vld [vmem:[%s26639_s8 + $0x88] sm:$0xff] }
0x244c   : > { %v20257_v21 = vpack.c.bf16 %v16108_v48, %v16107_v23  ;;  %v16110_v62 = vld [vmem:[%s26639_s8 + $0x98] sm:$0xff]  ;;  %v16121_v48 = vld [vmem:[%s26639_s8 + $0xf0] sm:$0xff] }
0x244d   : > { %v13552_v63 = vrot.slane %v26194_v22, 1  ;;  %v13708_v26 = vrot.slane %v26194_v22, 2  ;;  %v13878_v54 = vrot.slane %v26194_v22, 4  ;;  %v13793_v11 = vrot.slane %v26194_v22, 3  ;;  %v14127_v23 = vld [vmem:[%s26639_s8 + $0x78] sm:$0xff] }
0x244e   : > { %v13433_v5 = vpop.f32.mrb[142].mxu0  ;;  %v13526_v45 = vpop.f32.mrb[156].mxu1 }
0x244f   : > { %v13531_v58 = vmax.f32 %v13433_v5, %v13526_v45  ;;  %v13435_v25 = vpop.f32.mrb[143].mxu0  ;;  %v13528_v49 = vpop.f32.mrb[157].mxu1  ;;  %v16114_v5 = vld [vmem:[%s26639_s8 + $0xb8] sm:$0xff] }
0x2450   : > { %v20266_v45 = vpack.c.bf16 %v16114_v5, %v16113_v44  ;;  %v16116_v25 = vld [vmem:[%s26639_s8 + $0xc8] sm:$0xff]  ;;  %v14290_v44 = vld [vmem:[#allocation3] sm:$0xff] }
0x2451   : > { %v13553_v55 = vrot.slane %v13531_v58, 1  ;;  %v13709_v6 = vrot.slane %v13531_v58, 2  ;;  %v13794_v27 = vrot.slane %v13531_v58, 3  ;;  %v13879_v59 = vrot.slane %v13531_v58, 4  ;;  %v16115_v58 = vld [vmem:[%s26639_s8 + $0xc0] sm:$0xff]  ;;  %v14291_v5 = vld [vmem:[#allocation3 + $0x8] sm:$0xff] }
0x2452   : > { %v20269_v49 = vpack.c.bf16 %v16116_v25, %v16115_v58  ;;  %v20293_v25 = vpack.c.bf16 %v14291_v5, %v14290_v44 }
0x2453   : > { %v13554_v2 = vsel %vm538_vm3, %v13552_v63, %v13553_v55  ;;  %v13710_v18 = vsel %vm747_vm5, %v13708_v26, %v13709_v6  ;;  %v13880_v3 = vsel %vm553_vm0, %v13878_v54, %v13879_v59  ;;  %v26228_v12 = vsel %vm865_vm6, %v13793_v11, %v13794_v27  ;;  %v16119_v26 = vld [vmem:[%s26639_s8 + $0xe0] sm:$0xff]  ;;  %v16120_v54 = vld [vmem:[%s26639_s8 + $0xe8] sm:$0xff] }
0x2454   : > { %18220 = vmatmul.mubr.msk.f32.vlgmr.msra.gmra.mrb[144].mxu0 %vm1511_vm10, %v13554_v2  ;;  %18262 = vmatmul.mubr.msk.f32.vlgmr.msra.gmra.mrb[158].mxu1 %vm1511_vm10, %v13710_v18  ;;  %v20275_v11 = vpack.c.bf16 %v16120_v54, %v16119_v26  ;;  %v14292_v26 = vld [vmem:[#allocation3 + $0x10] sm:$0xff]  ;;  %v14293_v54 = vld [vmem:[#allocation3 + $0x18] sm:$0xff]  ;;  %vm14745_vm3 = vcmask 687104  }
0x2455   : > { %20186 = vmatpush3.bf16.msra.mxu0 %v20185_v8  ;;  %20222 = vmatpush3.bf16.msra.mxu1 %v20221_v50  ;;  %v16117_v8 = vld [vmem:[%s26639_s8 + $0xd0] sm:$0xff]  ;;  %v16118_v50 = vld [vmem:[%s26639_s8 + $0xd8] sm:$0xff] }
0x2456   : > { %20187 = vmatprep.subr.bf16.mxu0 %v20717_v14  ;;  %20223 = vmatprep.subr.bf16.mxu1 %v20717_v14  ;;  %v20272_v63 = vpack.c.bf16 %v16118_v50, %v16117_v8 }
0x2457   : > { %18240 = vmatprep.mubr.msk.f32.mxu0 %vm20718_vm9, %v20715_v0  ;;  %18303 = vmatprep.mubr.msk.f32.mxu1 %vm20718_vm9, %v20715_v0 }
0x2459   : > { %20189 = vmatpush3.bf16.msra.mxu0 %v20188_v30  ;;  %20225 = vmatpush3.bf16.msra.mxu1 %v20224_v31  ;;  %v16103_v31 = vld [vmem:[%s26637_s6] ss:$0 sm:$0xff] }
0x245a   : > { %20190 = vmatprep.subr.bf16.mxu0 %v20717_v14  ;;  %20226 = vmatprep.subr.bf16.mxu1 %v20717_v14 }
0x245d   : > { %20192 = vmatpush3.bf16.msra.mxu0 %v20191_v35  ;;  %20228 = vmatpush3.bf16.msra.mxu1 %v20227_v37  ;;  %v14112_v35 = vld [vmem:[%s26639_s8] sm:$0xff]  ;;  %v14113_v37 = vld [vmem:[%s26639_s8 + $0x8] sm:$0xff] }
0x245e   : > { %20193 = vmatprep.subr.bf16.mxu0 %v20717_v14  ;;  %20229 = vmatprep.subr.bf16.mxu1 %v20717_v14  ;;  %v20233_v41 = vpack.c.bf16 %v14113_v37, %v14112_v35  ;;  %v14457_v35 = vld [vmem:[#allocation3 + $0x80] sm:$0xff]  ;;  %v14458_v37 = vld [vmem:[#allocation3 + $0x88] sm:$0xff] }
0x2461   : > { %20195 = vmatpush3.bf16.msra.mxu0 %v20194_v43  ;;  %20231 = vmatpush3.bf16.msra.mxu1 %v20230_v29  ;;  %v20236_v43 = vpack.c.bf16 %v14115_v36, %v14114_v42  ;;  %v14116_v29 = vld [vmem:[%s26639_s8 + $0x20] sm:$0xff]  ;;  %v20305_v42 = vpack.c.bf16 %v14458_v37, %v14457_v35  ;;  %v14736_v37 = vld [vmem:[%s26644_s13 + $0x48] sm:$0xff] }
0x2462   : > { %18238 = vmatprep.subr.mxu0 %v20715_v0  ;;  %18301 = vmatprep.subr.mxu1 %v20715_v0  ;;  %v20239_v47 = vpack.c.bf16 %v14117_v46, %v14116_v29  ;;  %v14460_v29 = vld [vmem:[#allocation3 + $0x98] sm:$0xff]  ;;  %v14543_v46 = vld [vmem:[#allocation3 + $0xd0] sm:$0xff]  ;;  %v14735_v35 = vld [vmem:[%s26644_s13 + $0x40] sm:$0xff] }
0x2465   : > { %18239 = vmatpush3.msra.mxu0 %v13540_v51  ;;  %18302 = vmatpush3.msra.mxu1 %v16101_v52  ;;  %v14118_v51 = vld [vmem:[%s26639_s8 + $0x30] sm:$0xff]  ;;  %v14119_v52 = vld [vmem:[%s26639_s8 + $0x38] sm:$0xff] }
0x2466   : > { %18241 = vmatmul.mubr.msk.f32.vlgmr.msra.gmra.mrb[146].mxu0 %vm1511_vm10, %v26194_v22  ;;  %20208 = vmatprep.subr.bf16.mxu0 %v20717_v14  ;;  %v16109_v22 = vld [vmem:[%s26639_s8 + $0x90] sm:$0xff] }
0x2467   : > { %18304 = vmatmul.mubr.msk.f32.vlgmr.msra.gmra.mrb[160].mxu1 %vm1511_vm10, %v13880_v3  ;;  %20210 = vmatpush3.bf16.msra.mxu0 %v20209_v56  ;;  %v20260_v39 = vpack.c.bf16 %v16110_v62, %v16109_v22  ;;  %v20242_v56 = vpack.c.bf16 %v14119_v52, %v14118_v51  ;;  %v16122_v22 = vld [vmem:[%s26639_s8 + $0xf8] sm:$0xff] }
0x2468   : > { %20211 = vmatprep.subr.bf16.mxu0 %v20717_v14  ;;  %18282 = vmatprep.mubr.msk.f32.mxu0 %vm20718_vm9, %v20715_v0  ;;  %v20278_v62 = vpack.c.bf16 %v16122_v22, %v16121_v48  ;;  %v14631_v22 = vld [vmem:[%s26642_s11] sm:$0xff] }
0x2469   : > { %20256 = vmatprep.subr.bf16.mxu1 %v20717_v14  ;;  %18383 = vmatprep.mubr.msk.f32.mxu1 %vm20718_vm9, %v20715_v0 }
0x246a   : > { %20258 = vmatpush3.bf16.msra.mxu1 %v20257_v21 }
0x246b   : > { %20213 = vmatpush3.bf16.msra.mxu0 %v20212_v4  ;;  %20259 = vmatprep.subr.bf16.mxu1 %v20717_v14  ;;  %v20245_v4 = vpack.c.bf16 %v14121_v61, %v14120_v57  ;;  %v14461_v61 = vld [vmem:[#allocation3 + $0xa0] sm:$0xff] }
0x246c   : > { %20214 = vmatprep.subr.bf16.mxu0 %v20717_v14 }
0x246e   : > { %20261 = vmatpush3.bf16.msra.mxu1 %v20260_v39 }
0x246f   : > { %20216 = vmatpush3.bf16.msra.mxu0 %v20215_v15  ;;  %20262 = vmatprep.subr.bf16.mxu1 %v20717_v14  ;;  %v20248_v15 = vpack.c.bf16 %v14123_v10, %v14122_v7  ;;  %v14545_v7 = vld [vmem:[#allocation3 + $0xe0] sm:$0xff]  ;;  %v14546_v10 = vld [vmem:[#allocation3 + $0xe8] sm:$0xff] }
0x2470   : > { %20217 = vmatprep.subr.bf16.mxu0 %v20717_v14 }
0x2472   : > { %20264 = vmatpush3.bf16.msra.mxu1 %v20263_v24  ;;  %v14301_v24 = vld [vmem:[#allocation3 + $0x48] sm:$0xff] }
0x2473   : > { %20219 = vmatpush3.bf16.msra.mxu0 %v20218_v1  ;;  %20265 = vmatprep.subr.bf16.mxu1 %v20717_v14  ;;  %v20251_v1 = vpack.c.bf16 %v14125_v19, %v14124_v17  ;;  %v20281_v58 = vpack.c.bf16 %v14301_v24, %v14300_v40  ;;  %v20323_v17 = vpack.c.bf16 %v14546_v10, %v14545_v7  ;;  %v14463_v19 = vld [vmem:[#allocation3 + $0xb0] sm:$0xff] }
0x2474   : > { %18280 = vmatprep.subr.mxu0 %v20715_v0  ;;  %v14633_v40 = vld [vmem:[%s26642_s11 + $0x10] sm:$0xff] }
0x2476   : > { %20267 = vmatpush3.bf16.msra.mxu1 %v20266_v45 }
0x2477   : > { %18281 = vmatpush3.msra.mxu0 %v16091_v13  ;;  %20268 = vmatprep.subr.bf16.mxu1 %v20717_v14  ;;  %v14126_v13 = vld [vmem:[%s26639_s8 + $0x70] sm:$0xff] }
0x2478   : > { %18283 = vmatmul.mubr.msk.f32.vlgmr.msra.gmra.mrb[148].mxu0 %vm1511_vm10, %v26228_v12  ;;  %18306 = vmatprep.subr.mxu0 %v20715_v0  ;;  %v20254_v21 = vpack.c.bf16 %v14127_v23, %v14126_v13  ;;  %v14547_v13 = vld [vmem:[#allocation3 + $0xf0] sm:$0xff]  ;;  %v14548_v23 = vld [vmem:[#allocation3 + $0xf8] sm:$0xff] }
0x2479   : > { %18308 = vmatprep.mubr.msk.f32.mxu0 %vm20718_vm9, %v20715_v0 }
0x247a   : > { %20270 = vmatpush3.bf16.msra.mxu1 %v20269_v49  ;;  %v14302_v49 = vld [vmem:[#allocation3 + $0x50] sm:$0xff] }
0x247b   : > { %20271 = vmatprep.subr.bf16.mxu1 %v20717_v14 }
0x247e   : > { %20273 = vmatpush3.bf16.msra.mxu1 %v20272_v63  ;;  %v14303_v63 = vld [vmem:[#allocation3 + $0x58] sm:$0xff] }
0x247f   : > { %20274 = vmatprep.subr.bf16.mxu1 %v20717_v14 }
0x2482   : > { %20276 = vmatpush3.bf16.msra.mxu1 %v20275_v11  ;;  %v20284_v11 = vpack.c.bf16 %v14303_v63, %v14302_v49  ;;  %v14637_v49 = vld [vmem:[%s26642_s11 + $0x30] sm:$0xff]  ;;  %v14639_v63 = vld [vmem:[%s26642_s11 + $0x40] sm:$0xff] }
0x2483   : > { %20277 = vmatprep.subr.bf16.mxu1 %v20717_v14 }
0x2486   : > { %20279 = vmatpush3.bf16.msra.mxu1 %v20278_v62  ;;  %v14632_v62 = vld [vmem:[%s26642_s11 + $0x8] sm:$0xff] }
0x2487   : > { %20292 = vmatprep.subr.bf16.mxu1 %v20717_v14 }
0x2527   : > { %v13623_v55 = vpop.f32.mrb[144].mxu0  ;;  %v13779_v6 = vpop.f32.mrb[158].mxu1 }
0x2528   : > { %v18221_v27 = vpop.f32.mrb[145].mxu0  ;;  %v18263_v59 = vpop.f32.mrb[159].mxu1 }
0x2529   : > { %v14305_v27 = vld [vmem:[#allocation3 + $0x68] sm:$0xff]  ;;  %v14294_v59 = vld [vmem:[#allocation3 + $0x20] sm:$0xff] }
0x2539   : > { %v13695_v16 = vpop.f32.mrb[146].mxu0 }
0x253a   : > { %v13696_v60 = vadd.f32 %v13695_v16, %v13623_v55  ;;  %v13949_v9 = vpop.f32.mrb[160].mxu1  ;;  %v18242_v28 = vpop.f32.mrb[147].mxu0  ;;  %v20296_v55 = vpack.c.bf16 %v14293_v54, %v14292_v26  ;;  %v14640_v26 = vld [vmem:[%s26642_s11 + $0x48] sm:$0xff] }
0x253b   : > { %v18305_v2 = vpop.f32.mrb[161].mxu1  ;;  %v14306_v28 = vld [vmem:[#allocation3 + $0x70] sm:$0xff]  ;;  %v20341_v54 = vpack.c.bf16 %v14640_v26, %v14639_v63 }
0x253c   : > { %v13783_v18 = vadd.f32 %v13779_v6, %v13696_v60  ;;  %v14304_v6 = vld [vmem:[#allocation3 + $0x60] sm:$0xff]  ;;  %v14295_v60 = vld [vmem:[#allocation3 + $0x28] sm:$0xff]  ;;  %v14307_v2 = vld [vmem:[#allocation3 + $0x78] sm:$0xff] }
0x253d   : > { %v20287_v16 = vpack.c.bf16 %v14305_v27, %v14304_v6  ;;  %v14643_v27 = vld [vmem:[%s26642_s11 + $0x60] sm:$0xff] }
0x254b   : > { %v13864_v3 = vpop.f32.mrb[148].mxu0 }
0x254c   : > { %v13868_v12 = vadd.f32 %v13864_v3, %v13783_v18  ;;  %v18284_v30 = vpop.f32.mrb[149].mxu0  ;;  %v14296_v18 = vld [vmem:[#allocation3 + $0x30] sm:$0xff]  ;;  %v20290_v3 = vpack.c.bf16 %v14307_v2, %v14306_v28  ;;  %v14728_v28 = vld [vmem:[%s26644_s13 + $0x8] sm:$0xff] }
0x254d   : > { %v14729_v2 = vld [vmem:[%s26644_s13 + $0x10] sm:$0xff] }
0x254e   : > { %v13953_v32 = vadd.f32 %v13949_v9, %v13868_v12  ;;  %v20299_v9 = vpack.c.bf16 %v14295_v60, %v14294_v59  ;;  %v14297_v12 = vld [vmem:[#allocation3 + $0x38] sm:$0xff]  ;;  %v14644_v59 = vld [vmem:[%s26642_s11 + $0x68] sm:$0xff]  ;;  %v14645_v60 = vld [vmem:[%s26642_s11 + $0x70] sm:$0xff] }
0x254f   : > { %v20302_v30 = vpack.c.bf16 %v14297_v12, %v14296_v18 }
0x2550   : > { %v13961_v20 = vadd.f32 %v16103_v31, %v13953_v32 }
0x2552   : > { %v13962_v33 = vmax.f32 %v13961_v20, 0.0 }
0x2554   : > { %18307 = vmatpush3.msra.mxu0 %v13962_v33 }
0x2555   : > { %18309 = vmatmul.mubr.msk.f32.vlgmr.msra.gmra.mrb[150].mxu0 %vm1924_vm11, %v13963_v34  ;;  %18311 = vmatprep.subr.mxu0 %v20715_v0 }
0x2556   : > { %18312 = vmatpush3.msra.mxu0 %v13962_v33  ;;  %18313 = vmatprep.mubr.msk.f32.mxu0 %vm20718_vm9, %v20715_v0 }
0x2557   : > { %20232 = vmatprep.subr.bf16.mxu0 %v20717_v14 }
0x2559   : > { %18314 = vmatmul.mubr.msk.f32.vlgmr.msra.gmra.mrb[152].mxu0 %vm1924_vm11, %v16105_v38  ;;  %v14541_v38 = vld [vmem:[#allocation3 + $0xc0] sm:$0xff] }
0x255a   : > { %20234 = vmatpush3.bf16.msra.mxu0 %v20233_v41  ;;  %18348 = vmatprep.mubr.msk.f32.mxu0 %vm20718_vm9, %v20715_v0  ;;  %v14542_v41 = vld [vmem:[#allocation3 + $0xc8] sm:$0xff] }
0x255b   : > { %20235 = vmatprep.subr.bf16.mxu0 %v20717_v14  ;;  %v20317_v36 = vpack.c.bf16 %v14542_v41, %v14541_v38  ;;  %v20362_v38 = vpack.c.bf16 %v14736_v37, %v14735_v35 }
0x255e   : > { %20237 = vmatpush3.bf16.msra.mxu0 %v20236_v43  ;;  %v14459_v43 = vld [vmem:[#allocation3 + $0x90] sm:$0xff] }
0x255f   : > { %20238 = vmatprep.subr.bf16.mxu0 %v20717_v14 }
0x2562   : > { %20240 = vmatpush3.bf16.msra.mxu0 %v20239_v47  ;;  %v14544_v47 = vld [vmem:[#allocation3 + $0xd8] sm:$0xff] }
0x2563   : > { %20241 = vmatprep.subr.bf16.mxu0 %v20717_v14  ;;  %v20320_v57 = vpack.c.bf16 %v14544_v47, %v14543_v46 }
0x2566   : > { %20243 = vmatpush3.bf16.msra.mxu0 %v20242_v56  ;;  %v20308_v56 = vpack.c.bf16 %v14460_v29, %v14459_v43 }
0x2567   : > { %20244 = vmatprep.subr.bf16.mxu0 %v20717_v14 }
0x256a   : > { %20246 = vmatpush3.bf16.msra.mxu0 %v20245_v4  ;;  %v14462_v4 = vld [vmem:[#allocation3 + $0xa8] sm:$0xff] }
0x256b   : > { %20247 = vmatprep.subr.bf16.mxu0 %v20717_v14 }
0x256e   : > { %20249 = vmatpush3.bf16.msra.mxu0 %v20248_v15  ;;  %v20311_v15 = vpack.c.bf16 %v14462_v4, %v14461_v61  ;;  %v16128_v4 = vld [vmem:[%s26643_s12] ss:$0 sm:$0xff] }
0x256f   : > { %20250 = vmatprep.subr.bf16.mxu0 %v20717_v14 }
0x2572   : > { %20252 = vmatpush3.bf16.msra.mxu0 %v20251_v1  ;;  %v14464_v1 = vld [vmem:[#allocation3 + $0xb8] sm:$0xff] }
0x2573   : > { %20253 = vmatprep.subr.bf16.mxu0 %v20717_v14  ;;  %v20314_v48 = vpack.c.bf16 %v14464_v1, %v14463_v19 }
0x2576   : > { %20255 = vmatpush3.bf16.msra.mxu0 %v20254_v21  ;;  %v20326_v21 = vpack.c.bf16 %v14548_v23, %v14547_v13 }
0x2577   : > { %20280 = vmatprep.subr.bf16.mxu0 %v20717_v14 }
0x2628   : > { %v14033_v39 = vpop.f32.mrb[150].mxu0 }
0x2629   : > { %v18310_v53 = vpop.f32.mrb[151].mxu0 }
0x262a   : > { %v14634_v53 = vld [vmem:[%s26642_s11 + $0x18] sm:$0xff] }
0x262b   : > { %v20332_v5 = vpack.c.bf16 %v14634_v53, %v14633_v40 }
0x262c   : > { %v14107_v45 = vpop.f32.mrb[152].mxu0 }
0x262d   : > { %v14111_v8 = vmax.f32 %v14033_v39, %v14107_v45  ;;  %v18315_v50 = vpop.f32.mrb[153].mxu0  ;;  %v20329_v39 = vpack.c.bf16 %v14632_v62, %v14631_v22  ;;  %v14635_v45 = vld [vmem:[%s26642_s11 + $0x20] sm:$0xff] }
0x262f   : > { %18349 = vmatmul.mubr.f32.vlgmr.msra.gmra.mrb[154].mxu0 %v14111_v8  ;;  %18384 = vmatmul.mubr.f32.vlgmr.msra.gmra.mrb[162].mxu1 %v14111_v8  ;;  %v14638_v8 = vld [vmem:[%s26642_s11 + $0x38] sm:$0xff] }
0x2630   : > { %20282 = vmatpush3.bf16.msra.mxu0 %v20281_v58  ;;  %20294 = vmatpush3.bf16.msra.mxu1 %v20293_v25  ;;  %v14636_v58 = vld [vmem:[%s26642_s11 + $0x28] sm:$0xff]  ;;  %v20338_v50 = vpack.c.bf16 %v14638_v8, %v14637_v49 }
0x2631   : > { %20283 = vmatprep.subr.bf16.mxu0 %v20717_v14  ;;  %20295 = vmatprep.subr.bf16.mxu1 %v20717_v14  ;;  %v20335_v25 = vpack.c.bf16 %v14636_v58, %v14635_v45 }
0x2632   : > { %18402 = vmatprep.mubr.msk.f32.mxu0 %vm20718_vm9, %v20715_v0  ;;  %18421 = vmatprep.mubr.msk.f32.mxu1 %vm20718_vm9, %v20715_v0 }
0x2634   : > { %20285 = vmatpush3.bf16.msra.mxu0 %v20284_v11  ;;  %20297 = vmatpush3.bf16.msra.mxu1 %v20296_v55  ;;  %v14641_v11 = vld [vmem:[%s26642_s11 + $0x50] sm:$0xff]  ;;  %v14642_v55 = vld [vmem:[%s26642_s11 + $0x58] sm:$0xff] }
0x2635   : > { %20286 = vmatprep.subr.bf16.mxu0 %v20717_v14  ;;  %20298 = vmatprep.subr.bf16.mxu1 %v20717_v14  ;;  %v20344_v6 = vpack.c.bf16 %v14642_v55, %v14641_v11 }
0x2638   : > { %20288 = vmatpush3.bf16.msra.mxu0 %v20287_v16  ;;  %20300 = vmatpush3.bf16.msra.mxu1 %v20299_v9  ;;  %v20347_v16 = vpack.c.bf16 %v14644_v59, %v14643_v27  ;;  %v14727_v9 = vld [vmem:[%s26644_s13] sm:$0xff] }
0x2639   : > { %20289 = vmatprep.subr.bf16.mxu0 %v20717_v14  ;;  %20301 = vmatprep.subr.bf16.mxu1 %v20717_v14  ;;  %v20350_v18 = vpack.c.bf16 %v14728_v28, %v14727_v9 }
0x263c   : > { %20291 = vmatpush3.bf16.msra.mxu0 %v20290_v3  ;;  %20303 = vmatpush3.bf16.msra.mxu1 %v20302_v30  ;;  %v14730_v3 = vld [vmem:[%s26644_s13 + $0x18] sm:$0xff]  ;;  %v14731_v30 = vld [vmem:[%s26644_s13 + $0x20] sm:$0xff] }
0x263d   : > { %20304 = vmatprep.subr.bf16.mxu0 %v20717_v14  ;;  %20316 = vmatprep.subr.bf16.mxu1 %v20717_v14  ;;  %v20353_v12 = vpack.c.bf16 %v14730_v3, %v14729_v2 }
0x2702   : > { %v14194_v31 = vpop.f32.mrb[154].mxu0  ;;  %v14280_v32 = vpop.f32.mrb[162].mxu1 }
0x2703   : > { %v14284_v20 = vmax.f32 %v14194_v31, %v14280_v32  ;;  %v18350_v33 = vpop.f32.mrb[155].mxu0  ;;  %v18385_v34 = vpop.f32.mrb[163].mxu1  ;;  %v14732_v31 = vld [vmem:[%s26644_s13 + $0x28] sm:$0xff] }
0x2704   : > { %v20356_v32 = vpack.c.bf16 %v14732_v31, %v14731_v30  ;;  %v14734_v33 = vld [vmem:[%s26644_s13 + $0x38] sm:$0xff] }
0x2705   : > { %14285 = vst.msk [vmem:[#allocation2 + $0x7] sm:$0x1] %vm2248_vm12, %v14284_v20 }
0x2706   : > { %14286 = vst.msk [vmem:[#allocation2 + $0xe] sm:$0x2] %vm2250_vm13, %v14284_v20 }
0x2707   : > { %14287 = vst.msk [vmem:[#allocation2 + $0x15] sm:$0x4] %vm2252_vm14, %v14284_v20 }
0x2708   : > { %14288 = vst.msk [vmem:[#allocation2 + $0x1c] sm:$0x8] %vm2254_vm15, %v14284_v20  ;;  %v14733_v20 = vld [vmem:[%s26644_s13 + $0x30] sm:$0xff] }
0x2709   : > { %v20359_v34 = vpack.c.bf16 %v14734_v33, %v14733_v20 }
0x270c   : > { %v14289_v52 = vld [vmem:[#allocation2] sm:$0xff] }
0x270d   : > { %v14298_v51 = vld [vmem:[#allocation2 + $0x8] sm:$0xff]  ;;  %18422 = vmatmul.mubr.msk.f32.vlgmr.msra.gmra.mrb[164].mxu1 %vm14308_vm1, %v14289_v52 }
0x270e   : > { %18403 = vmatmul.mubr.msk.f32.vlgmr.msra.gmra.mrb[156].mxu0 %vm14308_vm1, %v14298_v51  ;;  %20318 = vmatpush3.bf16.msra.mxu1 %v20317_v36  ;;  %v14455_v24 = vld [vmem:[#allocation2 + $0x10] sm:$0xff] }
0x270f   : > { %20306 = vmatpush3.bf16.msra.mxu0 %v20305_v42  ;;  %20319 = vmatprep.subr.bf16.mxu1 %v20717_v14  ;;  %v14539_v44 = vld [vmem:[#allocation2 + $0x18] sm:$0xff] }
0x2710   : > { %20307 = vmatprep.subr.bf16.mxu0 %v20717_v14  ;;  %18440 = vmatprep.mubr.msk.f32.mxu0 %vm20718_vm9, %v20715_v0 }
0x2711   : > { %18459 = vmatprep.mubr.msk.f32.mxu1 %vm20718_vm9, %v20715_v0 }
0x2712   : > { %20321 = vmatpush3.bf16.msra.mxu1 %v20320_v57  ;;  %v16127_v57 = vld [vmem:[%s26641_s10] ss:$0 sm:$0xff] }
0x2713   : > { %20309 = vmatpush3.bf16.msra.mxu0 %v20308_v56  ;;  %20322 = vmatprep.subr.bf16.mxu1 %v20717_v14 }
0x2714   : > { %20310 = vmatprep.subr.bf16.mxu0 %v20717_v14 }
0x2716   : > { %20324 = vmatpush3.bf16.msra.mxu1 %v20323_v17  ;;  %v16130_v17 = vld [vmem:[%s26645_s14] ss:$0 sm:$0xff] }
0x2717   : > { %20312 = vmatpush3.bf16.msra.mxu0 %v20311_v15  ;;  %20325 = vmatprep.subr.bf16.mxu1 %v20717_v14 }
0x2718   : > { %20313 = vmatprep.subr.bf16.mxu0 %v20717_v14 }
0x271a   : > { %20327 = vmatpush3.bf16.msra.mxu1 %v20326_v21 }
0x271b   : > { %20315 = vmatpush3.bf16.msra.mxu0 %v20314_v48  ;;  %20349 = vmatprep.subr.bf16.mxu1 %v20717_v14 }
0x271c   : > { %20328 = vmatprep.subr.bf16.mxu0 %v20717_v14 }
0x271d   : > { %18460 = vmatmul.mubr.msk.f32.vlgmr.msra.gmra.mrb[166].mxu1 %vm14308_vm1, %v14539_v44 }
0x271e   : > { %18441 = vmatmul.mubr.msk.f32.vlgmr.msra.gmra.mrb[158].mxu0 %vm14308_vm1, %v14455_v24  ;;  %18517 = vmatprep.mubr.msk.f32.mxu1 %vm20718_vm9, %v20715_v0 }
0x271f   : > { %20330 = vmatpush3.bf16.msra.mxu0 %v20329_v39  ;;  %18492 = vmatprep.mubr.msk.f32.mxu0 %vm20718_vm9, %v20715_v0 }
0x2720   : > { %20331 = vmatprep.subr.bf16.mxu0 %v20717_v14  ;;  %20351 = vmatpush3.bf16.msra.mxu1 %v20350_v18 }
0x2721   : > { %20352 = vmatprep.subr.bf16.mxu1 %v20717_v14 }
0x2723   : > { %20333 = vmatpush3.bf16.msra.mxu0 %v20332_v5 }
0x2724   : > { %20334 = vmatprep.subr.bf16.mxu0 %v20717_v14  ;;  %20354 = vmatpush3.bf16.msra.mxu1 %v20353_v12 }
0x2725   : > { %20355 = vmatprep.subr.bf16.mxu1 %v20717_v14 }
0x2727   : > { %20336 = vmatpush3.bf16.msra.mxu0 %v20335_v25 }
0x2728   : > { %20337 = vmatprep.subr.bf16.mxu0 %v20717_v14  ;;  %20357 = vmatpush3.bf16.msra.mxu1 %v20356_v32 }
0x2729   : > { %20358 = vmatprep.subr.bf16.mxu1 %v20717_v14 }
0x272b   : > { %20339 = vmatpush3.bf16.msra.mxu0 %v20338_v50 }
0x272c   : > { %20340 = vmatprep.subr.bf16.mxu0 %v20717_v14  ;;  %20360 = vmatpush3.bf16.msra.mxu1 %v20359_v34 }
0x272d   : > { %20361 = vmatprep.subr.bf16.mxu1 %v20717_v14 }
0x272f   : > { %20342 = vmatpush3.bf16.msra.mxu0 %v20341_v54 }
0x2730   : > { %20343 = vmatprep.subr.bf16.mxu0 %v20717_v14  ;;  %20363 = vmatpush3.bf16.msra.mxu1 %v20362_v38 }
0x2731   : > { %18515 = vmatprep.subr.mxu1 %v20715_v0 }
0x2733   : > { %20345 = vmatpush3.bf16.msra.mxu0 %v20344_v6 }
0x2734   : > { %20346 = vmatprep.subr.bf16.mxu0 %v20717_v14 }
0x2737   : > { %20348 = vmatpush3.bf16.msra.mxu0 %v20347_v16 }
0x2738   : > { %18490 = vmatprep.subr.mxu0 %v20715_v0  ;;  %v14737_v0 = vld [vmem:[%s26644_s13 + $0x50] sm:$0xf] }
0x2739   : > { %18516 = vmatpush3.msk.msra.mxu1 %vm553_vm0, %v14737_v0 }
0x273b   : > { %18491 = vmatpush3.msra.mxu0 %v14645_v60 }
0x27e0   : > { %v14451_v42 = vpop.f32.mrb[164].mxu1 }
0x27e1   : > { %v14378_v41 = vpop.f32.mrb[156].mxu0  ;;  %v18423_v29 = vpop.f32.mrb[165].mxu1 }
0x27e2   : > { %v14452_v36 = vadd.f32 %v14451_v42, %v14378_v41  ;;  %v18404_v43 = vpop.f32.mrb[157].mxu0 }
0x27f0   : > { %v14618_v47 = vpop.f32.mrb[166].mxu1 }
0x27f1   : > { %v14534_v46 = vpop.f32.mrb[158].mxu0  ;;  %v18461_v56 = vpop.f32.mrb[167].mxu1 }
0x27f2   : > { %v14538_v51 = vadd.f32 %v14534_v46, %v14452_v36  ;;  %v18442_v52 = vpop.f32.mrb[159].mxu0 }
0x27f4   : > { %v14622_v61 = vadd.f32 %v14618_v47, %v14538_v51 }
0x27f6   : > { %v14630_v14 = vadd.f32 %v16127_v57, %v14622_v61 }
0x27f8   : > { %18493 = vmatmul.mubr.msk.f32.vlgmr.msra.gmra.mrb[160].mxu0 %vm14653_vm2, %v14630_v14 }
0x28cb   : > { %v14723_v7 = vpop.f32.mrb[160].mxu0 }
0x28cc   : > { %v14724_v10 = vadd.f32 %v16128_v4, %v14723_v7  ;;  %v18494_v15 = vpop.f32.mrb[161].mxu0 }
0x28ce   : > { %18518 = vmatmul.mubr.msk.f32.vlgmr.msra.gmra.mrb[168].mxu1 %vm14745_vm3, %v14724_v10 }
0x29a1   : > { %v14818_v19 = vpop.f32.mrb[168].mxu1 }
0x29a2   : > { %v14819_v1 = vadd.f32 %v16130_v17, %v14818_v19  ;;  %v18519_v13 = vpop.f32.mrb[169].mxu1 }
0x29a4   : > { %14822 = vmax.xlane.f32.xlu0 %v14819_v1 }
0x2a31   : > { %v14823_v23 = vpop.xlane.xlu0 %14822 }
0x2a32   : > { %v14824_v48 = vsub.f32 %v14819_v1, %v14823_v23 }
0x2a34   : > { %v14825_v21 = vmul.f32 1.442695, %v14824_v48 }
0x2a36   : > { %20612 = vpow2.f32 %v14825_v21 }
0x2a40   : > { %v20613_v22 = vpop.eup %20612 }
0x2a41   : > { %14827 = vadd.xlane.f32.xlu0 %v20613_v22 }
0x2ace   : > { %v14828_v62 = vpop.xlane.xlu0 %14827 }
0x2acf   : > { %20614 = vrcp.f32 %v14828_v62 }
0x2ad9   : > { %v20615_v39 = vpop.eup %20614 }
0x2ada   : > { %v14830_v40 = vmul.f32 %v20615_v39, %v20613_v22 }
0x2adc   : > { %14831 = vst [vmem:[%s505_s16] sm:$0xff] %v14830_v40 }
0x2add   : > { %20657 = shalt.err (!%p20654_p7)
}
0x2ade   : > { %s20658_s29 = scalar_lea.hbm %s26589_s25, 128  ;;  %s20662_s16 = scalar_lea.hbm %s26646_s15, 256 }
0x2adf   : > { %p20659_p8 = scmp.ne.s32.totalorder %s26589_s25, %s20658_s29  ;;  %p20663_p1 = scmp.lt.u32.totalorder %s26589_s25, %s26646_s15 }
0x2ae0   : > { %p20664_p0 = scmp.lt.u32.totalorder %s20662_s16, %s20658_s29  ;;  %p20666_p6 = scmp.lt.u32.totalorder %s20658_s29, %s26589_s25 }
0x2ae1   : > { %p20660_p11 = pnand %p20659_p8, %p26671_p9 }
0x2ae2   : > { %p20665_p5 = por %p20664_p0, %p20663_p1 }
0x2ae3   : > { %p20661_p13 = pneg %p20660_p11 }
0x2ae4   : > { %p20667_p10 = por %p20666_p6, %p20665_p5 }
0x2ae6   : > { %p20668_p12 = pnand %p20667_p10, %p20661_p13 }
0x2ae8   : > { %20671 = shalt.err (!%p20668_p12)
}
0x2ae9   : > { %20560 = dma.vmem_to_hbm [thread:$0]  (%p26671_p9), %s26591_s17, 128, %s26589_s25, %s14833_s9  }
0x2aea PF: > { %s26672_s26 = sld [smem:[#allocation9_spill]]  ;;  %s26673_s22 = sld [smem:[#allocation13_spill]] }
0x2aeb   : > { %p20572_p2 = scmp.ge.s32.totalorder %s20710_s21, 2 }
0x2af0   : > { %s14858_s18 = sand.u32 1, %s26672_s26   ;;  %p26674_p3 = scmp.ne.s32.totalorder %s26673_s22, 0 }
0x2af1   : > { %s14859_s27 = scalar_lea.sflag [#allocation5], %s14858_s18 }
0x2af2   : > { %p20567_p4 = pnand %p20572_p2, %p26674_p3 }
0x2af4   : > { %20693 = dma.done.wait (!%p20567_p4), %s14859_s27, 128  }
0x2af5   : > { %20695 = vsyncadd (!%p20567_p4), %s14859_s27, 4294967168  ;;  %s26675_s21 = sld [smem:[#allocation11_spill]]  ;;  %s26676_s29 = sld [smem:[#allocation10_spill]] }
0x2af6   : > { %s26677_s20 = sld [smem:[#allocation12_spill]]  ;;  %s26678_s18 = smov %s20702_s19 }
0x2afb   : > { %p26_p7 = scmp.ge.s32.totalorder %s26675_s21, 4   ;;  %s26679_s19 = smov %s26676_s29 }
0x2afd   :  { %28 = sbr.rel (!%p26_p7) target bundleno = 6 (0x6), region = 142 }
0x2b04   :  { %14864 = vsyncpa [#allocation4], 1 }
0x2b05   :  { %14866 = vsyncpa [#allocation4 + $0x1], 1 }
0x2b06   :  { %14867 = vsyncpa [#allocation5], 1 }
0x2b07   :  { %14869 = vsyncpa [#allocation5 + $0x1], 1 }

</bundles_post_ra>
